<compile_context>
chip_gen: v6e
topology: v6e:2x2x1
jax: 0.10.0
libtpu: 0.0.40
codegen_flags: <defaults>
</compile_context>

<pallas_src>
import functools

import jax
import jax.numpy as jnp
from jax import lax
from jax.experimental import pallas as pl
from jax.experimental.pallas import tpu as pltpu


def _round_up(x, m):
    return ((x + m - 1) // m) * m


def _vq_kernel(z_ref, wc_ref, eg_ref, esq_ref, q_ref, sse_ref, *,
               s_pack, kp, n_rows, fused_argmin):
    """One grid step: Tp packed rows = Tp * s_pack original z rows.

    z_ref   : (Tp, S*D)   packed z rows (input dtype)
    wc_ref  : (S*D, S*Kp) block-diagonal, pre-transposed codebook (distances)
    eg_ref  : (S*Kp, S*D) block-diagonal codebook (one-hot gather), f32
    esq_ref : (1, S*Kp)   0.5*||e||^2 (+1e30 for padded entries), f32
    q_ref   : (Tp, S*D)   packed quantized rows
    sse_ref : (1, 1, 1)   per-step sum of squared error
    """
    i = pl.program_id(0)
    tp = z_ref.shape[0]

    z_in = z_ref[...]
    z_f32 = z_in.astype(jnp.float32)

    # Distances for all S packed sub-rows at once.  Full-depth (S*D = 128)
    # contraction; the codebook is already transposed + block-diagonal in the
    # wrapper, so no per-step XLU transpose (review item #2).
    cross = jnp.dot(z_in.astype(wc_ref.dtype), wc_ref[...],
                    preferred_element_type=jnp.float32)          # (Tp, S*Kp)
    # ||z||^2 is a per-row constant (argmin-invariant); 0.5*||e||^2 is hoisted
    # to the wrapper, so `dist` has the same argmin as the full expression.
    dist = esq_ref[...] - cross                                  # (Tp, S*Kp) f32

    col = lax.broadcasted_iota(jnp.int32, (tp, kp), 1)           # (Tp, Kp)
    row_pk = i * tp + lax.broadcasted_iota(jnp.int32, (tp, 1), 0)

    nbits = max(1, (kp - 1).bit_length())
    low_mask = (1 << nbits) - 1

    onehot_parts = []
    for s in range(s_pack):                       # static, lane-aligned slices
        d_s = dist[:, s * kp:(s + 1) * kp]                        # (Tp, Kp)
        if fused_argmin:
            # Single lane-reduction: order-preserving int32 key with the column
            # index in the low bits (first-index tie-break).  Truncates dist to
            # 32-nbits key bits, so near-exact ties may flip vs. torch.argmin.
            bits = pltpu.bitcast(d_s, jnp.int32)
            mono = bits ^ ((bits >> 31) & jnp.int32(0x7FFFFFFF))
            key = (mono & jnp.int32(~low_mask)) | col
            idx = jnp.min(key, axis=1, keepdims=True) & jnp.int32(low_mask)
        else:
            # Exact: matches torch.argmin incl. first-index tie-break.
            min_d = jnp.min(d_s, axis=1, keepdims=True)
            idx = jnp.min(jnp.where(d_s == min_d, col, kp), axis=1,
                          keepdims=True)
        # Rows past n_rows are padding: zero their one-hot so q = 0 there and
        # the SSE contribution vanishes (they are sliced off in the wrapper).
        valid = (row_pk * s_pack + s) < n_rows                    # (Tp, 1)
        onehot_parts.append(
            jnp.logical_and(col == idx, valid).astype(jnp.float32))

    onehot = jnp.concatenate(onehot_parts, axis=1)                # (Tp, S*Kp)

    # Block-diagonal gather emits the packed (Tp, S*D) slab directly (full MXU
    # output width); f32 one-hot x f32 codebook -> exact codebook rows.
    q = jnp.dot(onehot, eg_ref[...], preferred_element_type=jnp.float32)
    q_ref[...] = q.astype(q_ref.dtype)

    diff = q - z_f32
    sse_ref[...] = jnp.sum(diff * diff).reshape(1, 1, 1)


def _vmem_policy():
    """Return (vmem_limit_bytes, working-set budget) per TPU generation."""
    try:
        kind = jax.devices()[0].device_kind.lower()
    except Exception:
        kind = ""
    mib = 1024 * 1024
    if "v7" in kind:
        # 64 MiB VMEM per TensorCore; the 'parallel' grid puts resident
        # buffers in both cores' VMEM -> keep the 32 MiB scoped limit.
        return 32 * mib, 20 * mib
    if "v5" in kind or "v6" in kind:
        # 128 MiB physical VMEM -> raise both the scoped limit and the budget.
        return 96 * mib, 56 * mib
    return 32 * mib, 16 * mib          # unknown generation: conservative


def _pick_packed_tile(n_packed, width, s_kp, z_itemsize, budget, fixed_bytes):
    # Per packed row: double-buffered z and q blocks, f32 compute copies
    # (z, q, diff) and ~4 live (Tp, S*Kp) f32/int32 intermediates
    # (cross, dist, per-segment keys/one-hots, concatenated one-hot).
    per_row = 4 * width * z_itemsize + 3 * width * 4 + 4 * s_kp * 4
    avail = max(budget - fixed_bytes, 8 * per_row)
    tp = max(8, (int(avail // per_row) // 8) * 8)
    return min(tp, _round_up(n_packed, 8))


def vector_quantizer_forward(z, embeddings, commitment_cost=0.25, *,
                             fused_argmin=False, cross_in_bf16=None):
    """z: (B, C, H, W), embeddings: (K, D), C == D.  Returns (quantized, loss)."""
    B, C, H, W = z.shape
    K, D = embeddings.shape
    assert C == D, "channel dim must equal embedding_dim"

    # ---- wrapper-side layout plumbing (reshapes only, no compute) -----------
    flat = jnp.transpose(z, (0, 2, 3, 1)).reshape(-1, D)          # (N, D)
    N = flat.shape[0]

    # Pack S = 128//D rows per stored row so every kernel block is lane-dense.
    S = 128 // D if (D < 128 and 128 % D == 0) else 1
    Wp = S * D

    # Codebook axis padded to a lane-dense multiple of 128; padded entries get
    # zero vectors and +1e30 half-norms so they can never win the argmin.
    # (Sentinel must stay f32 even if the matmul operands go bf16.)
    Kp = max(128, _round_up(K, 128))
    e_f32 = embeddings.astype(jnp.float32)
    e_pad = jnp.pad(e_f32, ((0, Kp - K), (0, 0)))                 # (Kp, D)
    half_esq = 0.5 * jnp.sum(e_f32 * e_f32, axis=1)
    half_esq = jnp.pad(half_esq, (0, Kp - K), constant_values=1e30)
    esq_packed = jnp.tile(half_esq.reshape(1, Kp), (1, S))        # (1, S*Kp)

    # Block-diagonal codebooks: W_cross pre-transposed (no in-kernel .T),
    # E_gather emits the packed output slab directly.
    if cross_in_bf16 is None:
        cross_in_bf16 = (z.dtype == jnp.bfloat16)
    cross_dtype = jnp.bfloat16 if cross_in_bf16 else jnp.float32
    eye_s = jnp.eye(S, dtype=jnp.float32)
    w_cross = jnp.kron(eye_s, e_pad.T).astype(cross_dtype)        # (S*D, S*Kp)
    e_gather = jnp.kron(eye_s, e_pad)                             # (S*Kp, S*D)

    # ---- tiling --------------------------------------------------------------
    vmem_limit, budget = _vmem_policy()
    fixed = (w_cross.size * w_cross.dtype.itemsize                # single-buffered
             + e_gather.size * 4 + esq_packed.size * 4)
    n_packed = pl.cdiv(N, S)
    Tp = _pick_packed_tile(n_packed, Wp, S * Kp, z.dtype.itemsize, budget, fixed)
    grid = pl.cdiv(n_packed, Tp)
    N_pad = grid * Tp * S
    flat_pad = jnp.pad(flat, ((0, N_pad - N), (0, 0)))
    z_packed = flat_pad.reshape(grid * Tp, Wp)

    kernel = functools.partial(_vq_kernel, s_pack=S, kp=Kp, n_rows=N,
                               fused_argmin=fused_argmin)

    # NOTE(K-streaming): for production codebooks (16K-64K entries) the
    # (Tp, S*Kp) intermediates and the resident block-diag codebooks stop
    # fitting (especially v7x's 64 MiB/TC).  Plan: add an innermost
    # "arbitrary" grid axis over K-chunks, carry a running per-row min-key in
    # VMEM scratch, stream W_cross chunks (pl.Buffered(2)), and do the one-hot
    # gather only in the final chunk.  Not needed at this size.
    # TODO(synk): K-chunk streaming for very large codebooks.

    def build(single_buffer_consts):
        def const_spec(shape):
            index_map = lambda i: (0,) * len(shape)
            if single_buffer_consts:
                # Constant index_map -> the second pipeline buffer is never
                # refilled; single-buffer to free VMEM (review item #3).
                return pl.BlockSpec(shape, index_map,
                                    pipeline_mode=pl.Buffered(1))
            return pl.BlockSpec(shape, index_map)

        return pl.pallas_call(
            kernel,
            out_shape=(
                jax.ShapeDtypeStruct((grid * Tp, Wp), z.dtype),
                jax.ShapeDtypeStruct((grid, 1, 1), jnp.float32),
            ),
            grid_spec=pltpu.PrefetchScalarGridSpec(
                num_scalar_prefetch=0,
                grid=(grid,),
                in_specs=[
                    pl.BlockSpec((Tp, Wp), lambda i: (i, 0)),     # packed z rows
                    const_spec((S * D, S * Kp)),                  # W_cross
                    const_spec((S * Kp, S * D)),                  # E_gather
                    const_spec((1, S * Kp)),                      # 0.5*||e||^2
                ],
                out_specs=[
                    pl.BlockSpec((Tp, Wp), lambda i: (i, 0)),     # packed q rows
                    pl.BlockSpec((1, 1, 1), lambda i: (i, 0, 0)),  # SSE partials
                ],
            ),
            compiler_params=pltpu.CompilerParams(
                dimension_semantics=("parallel",),   # independent tiles -> megacore
                vmem_limit_bytes=vmem_limit,
            ),
        )

    try:
        q_packed, sse_parts = build(True)(z_packed, w_cross, e_gather, esq_packed)
    except Exception:
        # Running JAX does not accept BlockSpec(pipeline_mode=pl.Buffered(1)):
        # fall back to default double-buffering of the constant blocks.
        q_packed, sse_parts = build(False)(z_packed, w_cross, e_gather, esq_packed)

    # packed (grid*Tp, S*D) -> (N_pad, D) -> drop pad rows -> NHWC -> NCHW
    quantized = (q_packed.reshape(N_pad, D)[:N]
                 .reshape(B, H, W, D).transpose(0, 3, 1, 2))

    # e_latent_loss and q_latent_loss have identical forward values (detach
    # only affects grads): loss = (1 + commitment_cost) * mse(quantized, z).
    mse = jnp.sum(sse_parts) / jnp.float32(N * D)
    loss = (1.0 + commitment_cost) * mse

    # Straight-through estimator: z + (quantized - z).detach() == quantized.
    # TODO(synk): training-time gradients (STE + the detach asymmetry of the
    # two MSE terms) need a custom_vjp; this implements the forward pass only.
    return quantized, loss


def _reference(z, embeddings, commitment_cost=0.25):
    B, C, H, W = z.shape
    flat = jnp.transpose(z, (0, 2, 3, 1)).reshape(-1, C)
    dist = (jnp.sum(flat ** 2, axis=1, keepdims=True)
            - 2.0 * flat @ embeddings.T
            + jnp.sum(embeddings ** 2, axis=1))
    idx = jnp.argmin(dist, axis=1)
    q = embeddings[idx].reshape(B, H, W, C).transpose(0, 3, 1, 2)
    mse = jnp.mean((q - z) ** 2)
    return q, (1.0 + commitment_cost) * mse


if __name__ == "__main__":
    num_embeddings = 32
    embedding_dim = 8
    B, H, W = 2, 16, 16
    commitment_cost = 0.25

    key = jax.random.PRNGKey(0)
    k_z, k_e = jax.random.split(key)

    z = jax.random.normal(k_z, (B, embedding_dim, H, W), dtype=jnp.float32)
    # nn.Embedding weight init: uniform(-1/K, 1/K)
    embeddings = jax.random.uniform(
        k_e, (num_embeddings, embedding_dim),
        minval=-1.0 / num_embeddings, maxval=1.0 / num_embeddings,
        dtype=jnp.float32)

    q_ref, loss_ref = _reference(z, embeddings, commitment_cost)

    # Default path: exact f32 distances + exact argmin (parity with torch).
    quantized, loss = vector_quantizer_forward(z, embeddings, commitment_cost)
    quantized = jax.block_until_ready(quantized)
    loss = jax.block_until_ready(loss)
    assert quantized.shape == (B, embedding_dim, H, W)
    assert jnp.allclose(quantized, q_ref, atol=1e-5), "quantized mismatch"
    assert jnp.allclose(loss, loss_ref, atol=1e-6), "loss mismatch"

    # Fused single-reduction argmin (perf option): may flip near-exact ties,
    # so only the (flip-insensitive) loss and the shape are checked here.
    q_fused, loss_fused = vector_quantizer_forward(
        z, embeddings, commitment_cost, fused_argmin=True)
    jax.block_until_ready(loss_fused)
    assert q_fused.shape == (B, embedding_dim, H, W)
    assert jnp.allclose(loss_fused, loss_ref, atol=1e-5), "fused loss mismatch"

    print("KERNEL_OK")
</pallas_src>

<mosaic_0001>
module attributes {stable_mosaic.version = 11 : i64} {
  func.func @_vq_kernel(%arg0: i32, %arg1: memref<32x128xf32, #tpu.memory_space<vmem>>, %arg2: memref<128x2048xf32, #tpu.memory_space<vmem>>, %arg3: memref<2048x128xf32, #tpu.memory_space<vmem>>, %arg4: memref<1x2048xf32, #tpu.memory_space<vmem>>, %arg5: memref<32x128xf32, #tpu.memory_space<vmem>>, %arg6: memref<1x1x1xf32, #tpu.memory_space<vmem>>) attributes {dimension_semantics = [#tpu.dimension_semantics<parallel>], iteration_bounds = array<i64: 1>, scalar_prefetch = 0 : i64, scratch_operands = 0 : i64, tpu.core_type = #tpu.core_type<tc>, window_params = [{transform_indices = @transform_0, window_bounds = array<i64: 32, 128>}, {pipeline_mode = #tpu.pipeline_mode<synchronous>, transform_indices = @transform_1, window_bounds = array<i64: 128, 2048>}, {pipeline_mode = #tpu.pipeline_mode<synchronous>, transform_indices = @transform_2, window_bounds = array<i64: 2048, 128>}, {pipeline_mode = #tpu.pipeline_mode<synchronous>, transform_indices = @transform_3, window_bounds = array<i64: 1, 2048>}, {transform_indices = @transform_4, window_bounds = array<i64: 32, 128>}, {transform_indices = @transform_5, window_bounds = array<i64: 1, 1, 1>}]} {
    %c0 = arith.constant 0 : index
    %c0_0 = arith.constant 0 : index
    %0 = vector.load %arg1[%c0, %c0_0] : memref<32x128xf32, #tpu.memory_space<vmem>>, vector<32x128xf32>
    %c0_1 = arith.constant 0 : index
    %c0_2 = arith.constant 0 : index
    %1 = vector.load %arg2[%c0_1, %c0_2] : memref<128x2048xf32, #tpu.memory_space<vmem>>, vector<128x2048xf32>
    %cst = arith.constant dense<0.000000e+00> : vector<32x2048xf32>
    %2 = tpu.matmul %0, %1, %cst {dimension_numbers = #tpu.dot_dimension_numbers<[1], [0], [0], [1], [0, 0, 1, 1], [], []>} : vector<32x128xf32>, vector<128x2048xf32>, vector<32x2048xf32> -> vector<32x2048xf32>
    %c0_3 = arith.constant 0 : index
    %c0_4 = arith.constant 0 : index
    %3 = vector.load %arg4[%c0_3, %c0_4] : memref<1x2048xf32, #tpu.memory_space<vmem>>, vector<1x2048xf32>
    %4 = vector.broadcast %3 : vector<1x2048xf32> to vector<32x2048xf32>
    %5 = arith.subf %4, %2 : vector<32x2048xf32>
    %6 = tpu.iota {dimensions = array<i32: 1>} : vector<32x128xi32>
    %c32_i32 = arith.constant 32 : i32
    %7 = arith.muli %arg0, %c32_i32 : i32
    %8 = tpu.iota {dimensions = array<i32: 0>} : vector<32x1xi32>
    %9 = vector.broadcast %7 : i32 to vector<32x1xi32>
    %10 = arith.addi %9, %8 : vector<32x1xi32>
    %11 = vector.extract_strided_slice %5 {offsets = [0, 0], sizes = [32, 128], strides = [1, 1]} : vector<32x2048xf32> to vector<32x128xf32>
    %cst_5 = arith.constant dense<0x7F800000> : vector<32xf32>
    %12 = vector.multi_reduction <minimumf>, %11, %cst_5 [1] : vector<32x128xf32> to vector<32xf32>
    %13 = vector.shape_cast %12 : vector<32xf32> to vector<32x1xf32>
    %14 = vector.broadcast %13 : vector<32x1xf32> to vector<32x128xf32>
    %15 = arith.cmpf oeq, %11, %14 : vector<32x128xf32>
    %c128_i32 = arith.constant 128 : i32
    %16 = vector.broadcast %c128_i32 : i32 to vector<32x128xi32>
    %17 = arith.select %15, %6, %16 : vector<32x128xi1>, vector<32x128xi32>
    %cst_6 = arith.constant dense<2147483647> : vector<32xi32>
    %18 = vector.multi_reduction <minsi>, %17, %cst_6 [1] : vector<32x128xi32> to vector<32xi32>
    %19 = vector.shape_cast %18 : vector<32xi32> to vector<32x1xi32>
    %c16_i32 = arith.constant 16 : i32
    %20 = vector.broadcast %c16_i32 : i32 to vector<32x1xi32>
    %21 = arith.muli %10, %20 : vector<32x1xi32>
    %c0_i32 = arith.constant 0 : i32
    %22 = vector.broadcast %c0_i32 : i32 to vector<32x1xi32>
    %23 = arith.addi %21, %22 : vector<32x1xi32>
    %c512_i32 = arith.constant 512 : i32
    %24 = vector.broadcast %c512_i32 : i32 to vector<32x1xi32>
    %25 = arith.cmpi slt, %23, %24 : vector<32x1xi32>
    %26 = vector.broadcast %19 : vector<32x1xi32> to vector<32x128xi32>
    %27 = arith.cmpi eq, %6, %26 : vector<32x128xi32>
    %28 = vector.broadcast %25 : vector<32x1xi1> to vector<32x128xi1>
    %29 = arith.andi %27, %28 : vector<32x128xi1>
    %30 = arith.extui %29 : vector<32x128xi1> to vector<32x128xi32>
    %31 = arith.sitofp %30 : vector<32x128xi32> to vector<32x128xf32>
    %32 = vector.extract_strided_slice %5 {offsets = [0, 128], sizes = [32, 128], strides = [1, 1]} : vector<32x2048xf32> to vector<32x128xf32>
    %cst_7 = arith.constant dense<0x7F800000> : vector<32xf32>
    %33 = vector.multi_reduction <minimumf>, %32, %cst_7 [1] : vector<32x128xf32> to vector<32xf32>
    %34 = vector.shape_cast %33 : vector<32xf32> to vector<32x1xf32>
    %35 = vector.broadcast %34 : vector<32x1xf32> to vector<32x128xf32>
    %36 = arith.cmpf oeq, %32, %35 : vector<32x128xf32>
    %c128_i32_8 = arith.constant 128 : i32
    %37 = vector.broadcast %c128_i32_8 : i32 to vector<32x128xi32>
    %38 = arith.select %36, %6, %37 : vector<32x128xi1>, vector<32x128xi32>
    %cst_9 = arith.constant dense<2147483647> : vector<32xi32>
    %39 = vector.multi_reduction <minsi>, %38, %cst_9 [1] : vector<32x128xi32> to vector<32xi32>
    %40 = vector.shape_cast %39 : vector<32xi32> to vector<32x1xi32>
    %c16_i32_10 = arith.constant 16 : i32
    %41 = vector.broadcast %c16_i32_10 : i32 to vector<32x1xi32>
    %42 = arith.muli %10, %41 : vector<32x1xi32>
    %c1_i32 = arith.constant 1 : i32
    %43 = vector.broadcast %c1_i32 : i32 to vector<32x1xi32>
    %44 = arith.addi %42, %43 : vector<32x1xi32>
    %c512_i32_11 = arith.constant 512 : i32
    %45 = vector.broadcast %c512_i32_11 : i32 to vector<32x1xi32>
    %46 = arith.cmpi slt, %44, %45 : vector<32x1xi32>
    %47 = vector.broadcast %40 : vector<32x1xi32> to vector<32x128xi32>
    %48 = arith.cmpi eq, %6, %47 : vector<32x128xi32>
    %49 = vector.broadcast %46 : vector<32x1xi1> to vector<32x128xi1>
    %50 = arith.andi %48, %49 : vector<32x128xi1>
    %51 = arith.extui %50 : vector<32x128xi1> to vector<32x128xi32>
    %52 = arith.sitofp %51 : vector<32x128xi32> to vector<32x128xf32>
    %53 = vector.extract_strided_slice %5 {offsets = [0, 256], sizes = [32, 128], strides = [1, 1]} : vector<32x2048xf32> to vector<32x128xf32>
    %cst_12 = arith.constant dense<0x7F800000> : vector<32xf32>
    %54 = vector.multi_reduction <minimumf>, %53, %cst_12 [1] : vector<32x128xf32> to vector<32xf32>
    %55 = vector.shape_cast %54 : vector<32xf32> to vector<32x1xf32>
    %56 = vector.broadcast %55 : vector<32x1xf32> to vector<32x128xf32>
    %57 = arith.cmpf oeq, %53, %56 : vector<32x128xf32>
    %c128_i32_13 = arith.constant 128 : i32
    %58 = vector.broadcast %c128_i32_13 : i32 to vector<32x128xi32>
    %59 = arith.select %57, %6, %58 : vector<32x128xi1>, vector<32x128xi32>
    %cst_14 = arith.constant dense<2147483647> : vector<32xi32>
    %60 = vector.multi_reduction <minsi>, %59, %cst_14 [1] : vector<32x128xi32> to vector<32xi32>
    %61 = vector.shape_cast %60 : vector<32xi32> to vector<32x1xi32>
    %c16_i32_15 = arith.constant 16 : i32
    %62 = vector.broadcast %c16_i32_15 : i32 to vector<32x1xi32>
    %63 = arith.muli %10, %62 : vector<32x1xi32>
    %c2_i32 = arith.constant 2 : i32
    %64 = vector.broadcast %c2_i32 : i32 to vector<32x1xi32>
    %65 = arith.addi %63, %64 : vector<32x1xi32>
    %c512_i32_16 = arith.constant 512 : i32
    %66 = vector.broadcast %c512_i32_16 : i32 to vector<32x1xi32>
    %67 = arith.cmpi slt, %65, %66 : vector<32x1xi32>
    %68 = vector.broadcast %61 : vector<32x1xi32> to vector<32x128xi32>
    %69 = arith.cmpi eq, %6, %68 : vector<32x128xi32>
    %70 = vector.broadcast %67 : vector<32x1xi1> to vector<32x128xi1>
    %71 = arith.andi %69, %70 : vector<32x128xi1>
    %72 = arith.extui %71 : vector<32x128xi1> to vector<32x128xi32>
    %73 = arith.sitofp %72 : vector<32x128xi32> to vector<32x128xf32>
    %74 = vector.extract_strided_slice %5 {offsets = [0, 384], sizes = [32, 128], strides = [1, 1]} : vector<32x2048xf32> to vector<32x128xf32>
    %cst_17 = arith.constant dense<0x7F800000> : vector<32xf32>
    %75 = vector.multi_reduction <minimumf>, %74, %cst_17 [1] : vector<32x128xf32> to vector<32xf32>
    %76 = vector.shape_cast %75 : vector<32xf32> to vector<32x1xf32>
    %77 = vector.broadcast %76 : vector<32x1xf32> to vector<32x128xf32>
    %78 = arith.cmpf oeq, %74, %77 : vector<32x128xf32>
    %c128_i32_18 = arith.constant 128 : i32
    %79 = vector.broadcast %c128_i32_18 : i32 to vector<32x128xi32>
    %80 = arith.select %78, %6, %79 : vector<32x128xi1>, vector<32x128xi32>
    %cst_19 = arith.constant dense<2147483647> : vector<32xi32>
    %81 = vector.multi_reduction <minsi>, %80, %cst_19 [1] : vector<32x128xi32> to vector<32xi32>
    %82 = vector.shape_cast %81 : vector<32xi32> to vector<32x1xi32>
    %c16_i32_20 = arith.constant 16 : i32
    %83 = vector.broadcast %c16_i32_20 : i32 to vector<32x1xi32>
    %84 = arith.muli %10, %83 : vector<32x1xi32>
    %c3_i32 = arith.constant 3 : i32
    %85 = vector.broadcast %c3_i32 : i32 to vector<32x1xi32>
    %86 = arith.addi %84, %85 : vector<32x1xi32>
    %c512_i32_21 = arith.constant 512 : i32
    %87 = vector.broadcast %c512_i32_21 : i32 to vector<32x1xi32>
    %88 = arith.cmpi slt, %86, %87 : vector<32x1xi32>
    %89 = vector.broadcast %82 : vector<32x1xi32> to vector<32x128xi32>
    %90 = arith.cmpi eq, %6, %89 : vector<32x128xi32>
    %91 = vector.broadcast %88 : vector<32x1xi1> to vector<32x128xi1>
    %92 = arith.andi %90, %91 : vector<32x128xi1>
    %93 = arith.extui %92 : vector<32x128xi1> to vector<32x128xi32>
    %94 = arith.sitofp %93 : vector<32x128xi32> to vector<32x128xf32>
    %95 = vector.extract_strided_slice %5 {offsets = [0, 512], sizes = [32, 128], strides = [1, 1]} : vector<32x2048xf32> to vector<32x128xf32>
    %cst_22 = arith.constant dense<0x7F800000> : vector<32xf32>
    %96 = vector.multi_reduction <minimumf>, %95, %cst_22 [1] : vector<32x128xf32> to vector<32xf32>
    %97 = vector.shape_cast %96 : vector<32xf32> to vector<32x1xf32>
    %98 = vector.broadcast %97 : vector<32x1xf32> to vector<32x128xf32>
    %99 = arith.cmpf oeq, %95, %98 : vector<32x128xf32>
    %c128_i32_23 = arith.constant 128 : i32
    %100 = vector.broadcast %c128_i32_23 : i32 to vector<32x128xi32>
    %101 = arith.select %99, %6, %100 : vector<32x128xi1>, vector<32x128xi32>
    %cst_24 = arith.constant dense<2147483647> : vector<32xi32>
    %102 = vector.multi_reduction <minsi>, %101, %cst_24 [1] : vector<32x128xi32> to vector<32xi32>
    %103 = vector.shape_cast %102 : vector<32xi32> to vector<32x1xi32>
    %c16_i32_25 = arith.constant 16 : i32
    %104 = vector.broadcast %c16_i32_25 : i32 to vector<32x1xi32>
    %105 = arith.muli %10, %104 : vector<32x1xi32>
    %c4_i32 = arith.constant 4 : i32
    %106 = vector.broadcast %c4_i32 : i32 to vector<32x1xi32>
    %107 = arith.addi %105, %106 : vector<32x1xi32>
    %c512_i32_26 = arith.constant 512 : i32
    %108 = vector.broadcast %c512_i32_26 : i32 to vector<32x1xi32>
    %109 = arith.cmpi slt, %107, %108 : vector<32x1xi32>
    %110 = vector.broadcast %103 : vector<32x1xi32> to vector<32x128xi32>
    %111 = arith.cmpi eq, %6, %110 : vector<32x128xi32>
    %112 = vector.broadcast %109 : vector<32x1xi1> to vector<32x128xi1>
    %113 = arith.andi %111, %112 : vector<32x128xi1>
    %114 = arith.extui %113 : vector<32x128xi1> to vector<32x128xi32>
    %115 = arith.sitofp %114 : vector<32x128xi32> to vector<32x128xf32>
    %116 = vector.extract_strided_slice %5 {offsets = [0, 640], sizes = [32, 128], strides = [1, 1]} : vector<32x2048xf32> to vector<32x128xf32>
    %cst_27 = arith.constant dense<0x7F800000> : vector<32xf32>
    %117 = vector.multi_reduction <minimumf>, %116, %cst_27 [1] : vector<32x128xf32> to vector<32xf32>
    %118 = vector.shape_cast %117 : vector<32xf32> to vector<32x1xf32>
    %119 = vector.broadcast %118 : vector<32x1xf32> to vector<32x128xf32>
    %120 = arith.cmpf oeq, %116, %119 : vector<32x128xf32>
    %c128_i32_28 = arith.constant 128 : i32
    %121 = vector.broadcast %c128_i32_28 : i32 to vector<32x128xi32>
    %122 = arith.select %120, %6, %121 : vector<32x128xi1>, vector<32x128xi32>
    %cst_29 = arith.constant dense<2147483647> : vector<32xi32>
    %123 = vector.multi_reduction <minsi>, %122, %cst_29 [1] : vector<32x128xi32> to vector<32xi32>
    %124 = vector.shape_cast %123 : vector<32xi32> to vector<32x1xi32>
    %c16_i32_30 = arith.constant 16 : i32
    %125 = vector.broadcast %c16_i32_30 : i32 to vector<32x1xi32>
    %126 = arith.muli %10, %125 : vector<32x1xi32>
    %c5_i32 = arith.constant 5 : i32
    %127 = vector.broadcast %c5_i32 : i32 to vector<32x1xi32>
    %128 = arith.addi %126, %127 : vector<32x1xi32>
    %c512_i32_31 = arith.constant 512 : i32
    %129 = vector.broadcast %c512_i32_31 : i32 to vector<32x1xi32>
    %130 = arith.cmpi slt, %128, %129 : vector<32x1xi32>
    %131 = vector.broadcast %124 : vector<32x1xi32> to vector<32x128xi32>
    %132 = arith.cmpi eq, %6, %131 : vector<32x128xi32>
    %133 = vector.broadcast %130 : vector<32x1xi1> to vector<32x128xi1>
    %134 = arith.andi %132, %133 : vector<32x128xi1>
    %135 = arith.extui %134 : vector<32x128xi1> to vector<32x128xi32>
    %136 = arith.sitofp %135 : vector<32x128xi32> to vector<32x128xf32>
    %137 = vector.extract_strided_slice %5 {offsets = [0, 768], sizes = [32, 128], strides = [1, 1]} : vector<32x2048xf32> to vector<32x128xf32>
    %cst_32 = arith.constant dense<0x7F800000> : vector<32xf32>
    %138 = vector.multi_reduction <minimumf>, %137, %cst_32 [1] : vector<32x128xf32> to vector<32xf32>
    %139 = vector.shape_cast %138 : vector<32xf32> to vector<32x1xf32>
    %140 = vector.broadcast %139 : vector<32x1xf32> to vector<32x128xf32>
    %141 = arith.cmpf oeq, %137, %140 : vector<32x128xf32>
    %c128_i32_33 = arith.constant 128 : i32
    %142 = vector.broadcast %c128_i32_33 : i32 to vector<32x128xi32>
    %143 = arith.select %141, %6, %142 : vector<32x128xi1>, vector<32x128xi32>
    %cst_34 = arith.constant dense<2147483647> : vector<32xi32>
    %144 = vector.multi_reduction <minsi>, %143, %cst_34 [1] : vector<32x128xi32> to vector<32xi32>
    %145 = vector.shape_cast %144 : vector<32xi32> to vector<32x1xi32>
    %c16_i32_35 = arith.constant 16 : i32
    %146 = vector.broadcast %c16_i32_35 : i32 to vector<32x1xi32>
    %147 = arith.muli %10, %146 : vector<32x1xi32>
    %c6_i32 = arith.constant 6 : i32
    %148 = vector.broadcast %c6_i32 : i32 to vector<32x1xi32>
    %149 = arith.addi %147, %148 : vector<32x1xi32>
    %c512_i32_36 = arith.constant 512 : i32
    %150 = vector.broadcast %c512_i32_36 : i32 to vector<32x1xi32>
    %151 = arith.cmpi slt, %149, %150 : vector<32x1xi32>
    %152 = vector.broadcast %145 : vector<32x1xi32> to vector<32x128xi32>
    %153 = arith.cmpi eq, %6, %152 : vector<32x128xi32>
    %154 = vector.broadcast %151 : vector<32x1xi1> to vector<32x128xi1>
    %155 = arith.andi %153, %154 : vector<32x128xi1>
    %156 = arith.extui %155 : vector<32x128xi1> to vector<32x128xi32>
    %157 = arith.sitofp %156 : vector<32x128xi32> to vector<32x128xf32>
    %158 = vector.extract_strided_slice %5 {offsets = [0, 896], sizes = [32, 128], strides = [1, 1]} : vector<32x2048xf32> to vector<32x128xf32>
    %cst_37 = arith.constant dense<0x7F800000> : vector<32xf32>
    %159 = vector.multi_reduction <minimumf>, %158, %cst_37 [1] : vector<32x128xf32> to vector<32xf32>
    %160 = vector.shape_cast %159 : vector<32xf32> to vector<32x1xf32>
    %161 = vector.broadcast %160 : vector<32x1xf32> to vector<32x128xf32>
    %162 = arith.cmpf oeq, %158, %161 : vector<32x128xf32>
    %c128_i32_38 = arith.constant 128 : i32
    %163 = vector.broadcast %c128_i32_38 : i32 to vector<32x128xi32>
    %164 = arith.select %162, %6, %163 : vector<32x128xi1>, vector<32x128xi32>
    %cst_39 = arith.constant dense<2147483647> : vector<32xi32>
    %165 = vector.multi_reduction <minsi>, %164, %cst_39 [1] : vector<32x128xi32> to vector<32xi32>
    %166 = vector.shape_cast %165 : vector<32xi32> to vector<32x1xi32>
    %c16_i32_40 = arith.constant 16 : i32
    %167 = vector.broadcast %c16_i32_40 : i32 to vector<32x1xi32>
    %168 = arith.muli %10, %167 : vector<32x1xi32>
    %c7_i32 = arith.constant 7 : i32
    %169 = vector.broadcast %c7_i32 : i32 to vector<32x1xi32>
    %170 = arith.addi %168, %169 : vector<32x1xi32>
    %c512_i32_41 = arith.constant 512 : i32
    %171 = vector.broadcast %c512_i32_41 : i32 to vector<32x1xi32>
    %172 = arith.cmpi slt, %170, %171 : vector<32x1xi32>
    %173 = vector.broadcast %166 : vector<32x1xi32> to vector<32x128xi32>
    %174 = arith.cmpi eq, %6, %173 : vector<32x128xi32>
    %175 = vector.broadcast %172 : vector<32x1xi1> to vector<32x128xi1>
    %176 = arith.andi %174, %175 : vector<32x128xi1>
    %177 = arith.extui %176 : vector<32x128xi1> to vector<32x128xi32>
    %178 = arith.sitofp %177 : vector<32x128xi32> to vector<32x128xf32>
    %179 = vector.extract_strided_slice %5 {offsets = [0, 1024], sizes = [32, 128], strides = [1, 1]} : vector<32x2048xf32> to vector<32x128xf32>
    %cst_42 = arith.constant dense<0x7F800000> : vector<32xf32>
    %180 = vector.multi_reduction <minimumf>, %179, %cst_42 [1] : vector<32x128xf32> to vector<32xf32>
    %181 = vector.shape_cast %180 : vector<32xf32> to vector<32x1xf32>
    %182 = vector.broadcast %181 : vector<32x1xf32> to vector<32x128xf32>
    %183 = arith.cmpf oeq, %179, %182 : vector<32x128xf32>
    %c128_i32_43 = arith.constant 128 : i32
    %184 = vector.broadcast %c128_i32_43 : i32 to vector<32x128xi32>
    %185 = arith.select %183, %6, %184 : vector<32x128xi1>, vector<32x128xi32>
    %cst_44 = arith.constant dense<2147483647> : vector<32xi32>
    %186 = vector.multi_reduction <minsi>, %185, %cst_44 [1] : vector<32x128xi32> to vector<32xi32>
    %187 = vector.shape_cast %186 : vector<32xi32> to vector<32x1xi32>
    %c16_i32_45 = arith.constant 16 : i32
    %188 = vector.broadcast %c16_i32_45 : i32 to vector<32x1xi32>
    %189 = arith.muli %10, %188 : vector<32x1xi32>
    %c8_i32 = arith.constant 8 : i32
    %190 = vector.broadcast %c8_i32 : i32 to vector<32x1xi32>
    %191 = arith.addi %189, %190 : vector<32x1xi32>
    %c512_i32_46 = arith.constant 512 : i32
    %192 = vector.broadcast %c512_i32_46 : i32 to vector<32x1xi32>
    %193 = arith.cmpi slt, %191, %192 : vector<32x1xi32>
    %194 = vector.broadcast %187 : vector<32x1xi32> to vector<32x128xi32>
    %195 = arith.cmpi eq, %6, %194 : vector<32x128xi32>
    %196 = vector.broadcast %193 : vector<32x1xi1> to vector<32x128xi1>
    %197 = arith.andi %195, %196 : vector<32x128xi1>
    %198 = arith.extui %197 : vector<32x128xi1> to vector<32x128xi32>
    %199 = arith.sitofp %198 : vector<32x128xi32> to vector<32x128xf32>
    %200 = vector.extract_strided_slice %5 {offsets = [0, 1152], sizes = [32, 128], strides = [1, 1]} : vector<32x2048xf32> to vector<32x128xf32>
    %cst_47 = arith.constant dense<0x7F800000> : vector<32xf32>
    %201 = vector.multi_reduction <minimumf>, %200, %cst_47 [1] : vector<32x128xf32> to vector<32xf32>
    %202 = vector.shape_cast %201 : vector<32xf32> to vector<32x1xf32>
    %203 = vector.broadcast %202 : vector<32x1xf32> to vector<32x128xf32>
    %204 = arith.cmpf oeq, %200, %203 : vector<32x128xf32>
    %c128_i32_48 = arith.constant 128 : i32
    %205 = vector.broadcast %c128_i32_48 : i32 to vector<32x128xi32>
    %206 = arith.select %204, %6, %205 : vector<32x128xi1>, vector<32x128xi32>
    %cst_49 = arith.constant dense<2147483647> : vector<32xi32>
    %207 = vector.multi_reduction <minsi>, %206, %cst_49 [1] : vector<32x128xi32> to vector<32xi32>
    %208 = vector.shape_cast %207 : vector<32xi32> to vector<32x1xi32>
    %c16_i32_50 = arith.constant 16 : i32
    %209 = vector.broadcast %c16_i32_50 : i32 to vector<32x1xi32>
    %210 = arith.muli %10, %209 : vector<32x1xi32>
    %c9_i32 = arith.constant 9 : i32
    %211 = vector.broadcast %c9_i32 : i32 to vector<32x1xi32>
    %212 = arith.addi %210, %211 : vector<32x1xi32>
    %c512_i32_51 = arith.constant 512 : i32
    %213 = vector.broadcast %c512_i32_51 : i32 to vector<32x1xi32>
    %214 = arith.cmpi slt, %212, %213 : vector<32x1xi32>
    %215 = vector.broadcast %208 : vector<32x1xi32> to vector<32x128xi32>
    %216 = arith.cmpi eq, %6, %215 : vector<32x128xi32>
    %217 = vector.broadcast %214 : vector<32x1xi1> to vector<32x128xi1>
    %218 = arith.andi %216, %217 : vector<32x128xi1>
    %219 = arith.extui %218 : vector<32x128xi1> to vector<32x128xi32>
    %220 = arith.sitofp %219 : vector<32x128xi32> to vector<32x128xf32>
    %221 = vector.extract_strided_slice %5 {offsets = [0, 1280], sizes = [32, 128], strides = [1, 1]} : vector<32x2048xf32> to vector<32x128xf32>
    %cst_52 = arith.constant dense<0x7F800000> : vector<32xf32>
    %222 = vector.multi_reduction <minimumf>, %221, %cst_52 [1] : vector<32x128xf32> to vector<32xf32>
    %223 = vector.shape_cast %222 : vector<32xf32> to vector<32x1xf32>
    %224 = vector.broadcast %223 : vector<32x1xf32> to vector<32x128xf32>
    %225 = arith.cmpf oeq, %221, %224 : vector<32x128xf32>
    %c128_i32_53 = arith.constant 128 : i32
    %226 = vector.broadcast %c128_i32_53 : i32 to vector<32x128xi32>
    %227 = arith.select %225, %6, %226 : vector<32x128xi1>, vector<32x128xi32>
    %cst_54 = arith.constant dense<2147483647> : vector<32xi32>
    %228 = vector.multi_reduction <minsi>, %227, %cst_54 [1] : vector<32x128xi32> to vector<32xi32>
    %229 = vector.shape_cast %228 : vector<32xi32> to vector<32x1xi32>
    %c16_i32_55 = arith.constant 16 : i32
    %230 = vector.broadcast %c16_i32_55 : i32 to vector<32x1xi32>
    %231 = arith.muli %10, %230 : vector<32x1xi32>
    %c10_i32 = arith.constant 10 : i32
    %232 = vector.broadcast %c10_i32 : i32 to vector<32x1xi32>
    %233 = arith.addi %231, %232 : vector<32x1xi32>
    %c512_i32_56 = arith.constant 512 : i32
    %234 = vector.broadcast %c512_i32_56 : i32 to vector<32x1xi32>
    %235 = arith.cmpi slt, %233, %234 : vector<32x1xi32>
    %236 = vector.broadcast %229 : vector<32x1xi32> to vector<32x128xi32>
    %237 = arith.cmpi eq, %6, %236 : vector<32x128xi32>
    %238 = vector.broadcast %235 : vector<32x1xi1> to vector<32x128xi1>
    %239 = arith.andi %237, %238 : vector<32x128xi1>
    %240 = arith.extui %239 : vector<32x128xi1> to vector<32x128xi32>
    %241 = arith.sitofp %240 : vector<32x128xi32> to vector<32x128xf32>
    %242 = vector.extract_strided_slice %5 {offsets = [0, 1408], sizes = [32, 128], strides = [1, 1]} : vector<32x2048xf32> to vector<32x128xf32>
    %cst_57 = arith.constant dense<0x7F800000> : vector<32xf32>
    %243 = vector.multi_reduction <minimumf>, %242, %cst_57 [1] : vector<32x128xf32> to vector<32xf32>
    %244 = vector.shape_cast %243 : vector<32xf32> to vector<32x1xf32>
    %245 = vector.broadcast %244 : vector<32x1xf32> to vector<32x128xf32>
    %246 = arith.cmpf oeq, %242, %245 : vector<32x128xf32>
    %c128_i32_58 = arith.constant 128 : i32
    %247 = vector.broadcast %c128_i32_58 : i32 to vector<32x128xi32>
    %248 = arith.select %246, %6, %247 : vector<32x128xi1>, vector<32x128xi32>
    %cst_59 = arith.constant dense<2147483647> : vector<32xi32>
    %249 = vector.multi_reduction <minsi>, %248, %cst_59 [1] : vector<32x128xi32> to vector<32xi32>
    %250 = vector.shape_cast %249 : vector<32xi32> to vector<32x1xi32>
    %c16_i32_60 = arith.constant 16 : i32
    %251 = vector.broadcast %c16_i32_60 : i32 to vector<32x1xi32>
    %252 = arith.muli %10, %251 : vector<32x1xi32>
    %c11_i32 = arith.constant 11 : i32
    %253 = vector.broadcast %c11_i32 : i32 to vector<32x1xi32>
    %254 = arith.addi %252, %253 : vector<32x1xi32>
    %c512_i32_61 = arith.constant 512 : i32
    %255 = vector.broadcast %c512_i32_61 : i32 to vector<32x1xi32>
    %256 = arith.cmpi slt, %254, %255 : vector<32x1xi32>
    %257 = vector.broadcast %250 : vector<32x1xi32> to vector<32x128xi32>
    %258 = arith.cmpi eq, %6, %257 : vector<32x128xi32>
    %259 = vector.broadcast %256 : vector<32x1xi1> to vector<32x128xi1>
    %260 = arith.andi %258, %259 : vector<32x128xi1>
    %261 = arith.extui %260 : vector<32x128xi1> to vector<32x128xi32>
    %262 = arith.sitofp %261 : vector<32x128xi32> to vector<32x128xf32>
    %263 = vector.extract_strided_slice %5 {offsets = [0, 1536], sizes = [32, 128], strides = [1, 1]} : vector<32x2048xf32> to vector<32x128xf32>
    %cst_62 = arith.constant dense<0x7F800000> : vector<32xf32>
    %264 = vector.multi_reduction <minimumf>, %263, %cst_62 [1] : vector<32x128xf32> to vector<32xf32>
    %265 = vector.shape_cast %264 : vector<32xf32> to vector<32x1xf32>
    %266 = vector.broadcast %265 : vector<32x1xf32> to vector<32x128xf32>
    %267 = arith.cmpf oeq, %263, %266 : vector<32x128xf32>
    %c128_i32_63 = arith.constant 128 : i32
    %268 = vector.broadcast %c128_i32_63 : i32 to vector<32x128xi32>
    %269 = arith.select %267, %6, %268 : vector<32x128xi1>, vector<32x128xi32>
    %cst_64 = arith.constant dense<2147483647> : vector<32xi32>
    %270 = vector.multi_reduction <minsi>, %269, %cst_64 [1] : vector<32x128xi32> to vector<32xi32>
    %271 = vector.shape_cast %270 : vector<32xi32> to vector<32x1xi32>
    %c16_i32_65 = arith.constant 16 : i32
    %272 = vector.broadcast %c16_i32_65 : i32 to vector<32x1xi32>
    %273 = arith.muli %10, %272 : vector<32x1xi32>
    %c12_i32 = arith.constant 12 : i32
    %274 = vector.broadcast %c12_i32 : i32 to vector<32x1xi32>
    %275 = arith.addi %273, %274 : vector<32x1xi32>
    %c512_i32_66 = arith.constant 512 : i32
    %276 = vector.broadcast %c512_i32_66 : i32 to vector<32x1xi32>
    %277 = arith.cmpi slt, %275, %276 : vector<32x1xi32>
    %278 = vector.broadcast %271 : vector<32x1xi32> to vector<32x128xi32>
    %279 = arith.cmpi eq, %6, %278 : vector<32x128xi32>
    %280 = vector.broadcast %277 : vector<32x1xi1> to vector<32x128xi1>
    %281 = arith.andi %279, %280 : vector<32x128xi1>
    %282 = arith.extui %281 : vector<32x128xi1> to vector<32x128xi32>
    %283 = arith.sitofp %282 : vector<32x128xi32> to vector<32x128xf32>
    %284 = vector.extract_strided_slice %5 {offsets = [0, 1664], sizes = [32, 128], strides = [1, 1]} : vector<32x2048xf32> to vector<32x128xf32>
    %cst_67 = arith.constant dense<0x7F800000> : vector<32xf32>
    %285 = vector.multi_reduction <minimumf>, %284, %cst_67 [1] : vector<32x128xf32> to vector<32xf32>
    %286 = vector.shape_cast %285 : vector<32xf32> to vector<32x1xf32>
    %287 = vector.broadcast %286 : vector<32x1xf32> to vector<32x128xf32>
    %288 = arith.cmpf oeq, %284, %287 : vector<32x128xf32>
    %c128_i32_68 = arith.constant 128 : i32
    %289 = vector.broadcast %c128_i32_68 : i32 to vector<32x128xi32>
    %290 = arith.select %288, %6, %289 : vector<32x128xi1>, vector<32x128xi32>
    %cst_69 = arith.constant dense<2147483647> : vector<32xi32>
    %291 = vector.multi_reduction <minsi>, %290, %cst_69 [1] : vector<32x128xi32> to vector<32xi32>
    %292 = vector.shape_cast %291 : vector<32xi32> to vector<32x1xi32>
    %c16_i32_70 = arith.constant 16 : i32
    %293 = vector.broadcast %c16_i32_70 : i32 to vector<32x1xi32>
    %294 = arith.muli %10, %293 : vector<32x1xi32>
    %c13_i32 = arith.constant 13 : i32
    %295 = vector.broadcast %c13_i32 : i32 to vector<32x1xi32>
    %296 = arith.addi %294, %295 : vector<32x1xi32>
    %c512_i32_71 = arith.constant 512 : i32
    %297 = vector.broadcast %c512_i32_71 : i32 to vector<32x1xi32>
    %298 = arith.cmpi slt, %296, %297 : vector<32x1xi32>
    %299 = vector.broadcast %292 : vector<32x1xi32> to vector<32x128xi32>
    %300 = arith.cmpi eq, %6, %299 : vector<32x128xi32>
    %301 = vector.broadcast %298 : vector<32x1xi1> to vector<32x128xi1>
    %302 = arith.andi %300, %301 : vector<32x128xi1>
    %303 = arith.extui %302 : vector<32x128xi1> to vector<32x128xi32>
    %304 = arith.sitofp %303 : vector<32x128xi32> to vector<32x128xf32>
    %305 = vector.extract_strided_slice %5 {offsets = [0, 1792], sizes = [32, 128], strides = [1, 1]} : vector<32x2048xf32> to vector<32x128xf32>
    %cst_72 = arith.constant dense<0x7F800000> : vector<32xf32>
    %306 = vector.multi_reduction <minimumf>, %305, %cst_72 [1] : vector<32x128xf32> to vector<32xf32>
    %307 = vector.shape_cast %306 : vector<32xf32> to vector<32x1xf32>
    %308 = vector.broadcast %307 : vector<32x1xf32> to vector<32x128xf32>
    %309 = arith.cmpf oeq, %305, %308 : vector<32x128xf32>
    %c128_i32_73 = arith.constant 128 : i32
    %310 = vector.broadcast %c128_i32_73 : i32 to vector<32x128xi32>
    %311 = arith.select %309, %6, %310 : vector<32x128xi1>, vector<32x128xi32>
    %cst_74 = arith.constant dense<2147483647> : vector<32xi32>
    %312 = vector.multi_reduction <minsi>, %311, %cst_74 [1] : vector<32x128xi32> to vector<32xi32>
    %313 = vector.shape_cast %312 : vector<32xi32> to vector<32x1xi32>
    %c16_i32_75 = arith.constant 16 : i32
    %314 = vector.broadcast %c16_i32_75 : i32 to vector<32x1xi32>
    %315 = arith.muli %10, %314 : vector<32x1xi32>
    %c14_i32 = arith.constant 14 : i32
    %316 = vector.broadcast %c14_i32 : i32 to vector<32x1xi32>
    %317 = arith.addi %315, %316 : vector<32x1xi32>
    %c512_i32_76 = arith.constant 512 : i32
    %318 = vector.broadcast %c512_i32_76 : i32 to vector<32x1xi32>
    %319 = arith.cmpi slt, %317, %318 : vector<32x1xi32>
    %320 = vector.broadcast %313 : vector<32x1xi32> to vector<32x128xi32>
    %321 = arith.cmpi eq, %6, %320 : vector<32x128xi32>
    %322 = vector.broadcast %319 : vector<32x1xi1> to vector<32x128xi1>
    %323 = arith.andi %321, %322 : vector<32x128xi1>
    %324 = arith.extui %323 : vector<32x128xi1> to vector<32x128xi32>
    %325 = arith.sitofp %324 : vector<32x128xi32> to vector<32x128xf32>
    %326 = vector.extract_strided_slice %5 {offsets = [0, 1920], sizes = [32, 128], strides = [1, 1]} : vector<32x2048xf32> to vector<32x128xf32>
    %cst_77 = arith.constant dense<0x7F800000> : vector<32xf32>
    %327 = vector.multi_reduction <minimumf>, %326, %cst_77 [1] : vector<32x128xf32> to vector<32xf32>
    %328 = vector.shape_cast %327 : vector<32xf32> to vector<32x1xf32>
    %329 = vector.broadcast %328 : vector<32x1xf32> to vector<32x128xf32>
    %330 = arith.cmpf oeq, %326, %329 : vector<32x128xf32>
    %c128_i32_78 = arith.constant 128 : i32
    %331 = vector.broadcast %c128_i32_78 : i32 to vector<32x128xi32>
    %332 = arith.select %330, %6, %331 : vector<32x128xi1>, vector<32x128xi32>
    %cst_79 = arith.constant dense<2147483647> : vector<32xi32>
    %333 = vector.multi_reduction <minsi>, %332, %cst_79 [1] : vector<32x128xi32> to vector<32xi32>
    %334 = vector.shape_cast %333 : vector<32xi32> to vector<32x1xi32>
    %c16_i32_80 = arith.constant 16 : i32
    %335 = vector.broadcast %c16_i32_80 : i32 to vector<32x1xi32>
    %336 = arith.muli %10, %335 : vector<32x1xi32>
    %c15_i32 = arith.constant 15 : i32
    %337 = vector.broadcast %c15_i32 : i32 to vector<32x1xi32>
    %338 = arith.addi %336, %337 : vector<32x1xi32>
    %c512_i32_81 = arith.constant 512 : i32
    %339 = vector.broadcast %c512_i32_81 : i32 to vector<32x1xi32>
    %340 = arith.cmpi slt, %338, %339 : vector<32x1xi32>
    %341 = vector.broadcast %334 : vector<32x1xi32> to vector<32x128xi32>
    %342 = arith.cmpi eq, %6, %341 : vector<32x128xi32>
    %343 = vector.broadcast %340 : vector<32x1xi1> to vector<32x128xi1>
    %344 = arith.andi %342, %343 : vector<32x128xi1>
    %345 = arith.extui %344 : vector<32x128xi1> to vector<32x128xi32>
    %346 = arith.sitofp %345 : vector<32x128xi32> to vector<32x128xf32>
    %347 = tpu.concatenate %31, %52, %73, %94, %115, %136, %157, %178, %199, %220, %241, %262, %283, %304, %325, %346 in 1 : vector<32x128xf32>, vector<32x128xf32>, vector<32x128xf32>, vector<32x128xf32>, vector<32x128xf32>, vector<32x128xf32>, vector<32x128xf32>, vector<32x128xf32>, vector<32x128xf32>, vector<32x128xf32>, vector<32x128xf32>, vector<32x128xf32>, vector<32x128xf32>, vector<32x128xf32>, vector<32x128xf32>, vector<32x128xf32> -> vector<32x2048xf32>
    %c0_82 = arith.constant 0 : index
    %c0_83 = arith.constant 0 : index
    %348 = vector.load %arg3[%c0_82, %c0_83] : memref<2048x128xf32, #tpu.memory_space<vmem>>, vector<2048x128xf32>
    %cst_84 = arith.constant dense<0.000000e+00> : vector<32x128xf32>
    %349 = tpu.matmul %347, %348, %cst_84 {dimension_numbers = #tpu.dot_dimension_numbers<[1], [0], [0], [1], [0, 0, 1, 1], [], []>} : vector<32x2048xf32>, vector<2048x128xf32>, vector<32x128xf32> -> vector<32x128xf32>
    %c0_85 = arith.constant 0 : index
    %c0_86 = arith.constant 0 : index
    %350 = vector.load %arg5[%c0_85, %c0_86] : memref<32x128xf32, #tpu.memory_space<vmem>>, vector<32x128xf32>
    tpu.vector_store %arg5[%c0_85, %c0_86], %349 {strides = array<i32>} : memref<32x128xf32, #tpu.memory_space<vmem>>, vector<32x128xf32>,
    %351 = arith.subf %349, %0 : vector<32x128xf32>
    %352 = arith.mulf %351, %351 : vector<32x128xf32>
    %353 = vector.shape_cast %352 : vector<32x128xf32> to vector<1x32x128xf32>
    %cst_87 = arith.constant dense<0.000000e+00> : vector<1xf32>
    %354 = vector.multi_reduction <add>, %353, %cst_87 [1, 2] : vector<1x32x128xf32> to vector<1xf32>
    %355 = vector.shape_cast %354 : vector<1xf32> to vector<1x1x1xf32>
    %356 = vector.extract %355[0, 0, 0] : f32 from vector<1x1x1xf32>
    %357 = vector.broadcast %356 : f32 to vector<1x1x1xf32>
    %c0_88 = arith.constant 0 : index
    %c0_89 = arith.constant 0 : index
    %c0_90 = arith.constant 0 : index
    %358 = vector.load %arg6[%c0_88, %c0_89, %c0_90] : memref<1x1x1xf32, #tpu.memory_space<vmem>>, vector<1x1x1xf32>
    tpu.vector_store %arg6[%c0_88, %c0_89, %c0_90], %357 {strides = array<i32>} : memref<1x1x1xf32, #tpu.memory_space<vmem>>, vector<1x1x1xf32>,
    return
  }
  func.func @transform_0(%arg0: i32) -> (i32, i32) {
    %c0_i32 = arith.constant 0 : i32
    %c0_i32_0 = arith.constant 0 : i32
    return %arg0, %c0_i32 : i32, i32
  }
  func.func @transform_1(%arg0: i32) -> (i32, i32) {
    %c0_i32 = arith.constant 0 : i32
    %c0_i32_0 = arith.constant 0 : i32
    %c0_i32_1 = arith.constant 0 : i32
    return %c0_i32, %c0_i32_0 : i32, i32
  }
  func.func @transform_2(%arg0: i32) -> (i32, i32) {
    %c0_i32 = arith.constant 0 : i32
    %c0_i32_0 = arith.constant 0 : i32
    %c0_i32_1 = arith.constant 0 : i32
    return %c0_i32, %c0_i32_0 : i32, i32
  }
  func.func @transform_3(%arg0: i32) -> (i32, i32) {
    %c0_i32 = arith.constant 0 : i32
    %c0_i32_0 = arith.constant 0 : i32
    %c0_i32_1 = arith.constant 0 : i32
    return %c0_i32, %c0_i32_0 : i32, i32
  }
  func.func @transform_4(%arg0: i32) -> (i32, i32) {
    %c0_i32 = arith.constant 0 : i32
    %c0_i32_0 = arith.constant 0 : i32
    return %arg0, %c0_i32 : i32, i32
  }
  func.func @transform_5(%arg0: i32) -> (i32, i32, i32) {
    %c0_i32 = arith.constant 0 : i32
    %c0_i32_0 = arith.constant 0 : i32
    %c0_i32_1 = arith.constant 0 : i32
    return %arg0, %c0_i32, %c0_i32_0 : i32, i32, i32
  }
}

module attributes {stable_mosaic.version = 11 : i64} {
  func.func @_vq_kernel(%arg0: i32, %arg1: memref<32x128xf32, #tpu.memory_space<vmem>>, %arg2: memref<128x2048xf32, #tpu.memory_space<vmem>>, %arg3: memref<2048x128xf32, #tpu.memory_space<vmem>>, %arg4: memref<1x2048xf32, #tpu.memory_space<vmem>>, %arg5: memref<32x128xf32, #tpu.memory_space<vmem>>, %arg6: memref<1x1x1xf32, #tpu.memory_space<vmem>>) attributes {dimension_semantics = [#tpu.dimension_semantics<parallel>], iteration_bounds = array<i64: 1>, scalar_prefetch = 0 : i64, scratch_operands = 0 : i64, tpu.core_type = #tpu.core_type<tc>, window_params = [{transform_indices = @transform_0, window_bounds = array<i64: 32, 128>}, {pipeline_mode = #tpu.pipeline_mode<synchronous>, transform_indices = @transform_1, window_bounds = array<i64: 128, 2048>}, {pipeline_mode = #tpu.pipeline_mode<synchronous>, transform_indices = @transform_2, window_bounds = array<i64: 2048, 128>}, {pipeline_mode = #tpu.pipeline_mode<synchronous>, transform_indices = @transform_3, window_bounds = array<i64: 1, 2048>}, {transform_indices = @transform_4, window_bounds = array<i64: 32, 128>}, {transform_indices = @transform_5, window_bounds = array<i64: 1, 1, 1>}]} {
    %c0 = arith.constant 0 : index
    %c0_0 = arith.constant 0 : index
    %0 = vector.load %arg1[%c0, %c0_0] : memref<32x128xf32, #tpu.memory_space<vmem>>, vector<32x128xf32>
    %c0_1 = arith.constant 0 : index
    %c0_2 = arith.constant 0 : index
    %1 = vector.load %arg2[%c0_1, %c0_2] : memref<128x2048xf32, #tpu.memory_space<vmem>>, vector<128x2048xf32>
    %cst = arith.constant dense<0.000000e+00> : vector<32x2048xf32>
    %2 = tpu.matmul %0, %1, %cst {dimension_numbers = #tpu.dot_dimension_numbers<[1], [0], [0], [1], [0, 0, 1, 1], [], []>} : vector<32x128xf32>, vector<128x2048xf32>, vector<32x2048xf32> -> vector<32x2048xf32>
    %c0_3 = arith.constant 0 : index
    %c0_4 = arith.constant 0 : index
    %3 = vector.load %arg4[%c0_3, %c0_4] : memref<1x2048xf32, #tpu.memory_space<vmem>>, vector<1x2048xf32>
    %4 = vector.broadcast %3 : vector<1x2048xf32> to vector<32x2048xf32>
    %5 = arith.subf %4, %2 : vector<32x2048xf32>
    %6 = tpu.iota {dimensions = array<i32: 1>} : vector<32x128xi32>
    %c32_i32 = arith.constant 32 : i32
    %7 = arith.muli %arg0, %c32_i32 : i32
    %8 = tpu.iota {dimensions = array<i32: 0>} : vector<32x1xi32>
    %9 = vector.broadcast %7 : i32 to vector<32x1xi32>
    %10 = arith.addi %9, %8 : vector<32x1xi32>
    %11 = vector.extract_strided_slice %5 {offsets = [0, 0], sizes = [32, 128], strides = [1, 1]} : vector<32x2048xf32> to vector<32x128xf32>
    %cst_5 = arith.constant dense<0x7F800000> : vector<32xf32>
    %12 = vector.multi_reduction <minimumf>, %11, %cst_5 [1] : vector<32x128xf32> to vector<32xf32>
    %13 = vector.shape_cast %12 : vector<32xf32> to vector<32x1xf32>
    %14 = vector.broadcast %13 : vector<32x1xf32> to vector<32x128xf32>
    %15 = arith.cmpf oeq, %11, %14 : vector<32x128xf32>
    %c128_i32 = arith.constant 128 : i32
    %16 = vector.broadcast %c128_i32 : i32 to vector<32x128xi32>
    %17 = arith.select %15, %6, %16 : vector<32x128xi1>, vector<32x128xi32>
    %cst_6 = arith.constant dense<2147483647> : vector<32xi32>
    %18 = vector.multi_reduction <minsi>, %17, %cst_6 [1] : vector<32x128xi32> to vector<32xi32>
    %19 = vector.shape_cast %18 : vector<32xi32> to vector<32x1xi32>
    %c16_i32 = arith.constant 16 : i32
    %20 = vector.broadcast %c16_i32 : i32 to vector<32x1xi32>
    %21 = arith.muli %10, %20 : vector<32x1xi32>
    %c0_i32 = arith.constant 0 : i32
    %22 = vector.broadcast %c0_i32 : i32 to vector<32x1xi32>
    %23 = arith.addi %21, %22 : vector<32x1xi32>
    %c512_i32 = arith.constant 512 : i32
    %24 = vector.broadcast %c512_i32 : i32 to vector<32x1xi32>
    %25 = arith.cmpi slt, %23, %24 : vector<32x1xi32>
    %26 = vector.broadcast %19 : vector<32x1xi32> to vector<32x128xi32>
    %27 = arith.cmpi eq, %6, %26 : vector<32x128xi32>
    %28 = vector.broadcast %25 : vector<32x1xi1> to vector<32x128xi1>
    %29 = arith.andi %27, %28 : vector<32x128xi1>
    %30 = arith.extui %29 : vector<32x128xi1> to vector<32x128xi32>
    %31 = arith.sitofp %30 : vector<32x128xi32> to vector<32x128xf32>
    %32 = vector.extract_strided_slice %5 {offsets = [0, 128], sizes = [32, 128], strides = [1, 1]} : vector<32x2048xf32> to vector<32x128xf32>
    %cst_7 = arith.constant dense<0x7F800000> : vector<32xf32>
    %33 = vector.multi_reduction <minimumf>, %32, %cst_7 [1] : vector<32x128xf32> to vector<32xf32>
    %34 = vector.shape_cast %33 : vector<32xf32> to vector<32x1xf32>
    %35 = vector.broadcast %34 : vector<32x1xf32> to vector<32x128xf32>
    %36 = arith.cmpf oeq, %32, %35 : vector<32x128xf32>
    %c128_i32_8 = arith.constant 128 : i32
    %37 = vector.broadcast %c128_i32_8 : i32 to vector<32x128xi32>
    %38 = arith.select %36, %6, %37 : vector<32x128xi1>, vector<32x128xi32>
    %cst_9 = arith.constant dense<2147483647> : vector<32xi32>
    %39 = vector.multi_reduction <minsi>, %38, %cst_9 [1] : vector<32x128xi32> to vector<32xi32>
    %40 = vector.shape_cast %39 : vector<32xi32> to vector<32x1xi32>
    %c16_i32_10 = arith.constant 16 : i32
    %41 = vector.broadcast %c16_i32_10 : i32 to vector<32x1xi32>
    %42 = arith.muli %10, %41 : vector<32x1xi32>
    %c1_i32 = arith.constant 1 : i32
    %43 = vector.broadcast %c1_i32 : i32 to vector<32x1xi32>
    %44 = arith.addi %42, %43 : vector<32x1xi32>
    %c512_i32_11 = arith.constant 512 : i32
    %45 = vector.broadcast %c512_i32_11 : i32 to vector<32x1xi32>
    %46 = arith.cmpi slt, %44, %45 : vector<32x1xi32>
    %47 = vector.broadcast %40 : vector<32x1xi32> to vector<32x128xi32>
    %48 = arith.cmpi eq, %6, %47 : vector<32x128xi32>
    %49 = vector.broadcast %46 : vector<32x1xi1> to vector<32x128xi1>
    %50 = arith.andi %48, %49 : vector<32x128xi1>
    %51 = arith.extui %50 : vector<32x128xi1> to vector<32x128xi32>
    %52 = arith.sitofp %51 : vector<32x128xi32> to vector<32x128xf32>
    %53 = vector.extract_strided_slice %5 {offsets = [0, 256], sizes = [32, 128], strides = [1, 1]} : vector<32x2048xf32> to vector<32x128xf32>
    %cst_12 = arith.constant dense<0x7F800000> : vector<32xf32>
    %54 = vector.multi_reduction <minimumf>, %53, %cst_12 [1] : vector<32x128xf32> to vector<32xf32>
    %55 = vector.shape_cast %54 : vector<32xf32> to vector<32x1xf32>
    %56 = vector.broadcast %55 : vector<32x1xf32> to vector<32x128xf32>
    %57 = arith.cmpf oeq, %53, %56 : vector<32x128xf32>
    %c128_i32_13 = arith.constant 128 : i32
    %58 = vector.broadcast %c128_i32_13 : i32 to vector<32x128xi32>
    %59 = arith.select %57, %6, %58 : vector<32x128xi1>, vector<32x128xi32>
    %cst_14 = arith.constant dense<2147483647> : vector<32xi32>
    %60 = vector.multi_reduction <minsi>, %59, %cst_14 [1] : vector<32x128xi32> to vector<32xi32>
    %61 = vector.shape_cast %60 : vector<32xi32> to vector<32x1xi32>
    %c16_i32_15 = arith.constant 16 : i32
    %62 = vector.broadcast %c16_i32_15 : i32 to vector<32x1xi32>
    %63 = arith.muli %10, %62 : vector<32x1xi32>
    %c2_i32 = arith.constant 2 : i32
    %64 = vector.broadcast %c2_i32 : i32 to vector<32x1xi32>
    %65 = arith.addi %63, %64 : vector<32x1xi32>
    %c512_i32_16 = arith.constant 512 : i32
    %66 = vector.broadcast %c512_i32_16 : i32 to vector<32x1xi32>
    %67 = arith.cmpi slt, %65, %66 : vector<32x1xi32>
    %68 = vector.broadcast %61 : vector<32x1xi32> to vector<32x128xi32>
    %69 = arith.cmpi eq, %6, %68 : vector<32x128xi32>
    %70 = vector.broadcast %67 : vector<32x1xi1> to vector<32x128xi1>
    %71 = arith.andi %69, %70 : vector<32x128xi1>
    %72 = arith.extui %71 : vector<32x128xi1> to vector<32x128xi32>
    %73 = arith.sitofp %72 : vector<32x128xi32> to vector<32x128xf32>
    %74 = vector.extract_strided_slice %5 {offsets = [0, 384], sizes = [32, 128], strides = [1, 1]} : vector<32x2048xf32> to vector<32x128xf32>
    %cst_17 = arith.constant dense<0x7F800000> : vector<32xf32>
    %75 = vector.multi_reduction <minimumf>, %74, %cst_17 [1] : vector<32x128xf32> to vector<32xf32>
    %76 = vector.shape_cast %75 : vector<32xf32> to vector<32x1xf32>
    %77 = vector.broadcast %76 : vector<32x1xf32> to vector<32x128xf32>
    %78 = arith.cmpf oeq, %74, %77 : vector<32x128xf32>
    %c128_i32_18 = arith.constant 128 : i32
    %79 = vector.broadcast %c128_i32_18 : i32 to vector<32x128xi32>
    %80 = arith.select %78, %6, %79 : vector<32x128xi1>, vector<32x128xi32>
    %cst_19 = arith.constant dense<2147483647> : vector<32xi32>
    %81 = vector.multi_reduction <minsi>, %80, %cst_19 [1] : vector<32x128xi32> to vector<32xi32>
    %82 = vector.shape_cast %81 : vector<32xi32> to vector<32x1xi32>
    %c16_i32_20 = arith.constant 16 : i32
    %83 = vector.broadcast %c16_i32_20 : i32 to vector<32x1xi32>
    %84 = arith.muli %10, %83 : vector<32x1xi32>
    %c3_i32 = arith.constant 3 : i32
    %85 = vector.broadcast %c3_i32 : i32 to vector<32x1xi32>
    %86 = arith.addi %84, %85 : vector<32x1xi32>
    %c512_i32_21 = arith.constant 512 : i32
    %87 = vector.broadcast %c512_i32_21 : i32 to vector<32x1xi32>
    %88 = arith.cmpi slt, %86, %87 : vector<32x1xi32>
    %89 = vector.broadcast %82 : vector<32x1xi32> to vector<32x128xi32>
    %90 = arith.cmpi eq, %6, %89 : vector<32x128xi32>
    %91 = vector.broadcast %88 : vector<32x1xi1> to vector<32x128xi1>
    %92 = arith.andi %90, %91 : vector<32x128xi1>
    %93 = arith.extui %92 : vector<32x128xi1> to vector<32x128xi32>
    %94 = arith.sitofp %93 : vector<32x128xi32> to vector<32x128xf32>
    %95 = vector.extract_strided_slice %5 {offsets = [0, 512], sizes = [32, 128], strides = [1, 1]} : vector<32x2048xf32> to vector<32x128xf32>
    %cst_22 = arith.constant dense<0x7F800000> : vector<32xf32>
    %96 = vector.multi_reduction <minimumf>, %95, %cst_22 [1] : vector<32x128xf32> to vector<32xf32>
    %97 = vector.shape_cast %96 : vector<32xf32> to vector<32x1xf32>
    %98 = vector.broadcast %97 : vector<32x1xf32> to vector<32x128xf32>
    %99 = arith.cmpf oeq, %95, %98 : vector<32x128xf32>
    %c128_i32_23 = arith.constant 128 : i32
    %100 = vector.broadcast %c128_i32_23 : i32 to vector<32x128xi32>
    %101 = arith.select %99, %6, %100 : vector<32x128xi1>, vector<32x128xi32>
    %cst_24 = arith.constant dense<2147483647> : vector<32xi32>
    %102 = vector.multi_reduction <minsi>, %101, %cst_24 [1] : vector<32x128xi32> to vector<32xi32>
    %103 = vector.shape_cast %102 : vector<32xi32> to vector<32x1xi32>
    %c16_i32_25 = arith.constant 16 : i32
    %104 = vector.broadcast %c16_i32_25 : i32 to vector<32x1xi32>
    %105 = arith.muli %10, %104 : vector<32x1xi32>
    %c4_i32 = arith.constant 4 : i32
    %106 = vector.broadcast %c4_i32 : i32 to vector<32x1xi32>
    %107 = arith.addi %105, %106 : vector<32x1xi32>
    %c512_i32_26 = arith.constant 512 : i32
    %108 = vector.broadcast %c512_i32_26 : i32 to vector<32x1xi32>
    %109 = arith.cmpi slt, %107, %108 : vector<32x1xi32>
    %110 = vector.broadcast %103 : vector<32x1xi32> to vector<32x128xi32>
    %111 = arith.cmpi eq, %6, %110 : vector<32x128xi32>
    %112 = vector.broadcast %109 : vector<32x1xi1> to vector<32x128xi1>
    %113 = arith.andi %111, %112 : vector<32x128xi1>
    %114 = arith.extui %113 : vector<32x128xi1> to vector<32x128xi32>
    %115 = arith.sitofp %114 : vector<32x128xi32> to vector<32x128xf32>
    %116 = vector.extract_strided_slice %5 {offsets = [0, 640], sizes = [32, 128], strides = [1, 1]} : vector<32x2048xf32> to vector<32x128xf32>
    %cst_27 = arith.constant dense<0x7F800000> : vector<32xf32>
    %117 = vector.multi_reduction <minimumf>, %116, %cst_27 [1] : vector<32x128xf32> to vector<32xf32>
    %118 = vector.shape_cast %117 : vector<32xf32> to vector<32x1xf32>
    %119 = vector.broadcast %118 : vector<32x1xf32> to vector<32x128xf32>
    %120 = arith.cmpf oeq, %116, %119 : vector<32x128xf32>
    %c128_i32_28 = arith.constant 128 : i32
    %121 = vector.broadcast %c128_i32_28 : i32 to vector<32x128xi32>
    %122 = arith.select %120, %6, %121 : vector<32x128xi1>, vector<32x128xi32>
    %cst_29 = arith.constant dense<2147483647> : vector<32xi32>
    %123 = vector.multi_reduction <minsi>, %122, %cst_29 [1] : vector<32x128xi32> to vector<32xi32>
    %124 = vector.shape_cast %123 : vector<32xi32> to vector<32x1xi32>
    %c16_i32_30 = arith.constant 16 : i32
    %125 = vector.broadcast %c16_i32_30 : i32 to vector<32x1xi32>
    %126 = arith.muli %10, %125 : vector<32x1xi32>
    %c5_i32 = arith.constant 5 : i32
    %127 = vector.broadcast %c5_i32 : i32 to vector<32x1xi32>
    %128 = arith.addi %126, %127 : vector<32x1xi32>
    %c512_i32_31 = arith.constant 512 : i32
    %129 = vector.broadcast %c512_i32_31 : i32 to vector<32x1xi32>
    %130 = arith.cmpi slt, %128, %129 : vector<32x1xi32>
    %131 = vector.broadcast %124 : vector<32x1xi32> to vector<32x128xi32>
    %132 = arith.cmpi eq, %6, %131 : vector<32x128xi32>
    %133 = vector.broadcast %130 : vector<32x1xi1> to vector<32x128xi1>
    %134 = arith.andi %132, %133 : vector<32x128xi1>
    %135 = arith.extui %134 : vector<32x128xi1> to vector<32x128xi32>
    %136 = arith.sitofp %135 : vector<32x128xi32> to vector<32x128xf32>
    %137 = vector.extract_strided_slice %5 {offsets = [0, 768], sizes = [32, 128], strides = [1, 1]} : vector<32x2048xf32> to vector<32x128xf32>
    %cst_32 = arith.constant dense<0x7F800000> : vector<32xf32>
    %138 = vector.multi_reduction <minimumf>, %137, %cst_32 [1] : vector<32x128xf32> to vector<32xf32>
    %139 = vector.shape_cast %138 : vector<32xf32> to vector<32x1xf32>
    %140 = vector.broadcast %139 : vector<32x1xf32> to vector<32x128xf32>
    %141 = arith.cmpf oeq, %137, %140 : vector<32x128xf32>
    %c128_i32_33 = arith.constant 128 : i32
    %142 = vector.broadcast %c128_i32_33 : i32 to vector<32x128xi32>
    %143 = arith.select %141, %6, %142 : vector<32x128xi1>, vector<32x128xi32>
    %cst_34 = arith.constant dense<2147483647> : vector<32xi32>
    %144 = vector.multi_reduction <minsi>, %143, %cst_34 [1] : vector<32x128xi32> to vector<32xi32>
    %145 = vector.shape_cast %144 : vector<32xi32> to vector<32x1xi32>
    %c16_i32_35 = arith.constant 16 : i32
    %146 = vector.broadcast %c16_i32_35 : i32 to vector<32x1xi32>
    %147 = arith.muli %10, %146 : vector<32x1xi32>
    %c6_i32 = arith.constant 6 : i32
    %148 = vector.broadcast %c6_i32 : i32 to vector<32x1xi32>
    %149 = arith.addi %147, %148 : vector<32x1xi32>
    %c512_i32_36 = arith.constant 512 : i32
    %150 = vector.broadcast %c512_i32_36 : i32 to vector<32x1xi32>
    %151 = arith.cmpi slt, %149, %150 : vector<32x1xi32>
    %152 = vector.broadcast %145 : vector<32x1xi32> to vector<32x128xi32>
    %153 = arith.cmpi eq, %6, %152 : vector<32x128xi32>
    %154 = vector.broadcast %151 : vector<32x1xi1> to vector<32x128xi1>
    %155 = arith.andi %153, %154 : vector<32x128xi1>
    %156 = arith.extui %155 : vector<32x128xi1> to vector<32x128xi32>
    %157 = arith.sitofp %156 : vector<32x128xi32> to vector<32x128xf32>
    %158 = vector.extract_strided_slice %5 {offsets = [0, 896], sizes = [32, 128], strides = [1, 1]} : vector<32x2048xf32> to vector<32x128xf32>
    %cst_37 = arith.constant dense<0x7F800000> : vector<32xf32>
    %159 = vector.multi_reduction <minimumf>, %158, %cst_37 [1] : vector<32x128xf32> to vector<32xf32>
    %160 = vector.shape_cast %159 : vector<32xf32> to vector<32x1xf32>
    %161 = vector.broadcast %160 : vector<32x1xf32> to vector<32x128xf32>
    %162 = arith.cmpf oeq, %158, %161 : vector<32x128xf32>
    %c128_i32_38 = arith.constant 128 : i32
    %163 = vector.broadcast %c128_i32_38 : i32 to vector<32x128xi32>
    %164 = arith.select %162, %6, %163 : vector<32x128xi1>, vector<32x128xi32>
    %cst_39 = arith.constant dense<2147483647> : vector<32xi32>
    %165 = vector.multi_reduction <minsi>, %164, %cst_39 [1] : vector<32x128xi32> to vector<32xi32>
    %166 = vector.shape_cast %165 : vector<32xi32> to vector<32x1xi32>
    %c16_i32_40 = arith.constant 16 : i32
    %167 = vector.broadcast %c16_i32_40 : i32 to vector<32x1xi32>
    %168 = arith.muli %10, %167 : vector<32x1xi32>
    %c7_i32 = arith.constant 7 : i32
    %169 = vector.broadcast %c7_i32 : i32 to vector<32x1xi32>
    %170 = arith.addi %168, %169 : vector<32x1xi32>
    %c512_i32_41 = arith.constant 512 : i32
    %171 = vector.broadcast %c512_i32_41 : i32 to vector<32x1xi32>
    %172 = arith.cmpi slt, %170, %171 : vector<32x1xi32>
    %173 = vector.broadcast %166 : vector<32x1xi32> to vector<32x128xi32>
    %174 = arith.cmpi eq, %6, %173 : vector<32x128xi32>
    %175 = vector.broadcast %172 : vector<32x1xi1> to vector<32x128xi1>
    %176 = arith.andi %174, %175 : vector<32x128xi1>
    %177 = arith.extui %176 : vector<32x128xi1> to vector<32x128xi32>
    %178 = arith.sitofp %177 : vector<32x128xi32> to vector<32x128xf32>
    %179 = vector.extract_strided_slice %5 {offsets = [0, 1024], sizes = [32, 128], strides = [1, 1]} : vector<32x2048xf32> to vector<32x128xf32>
    %cst_42 = arith.constant dense<0x7F800000> : vector<32xf32>
    %180 = vector.multi_reduction <minimumf>, %179, %cst_42 [1] : vector<32x128xf32> to vector<32xf32>
    %181 = vector.shape_cast %180 : vector<32xf32> to vector<32x1xf32>
    %182 = vector.broadcast %181 : vector<32x1xf32> to vector<32x128xf32>
    %183 = arith.cmpf oeq, %179, %182 : vector<32x128xf32>
    %c128_i32_43 = arith.constant 128 : i32
    %184 = vector.broadcast %c128_i32_43 : i32 to vector<32x128xi32>
    %185 = arith.select %183, %6, %184 : vector<32x128xi1>, vector<32x128xi32>
    %cst_44 = arith.constant dense<2147483647> : vector<32xi32>
    %186 = vector.multi_reduction <minsi>, %185, %cst_44 [1] : vector<32x128xi32> to vector<32xi32>
    %187 = vector.shape_cast %186 : vector<32xi32> to vector<32x1xi32>
    %c16_i32_45 = arith.constant 16 : i32
    %188 = vector.broadcast %c16_i32_45 : i32 to vector<32x1xi32>
    %189 = arith.muli %10, %188 : vector<32x1xi32>
    %c8_i32 = arith.constant 8 : i32
    %190 = vector.broadcast %c8_i32 : i32 to vector<32x1xi32>
    %191 = arith.addi %189, %190 : vector<32x1xi32>
    %c512_i32_46 = arith.constant 512 : i32
    %192 = vector.broadcast %c512_i32_46 : i32 to vector<32x1xi32>
    %193 = arith.cmpi slt, %191, %192 : vector<32x1xi32>
    %194 = vector.broadcast %187 : vector<32x1xi32> to vector<32x128xi32>
    %195 = arith.cmpi eq, %6, %194 : vector<32x128xi32>
    %196 = vector.broadcast %193 : vector<32x1xi1> to vector<32x128xi1>
    %197 = arith.andi %195, %196 : vector<32x128xi1>
    %198 = arith.extui %197 : vector<32x128xi1> to vector<32x128xi32>
    %199 = arith.sitofp %198 : vector<32x128xi32> to vector<32x128xf32>
    %200 = vector.extract_strided_slice %5 {offsets = [0, 1152], sizes = [32, 128], strides = [1, 1]} : vector<32x2048xf32> to vector<32x128xf32>
    %cst_47 = arith.constant dense<0x7F800000> : vector<32xf32>
    %201 = vector.multi_reduction <minimumf>, %200, %cst_47 [1] : vector<32x128xf32> to vector<32xf32>
    %202 = vector.shape_cast %201 : vector<32xf32> to vector<32x1xf32>
    %203 = vector.broadcast %202 : vector<32x1xf32> to vector<32x128xf32>
    %204 = arith.cmpf oeq, %200, %203 : vector<32x128xf32>
    %c128_i32_48 = arith.constant 128 : i32
    %205 = vector.broadcast %c128_i32_48 : i32 to vector<32x128xi32>
    %206 = arith.select %204, %6, %205 : vector<32x128xi1>, vector<32x128xi32>
    %cst_49 = arith.constant dense<2147483647> : vector<32xi32>
    %207 = vector.multi_reduction <minsi>, %206, %cst_49 [1] : vector<32x128xi32> to vector<32xi32>
    %208 = vector.shape_cast %207 : vector<32xi32> to vector<32x1xi32>
    %c16_i32_50 = arith.constant 16 : i32
    %209 = vector.broadcast %c16_i32_50 : i32 to vector<32x1xi32>
    %210 = arith.muli %10, %209 : vector<32x1xi32>
    %c9_i32 = arith.constant 9 : i32
    %211 = vector.broadcast %c9_i32 : i32 to vector<32x1xi32>
    %212 = arith.addi %210, %211 : vector<32x1xi32>
    %c512_i32_51 = arith.constant 512 : i32
    %213 = vector.broadcast %c512_i32_51 : i32 to vector<32x1xi32>
    %214 = arith.cmpi slt, %212, %213 : vector<32x1xi32>
    %215 = vector.broadcast %208 : vector<32x1xi32> to vector<32x128xi32>
    %216 = arith.cmpi eq, %6, %215 : vector<32x128xi32>
    %217 = vector.broadcast %214 : vector<32x1xi1> to vector<32x128xi1>
    %218 = arith.andi %216, %217 : vector<32x128xi1>
    %219 = arith.extui %218 : vector<32x128xi1> to vector<32x128xi32>
    %220 = arith.sitofp %219 : vector<32x128xi32> to vector<32x128xf32>
    %221 = vector.extract_strided_slice %5 {offsets = [0, 1280], sizes = [32, 128], strides = [1, 1]} : vector<32x2048xf32> to vector<32x128xf32>
    %cst_52 = arith.constant dense<0x7F800000> : vector<32xf32>
    %222 = vector.multi_reduction <minimumf>, %221, %cst_52 [1] : vector<32x128xf32> to vector<32xf32>
    %223 = vector.shape_cast %222 : vector<32xf32> to vector<32x1xf32>
    %224 = vector.broadcast %223 : vector<32x1xf32> to vector<32x128xf32>
    %225 = arith.cmpf oeq, %221, %224 : vector<32x128xf32>
    %c128_i32_53 = arith.constant 128 : i32
    %226 = vector.broadcast %c128_i32_53 : i32 to vector<32x128xi32>
    %227 = arith.select %225, %6, %226 : vector<32x128xi1>, vector<32x128xi32>
    %cst_54 = arith.constant dense<2147483647> : vector<32xi32>
    %228 = vector.multi_reduction <minsi>, %227, %cst_54 [1] : vector<32x128xi32> to vector<32xi32>
    %229 = vector.shape_cast %228 : vector<32xi32> to vector<32x1xi32>
    %c16_i32_55 = arith.constant 16 : i32
    %230 = vector.broadcast %c16_i32_55 : i32 to vector<32x1xi32>
    %231 = arith.muli %10, %230 : vector<32x1xi32>
    %c10_i32 = arith.constant 10 : i32
    %232 = vector.broadcast %c10_i32 : i32 to vector<32x1xi32>
    %233 = arith.addi %231, %232 : vector<32x1xi32>
    %c512_i32_56 = arith.constant 512 : i32
    %234 = vector.broadcast %c512_i32_56 : i32 to vector<32x1xi32>
    %235 = arith.cmpi slt, %233, %234 : vector<32x1xi32>
    %236 = vector.broadcast %229 : vector<32x1xi32> to vector<32x128xi32>
    %237 = arith.cmpi eq, %6, %236 : vector<32x128xi32>
    %238 = vector.broadcast %235 : vector<32x1xi1> to vector<32x128xi1>
    %239 = arith.andi %237, %238 : vector<32x128xi1>
    %240 = arith.extui %239 : vector<32x128xi1> to vector<32x128xi32>
    %241 = arith.sitofp %240 : vector<32x128xi32> to vector<32x128xf32>
    %242 = vector.extract_strided_slice %5 {offsets = [0, 1408], sizes = [32, 128], strides = [1, 1]} : vector<32x2048xf32> to vector<32x128xf32>
    %cst_57 = arith.constant dense<0x7F800000> : vector<32xf32>
    %243 = vector.multi_reduction <minimumf>, %242, %cst_57 [1] : vector<32x128xf32> to vector<32xf32>
    %244 = vector.shape_cast %243 : vector<32xf32> to vector<32x1xf32>
    %245 = vector.broadcast %244 : vector<32x1xf32> to vector<32x128xf32>
    %246 = arith.cmpf oeq, %242, %245 : vector<32x128xf32>
    %c128_i32_58 = arith.constant 128 : i32
    %247 = vector.broadcast %c128_i32_58 : i32 to vector<32x128xi32>
    %248 = arith.select %246, %6, %247 : vector<32x128xi1>, vector<32x128xi32>
    %cst_59 = arith.constant dense<2147483647> : vector<32xi32>
    %249 = vector.multi_reduction <minsi>, %248, %cst_59 [1] : vector<32x128xi32> to vector<32xi32>
    %250 = vector.shape_cast %249 : vector<32xi32> to vector<32x1xi32>
    %c16_i32_60 = arith.constant 16 : i32
    %251 = vector.broadcast %c16_i32_60 : i32 to vector<32x1xi32>
    %252 = arith.muli %10, %251 : vector<32x1xi32>
    %c11_i32 = arith.constant 11 : i32
    %253 = vector.broadcast %c11_i32 : i32 to vector<32x1xi32>
    %254 = arith.addi %252, %253 : vector<32x1xi32>
    %c512_i32_61 = arith.constant 512 : i32
    %255 = vector.broadcast %c512_i32_61 : i32 to vector<32x1xi32>
    %256 = arith.cmpi slt, %254, %255 : vector<32x1xi32>
    %257 = vector.broadcast %250 : vector<32x1xi32> to vector<32x128xi32>
    %258 = arith.cmpi eq, %6, %257 : vector<32x128xi32>
    %259 = vector.broadcast %256 : vector<32x1xi1> to vector<32x128xi1>
    %260 = arith.andi %258, %259 : vector<32x128xi1>
    %261 = arith.extui %260 : vector<32x128xi1> to vector<32x128xi32>
    %262 = arith.sitofp %261 : vector<32x128xi32> to vector<32x128xf32>
    %263 = vector.extract_strided_slice %5 {offsets = [0, 1536], sizes = [32, 128], strides = [1, 1]} : vector<32x2048xf32> to vector<32x128xf32>
    %cst_62 = arith.constant dense<0x7F800000> : vector<32xf32>
    %264 = vector.multi_reduction <minimumf>, %263, %cst_62 [1] : vector<32x128xf32> to vector<32xf32>
    %265 = vector.shape_cast %264 : vector<32xf32> to vector<32x1xf32>
    %266 = vector.broadcast %265 : vector<32x1xf32> to vector<32x128xf32>
    %267 = arith.cmpf oeq, %263, %266 : vector<32x128xf32>
    %c128_i32_63 = arith.constant 128 : i32
    %268 = vector.broadcast %c128_i32_63 : i32 to vector<32x128xi32>
    %269 = arith.select %267, %6, %268 : vector<32x128xi1>, vector<32x128xi32>
    %cst_64 = arith.constant dense<2147483647> : vector<32xi32>
    %270 = vector.multi_reduction <minsi>, %269, %cst_64 [1] : vector<32x128xi32> to vector<32xi32>
    %271 = vector.shape_cast %270 : vector<32xi32> to vector<32x1xi32>
    %c16_i32_65 = arith.constant 16 : i32
    %272 = vector.broadcast %c16_i32_65 : i32 to vector<32x1xi32>
    %273 = arith.muli %10, %272 : vector<32x1xi32>
    %c12_i32 = arith.constant 12 : i32
    %274 = vector.broadcast %c12_i32 : i32 to vector<32x1xi32>
    %275 = arith.addi %273, %274 : vector<32x1xi32>
    %c512_i32_66 = arith.constant 512 : i32
    %276 = vector.broadcast %c512_i32_66 : i32 to vector<32x1xi32>
    %277 = arith.cmpi slt, %275, %276 : vector<32x1xi32>
    %278 = vector.broadcast %271 : vector<32x1xi32> to vector<32x128xi32>
    %279 = arith.cmpi eq, %6, %278 : vector<32x128xi32>
    %280 = vector.broadcast %277 : vector<32x1xi1> to vector<32x128xi1>
    %281 = arith.andi %279, %280 : vector<32x128xi1>
    %282 = arith.extui %281 : vector<32x128xi1> to vector<32x128xi32>
    %283 = arith.sitofp %282 : vector<32x128xi32> to vector<32x128xf32>
    %284 = vector.extract_strided_slice %5 {offsets = [0, 1664], sizes = [32, 128], strides = [1, 1]} : vector<32x2048xf32> to vector<32x128xf32>
    %cst_67 = arith.constant dense<0x7F800000> : vector<32xf32>
    %285 = vector.multi_reduction <minimumf>, %284, %cst_67 [1] : vector<32x128xf32> to vector<32xf32>
    %286 = vector.shape_cast %285 : vector<32xf32> to vector<32x1xf32>
    %287 = vector.broadcast %286 : vector<32x1xf32> to vector<32x128xf32>
    %288 = arith.cmpf oeq, %284, %287 : vector<32x128xf32>
    %c128_i32_68 = arith.constant 128 : i32
    %289 = vector.broadcast %c128_i32_68 : i32 to vector<32x128xi32>
    %290 = arith.select %288, %6, %289 : vector<32x128xi1>, vector<32x128xi32>
    %cst_69 = arith.constant dense<2147483647> : vector<32xi32>
    %291 = vector.multi_reduction <minsi>, %290, %cst_69 [1] : vector<32x128xi32> to vector<32xi32>
    %292 = vector.shape_cast %291 : vector<32xi32> to vector<32x1xi32>
    %c16_i32_70 = arith.constant 16 : i32
    %293 = vector.broadcast %c16_i32_70 : i32 to vector<32x1xi32>
    %294 = arith.muli %10, %293 : vector<32x1xi32>
    %c13_i32 = arith.constant 13 : i32
    %295 = vector.broadcast %c13_i32 : i32 to vector<32x1xi32>
    %296 = arith.addi %294, %295 : vector<32x1xi32>
    %c512_i32_71 = arith.constant 512 : i32
    %297 = vector.broadcast %c512_i32_71 : i32 to vector<32x1xi32>
    %298 = arith.cmpi slt, %296, %297 : vector<32x1xi32>
    %299 = vector.broadcast %292 : vector<32x1xi32> to vector<32x128xi32>
    %300 = arith.cmpi eq, %6, %299 : vector<32x128xi32>
    %301 = vector.broadcast %298 : vector<32x1xi1> to vector<32x128xi1>
    %302 = arith.andi %300, %301 : vector<32x128xi1>
    %303 = arith.extui %302 : vector<32x128xi1> to vector<32x128xi32>
    %304 = arith.sitofp %303 : vector<32x128xi32> to vector<32x128xf32>
    %305 = vector.extract_strided_slice %5 {offsets = [0, 1792], sizes = [32, 128], strides = [1, 1]} : vector<32x2048xf32> to vector<32x128xf32>
    %cst_72 = arith.constant dense<0x7F800000> : vector<32xf32>
    %306 = vector.multi_reduction <minimumf>, %305, %cst_72 [1] : vector<32x128xf32> to vector<32xf32>
    %307 = vector.shape_cast %306 : vector<32xf32> to vector<32x1xf32>
    %308 = vector.broadcast %307 : vector<32x1xf32> to vector<32x128xf32>
    %309 = arith.cmpf oeq, %305, %308 : vector<32x128xf32>
    %c128_i32_73 = arith.constant 128 : i32
    %310 = vector.broadcast %c128_i32_73 : i32 to vector<32x128xi32>
    %311 = arith.select %309, %6, %310 : vector<32x128xi1>, vector<32x128xi32>
    %cst_74 = arith.constant dense<2147483647> : vector<32xi32>
    %312 = vector.multi_reduction <minsi>, %311, %cst_74 [1] : vector<32x128xi32> to vector<32xi32>
    %313 = vector.shape_cast %312 : vector<32xi32> to vector<32x1xi32>
    %c16_i32_75 = arith.constant 16 : i32
    %314 = vector.broadcast %c16_i32_75 : i32 to vector<32x1xi32>
    %315 = arith.muli %10, %314 : vector<32x1xi32>
    %c14_i32 = arith.constant 14 : i32
    %316 = vector.broadcast %c14_i32 : i32 to vector<32x1xi32>
    %317 = arith.addi %315, %316 : vector<32x1xi32>
    %c512_i32_76 = arith.constant 512 : i32
    %318 = vector.broadcast %c512_i32_76 : i32 to vector<32x1xi32>
    %319 = arith.cmpi slt, %317, %318 : vector<32x1xi32>
    %320 = vector.broadcast %313 : vector<32x1xi32> to vector<32x128xi32>
    %321 = arith.cmpi eq, %6, %320 : vector<32x128xi32>
    %322 = vector.broadcast %319 : vector<32x1xi1> to vector<32x128xi1>
    %323 = arith.andi %321, %322 : vector<32x128xi1>
    %324 = arith.extui %323 : vector<32x128xi1> to vector<32x128xi32>
    %325 = arith.sitofp %324 : vector<32x128xi32> to vector<32x128xf32>
    %326 = vector.extract_strided_slice %5 {offsets = [0, 1920], sizes = [32, 128], strides = [1, 1]} : vector<32x2048xf32> to vector<32x128xf32>
    %cst_77 = arith.constant dense<0x7F800000> : vector<32xf32>
    %327 = vector.multi_reduction <minimumf>, %326, %cst_77 [1] : vector<32x128xf32> to vector<32xf32>
    %328 = vector.shape_cast %327 : vector<32xf32> to vector<32x1xf32>
    %329 = vector.broadcast %328 : vector<32x1xf32> to vector<32x128xf32>
    %330 = arith.cmpf oeq, %326, %329 : vector<32x128xf32>
    %c128_i32_78 = arith.constant 128 : i32
    %331 = vector.broadcast %c128_i32_78 : i32 to vector<32x128xi32>
    %332 = arith.select %330, %6, %331 : vector<32x128xi1>, vector<32x128xi32>
    %cst_79 = arith.constant dense<2147483647> : vector<32xi32>
    %333 = vector.multi_reduction <minsi>, %332, %cst_79 [1] : vector<32x128xi32> to vector<32xi32>
    %334 = vector.shape_cast %333 : vector<32xi32> to vector<32x1xi32>
    %c16_i32_80 = arith.constant 16 : i32
    %335 = vector.broadcast %c16_i32_80 : i32 to vector<32x1xi32>
    %336 = arith.muli %10, %335 : vector<32x1xi32>
    %c15_i32 = arith.constant 15 : i32
    %337 = vector.broadcast %c15_i32 : i32 to vector<32x1xi32>
    %338 = arith.addi %336, %337 : vector<32x1xi32>
    %c512_i32_81 = arith.constant 512 : i32
    %339 = vector.broadcast %c512_i32_81 : i32 to vector<32x1xi32>
    %340 = arith.cmpi slt, %338, %339 : vector<32x1xi32>
    %341 = vector.broadcast %334 : vector<32x1xi32> to vector<32x128xi32>
    %342 = arith.cmpi eq, %6, %341 : vector<32x128xi32>
    %343 = vector.broadcast %340 : vector<32x1xi1> to vector<32x128xi1>
    %344 = arith.andi %342, %343 : vector<32x128xi1>
    %345 = arith.extui %344 : vector<32x128xi1> to vector<32x128xi32>
    %346 = arith.sitofp %345 : vector<32x128xi32> to vector<32x128xf32>
    %347 = tpu.concatenate %31, %52, %73, %94, %115, %136, %157, %178, %199, %220, %241, %262, %283, %304, %325, %346 in 1 : vector<32x128xf32>, vector<32x128xf32>, vector<32x128xf32>, vector<32x128xf32>, vector<32x128xf32>, vector<32x128xf32>, vector<32x128xf32>, vector<32x128xf32>, vector<32x128xf32>, vector<32x128xf32>, vector<32x128xf32>, vector<32x128xf32>, vector<32x128xf32>, vector<32x128xf32>, vector<32x128xf32>, vector<32x128xf32> -> vector<32x2048xf32>
    %c0_82 = arith.constant 0 : index
    %c0_83 = arith.constant 0 : index
    %348 = vector.load %arg3[%c0_82, %c0_83] : memref<2048x128xf32, #tpu.memory_space<vmem>>, vector<2048x128xf32>
    %cst_84 = arith.constant dense<0.000000e+00> : vector<32x128xf32>
    %349 = tpu.matmul %347, %348, %cst_84 {dimension_numbers = #tpu.dot_dimension_numbers<[1], [0], [0], [1], [0, 0, 1, 1], [], []>} : vector<32x2048xf32>, vector<2048x128xf32>, vector<32x128xf32> -> vector<32x128xf32>
    %c0_85 = arith.constant 0 : index
    %c0_86 = arith.constant 0 : index
    %350 = vector.load %arg5[%c0_85, %c0_86] : memref<32x128xf32, #tpu.memory_space<vmem>>, vector<32x128xf32>
    tpu.vector_store %arg5[%c0_85, %c0_86], %349 {strides = array<i32>} : memref<32x128xf32, #tpu.memory_space<vmem>>, vector<32x128xf32>,
    %351 = arith.subf %349, %0 : vector<32x128xf32>
    %352 = arith.mulf %351, %351 : vector<32x128xf32>
    %353 = vector.shape_cast %352 : vector<32x128xf32> to vector<1x32x128xf32>
    %cst_87 = arith.constant dense<0.000000e+00> : vector<1xf32>
    %354 = vector.multi_reduction <add>, %353, %cst_87 [1, 2] : vector<1x32x128xf32> to vector<1xf32>
    %355 = vector.shape_cast %354 : vector<1xf32> to vector<1x1x1xf32>
    %356 = vector.extract %355[0, 0, 0] : f32 from vector<1x1x1xf32>
    %357 = vector.broadcast %356 : f32 to vector<1x1x1xf32>
    %c0_88 = arith.constant 0 : index
    %c0_89 = arith.constant 0 : index
    %c0_90 = arith.constant 0 : index
    %358 = vector.load %arg6[%c0_88, %c0_89, %c0_90] : memref<1x1x1xf32, #tpu.memory_space<vmem>>, vector<1x1x1xf32>
    tpu.vector_store %arg6[%c0_88, %c0_89, %c0_90], %357 {strides = array<i32>} : memref<1x1x1xf32, #tpu.memory_space<vmem>>, vector<1x1x1xf32>,
    return
  }
  func.func @transform_0(%arg0: i32) -> (i32, i32) {
    %c0_i32 = arith.constant 0 : i32
    %c0_i32_0 = arith.constant 0 : i32
    return %arg0, %c0_i32 : i32, i32
  }
  func.func @transform_1(%arg0: i32) -> (i32, i32) {
    %c0_i32 = arith.constant 0 : i32
    %c0_i32_0 = arith.constant 0 : i32
    %c0_i32_1 = arith.constant 0 : i32
    return %c0_i32, %c0_i32_0 : i32, i32
  }
  func.func @transform_2(%arg0: i32) -> (i32, i32) {
    %c0_i32 = arith.constant 0 : i32
    %c0_i32_0 = arith.constant 0 : i32
    %c0_i32_1 = arith.constant 0 : i32
    return %c0_i32, %c0_i32_0 : i32, i32
  }
  func.func @transform_3(%arg0: i32) -> (i32, i32) {
    %c0_i32 = arith.constant 0 : i32
    %c0_i32_0 = arith.constant 0 : i32
    %c0_i32_1 = arith.constant 0 : i32
    return %c0_i32, %c0_i32_0 : i32, i32
  }
  func.func @transform_4(%arg0: i32) -> (i32, i32) {
    %c0_i32 = arith.constant 0 : i32
    %c0_i32_0 = arith.constant 0 : i32
    return %arg0, %c0_i32 : i32, i32
  }
  func.func @transform_5(%arg0: i32) -> (i32, i32, i32) {
    %c0_i32 = arith.constant 0 : i32
    %c0_i32_0 = arith.constant 0 : i32
    %c0_i32_1 = arith.constant 0 : i32
    return %arg0, %c0_i32, %c0_i32_0 : i32, i32, i32
  }
}

</mosaic_0001>

<bundles_post_ra>
// kernel: tpu_custom_call.1
= control target key start
LH: loop header
LB: loop body
LE: loop exit
PB: predicated region body
PF: predicated region fallthrough
CT: control target
= control target key end

     0   :  { %11 = vsyncpa [#allocation3], 0  ;;  %s6424_s0 = inlined_call_operand.hbm [shape: f32[32,128], index: 0, kind: input, shape index: {}]   ;;  %s6425_s1 = inlined_call_operand.hbm [shape: f32[128,2048], index: 1, kind: input, shape index: {}]   ;;  %s6426_s2 = inlined_call_operand.hbm [shape: f32[2048,128], index: 2, kind: input, shape index: {}]   ;;  %s6427_s3 = inlined_call_operand.hbm [shape: f32[1,2048], index: 3, kind: input, shape index: {}]   ;;  %s6428_s4 = inlined_call_operand.hbm [shape: f32[32,128], index: 4, kind: output, shape index: {0}]   ;;  %s6429_s5 = inlined_call_operand.hbm [shape: f32[1,1,1], index: 5, kind: output, shape index: {1}]  }
   0x1   :  { %12 = vsyncpa [#allocation6], 0 }
   0x2   :  { %13 = vsyncpa [#allocation9], 0 }
   0x3   :  { %14 = vsyncpa [#allocation4], 0 }
   0x4   :  { %15 = vsyncpa [#allocation12], 0  ;;  %s4494_s18 = smov [#allocation5]  }
   0x5   :  { %s33_s19 = sshll.u32 %s4494_s18, 4  ;;  %s34_s19 = int_to_ptr.vmem [resolvable:$true] %s33_s19 }
   0x6   :  { %s4372_s20 = scalar_lea.vmem %s34_s19, 32768  ;;  %p4377_p1 = scmp.lt.s32.totalorder %s34_s19, %s34_s19 }
   0x7   :  { %p4373_p0 = scmp.ne.s32.totalorder %s34_s19, %s4372_s20  ;;  %p4378_p2 = scmp.lt.s32.totalorder %s4372_s20, %s4372_s20 }
   0x9   :  { %p4379_p3 = por %p4378_p2, %p4377_p1 }
   0xb   :  { %p4380_p4 = pnand %p4379_p3, %p4373_p0 }
   0xd   :  { %4383 = shalt.err (!%p4380_p4)
}
   0xe   :  { %s4495_s21 = smov 2048   ;;  %s4496_s22 = smov 128  }
   0xf   :  { %39 = dma.hbm_to_vmem [thread:$0]  %s6425_s1, 32768, %s34_s19, [#allocation6], %s4495_s21, %s4495_s21, %s4496_s22  }
  0x10   :  { %s4497_s25 = smov [#allocation2]  }
  0x11   :  { %s21_s26 = sshll.u32 %s4497_s25, 4  ;;  %s22_s26 = int_to_ptr.vmem [resolvable:$true] %s21_s26 }
  0x12   :  { %s4392_s27 = scalar_lea.vmem %s22_s26, 512  ;;  %p4397_p6 = scmp.lt.s32.totalorder %s22_s26, %s22_s26 }
  0x13   :  { %p4393_p5 = scmp.ne.s32.totalorder %s22_s26, %s4392_s27  ;;  %p4398_p7 = scmp.lt.s32.totalorder %s4392_s27, %s4392_s27 }
  0x15   :  { %p4399_p8 = por %p4398_p7, %p4397_p6 }
  0x17   :  { %p4400_p9 = pnand %p4399_p8, %p4393_p5 }
  0x19   :  { %4403 = shalt.err (!%p4400_p9)
}
  0x1a   :  { %s4498_s28 = smov 8   ;;  %s4499_s6 = smov [#allocation7]  }
  0x1b   :  { %27 = dma.hbm_to_vmem [thread:$0]  %s6424_s0, 512, %s22_s26, [#allocation3], %s4496_s22, %s4496_s22, %s4498_s28  }
  0x1c   :  { %s45_s1 = sshll.u32 %s4499_s6, 4  ;;  %s4500_s7 = smov [#allocation8]   ;;  %s46_s1 = int_to_ptr.vmem [resolvable:$true] %s45_s1 }
  0x1d   :  { %s58_s8 = sshll.u32 %s4500_s7, 4  ;;  %s4412_s9 = scalar_lea.vmem %s46_s1, 32768  ;;  %s59_s8 = int_to_ptr.vmem [resolvable:$true] %s58_s8 }
  0x1e   :  { %p4413_p10 = scmp.ne.s32.totalorder %s46_s1, %s4412_s9  ;;  %p4417_p11 = scmp.lt.s32.totalorder %s46_s1, %s46_s1 }
  0x1f   :  { %p4418_p12 = scmp.lt.s32.totalorder %s4412_s9, %s4412_s9 }
  0x21   :  { %p4419_p13 = por %p4418_p12, %p4417_p11 }
  0x23   :  { %p4420_p0 = pnand %p4419_p13, %p4413_p10 }
  0x25   :  { %4423 = shalt.err (!%p4420_p0)
}
  0x26   :  { %51 = dma.hbm_to_vmem [thread:$0]  %s6426_s2, 32768, %s46_s1, [#allocation6], %s4496_s22, %s4496_s22, %s4498_s28  }
  0x27   :  { %s4432_s0 = scalar_lea.vmem %s59_s8, 256  ;;  %p4437_p2 = scmp.lt.s32.totalorder %s59_s8, %s59_s8 }
  0x28   :  { %p4433_p1 = scmp.ne.s32.totalorder %s59_s8, %s4432_s0  ;;  %p4438_p3 = scmp.lt.s32.totalorder %s4432_s0, %s4432_s0 }
  0x2a   :  { %p4439_p4 = por %p4438_p3, %p4437_p2 }
  0x2c   :  { %p4440_p5 = pnand %p4439_p4, %p4433_p1 }
  0x2e   :  { %4443 = shalt.err (!%p4440_p5)
}
  0x2f   :  { %61 = dma.hbm_to_vmem [thread:$0]  %s6427_s3, 256, %s59_s8, [#allocation9]  }
  0x30   :  { %4484 = dma.done.wait [#allocation3], 512  }
  0x31   :  { %4485 = vsyncadd [#allocation3], 4294966784 }
  0x32   :  { %4486 = dma.done.wait [#allocation6], 65536  }
  0x33   :  { %4487 = vsyncadd [#allocation6], 4294901760 }
  0x34   :  { %4488 = dma.done.wait [#allocation9], 256  }
  0x35   :  { %4489 = vsyncadd [#allocation9], 4294967040  ;;  %v4501_v0 = vmov 0.0   ;;  %v319_v1 = vld [vmem:[#allocation5 + $0x788] sm:$0xff]  ;;  %v321_v2 = vld [vmem:[#allocation5 + $0x798] sm:$0xff]  ;;  %s4503_s2 = smov [#allocation10]  }
  0x36   :  { %398 = vmatprep.mubr.f32.mxu0 %v4501_v0  ;;  %487 = vmatprep.mubr.f32.mxu1 %v4501_v0  ;;  %v318_v3 = vld [vmem:[#allocation5 + $0x780] sm:$0xff]  ;;  %v320_v4 = vld [vmem:[#allocation5 + $0x790] sm:$0xff]  ;;  %v303_v5 = vld [vmem:[#allocation5 + $0x708] sm:$0xff]  ;;  %s3839_s3 = sshll.u32 %s4503_s2, 4  ;;  %s3840_s3 = int_to_ptr.vmem [resolvable:$true] %s3839_s3 }
  0x37   :  { %334 = vmatprep.subr.mxu0 %v319_v1  ;;  %423 = vmatprep.subr.mxu1 %v321_v2  ;;  %v305_v6 = vld [vmem:[#allocation5 + $0x718] sm:$0xff]  ;;  %v302_v7 = vld [vmem:[#allocation5 + $0x700] sm:$0xff]  ;;  %v304_v8 = vld [vmem:[#allocation5 + $0x710] sm:$0xff]  ;;  %s4444_s14 = scalar_lea.vmem %s3840_s3, 512  ;;  %p4449_p7 = scmp.lt.s32.totalorder %s3840_s3, %s3840_s3 }
  0x38   :  { %335 = vmatpush1.msra.mxu0 %v318_v3  ;;  %424 = vmatpush1.msra.mxu1 %v320_v4  ;;  %v287_v9 = vld [vmem:[#allocation5 + $0x688] sm:$0xff]  ;;  %v289_v10 = vld [vmem:[#allocation5 + $0x698] sm:$0xff]  ;;  %v286_v11 = vld [vmem:[#allocation5 + $0x680] sm:$0xff]  ;;  %p4445_p6 = scmp.ne.s32.totalorder %s3840_s3, %s4444_s14  ;;  %p4450_p8 = scmp.lt.s32.totalorder %s4444_s14, %s4444_s14 }
  0x39   :  { %336 = vmatprep.subr.mxu0 %v303_v5  ;;  %425 = vmatprep.subr.mxu1 %v305_v6  ;;  %v288_v12 = vld [vmem:[#allocation5 + $0x690] sm:$0xff]  ;;  %v271_v13 = vld [vmem:[#allocation5 + $0x608] sm:$0xff]  ;;  %v273_v14 = vld [vmem:[#allocation5 + $0x618] sm:$0xff] }
  0x3a   :  { %337 = vmatpush1.msra.mxu0 %v302_v7  ;;  %426 = vmatpush1.msra.mxu1 %v304_v8  ;;  %v270_v15 = vld [vmem:[#allocation5 + $0x600] sm:$0xff]  ;;  %v272_v16 = vld [vmem:[#allocation5 + $0x610] sm:$0xff]  ;;  %v255_v17 = vld [vmem:[#allocation5 + $0x588] sm:$0xff]  ;;  %p4451_p9 = por %p4450_p8, %p4449_p7 }
  0x3b   :  { %338 = vmatprep.subr.mxu0 %v287_v9  ;;  %427 = vmatprep.subr.mxu1 %v289_v10  ;;  %v257_v18 = vld [vmem:[#allocation5 + $0x598] sm:$0xff]  ;;  %v254_v19 = vld [vmem:[#allocation5 + $0x580] sm:$0xff]  ;;  %v256_v20 = vld [vmem:[#allocation5 + $0x590] sm:$0xff] }
  0x3c   :  { %339 = vmatpush1.msra.mxu0 %v286_v11  ;;  %428 = vmatpush1.msra.mxu1 %v288_v12  ;;  %v239_v21 = vld [vmem:[#allocation5 + $0x508] sm:$0xff]  ;;  %v241_v22 = vld [vmem:[#allocation5 + $0x518] sm:$0xff]  ;;  %v238_v23 = vld [vmem:[#allocation5 + $0x500] sm:$0xff]  ;;  %p4452_p10 = pnand %p4451_p9, %p4445_p6 }
  0x3d   :  { %340 = vmatprep.subr.mxu0 %v271_v13  ;;  %429 = vmatprep.subr.mxu1 %v273_v14  ;;  %v240_v24 = vld [vmem:[#allocation5 + $0x510] sm:$0xff]  ;;  %v223_v25 = vld [vmem:[#allocation5 + $0x488] sm:$0xff]  ;;  %v225_v26 = vld [vmem:[#allocation5 + $0x498] sm:$0xff] }
  0x3e   :  { %341 = vmatpush1.msra.mxu0 %v270_v15  ;;  %430 = vmatpush1.msra.mxu1 %v272_v16  ;;  %v222_v27 = vld [vmem:[#allocation5 + $0x480] sm:$0xff]  ;;  %v224_v28 = vld [vmem:[#allocation5 + $0x490] sm:$0xff]  ;;  %v207_v29 = vld [vmem:[#allocation5 + $0x408] sm:$0xff] }
  0x3f   :  { %342 = vmatprep.subr.mxu0 %v255_v17  ;;  %431 = vmatprep.subr.mxu1 %v257_v18  ;;  %v209_v30 = vld [vmem:[#allocation5 + $0x418] sm:$0xff]  ;;  %v206_v31 = vld [vmem:[#allocation5 + $0x400] sm:$0xff]  ;;  %v208_v32 = vld [vmem:[#allocation5 + $0x410] sm:$0xff] }
  0x40   :  { %343 = vmatpush1.msra.mxu0 %v254_v19  ;;  %432 = vmatpush1.msra.mxu1 %v256_v20  ;;  %v191_v33 = vld [vmem:[#allocation5 + $0x388] sm:$0xff]  ;;  %v193_v34 = vld [vmem:[#allocation5 + $0x398] sm:$0xff]  ;;  %v190_v35 = vld [vmem:[#allocation5 + $0x380] sm:$0xff] }
  0x41   :  { %344 = vmatprep.subr.mxu0 %v239_v21  ;;  %433 = vmatprep.subr.mxu1 %v241_v22  ;;  %v192_v36 = vld [vmem:[#allocation5 + $0x390] sm:$0xff]  ;;  %v175_v37 = vld [vmem:[#allocation5 + $0x308] sm:$0xff]  ;;  %v177_v38 = vld [vmem:[#allocation5 + $0x318] sm:$0xff] }
  0x42   :  { %345 = vmatpush1.msra.mxu0 %v238_v23  ;;  %434 = vmatpush1.msra.mxu1 %v240_v24  ;;  %v174_v39 = vld [vmem:[#allocation5 + $0x300] sm:$0xff]  ;;  %v176_v40 = vld [vmem:[#allocation5 + $0x310] sm:$0xff]  ;;  %v159_v41 = vld [vmem:[#allocation5 + $0x288] sm:$0xff] }
  0x43   :  { %346 = vmatprep.subr.mxu0 %v223_v25  ;;  %435 = vmatprep.subr.mxu1 %v225_v26  ;;  %v161_v42 = vld [vmem:[#allocation5 + $0x298] sm:$0xff]  ;;  %v158_v43 = vld [vmem:[#allocation5 + $0x280] sm:$0xff]  ;;  %v160_v44 = vld [vmem:[#allocation5 + $0x290] sm:$0xff] }
  0x44   :  { %347 = vmatpush1.msra.mxu0 %v222_v27  ;;  %436 = vmatpush1.msra.mxu1 %v224_v28  ;;  %v143_v45 = vld [vmem:[#allocation5 + $0x208] sm:$0xff]  ;;  %v145_v46 = vld [vmem:[#allocation5 + $0x218] sm:$0xff]  ;;  %v142_v47 = vld [vmem:[#allocation5 + $0x200] sm:$0xff] }
  0x45   :  { %348 = vmatprep.subr.mxu0 %v207_v29  ;;  %437 = vmatprep.subr.mxu1 %v209_v30  ;;  %v144_v48 = vld [vmem:[#allocation5 + $0x210] sm:$0xff]  ;;  %v127_v49 = vld [vmem:[#allocation5 + $0x188] sm:$0xff]  ;;  %v129_v50 = vld [vmem:[#allocation5 + $0x198] sm:$0xff] }
  0x46   :  { %349 = vmatpush1.msra.mxu0 %v206_v31  ;;  %438 = vmatpush1.msra.mxu1 %v208_v32  ;;  %v126_v51 = vld [vmem:[#allocation5 + $0x180] sm:$0xff]  ;;  %v128_v52 = vld [vmem:[#allocation5 + $0x190] sm:$0xff]  ;;  %v111_v53 = vld [vmem:[#allocation5 + $0x108] sm:$0xff] }
  0x47   :  { %350 = vmatprep.subr.mxu0 %v191_v33  ;;  %439 = vmatprep.subr.mxu1 %v193_v34  ;;  %v113_v54 = vld [vmem:[#allocation5 + $0x118] sm:$0xff]  ;;  %v110_v55 = vld [vmem:[#allocation5 + $0x100] sm:$0xff]  ;;  %v112_v56 = vld [vmem:[#allocation5 + $0x110] sm:$0xff] }
  0x48   :  { %351 = vmatpush1.msra.mxu0 %v190_v35  ;;  %440 = vmatpush1.msra.mxu1 %v192_v36  ;;  %v95_v57 = vld [vmem:[#allocation5 + $0x88] sm:$0xff]  ;;  %v97_v58 = vld [vmem:[#allocation5 + $0x98] sm:$0xff]  ;;  %v94_v59 = vld [vmem:[#allocation5 + $0x80] sm:$0xff] }
  0x49   :  { %352 = vmatprep.subr.mxu0 %v175_v37  ;;  %441 = vmatprep.subr.mxu1 %v177_v38  ;;  %v96_v60 = vld [vmem:[#allocation5 + $0x90] sm:$0xff]  ;;  %v79_v61 = vld [vmem:[#allocation5 + $0x8] sm:$0xff]  ;;  %v81_v62 = vld [vmem:[#allocation5 + $0x18] sm:$0xff] }
  0x4a   :  { %353 = vmatpush1.msra.mxu0 %v174_v39  ;;  %442 = vmatpush1.msra.mxu1 %v176_v40  ;;  %v78_v63 = vld [vmem:[#allocation5] sm:$0xff]  ;;  %v80_v1 = vld [vmem:[#allocation5 + $0x10] sm:$0xff]  ;;  %v323_v3 = vld [vmem:[#allocation5 + $0x7a8] sm:$0xff] }
  0x4b   :  { %354 = vmatprep.subr.mxu0 %v159_v41  ;;  %443 = vmatprep.subr.mxu1 %v161_v42  ;;  %v4556_v2 = vld [vmem:[#allocation2] sm:$0xff]  ;;  %v325_v4 = vld [vmem:[#allocation5 + $0x7b8] sm:$0xff]  ;;  %v324_v6 = vld [vmem:[#allocation5 + $0x7b0] sm:$0xff] }
  0x4c   :  { %355 = vmatpush1.msra.mxu0 %v158_v43  ;;  %444 = vmatpush1.msra.mxu1 %v160_v44  ;;  %v322_v5 = vld [vmem:[#allocation5 + $0x7a0] sm:$0xff]  ;;  %v307_v7 = vld [vmem:[#allocation5 + $0x728] sm:$0xff]  ;;  %v309_v8 = vld [vmem:[#allocation5 + $0x738] sm:$0xff] }
  0x4d   :  { %356 = vmatprep.subr.mxu0 %v143_v45  ;;  %445 = vmatprep.subr.mxu1 %v145_v46  ;;  %v306_v9 = vld [vmem:[#allocation5 + $0x720] sm:$0xff]  ;;  %v291_v10 = vld [vmem:[#allocation5 + $0x6a8] sm:$0xff]  ;;  %v308_v11 = vld [vmem:[#allocation5 + $0x730] sm:$0xff] }
  0x4e   :  { %357 = vmatpush1.msra.mxu0 %v142_v47  ;;  %446 = vmatpush1.msra.mxu1 %v144_v48  ;;  %v290_v12 = vld [vmem:[#allocation5 + $0x6a0] sm:$0xff]  ;;  %v293_v13 = vld [vmem:[#allocation5 + $0x6b8] sm:$0xff]  ;;  %v4561_v14 = vld [vmem:[#allocation2 + $0x8] sm:$0xff] }
  0x4f   :  { %358 = vmatprep.subr.mxu0 %v127_v49  ;;  %447 = vmatprep.subr.mxu1 %v129_v50  ;;  %v275_v15 = vld [vmem:[#allocation5 + $0x628] sm:$0xff]  ;;  %v274_v16 = vld [vmem:[#allocation5 + $0x620] sm:$0xff]  ;;  %v292_v17 = vld [vmem:[#allocation5 + $0x6b0] sm:$0xff] }
  0x50   :  { %359 = vmatpush1.msra.mxu0 %v126_v51  ;;  %448 = vmatpush1.msra.mxu1 %v128_v52  ;;  %v259_v18 = vld [vmem:[#allocation5 + $0x5a8] sm:$0xff]  ;;  %v277_v19 = vld [vmem:[#allocation5 + $0x638] sm:$0xff]  ;;  %v258_v20 = vld [vmem:[#allocation5 + $0x5a0] sm:$0xff] }
  0x51   :  { %360 = vmatprep.subr.mxu0 %v111_v53  ;;  %449 = vmatprep.subr.mxu1 %v113_v54  ;;  %v276_v21 = vld [vmem:[#allocation5 + $0x630] sm:$0xff]  ;;  %v243_v22 = vld [vmem:[#allocation5 + $0x528] sm:$0xff]  ;;  %v261_v23 = vld [vmem:[#allocation5 + $0x5b8] sm:$0xff] }
  0x52   :  { %361 = vmatpush1.msra.mxu0 %v110_v55  ;;  %450 = vmatpush1.msra.mxu1 %v112_v56  ;;  %v242_v24 = vld [vmem:[#allocation5 + $0x520] sm:$0xff]  ;;  %v260_v25 = vld [vmem:[#allocation5 + $0x5b0] sm:$0xff]  ;;  %v227_v26 = vld [vmem:[#allocation5 + $0x4a8] sm:$0xff] }
  0x53   :  { %362 = vmatprep.subr.mxu0 %v95_v57  ;;  %451 = vmatprep.subr.mxu1 %v97_v58  ;;  %v245_v27 = vld [vmem:[#allocation5 + $0x538] sm:$0xff]  ;;  %v226_v28 = vld [vmem:[#allocation5 + $0x4a0] sm:$0xff]  ;;  %v244_v29 = vld [vmem:[#allocation5 + $0x530] sm:$0xff] }
  0x54   :  { %363 = vmatpush1.msra.mxu0 %v94_v59  ;;  %452 = vmatpush1.msra.mxu1 %v96_v60  ;;  %v4566_v30 = vld [vmem:[#allocation2 + $0x10] sm:$0xff]  ;;  %v211_v31 = vld [vmem:[#allocation5 + $0x428] sm:$0xff]  ;;  %v229_v32 = vld [vmem:[#allocation5 + $0x4b8] sm:$0xff] }
  0x55   :  { %364 = vmatprep.subr.mxu0 %v79_v61  ;;  %453 = vmatprep.subr.mxu1 %v81_v62  ;;  %v210_v33 = vld [vmem:[#allocation5 + $0x420] sm:$0xff]  ;;  %v228_v34 = vld [vmem:[#allocation5 + $0x4b0] sm:$0xff]  ;;  %v195_v35 = vld [vmem:[#allocation5 + $0x3a8] sm:$0xff] }
  0x56   :  { %365 = vmatpush1.msra.mxu0 %v78_v63  ;;  %454 = vmatpush1.msra.mxu1 %v80_v1  ;;  %v213_v36 = vld [vmem:[#allocation5 + $0x438] sm:$0xff]  ;;  %v194_v37 = vld [vmem:[#allocation5 + $0x3a0] sm:$0xff]  ;;  %v212_v38 = vld [vmem:[#allocation5 + $0x430] sm:$0xff] }
  0x57   :  { %399 = vmatmul.mubr.f32.vlgmr.msra.gmra.mxu0 %v4556_v2  ;;  %488 = vmatmul.mubr.f32.vlgmr.msra.gmra.mxu1 %v4556_v2  ;;  %v179_v39 = vld [vmem:[#allocation5 + $0x328] sm:$0xff]  ;;  %v197_v40 = vld [vmem:[#allocation5 + $0x3b8] sm:$0xff]  ;;  %v178_v41 = vld [vmem:[#allocation5 + $0x320] sm:$0xff] }
  0x58   :  { %512 = vmatprep.subr.mxu0 %v323_v3  ;;  %601 = vmatprep.subr.mxu1 %v325_v4  ;;  %v196_v42 = vld [vmem:[#allocation5 + $0x3b0] sm:$0xff]  ;;  %v163_v43 = vld [vmem:[#allocation5 + $0x2a8] sm:$0xff]  ;;  %v181_v44 = vld [vmem:[#allocation5 + $0x338] sm:$0xff] }
  0x59   :  { %513 = vmatpush1.msra.mxu0 %v322_v5  ;;  %602 = vmatpush1.msra.mxu1 %v324_v6  ;;  %v162_v45 = vld [vmem:[#allocation5 + $0x2a0] sm:$0xff]  ;;  %v180_v46 = vld [vmem:[#allocation5 + $0x330] sm:$0xff]  ;;  %v4572_v47 = vld [vmem:[#allocation2 + $0x18] sm:$0xff] }
  0x5a   :  { %514 = vmatprep.subr.mxu0 %v307_v7  ;;  %603 = vmatprep.subr.mxu1 %v309_v8  ;;  %v147_v48 = vld [vmem:[#allocation5 + $0x228] sm:$0xff]  ;;  %v165_v49 = vld [vmem:[#allocation5 + $0x2b8] sm:$0xff]  ;;  %v146_v50 = vld [vmem:[#allocation5 + $0x220] sm:$0xff] }
  0x5b   :  { %515 = vmatpush1.msra.mxu0 %v306_v9  ;;  %404 = vmatprep.mubr.f32.mxu0 %v4501_v0  ;;  %v164_v51 = vld [vmem:[#allocation5 + $0x2b0] sm:$0xff]  ;;  %v131_v52 = vld [vmem:[#allocation5 + $0x1a8] sm:$0xff]  ;;  %v149_v53 = vld [vmem:[#allocation5 + $0x238] sm:$0xff] }
  0x5c   :  { %516 = vmatprep.subr.mxu0 %v291_v10  ;;  %604 = vmatpush1.msra.mxu1 %v308_v11  ;;  %v130_v54 = vld [vmem:[#allocation5 + $0x1a0] sm:$0xff]  ;;  %v148_v55 = vld [vmem:[#allocation5 + $0x230] sm:$0xff]  ;;  %v115_v56 = vld [vmem:[#allocation5 + $0x128] sm:$0xff] }
  0x5d   :  { %517 = vmatpush1.msra.mxu0 %v290_v12  ;;  %605 = vmatprep.subr.mxu1 %v293_v13  ;;  %v133_v57 = vld [vmem:[#allocation5 + $0x1b8] sm:$0xff]  ;;  %v114_v58 = vld [vmem:[#allocation5 + $0x120] sm:$0xff]  ;;  %v132_v59 = vld [vmem:[#allocation5 + $0x1b0] sm:$0xff] }
  0x5e   :  { %405 = vmatmul.mubr.f32.gmra.mxu0 %v4561_v14  ;;  %518 = vmatprep.subr.mxu0 %v275_v15  ;;  %v99_v60 = vld [vmem:[#allocation5 + $0xa8] sm:$0xff]  ;;  %v117_v61 = vld [vmem:[#allocation5 + $0x138] sm:$0xff]  ;;  %v98_v62 = vld [vmem:[#allocation5 + $0xa0] sm:$0xff] }
  0x5f   :  { %519 = vmatpush1.msra.mxu0 %v274_v16  ;;  %606 = vmatpush1.msra.mxu1 %v292_v17  ;;  %v116_v63 = vld [vmem:[#allocation5 + $0x130] sm:$0xff]  ;;  %v83_v1 = vld [vmem:[#allocation5 + $0x28] sm:$0xff]  ;;  %v101_v3 = vld [vmem:[#allocation5 + $0xb8] sm:$0xff] }
  0x60   :  { %520 = vmatprep.subr.mxu0 %v259_v18  ;;  %607 = vmatprep.subr.mxu1 %v277_v19  ;;  %v82_v4 = vld [vmem:[#allocation5 + $0x20] sm:$0xff]  ;;  %v100_v5 = vld [vmem:[#allocation5 + $0xb0] sm:$0xff]  ;;  %v85_v6 = vld [vmem:[#allocation5 + $0x38] sm:$0xff] }
  0x61   :  { %493 = vmatprep.mubr.f32.mxu1 %v4501_v0  ;;  %521 = vmatpush1.msra.mxu0 %v258_v20  ;;  %v327_v7 = vld [vmem:[#allocation5 + $0x7c8] sm:$0xff]  ;;  %v84_v8 = vld [vmem:[#allocation5 + $0x30] sm:$0xff]  ;;  %v326_v9 = vld [vmem:[#allocation5 + $0x7c0] sm:$0xff] }
  0x62   :  { %608 = vmatpush1.msra.mxu1 %v276_v21  ;;  %522 = vmatprep.subr.mxu0 %v243_v22  ;;  %v311_v10 = vld [vmem:[#allocation5 + $0x748] sm:$0xff]  ;;  %v329_v11 = vld [vmem:[#allocation5 + $0x7d8] sm:$0xff]  ;;  %v310_v12 = vld [vmem:[#allocation5 + $0x740] sm:$0xff] }
  0x63   :  { %494 = vmatmul.mubr.f32.gmra.mxu1 %v4561_v14  ;;  %609 = vmatprep.subr.mxu1 %v261_v23  ;;  %v328_v13 = vld [vmem:[#allocation5 + $0x7d0] sm:$0xff]  ;;  %v295_v15 = vld [vmem:[#allocation5 + $0x6c8] sm:$0xff]  ;;  %v313_v16 = vld [vmem:[#allocation5 + $0x758] sm:$0xff] }
  0x64   :  { %523 = vmatpush1.msra.mxu0 %v242_v24  ;;  %610 = vmatpush1.msra.mxu1 %v260_v25  ;;  %v294_v17 = vld [vmem:[#allocation5 + $0x6c0] sm:$0xff]  ;;  %v312_v18 = vld [vmem:[#allocation5 + $0x750] sm:$0xff]  ;;  %v279_v19 = vld [vmem:[#allocation5 + $0x648] sm:$0xff] }
  0x65   :  { %524 = vmatprep.subr.mxu0 %v227_v26  ;;  %611 = vmatprep.subr.mxu1 %v245_v27  ;;  %v297_v20 = vld [vmem:[#allocation5 + $0x6d8] sm:$0xff]  ;;  %v278_v21 = vld [vmem:[#allocation5 + $0x640] sm:$0xff]  ;;  %v296_v22 = vld [vmem:[#allocation5 + $0x6d0] sm:$0xff] }
  0x66   :  { %410 = vmatprep.mubr.f32.mxu0 %v4501_v0  ;;  %525 = vmatpush1.msra.mxu0 %v226_v28  ;;  %v263_v23 = vld [vmem:[#allocation5 + $0x5c8] sm:$0xff]  ;;  %v281_v24 = vld [vmem:[#allocation5 + $0x658] sm:$0xff]  ;;  %v262_v25 = vld [vmem:[#allocation5 + $0x5c0] sm:$0xff] }
  0x67   :  { %612 = vmatpush1.msra.mxu1 %v244_v29  ;;  %411 = vmatmul.mubr.f32.gmra.mxu0 %v4566_v30  ;;  %v280_v26 = vld [vmem:[#allocation5 + $0x650] sm:$0xff]  ;;  %v247_v27 = vld [vmem:[#allocation5 + $0x548] sm:$0xff]  ;;  %v265_v28 = vld [vmem:[#allocation5 + $0x5d8] sm:$0xff] }
  0x68   :  { %526 = vmatprep.subr.mxu0 %v211_v31  ;;  %613 = vmatprep.subr.mxu1 %v229_v32  ;;  %v246_v29 = vld [vmem:[#allocation5 + $0x540] sm:$0xff]  ;;  %v264_v31 = vld [vmem:[#allocation5 + $0x5d0] sm:$0xff]  ;;  %v231_v32 = vld [vmem:[#allocation5 + $0x4c8] sm:$0xff] }
  0x69   :  { %527 = vmatpush1.msra.mxu0 %v210_v33  ;;  %614 = vmatpush1.msra.mxu1 %v228_v34  ;;  %v249_v33 = vld [vmem:[#allocation5 + $0x558] sm:$0xff]  ;;  %v230_v34 = vld [vmem:[#allocation5 + $0x4c0] sm:$0xff] }
  0x6a   :  { %528 = vmatprep.subr.mxu0 %v195_v35  ;;  %615 = vmatprep.subr.mxu1 %v213_v36  ;;  %v248_v35 = vld [vmem:[#allocation5 + $0x550] sm:$0xff]  ;;  %v215_v36 = vld [vmem:[#allocation5 + $0x448] sm:$0xff] }
  0x6b   :  { %499 = vmatprep.mubr.f32.mxu1 %v4501_v0  ;;  %529 = vmatpush1.msra.mxu0 %v194_v37  ;;  %v233_v37 = vld [vmem:[#allocation5 + $0x4d8] sm:$0xff] }
  0x6c   :  { %616 = vmatpush1.msra.mxu1 %v212_v38  ;;  %530 = vmatprep.subr.mxu0 %v179_v39  ;;  %v214_v38 = vld [vmem:[#allocation5 + $0x440] sm:$0xff]  ;;  %v232_v39 = vld [vmem:[#allocation5 + $0x4d0] sm:$0xff] }
  0x6d   :  { %500 = vmatmul.mubr.f32.gmra.mxu1 %v4566_v30  ;;  %617 = vmatprep.subr.mxu1 %v197_v40  ;;  %v199_v40 = vld [vmem:[#allocation5 + $0x3c8] sm:$0xff] }
  0x6e   :  { %531 = vmatpush1.msra.mxu0 %v178_v41  ;;  %618 = vmatpush1.msra.mxu1 %v196_v42  ;;  %v217_v41 = vld [vmem:[#allocation5 + $0x458] sm:$0xff]  ;;  %v198_v42 = vld [vmem:[#allocation5 + $0x3c0] sm:$0xff] }
  0x6f   :  { %532 = vmatprep.subr.mxu0 %v163_v43  ;;  %619 = vmatprep.subr.mxu1 %v181_v44  ;;  %v216_v43 = vld [vmem:[#allocation5 + $0x450] sm:$0xff]  ;;  %v183_v44 = vld [vmem:[#allocation5 + $0x348] sm:$0xff] }
  0x70   :  { %416 = vmatprep.mubr.f32.mxu0 %v4501_v0  ;;  %533 = vmatpush1.msra.mxu0 %v162_v45  ;;  %v201_v45 = vld [vmem:[#allocation5 + $0x3d8] sm:$0xff] }
  0x71   :  { %620 = vmatpush1.msra.mxu1 %v180_v46  ;;  %417 = vmatmul.mubr.f32.gmra.mxu0 %v4572_v47  ;;  %v182_v46 = vld [vmem:[#allocation5 + $0x340] sm:$0xff] }
  0x72   :  { %534 = vmatprep.subr.mxu0 %v147_v48  ;;  %621 = vmatprep.subr.mxu1 %v165_v49  ;;  %v200_v48 = vld [vmem:[#allocation5 + $0x3d0] sm:$0xff]  ;;  %v167_v49 = vld [vmem:[#allocation5 + $0x2c8] sm:$0xff] }
  0x73   :  { %535 = vmatpush1.msra.mxu0 %v146_v50  ;;  %622 = vmatpush1.msra.mxu1 %v164_v51  ;;  %v185_v50 = vld [vmem:[#allocation5 + $0x358] sm:$0xff]  ;;  %v166_v51 = vld [vmem:[#allocation5 + $0x2c0] sm:$0xff] }
  0x74   :  { %536 = vmatprep.subr.mxu0 %v131_v52  ;;  %623 = vmatprep.subr.mxu1 %v149_v53  ;;  %v184_v52 = vld [vmem:[#allocation5 + $0x350] sm:$0xff]  ;;  %v151_v53 = vld [vmem:[#allocation5 + $0x248] sm:$0xff] }
  0x75   :  { %505 = vmatprep.mubr.f32.mxu1 %v4501_v0  ;;  %537 = vmatpush1.msra.mxu0 %v130_v54  ;;  %v169_v54 = vld [vmem:[#allocation5 + $0x2d8] sm:$0xff] }
  0x76   :  { %624 = vmatpush1.msra.mxu1 %v148_v55  ;;  %538 = vmatprep.subr.mxu0 %v115_v56  ;;  %v150_v55 = vld [vmem:[#allocation5 + $0x240] sm:$0xff]  ;;  %v168_v56 = vld [vmem:[#allocation5 + $0x2d0] sm:$0xff] }
  0x77   :  { %506 = vmatmul.mubr.f32.gmra.mxu1 %v4572_v47  ;;  %625 = vmatprep.subr.mxu1 %v133_v57  ;;  %v135_v57 = vld [vmem:[#allocation5 + $0x1c8] sm:$0xff] }
  0x78   :  { %539 = vmatpush1.msra.mxu0 %v114_v58  ;;  %626 = vmatpush1.msra.mxu1 %v132_v59  ;;  %v153_v58 = vld [vmem:[#allocation5 + $0x258] sm:$0xff]  ;;  %v134_v59 = vld [vmem:[#allocation5 + $0x1c0] sm:$0xff] }
  0x79   :  { %540 = vmatprep.subr.mxu0 %v99_v60  ;;  %627 = vmatprep.subr.mxu1 %v117_v61  ;;  %v152_v60 = vld [vmem:[#allocation5 + $0x250] sm:$0xff]  ;;  %v119_v61 = vld [vmem:[#allocation5 + $0x148] sm:$0xff] }
  0x7a   :  { %541 = vmatpush1.msra.mxu0 %v98_v62  ;;  %628 = vmatpush1.msra.mxu1 %v116_v63  ;;  %v137_v62 = vld [vmem:[#allocation5 + $0x1d8] sm:$0xff]  ;;  %v118_v63 = vld [vmem:[#allocation5 + $0x140] sm:$0xff] }
  0x7b   :  { %542 = vmatprep.subr.mxu0 %v83_v1  ;;  %629 = vmatprep.subr.mxu1 %v101_v3  ;;  %v136_v1 = vld [vmem:[#allocation5 + $0x1d0] sm:$0xff]  ;;  %v103_v3 = vld [vmem:[#allocation5 + $0xc8] sm:$0xff] }
  0x7c   :  { %543 = vmatpush1.msra.mxu0 %v82_v4  ;;  %576 = vmatprep.mubr.f32.mxu0 %v4501_v0  ;;  %v121_v4 = vld [vmem:[#allocation5 + $0x158] sm:$0xff] }
  0x7d   :  { %630 = vmatpush1.msra.mxu1 %v100_v5  ;;  %577 = vmatmul.mubr.f32.vlgmr.msra.gmra.mxu0 %v4556_v2  ;;  %v102_v5 = vld [vmem:[#allocation5 + $0xc0] sm:$0xff] }
  0x7e   :  { %631 = vmatprep.subr.mxu1 %v85_v6  ;;  %690 = vmatprep.subr.mxu0 %v327_v7  ;;  %v120_v6 = vld [vmem:[#allocation5 + $0x150] sm:$0xff]  ;;  %v87_v7 = vld [vmem:[#allocation5 + $0x48] sm:$0xff] }
  0x7f   :  { %632 = vmatpush1.msra.mxu1 %v84_v8  ;;  %665 = vmatprep.mubr.f32.mxu1 %v4501_v0  ;;  %v105_v8 = vld [vmem:[#allocation5 + $0xd8] sm:$0xff] }
  0x80   :  { %691 = vmatpush1.msra.mxu0 %v326_v9  ;;  %666 = vmatmul.mubr.f32.vlgmr.msra.gmra.mxu1 %v4556_v2  ;;  %v86_v9 = vld [vmem:[#allocation5 + $0x40] sm:$0xff] }
  0x81   :  { %692 = vmatprep.subr.mxu0 %v311_v10  ;;  %779 = vmatprep.subr.mxu1 %v329_v11  ;;  %v104_v10 = vld [vmem:[#allocation5 + $0xd0] sm:$0xff]  ;;  %v89_v11 = vld [vmem:[#allocation5 + $0x58] sm:$0xff] }
  0x82   :  { %693 = vmatpush1.msra.mxu0 %v310_v12  ;;  %780 = vmatpush1.msra.mxu1 %v328_v13  ;;  %v331_v12 = vld [vmem:[#allocation5 + $0x7e8] sm:$0xff]  ;;  %v88_v13 = vld [vmem:[#allocation5 + $0x50] sm:$0xff] }
  0x83   :  { %694 = vmatprep.subr.mxu0 %v295_v15  ;;  %781 = vmatprep.subr.mxu1 %v313_v16  ;;  %v330_v15 = vld [vmem:[#allocation5 + $0x7e0] sm:$0xff]  ;;  %v315_v16 = vld [vmem:[#allocation5 + $0x768] sm:$0xff] }
  0x84   :  { %582 = vmatprep.mubr.f32.mxu0 %v4501_v0  ;;  %695 = vmatpush1.msra.mxu0 %v294_v17  ;;  %v333_v17 = vld [vmem:[#allocation5 + $0x7f8] sm:$0xff] }
  0x85   :  { %782 = vmatpush1.msra.mxu1 %v312_v18  ;;  %583 = vmatmul.mubr.f32.gmra.mxu0 %v4561_v14  ;;  %v314_v18 = vld [vmem:[#allocation5 + $0x760] sm:$0xff] }
  0x86   :  { %696 = vmatprep.subr.mxu0 %v279_v19  ;;  %783 = vmatprep.subr.mxu1 %v297_v20  ;;  %v299_v19 = vld [vmem:[#allocation5 + $0x6e8] sm:$0xff]  ;;  %v332_v20 = vld [vmem:[#allocation5 + $0x7f0] sm:$0xff] }
  0x87   :  { %697 = vmatpush1.msra.mxu0 %v278_v21  ;;  %784 = vmatpush1.msra.mxu1 %v296_v22  ;;  %v298_v21 = vld [vmem:[#allocation5 + $0x6e0] sm:$0xff]  ;;  %v317_v22 = vld [vmem:[#allocation5 + $0x778] sm:$0xff] }
  0x88   :  { %698 = vmatprep.subr.mxu0 %v263_v23  ;;  %785 = vmatprep.subr.mxu1 %v281_v24  ;;  %v283_v23 = vld [vmem:[#allocation5 + $0x668] sm:$0xff]  ;;  %v282_v24 = vld [vmem:[#allocation5 + $0x660] sm:$0xff] }
  0x89   :  { %671 = vmatprep.mubr.f32.mxu1 %v4501_v0  ;;  %699 = vmatpush1.msra.mxu0 %v262_v25  ;;  %v316_v25 = vld [vmem:[#allocation5 + $0x770] sm:$0xff] }
  0x8a   :  { %786 = vmatpush1.msra.mxu1 %v280_v26  ;;  %700 = vmatprep.subr.mxu0 %v247_v27  ;;  %v267_v26 = vld [vmem:[#allocation5 + $0x5e8] sm:$0xff]  ;;  %v301_v27 = vld [vmem:[#allocation5 + $0x6f8] sm:$0xff] }
  0x8b   :  { %672 = vmatmul.mubr.f32.gmra.mxu1 %v4561_v14  ;;  %787 = vmatprep.subr.mxu1 %v265_v28  ;;  %v266_v28 = vld [vmem:[#allocation5 + $0x5e0] sm:$0xff] }
  0x8c   :  { %701 = vmatpush1.msra.mxu0 %v246_v29  ;;  %788 = vmatpush1.msra.mxu1 %v264_v31  ;;  %v300_v29 = vld [vmem:[#allocation5 + $0x6f0] sm:$0xff]  ;;  %v251_v31 = vld [vmem:[#allocation5 + $0x568] sm:$0xff] }
  0x8d   :  { %702 = vmatprep.subr.mxu0 %v231_v32  ;;  %789 = vmatprep.subr.mxu1 %v249_v33  ;;  %v285_v32 = vld [vmem:[#allocation5 + $0x678] sm:$0xff]  ;;  %v250_v33 = vld [vmem:[#allocation5 + $0x560] sm:$0xff] }
  0x8e   :  { %588 = vmatprep.mubr.f32.mxu0 %v4501_v0  ;;  %703 = vmatpush1.msra.mxu0 %v230_v34  ;;  %v284_v34 = vld [vmem:[#allocation5 + $0x670] sm:$0xff] }
  0x8f   :  { %790 = vmatpush1.msra.mxu1 %v248_v35  ;;  %589 = vmatmul.mubr.f32.gmra.mxu0 %v4566_v30  ;;  %v235_v35 = vld [vmem:[#allocation5 + $0x4e8] sm:$0xff] }
  0x90   :  { %704 = vmatprep.subr.mxu0 %v215_v36  ;;  %791 = vmatprep.subr.mxu1 %v233_v37  ;;  %v269_v36 = vld [vmem:[#allocation5 + $0x5f8] sm:$0xff]  ;;  %v234_v37 = vld [vmem:[#allocation5 + $0x4e0] sm:$0xff] }
  0x91   :  { %705 = vmatpush1.msra.mxu0 %v214_v38  ;;  %792 = vmatpush1.msra.mxu1 %v232_v39  ;;  %v268_v38 = vld [vmem:[#allocation5 + $0x5f0] sm:$0xff]  ;;  %v219_v39 = vld [vmem:[#allocation5 + $0x468] sm:$0xff] }
  0x92   :  { %706 = vmatprep.subr.mxu0 %v199_v40  ;;  %793 = vmatprep.subr.mxu1 %v217_v41  ;;  %v253_v40 = vld [vmem:[#allocation5 + $0x578] sm:$0xff]  ;;  %v218_v41 = vld [vmem:[#allocation5 + $0x460] sm:$0xff] }
  0x93   :  { %677 = vmatprep.mubr.f32.mxu1 %v4501_v0  ;;  %707 = vmatpush1.msra.mxu0 %v198_v42  ;;  %v252_v42 = vld [vmem:[#allocation5 + $0x570] sm:$0xff] }
  0x94   :  { %794 = vmatpush1.msra.mxu1 %v216_v43  ;;  %708 = vmatprep.subr.mxu0 %v183_v44  ;;  %v203_v43 = vld [vmem:[#allocation5 + $0x3e8] sm:$0xff]  ;;  %v237_v44 = vld [vmem:[#allocation5 + $0x4f8] sm:$0xff] }
  0x95   :  { %678 = vmatmul.mubr.f32.gmra.mxu1 %v4566_v30  ;;  %795 = vmatprep.subr.mxu1 %v201_v45  ;;  %v202_v45 = vld [vmem:[#allocation5 + $0x3e0] sm:$0xff] }
  0x96   :  { %709 = vmatpush1.msra.mxu0 %v182_v46  ;;  %796 = vmatpush1.msra.mxu1 %v200_v48  ;;  %v236_v46 = vld [vmem:[#allocation5 + $0x4f0] sm:$0xff]  ;;  %v187_v48 = vld [vmem:[#allocation5 + $0x368] sm:$0xff] }
  0x97   :  { %710 = vmatprep.subr.mxu0 %v167_v49  ;;  %797 = vmatprep.subr.mxu1 %v185_v50  ;;  %v221_v49 = vld [vmem:[#allocation5 + $0x478] sm:$0xff]  ;;  %v186_v50 = vld [vmem:[#allocation5 + $0x360] sm:$0xff] }
  0x98   :  { %594 = vmatprep.mubr.f32.mxu0 %v4501_v0  ;;  %711 = vmatpush1.msra.mxu0 %v166_v51  ;;  %v220_v51 = vld [vmem:[#allocation5 + $0x470] sm:$0xff] }
  0x99   :  { %798 = vmatpush1.msra.mxu1 %v184_v52  ;;  %595 = vmatmul.mubr.f32.gmra.mxu0 %v4572_v47  ;;  %v171_v52 = vld [vmem:[#allocation5 + $0x2e8] sm:$0xff] }
  0x9a   :  { %712 = vmatprep.subr.mxu0 %v151_v53  ;;  %799 = vmatprep.subr.mxu1 %v169_v54  ;;  %v205_v53 = vld [vmem:[#allocation5 + $0x3f8] sm:$0xff]  ;;  %v170_v54 = vld [vmem:[#allocation5 + $0x2e0] sm:$0xff] }
  0x9b   :  { %713 = vmatpush1.msra.mxu0 %v150_v55  ;;  %800 = vmatpush1.msra.mxu1 %v168_v56  ;;  %v204_v55 = vld [vmem:[#allocation5 + $0x3f0] sm:$0xff]  ;;  %v155_v56 = vld [vmem:[#allocation5 + $0x268] sm:$0xff] }
  0x9c   :  { %714 = vmatprep.subr.mxu0 %v135_v57  ;;  %801 = vmatprep.subr.mxu1 %v153_v58  ;;  %v189_v57 = vld [vmem:[#allocation5 + $0x378] sm:$0xff]  ;;  %v154_v58 = vld [vmem:[#allocation5 + $0x260] sm:$0xff] }
  0x9d   :  { %683 = vmatprep.mubr.f32.mxu1 %v4501_v0  ;;  %715 = vmatpush1.msra.mxu0 %v134_v59  ;;  %v188_v59 = vld [vmem:[#allocation5 + $0x370] sm:$0xff] }
  0x9e   :  { %802 = vmatpush1.msra.mxu1 %v152_v60  ;;  %716 = vmatprep.subr.mxu0 %v119_v61  ;;  %v139_v60 = vld [vmem:[#allocation5 + $0x1e8] sm:$0xff]  ;;  %v173_v61 = vld [vmem:[#allocation5 + $0x2f8] sm:$0xff] }
  0x9f   :  { %684 = vmatmul.mubr.f32.gmra.mxu1 %v4572_v47  ;;  %803 = vmatprep.subr.mxu1 %v137_v62  ;;  %v138_v62 = vld [vmem:[#allocation5 + $0x1e0] sm:$0xff] }
  0xa0   :  { %717 = vmatpush1.msra.mxu0 %v118_v63  ;;  %804 = vmatpush1.msra.mxu1 %v136_v1  ;;  %v172_v63 = vld [vmem:[#allocation5 + $0x2f0] sm:$0xff]  ;;  %v123_v1 = vld [vmem:[#allocation5 + $0x168] sm:$0xff] }
  0xa1   :  { %718 = vmatprep.subr.mxu0 %v103_v3  ;;  %805 = vmatprep.subr.mxu1 %v121_v4  ;;  %v157_v3 = vld [vmem:[#allocation5 + $0x278] sm:$0xff]  ;;  %v122_v4 = vld [vmem:[#allocation5 + $0x160] sm:$0xff] }
  0xa2   :  { %719 = vmatpush1.msra.mxu0 %v102_v5  ;;  %806 = vmatpush1.msra.mxu1 %v120_v6  ;;  %v156_v5 = vld [vmem:[#allocation5 + $0x270] sm:$0xff]  ;;  %v107_v6 = vld [vmem:[#allocation5 + $0xe8] sm:$0xff] }
  0xa3   :  { %720 = vmatprep.subr.mxu0 %v87_v7  ;;  %807 = vmatprep.subr.mxu1 %v105_v8  ;;  %v141_v7 = vld [vmem:[#allocation5 + $0x1f8] sm:$0xff]  ;;  %v106_v8 = vld [vmem:[#allocation5 + $0xe0] sm:$0xff] }
  0xa4   :  { %721 = vmatpush1.msra.mxu0 %v86_v9  ;;  %754 = vmatprep.mubr.f32.mxu0 %v4501_v0  ;;  %v140_v9 = vld [vmem:[#allocation5 + $0x1f0] sm:$0xff] }
  0xa5   :  { %808 = vmatpush1.msra.mxu1 %v104_v10  ;;  %755 = vmatmul.mubr.f32.vlgmr.msra.gmra.mxu0 %v4556_v2  ;;  %v91_v10 = vld [vmem:[#allocation5 + $0x68] sm:$0xff] }
  0xa6   :  { %809 = vmatprep.subr.mxu1 %v89_v11  ;;  %868 = vmatprep.subr.mxu0 %v331_v12  ;;  %v125_v11 = vld [vmem:[#allocation5 + $0x178] sm:$0xff]  ;;  %v90_v12 = vld [vmem:[#allocation5 + $0x60] sm:$0xff] }
  0xa7   :  { %810 = vmatpush1.msra.mxu1 %v88_v13  ;;  %843 = vmatprep.mubr.f32.mxu1 %v4501_v0  ;;  %v124_v13 = vld [vmem:[#allocation5 + $0x170] sm:$0xff] }
  0xa8   :  { %869 = vmatpush1.msra.mxu0 %v330_v15  ;;  %844 = vmatmul.mubr.f32.vlgmr.msra.gmra.mxu1 %v4556_v2  ;;  %v109_v15 = vld [vmem:[#allocation5 + $0xf8] sm:$0xff] }
  0xa9   :  { %870 = vmatprep.subr.mxu0 %v315_v16  ;;  %957 = vmatprep.subr.mxu1 %v333_v17  ;;  %v108_v16 = vld [vmem:[#allocation5 + $0xf0] sm:$0xff]  ;;  %v93_v17 = vld [vmem:[#allocation5 + $0x78] sm:$0xff] }
  0xaa   :  { %871 = vmatpush1.msra.mxu0 %v314_v18  ;;  %760 = vmatprep.mubr.f32.mxu0 %v4501_v0  ;;  %v92_v18 = vld [vmem:[#allocation5 + $0x70] sm:$0xff] }
  0xab   :  { %872 = vmatprep.subr.mxu0 %v299_v19  ;;  %958 = vmatpush1.msra.mxu1 %v332_v20 }
  0xac   :  { %873 = vmatpush1.msra.mxu0 %v298_v21  ;;  %959 = vmatprep.subr.mxu1 %v317_v22  ;;  %v4631_v21 = vld [vmem:[#allocation8] sm:$0xff] }
  0xad   :  { %761 = vmatmul.mubr.f32.gmra.mxu0 %v4561_v14  ;;  %874 = vmatprep.subr.mxu0 %v283_v23 }
  0xae   :  { %875 = vmatpush1.msra.mxu0 %v282_v24  ;;  %960 = vmatpush1.msra.mxu1 %v316_v25 }
  0xaf   :  { %876 = vmatprep.subr.mxu0 %v267_v26  ;;  %961 = vmatprep.subr.mxu1 %v301_v27 }
  0xb0   :  { %849 = vmatprep.mubr.f32.mxu1 %v4501_v0  ;;  %877 = vmatpush1.msra.mxu0 %v266_v28 }
  0xb1   :  { %962 = vmatpush1.msra.mxu1 %v300_v29  ;;  %878 = vmatprep.subr.mxu0 %v251_v31 }
  0xb2   :  { %850 = vmatmul.mubr.f32.gmra.mxu1 %v4561_v14  ;;  %963 = vmatprep.subr.mxu1 %v285_v32 }
  0xb3   :  { %879 = vmatpush1.msra.mxu0 %v250_v33  ;;  %964 = vmatpush1.msra.mxu1 %v284_v34 }
  0xb4   :  { %880 = vmatprep.subr.mxu0 %v235_v35  ;;  %965 = vmatprep.subr.mxu1 %v269_v36 }
  0xb5   :  { %766 = vmatprep.mubr.f32.mxu0 %v4501_v0  ;;  %881 = vmatpush1.msra.mxu0 %v234_v37 }
  0xb6   :  { %966 = vmatpush1.msra.mxu1 %v268_v38  ;;  %767 = vmatmul.mubr.f32.gmra.mxu0 %v4566_v30 }
  0xb7   :  { %882 = vmatprep.subr.mxu0 %v219_v39  ;;  %967 = vmatprep.subr.mxu1 %v253_v40 }
  0xb8   :  { %883 = vmatpush1.msra.mxu0 %v218_v41  ;;  %968 = vmatpush1.msra.mxu1 %v252_v42 }
  0xb9   :  { %884 = vmatprep.subr.mxu0 %v203_v43  ;;  %969 = vmatprep.subr.mxu1 %v237_v44 }
  0xba   :  { %855 = vmatprep.mubr.f32.mxu1 %v4501_v0  ;;  %885 = vmatpush1.msra.mxu0 %v202_v45 }
  0xbb   :  { %970 = vmatpush1.msra.mxu1 %v236_v46  ;;  %886 = vmatprep.subr.mxu0 %v187_v48 }
  0xbc   :  { %856 = vmatmul.mubr.f32.gmra.mxu1 %v4566_v30  ;;  %971 = vmatprep.subr.mxu1 %v221_v49 }
  0xbd   :  { %887 = vmatpush1.msra.mxu0 %v186_v50  ;;  %972 = vmatpush1.msra.mxu1 %v220_v51 }
  0xbe   :  { %888 = vmatprep.subr.mxu0 %v171_v52  ;;  %973 = vmatprep.subr.mxu1 %v205_v53 }
  0xbf   :  { %772 = vmatprep.mubr.f32.mxu0 %v4501_v0  ;;  %889 = vmatpush1.msra.mxu0 %v170_v54 }
  0xc0   :  { %974 = vmatpush1.msra.mxu1 %v204_v55  ;;  %773 = vmatmul.mubr.f32.gmra.mxu0 %v4572_v47 }
  0xc1   :  { %890 = vmatprep.subr.mxu0 %v155_v56  ;;  %975 = vmatprep.subr.mxu1 %v189_v57 }
  0xc2   :  { %891 = vmatpush1.msra.mxu0 %v154_v58  ;;  %976 = vmatpush1.msra.mxu1 %v188_v59 }
  0xc3   :  { %892 = vmatprep.subr.mxu0 %v139_v60  ;;  %977 = vmatprep.subr.mxu1 %v173_v61 }
  0xc4   :  { %861 = vmatprep.mubr.f32.mxu1 %v4501_v0  ;;  %893 = vmatpush1.msra.mxu0 %v138_v62 }
  0xc5   :  { %978 = vmatpush1.msra.mxu1 %v172_v63  ;;  %894 = vmatprep.subr.mxu0 %v123_v1 }
  0xc6   :  { %862 = vmatmul.mubr.f32.gmra.mxu1 %v4572_v47  ;;  %979 = vmatprep.subr.mxu1 %v157_v3 }
  0xc7   :  { %895 = vmatpush1.msra.mxu0 %v122_v4  ;;  %980 = vmatpush1.msra.mxu1 %v156_v5 }
  0xc8   :  { %896 = vmatprep.subr.mxu0 %v107_v6  ;;  %981 = vmatprep.subr.mxu1 %v141_v7 }
  0xc9   :  { %897 = vmatpush1.msra.mxu0 %v106_v8  ;;  %982 = vmatpush1.msra.mxu1 %v140_v9 }
  0xca   :  { %898 = vmatprep.subr.mxu0 %v91_v10  ;;  %983 = vmatprep.subr.mxu1 %v125_v11 }
  0xcb   :  { %899 = vmatpush1.msra.mxu0 %v90_v12  ;;  %932 = vmatprep.mubr.f32.mxu0 %v4501_v0 }
  0xcc   :  { %984 = vmatpush1.msra.mxu1 %v124_v13  ;;  %933 = vmatmul.mubr.f32.vlgmr.msra.gmra.mxu0 %v4556_v2 }
  0xcd   :  { %985 = vmatprep.subr.mxu1 %v109_v15  ;;  %1021 = vmatprep.mubr.f32.mxu1 %v4501_v0 }
  0xce   :  { %986 = vmatpush1.msra.mxu1 %v108_v16  ;;  %938 = vmatprep.mubr.f32.mxu0 %v4501_v0 }
  0xcf   :  { %987 = vmatprep.subr.mxu1 %v93_v17 }
  0xd0   :  { %988 = vmatpush1.msra.mxu1 %v92_v18  ;;  %939 = vmatmul.mubr.f32.gmra.mxu0 %v4561_v14 }
  0xd1   :  { %1022 = vmatmul.mubr.f32.vlgmr.msra.gmra.mxu1 %v4556_v2  ;;  %944 = vmatprep.mubr.f32.mxu0 %v4501_v0  ;;  %v6430_v2 = vlaneseq }
  0xd2   :  { %1027 = vmatprep.mubr.f32.mxu1 %v4501_v0 }
  0xd3   :  { %v4627_v19 = vshrl.u32 %v6430_v2, 7 }
  0xd4   :  { %945 = vmatmul.mubr.f32.gmra.mxu0 %v4566_v30 }
  0xd5   :  { %1028 = vmatmul.mubr.f32.gmra.mxu1 %v4561_v14  ;;  %950 = vmatprep.mubr.f32.mxu0 %v4501_v0  ;;  %6568 = vst [vmem:[#allocation18_spill] sm:$0xff] %v4627_v19  ;;  %v1052_v20 = vsub.s32 0, %v4627_v19  ;;  %v1060_v14 = vsub.s32 2, %v4627_v19  ;;  %v1064_v22 = vsub.s32 3, %v4627_v19  ;;  %v1068_v55 = vsub.s32 4, %v4627_v19 }
  0xd6   :  { %1033 = vmatprep.mubr.f32.mxu1 %v4501_v0  ;;  %v1072_v58 = vsub.s32 5, %v4627_v19  ;;  %v1076_v60 = vsub.s32 6, %v4627_v19  ;;  %v1080_v1 = vsub.s32 7, %v4627_v19 }
  0xd7   :  { %v1065_v23 = vrot.slane %v4631_v21, %v1064_v22  ;;  %v1069_v62 = vrot.slane %v4631_v21, %v1068_v55 }
  0xd8   :  { %951 = vmatmul.mubr.f32.gmra.mxu0 %v4572_v47  ;;  %v1073_v63 = vrot.slane %v4631_v21, %v1072_v58  ;;  %v1077_v4 = vrot.slane %v4631_v21, %v1076_v60  ;;  %v1081_v9 = vrot.slane %v4631_v21, %v1080_v1 }
  0xd9   :  { %1034 = vmatmul.mubr.f32.gmra.mxu1 %v4566_v30  ;;  %v1053_v30 = vrot.slane %v4631_v21, %v1052_v20 }
  0xda   :  { %1039 = vmatprep.mubr.f32.mxu1 %v4501_v0  ;;  %v1061_v0 = vrot.slane %v4631_v21, %v1060_v14 }
  0xdd   :  { %1040 = vmatmul.mubr.f32.gmra.mxu1 %v4572_v47  ;;  %v1056_v47 = vsub.s32 1, %v4627_v19 }
  0xdf   :  { %v1057_v28 = vrot.slane %v4631_v21, %v1056_v47 }
 0x117   :  { %v400_v24 = vpop.f32.mrf.mxu0  ;;  %v489_v25 = vpop.f32.mrf.mxu1 }
 0x118   :  { %v4644_v26 = vsub.f32 %v1053_v30, %v400_v24  ;;  %v4646_v27 = vsub.f32 %v1061_v0, %v489_v25 }
 0x119   :  { %v402_v29 = vpop.f32.mrf.mxu0  ;;  %v491_v31 = vpop.f32.mrf.mxu1 }
 0x11a   :  { %1415 = vmin.xlane.f32.xlu1 %v4646_v27  ;;  %1207 = vmin.xlane.f32.xlu0 %v4644_v26  ;;  %v4653_v32 = vsub.f32 %v1065_v23, %v491_v31  ;;  %v4655_v33 = vsub.f32 %v1057_v28, %v402_v29 }
 0x11e   :  { %v406_v34 = vpop.f32.mrf.mxu0  ;;  %1519 = vmin.xlane.f32.xlu1 %v4653_v32  ;;  %1311 = vmin.xlane.f32.xlu0 %v4655_v33 }
 0x11f   :  { %v4659_v35 = vsub.f32 %v1053_v30, %v406_v34 }
 0x120   :  { %v408_v36 = vpop.f32.mrf.mxu0 }
 0x121   :  { %v4661_v37 = vsub.f32 %v1057_v28, %v408_v36 }
 0x122   :  { %1209 = vmin.xlane.f32.xlu1 %v4659_v35 }
 0x123   :  { %v495_v38 = vpop.f32.mrf.mxu1  ;;  %1313 = vmin.xlane.f32.xlu0 %v4661_v37 }
 0x124   :  { %v4665_v39 = vsub.f32 %v1061_v0, %v495_v38 }
 0x125   :  { %v497_v40 = vpop.f32.mrf.mxu1 }
 0x126   :  { %v4667_v41 = vsub.f32 %v1065_v23, %v497_v40  ;;  %1417 = vmin.xlane.f32.xlu1 %v4665_v39 }
 0x127   :  { %v412_v42 = vpop.f32.mrf.mxu0 }
 0x128   :  { %v4670_v43 = vsub.f32 %v1053_v30, %v412_v42  ;;  %1521 = vmin.xlane.f32.xlu0 %v4667_v41 }
 0x129   :  { %v414_v44 = vpop.f32.mrf.mxu0 }
 0x12a   :  { %v4673_v45 = vsub.f32 %v1057_v28, %v414_v44  ;;  %1211 = vmin.xlane.f32.xlu1 %v4670_v43 }
 0x12c   :  { %1315 = vmin.xlane.f32.xlu0 %v4673_v45 }
 0x12d   :  { %v501_v46 = vpop.f32.mrf.mxu1 }
 0x12e   :  { %v4677_v48 = vsub.f32 %v1061_v0, %v501_v46 }
 0x12f   :  { %v503_v49 = vpop.f32.mrf.mxu1 }
 0x130   :  { %v4679_v50 = vsub.f32 %v1065_v23, %v503_v49  ;;  %1419 = vmin.xlane.f32.xlu1 %v4677_v48  ;;  %v4753_v49 = vld [vmem:[#allocation8 + $0x8] sm:$0xff] }
 0x131   :  { %v418_v51 = vpop.f32.mrf.mxu0 }
 0x132   :  { %v4682_v52 = vsub.f32 %v1053_v30, %v418_v51  ;;  %1523 = vmin.xlane.f32.xlu0 %v4679_v50 }
 0x133   :  { %v420_v53 = vpop.f32.mrf.mxu0 }
 0x134   :  { %v4685_v54 = vsub.f32 %v1057_v28, %v420_v53  ;;  %1213 = vmin.xlane.f32.xlu1 %v4682_v52 }
 0x136   :  { %1317 = vmin.xlane.f32.xlu0 %v4685_v54 }
 0x137   :  { %v507_v56 = vpop.f32.mrf.mxu1 }
 0x138   :  { %v4690_v57 = vsub.f32 %v1061_v0, %v507_v56 }
 0x139   :  { %v509_v59 = vpop.f32.mrf.mxu1 }
 0x13a   :  { %v4694_v61 = vsub.f32 %v1065_v23, %v509_v59  ;;  %1421 = vmin.xlane.f32.xlu1 %v4690_v57  ;;  %v1085_v59 = vrot.slane %v4753_v49, %v1052_v20  ;;  %v1097_v20 = vrot.slane %v4753_v49, %v1064_v22 }
 0x13c   :  { %1525 = vmin.xlane.f32.xlu0 %v4694_v61 }
 0x13d   :  { %v578_v3 = vpop.f32.mrf.mxu0 }
 0x13e   :  { %v4708_v5 = vsub.f32 %v1069_v62, %v578_v3  ;;  %v1093_v3 = vrot.slane %v4753_v49, %v1060_v14 }
 0x13f   :  { %v580_v6 = vpop.f32.mrf.mxu0 }
 0x140   :  { %v4710_v7 = vsub.f32 %v1073_v63, %v580_v6  ;;  %v667_v8 = vpop.f32.mrf.mxu1  ;;  %1623 = vmin.xlane.f32.xlu1 %v4708_v5 }
 0x141   :  { %v4716_v10 = vsub.f32 %v1077_v4, %v667_v8 }
 0x142   :  { %v669_v11 = vpop.f32.mrf.mxu1  ;;  %1727 = vmin.xlane.f32.xlu0 %v4710_v7 }
 0x143   :  { %v4719_v12 = vsub.f32 %v1081_v9, %v669_v11 }
 0x144   :  { %1831 = vmin.xlane.f32.xlu1 %v4716_v10 }
 0x145   :  { %v584_v13 = vpop.f32.mrf.mxu0 }
 0x146   :  { %v4722_v15 = vsub.f32 %v1069_v62, %v584_v13  ;;  %1935 = vmin.xlane.f32.xlu0 %v4719_v12 }
 0x147   :  { %v586_v16 = vpop.f32.mrf.mxu0 }
 0x148   :  { %v4725_v17 = vsub.f32 %v1073_v63, %v586_v16  ;;  %1625 = vmin.xlane.f32.xlu1 %v4722_v15 }
 0x14a   :  { %1729 = vmin.xlane.f32.xlu0 %v4725_v17 }
 0x14b   :  { %v673_v18 = vpop.f32.mrf.mxu1 }
 0x14c   :  { %v4729_v21 = vsub.f32 %v1077_v4, %v673_v18 }
 0x14d   :  { %v675_v30 = vpop.f32.mrf.mxu1 }
 0x14e   :  { %v4731_v0 = vsub.f32 %v1081_v9, %v675_v30  ;;  %1833 = vmin.xlane.f32.xlu1 %v4729_v21 }
 0x14f   :  { %v590_v23 = vpop.f32.mrf.mxu0 }
 0x150   :  { %v4734_v24 = vsub.f32 %v1069_v62, %v590_v23  ;;  %1937 = vmin.xlane.f32.xlu0 %v4731_v0 }
 0x151   :  { %v592_v25 = vpop.f32.mrf.mxu0 }
 0x152   :  { %v4737_v28 = vsub.f32 %v1073_v63, %v592_v25  ;;  %1627 = vmin.xlane.f32.xlu1 %v4734_v24 }
 0x154   :  { %1731 = vmin.xlane.f32.xlu0 %v4737_v28 }
 0x155   :  { %v679_v29 = vpop.f32.mrf.mxu1 }
 0x156   :  { %v4741_v31 = vsub.f32 %v1077_v4, %v679_v29 }
 0x157   :  { %v681_v34 = vpop.f32.mrf.mxu1 }
 0x158   :  { %v4743_v36 = vsub.f32 %v1081_v9, %v681_v34  ;;  %1835 = vmin.xlane.f32.xlu1 %v4741_v31 }
 0x159   :  { %v596_v38 = vpop.f32.mrf.mxu0 }
 0x15a   :  { %v4746_v40 = vsub.f32 %v1069_v62, %v596_v38  ;;  %1939 = vmin.xlane.f32.xlu0 %v4743_v36  ;;  %v1089_v62 = vrot.slane %v4753_v49, %v1056_v47 }
 0x15b   :  { %v598_v42 = vpop.f32.mrf.mxu0 }
 0x15c   :  { %v4749_v44 = vsub.f32 %v1073_v63, %v598_v42  ;;  %1629 = vmin.xlane.f32.xlu1 %v4746_v40 }
 0x15e   :  { %1733 = vmin.xlane.f32.xlu0 %v4749_v44 }
 0x15f   :  { %v685_v46 = vpop.f32.mrf.mxu1 }
 0x160   :  { %v4755_v51 = vsub.f32 %v1077_v4, %v685_v46 }
 0x161   :  { %v687_v53 = vpop.f32.mrf.mxu1 }
 0x162   :  { %v4757_v56 = vsub.f32 %v1081_v9, %v687_v53  ;;  %1837 = vmin.xlane.f32.xlu1 %v4755_v51 }
 0x164   :  { %1941 = vmin.xlane.f32.xlu0 %v4757_v56 }
 0x165   :  { %v756_v63 = vpop.f32.mrf.mxu0 }
 0x166   :  { %v4770_v4 = vsub.f32 %v1085_v59, %v756_v63 }
 0x167   :  { %v758_v6 = vpop.f32.mrf.mxu0 }
 0x168   :  { %v4772_v8 = vsub.f32 %v1089_v62, %v758_v6  ;;  %v845_v9 = vpop.f32.mrf.mxu1  ;;  %2039 = vmin.xlane.f32.xlu1 %v4770_v4 }
 0x169   :  { %v4778_v11 = vsub.f32 %v1093_v3, %v845_v9 }
 0x16a   :  { %v847_v47 = vpop.f32.mrf.mxu1  ;;  %2143 = vmin.xlane.f32.xlu0 %v4772_v8 }
 0x16b   :  { %v4781_v13 = vsub.f32 %v1097_v20, %v847_v47 }
 0x16c   :  { %2247 = vmin.xlane.f32.xlu1 %v4778_v11 }
 0x16d   :  { %v762_v14 = vpop.f32.mrf.mxu0 }
 0x16e   :  { %v4784_v16 = vsub.f32 %v1085_v59, %v762_v14  ;;  %2351 = vmin.xlane.f32.xlu0 %v4781_v13 }
 0x16f   :  { %v764_v18 = vpop.f32.mrf.mxu0 }
 0x170   :  { %v4787_v30 = vsub.f32 %v1089_v62, %v764_v18  ;;  %2041 = vmin.xlane.f32.xlu1 %v4784_v16 }
 0x172   :  { %v851_v22 = vpop.f32.mrf.mxu1  ;;  %2145 = vmin.xlane.f32.xlu0 %v4787_v30 }
 0x173   :  { %v4791_v23 = vsub.f32 %v1093_v3, %v851_v22 }
 0x174   :  { %v853_v25 = vpop.f32.mrf.mxu1 }
 0x175   :  { %v4793_v29 = vsub.f32 %v1097_v20, %v853_v25  ;;  %2249 = vmin.xlane.f32.xlu1 %v4791_v23 }
 0x176   :  { %v768_v34 = vpop.f32.mrf.mxu0 }
 0x177   :  { %v4796_v38 = vsub.f32 %v1085_v59, %v768_v34  ;;  %2353 = vmin.xlane.f32.xlu0 %v4793_v29 }
 0x178   :  { %v770_v42 = vpop.f32.mrf.mxu0 }
 0x179   :  { %v4799_v46 = vsub.f32 %v1089_v62, %v770_v42  ;;  %2043 = vmin.xlane.f32.xlu1 %v4796_v38 }
 0x17b   :  { %2147 = vmin.xlane.f32.xlu0 %v4799_v46 }
 0x17c   :  { %v857_v53 = vpop.f32.mrf.mxu1 }
 0x17d   :  { %v4803_v63 = vsub.f32 %v1093_v3, %v857_v53 }
 0x17e   :  { %v859_v6 = vpop.f32.mrf.mxu1 }
 0x17f   :  { %v4805_v9 = vsub.f32 %v1097_v20, %v859_v6  ;;  %2251 = vmin.xlane.f32.xlu1 %v4803_v63 }
 0x180   :  { %v774_v47 = vpop.f32.mrf.mxu0 }
 0x181   :  { %v4808_v14 = vsub.f32 %v1085_v59, %v774_v47  ;;  %2355 = vmin.xlane.f32.xlu0 %v4805_v9  ;;  %v4823_v59 = vrot.slane %v4753_v49, %v1068_v55  ;;  %v4838_v47 = vrot.slane %v4753_v49, %v1072_v58 }
 0x182   :  { %v776_v18 = vpop.f32.mrf.mxu0 }
 0x183   :  { %v4811_v22 = vsub.f32 %v1089_v62, %v776_v18  ;;  %2045 = vmin.xlane.f32.xlu1 %v4808_v14 }
 0x185   :  { %2149 = vmin.xlane.f32.xlu0 %v4811_v22 }
 0x186   :  { %v863_v25 = vpop.f32.mrf.mxu1 }
 0x187   :  { %v4815_v34 = vsub.f32 %v1093_v3, %v863_v25  ;;  %v4832_v3 = vrot.slane %v4753_v49, %v1076_v60  ;;  %v4850_v60 = vrot.slane %v4753_v49, %v1080_v1  ;;  %v6575_v1 = vlaneseq }
 0x188   :  { %v865_v42 = vpop.f32.mrf.mxu1 }
 0x189   :  { %v4817_v53 = vsub.f32 %v1097_v20, %v865_v42  ;;  %2253 = vmin.xlane.f32.xlu1 %v4815_v34  ;;  %v4865_v49 = vand.u32 127, %v6575_v1 }
 0x18b   :  { %2357 = vmin.xlane.f32.xlu0 %v4817_v53 }
 0x18c   :  { %v934_v62 = vpop.f32.mrf.mxu0 }
 0x18d   :  { %v4827_v6 = vsub.f32 %v4823_v59, %v934_v62 }
 0x18e   :  { %v936_v18 = vpop.f32.mrf.mxu0 }
 0x18f   :  { %6569 = vst [vmem:[#allocation19_spill] sm:$0xff] %v4827_v6  ;;  %2455 = vmin.xlane.f32.xlu0 %v4827_v6  ;;  %v4845_v25 = vsub.f32 %v4838_v47, %v936_v18 }
 0x190   :  { %v940_v62 = vpop.f32.mrf.mxu0 }
 0x191   :  { %v1023_v20 = vpop.f32.mrf.mxu1  ;;  %6571 = vst [vmem:[#allocation21_spill] sm:$0xff] %v4845_v25 }
 0x192   :  { %v4841_v55 = vsub.f32 %v4832_v3, %v1023_v20  ;;  %v4857_v20 = vsub.f32 %v4823_v59, %v940_v62  ;;  %v942_v19 = vpop.f32.mrf.mxu0 }
 0x193   :  { %v1025_v42 = vpop.f32.mrf.mxu1  ;;  %v4877_v62 = vsub.f32 %v4838_v47, %v942_v19 }
 0x194   :  { %6570 = vst [vmem:[#allocation20_spill] sm:$0xff] %v4841_v55  ;;  %2663 = vmin.xlane.f32.xlu0 %v4841_v55  ;;  %v4854_v58 = vsub.f32 %v4850_v60, %v1025_v42  ;;  %6573 = vst [vmem:[#allocation23_spill] sm:$0xff] %v4857_v20  ;;  %v946_v19 = vpop.f32.mrf.mxu0 }
 0x195   :  { %v1029_v2 = vpop.f32.mrf.mxu1  ;;  %6578 = vst [vmem:[#allocation27_spill] sm:$0xff] %v4877_v62 }
 0x196   :  { %6572 = vst [vmem:[#allocation22_spill] sm:$0xff] %v4854_v58  ;;  %v4861_v18 = vsub.f32 %v4832_v3, %v1029_v2 }
 0x197   :  { %v1031_v1 = vpop.f32.mrf.mxu1 }
 0x198   :  { %2559 = vmin.xlane.f32.xlu0 %v4845_v25  ;;  %6574 = vst [vmem:[#allocation24_spill] sm:$0xff] %v4861_v18 }
 0x19c   :  { %2767 = vmin.xlane.f32.xlu0 %v4854_v58 }
 0x1a0   :  { %2457 = vmin.xlane.f32.xlu0 %v4857_v20 }
 0x1a3   :  { %v1416_v25 = vpop.xlane.xlu1 %1415  ;;  %v1208_v55 = vpop.xlane.xlu0 %1207 }
 0x1a4   :  { %2665 = vmin.xlane.f32.xlu0 %v4861_v18  ;;  %vm1423_vm0 = vcmp.eq.f32.partialorder %v4646_v27, %v1416_v25  ;;  %vm1215_vm1 = vcmp.eq.f32.partialorder %v4644_v26, %v1208_v55  ;;  %v4889_v55 = vsub.f32 %v4850_v60, %v1031_v1  ;;  %v4893_v18 = vsub.f32 %v4823_v59, %v946_v19 }
 0x1a5   :  { %v4871_v42 = vsel %vm1423_vm0, %v4865_v49, 128  ;;  %v4874_v2 = vsel %vm1215_vm1, %v4865_v49, 128 }
 0x1a6   :  { %6576 = vst [vmem:[#allocation25_spill] sm:$0xff] %v4871_v42  ;;  %6577 = vst [vmem:[#allocation26_spill] sm:$0xff] %v4874_v2  ;;  %v1224_v20 = vshra.s32 %v4874_v2, 16  ;;  %v1432_v26 = vshra.s32 %v4871_v42, 16 }
 0x1a7   :  { %v4880_v58 = vpop.xlane.xlu1 %1519  ;;  %v4882_v6 = vpop.xlane.xlu0 %1311  ;;  %6580 = vst [vmem:[#allocation29_spill] sm:$0xff] %v4893_v18 }
 0x1a8   :  { %2561 = vmin.xlane.f32.xlu0 %v4877_v62  ;;  %v4885_v27 = vcvt.s32.f32 %v1224_v20  ;;  %v4897_v62 = vcvt.s32.f32 %v1432_v26  ;;  %vm1319_vm10 = vcmp.eq.f32.partialorder %v4655_v33, %v4882_v6  ;;  %vm1527_vm12 = vcmp.eq.f32.partialorder %v4653_v32, %v4880_v58 }
 0x1a9   :  { %v5002_v32 = vsel %vm1527_vm12, %v4865_v49, 128 }
 0x1aa   :  { %6579 = vst [vmem:[#allocation28_spill] sm:$0xff] %v4885_v27  ;;  %1227 = vmin.xlane.f32.xlu1 %v4885_v27  ;;  %6581 = vst [vmem:[#allocation30_spill] sm:$0xff] %v4897_v62  ;;  %v1035_v27 = vpop.f32.mrf.mxu1 }
 0x1ab   :  { %v1210_v25 = vpop.xlane.xlu1 %1209  ;;  %v4906_v19 = vsub.f32 %v4832_v3, %v1035_v27 }
 0x1ac   :  { %2769 = vmin.xlane.f32.xlu0 %v4889_v55  ;;  %vm1216_vm2 = vcmp.eq.f32.partialorder %v4659_v35, %v1210_v25  ;;  %v1314_v2 = vpop.xlane.xlu0 %1313  ;;  %v948_v25 = vpop.f32.mrf.mxu0 }
 0x1ad   :  { %v4900_v20 = vsel %vm1216_vm2, %v4865_v49, 128  ;;  %vm1320_vm3 = vcmp.eq.f32.partialorder %v4661_v37, %v1314_v2  ;;  %6583 = vst [vmem:[#allocation32_spill] sm:$0xff] %v4906_v19 }
 0x1ae   :  { %6582 = vst [vmem:[#allocation31_spill] sm:$0xff] %v4900_v20  ;;  %1435 = vmin.xlane.f32.xlu1 %v4897_v62  ;;  %v1238_v1 = vshra.s32 %v4900_v20, 16  ;;  %v4913_v26 = vsel %vm1320_vm3, %v4865_v49, 128  ;;  %v4929_v62 = vsub.f32 %v4838_v47, %v948_v25 }
 0x1af   :  { %v1418_v42 = vpop.xlane.xlu1 %1417  ;;  %6584 = vst [vmem:[#allocation33_spill] sm:$0xff] %v4913_v26 }
 0x1b0   :  { %2459 = vmin.xlane.f32.xlu0 %v4893_v18  ;;  %vm1424_vm4 = vcmp.eq.f32.partialorder %v4665_v39, %v1418_v42  ;;  %v4910_v35 = vcvt.s32.f32 %v1238_v1  ;;  %v1342_v42 = vshra.s32 %v4913_v26, 16 }
 0x1b1   :  { %v4916_v37 = vsel %vm1424_vm4, %v4865_v49, 128  ;;  %v1522_v2 = vpop.xlane.xlu0 %1521 }
 0x1b2   :  { %6585 = vst [vmem:[#allocation34_spill] sm:$0xff] %v4916_v37  ;;  %vm1528_vm5 = vcmp.eq.f32.partialorder %v4667_v41, %v1522_v2  ;;  %1241 = vmin.xlane.f32.xlu1 %v4910_v35  ;;  %v1446_v27 = vshra.s32 %v4916_v37, 16  ;;  %v1037_v41 = vpop.f32.mrf.mxu1  ;;  %v4934_v2 = vcvt.s32.f32 %v1342_v42 }
 0x1b3   :  { %v1212_v20 = vpop.xlane.xlu1 %1211  ;;  %v4926_v1 = vsel %vm1528_vm5, %v4865_v49, 128  ;;  %v4941_v37 = vsub.f32 %v4850_v60, %v1037_v41 }
 0x1b4   :  { %2667 = vmin.xlane.f32.xlu0 %v4906_v19  ;;  %v4922_v39 = vcvt.s32.f32 %v1446_v27  ;;  %6587 = vst [vmem:[#allocation36_spill] sm:$0xff] %v4926_v1  ;;  %vm1217_vm6 = vcmp.eq.f32.partialorder %v4670_v43, %v1212_v20  ;;  %v1550_v27 = vshra.s32 %v4926_v1, 16  ;;  %v952_v43 = vpop.f32.mrf.mxu0 }
 0x1b5   :  { %v1316_v18 = vpop.xlane.xlu0 %1315  ;;  %v4938_v19 = vsel %vm1217_vm6, %v4865_v49, 128  ;;  %v4946_v25 = vsub.f32 %v4823_v59, %v952_v43 }
 0x1b6   :  { %6586 = vst [vmem:[#allocation35_spill] sm:$0xff] %v4922_v39  ;;  %1449 = vmin.xlane.f32.xlu1 %v4922_v39  ;;  %6588 = vst [vmem:[#allocation37_spill] sm:$0xff] %v4938_v19  ;;  %v4949_v42 = vcvt.s32.f32 %v1550_v27  ;;  %v1252_v1 = vshra.s32 %v4938_v19, 16  ;;  %vm1321_vm8 = vcmp.eq.f32.partialorder %v4673_v45, %v1316_v18  ;;  %v954_v45 = vpop.f32.mrf.mxu0 }
 0x1b7   :  { %v4965_v43 = vsel %vm1321_vm8, %v4865_v49, 128 }
 0x1b8   :  { %2563 = vmin.xlane.f32.xlu0 %v4929_v62  ;;  %v4961_v59 = vcvt.s32.f32 %v1252_v1  ;;  %6590 = vst [vmem:[#allocation39_spill] sm:$0xff] %v4965_v43  ;;  %v1356_v1 = vshra.s32 %v4965_v43, 16 }
 0x1b9   :  { %v1420_v26 = vpop.xlane.xlu1 %1419 }
 0x1ba   :  { %vm1425_vm7 = vcmp.eq.f32.partialorder %v4677_v48, %v1420_v26  ;;  %1345 = vmin.xlane.f32.xlu1 %v4934_v2  ;;  %v1041_v48 = vpop.f32.mrf.mxu1 }
 0x1bb   :  { %v1524_v20 = vpop.xlane.xlu0 %1523  ;;  %v4953_v39 = vsel %vm1425_vm7, %v4865_v49, 128  ;;  %v4958_v26 = vsub.f32 %v4832_v3, %v1041_v48 }
 0x1bc   :  { %2771 = vmin.xlane.f32.xlu0 %v4941_v37  ;;  %6589 = vst [vmem:[#allocation38_spill] sm:$0xff] %v4953_v39  ;;  %v1460_v27 = vshra.s32 %v4953_v39, 16  ;;  %vm1529_vm9 = vcmp.eq.f32.partialorder %v4679_v50, %v1524_v20  ;;  %v4979_v39 = vsub.f32 %v4838_v47, %v954_v45  ;;  %v4984_v50 = vsel %vm1319_vm10, %v4865_v49, 128  ;;  %v1043_v33 = vpop.f32.mrf.mxu1 }
 0x1bd   :  { %v1214_v41 = vpop.xlane.xlu1 %1213  ;;  %v4976_v48 = vsel %vm1529_vm9, %v4865_v49, 128  ;;  %v4989_v20 = vcvt.s32.f32 %v1356_v1  ;;  %v1328_v45 = vshra.s32 %v4984_v50, 16 }
 0x1be   :  { %1553 = vmin.xlane.f32.xlu1 %v4949_v42  ;;  %v4972_v3 = vcvt.s32.f32 %v1460_v27  ;;  %6592 = vst [vmem:[#allocation41_spill] sm:$0xff] %v4976_v48  ;;  %vm1218_vm11 = vcmp.eq.f32.partialorder %v4682_v52, %v1214_v41  ;;  %v1564_v27 = vshra.s32 %v4976_v48, 16  ;;  %v4996_v41 = vsub.f32 %v4850_v60, %v1043_v33 }
 0x1bf   :  { %v1318_v19 = vpop.xlane.xlu0 %1317  ;;  %6593 = vst [vmem:[#allocation42_spill] sm:$0xff] %v4989_v20  ;;  %v4993_v47 = vsel %vm1218_vm11, %v4865_v49, 128  ;;  %v5012_v33 = vcvt.s32.f32 %v1328_v45 }
 0x1c0   :  { %2461 = vmin.xlane.f32.xlu0 %v4946_v25  ;;  %6591 = vst [vmem:[#allocation40_spill] sm:$0xff] %v4972_v3  ;;  %6594 = vst [vmem:[#allocation43_spill] sm:$0xff] %v4993_v47  ;;  %v5005_v1 = vcvt.s32.f32 %v1564_v27  ;;  %v1266_v48 = vshra.s32 %v4993_v47, 16  ;;  %vm1322_vm14 = vcmp.eq.f32.partialorder %v4685_v54, %v1318_v19 }
 0x1c1   :  { %v5021_v47 = vsel %vm1322_vm14, %v4865_v49, 128 }
 0x1c2   :  { %1255 = vmin.xlane.f32.xlu1 %v4961_v59  ;;  %6595 = vst [vmem:[#allocation44_spill] sm:$0xff] %v5005_v1  ;;  %6597 = vst [vmem:[#allocation46_spill] sm:$0xff] %v5021_v47 }
 0x1c3   :  { %v1422_v18 = vpop.xlane.xlu1 %1421 }
 0x1c4   :  { %2669 = vmin.xlane.f32.xlu0 %v4958_v26  ;;  %vm1426_vm13 = vcmp.eq.f32.partialorder %v4690_v57, %v1422_v18  ;;  %v1536_v57 = vshra.s32 %v5002_v32, 16 }
 0x1c5   :  { %v1526_v6 = vpop.xlane.xlu0 %1525  ;;  %v5009_v43 = vsel %vm1426_vm13, %v4865_v49, 128 }
 0x1c6   :  { %1463 = vmin.xlane.f32.xlu1 %v4972_v3  ;;  %6596 = vst [vmem:[#allocation45_spill] sm:$0xff] %v5009_v43  ;;  %v1474_v27 = vshra.s32 %v5009_v43, 16  ;;  %vm1530_vm15 = vcmp.eq.f32.partialorder %v4694_v61, %v1526_v6  ;;  %v5024_v54 = vcvt.s32.f32 %v1536_v57 }
 0x1c7   :  { %v5033_v43 = vsel %vm1530_vm15, %v4865_v49, 128 }
 0x1c8   :  { %2565 = vmin.xlane.f32.xlu0 %v4979_v39  ;;  %v5029_v45 = vcvt.s32.f32 %v1474_v27  ;;  %6599 = vst [vmem:[#allocation48_spill] sm:$0xff] %v5033_v43  ;;  %v1578_v27 = vshra.s32 %v5033_v43, 16 }
 0x1c9   :  { %v1624_v52 = vpop.xlane.xlu1 %1623 }
 0x1ca   :  { %1359 = vmin.xlane.f32.xlu1 %v4989_v20  ;;  %v5017_v20 = vcvt.s32.f32 %v1266_v48  ;;  %6598 = vst [vmem:[#allocation47_spill] sm:$0xff] %v5029_v45  ;;  %v1370_v48 = vshra.s32 %v5021_v47, 16  ;;  %vm1631_vm1 = vcmp.eq.f32.partialorder %v4708_v5, %v1624_v52 }
 0x1cb   :  { %v1728_v58 = vpop.xlane.xlu0 %1727 }
 0x1cc   :  { %2773 = vmin.xlane.f32.xlu0 %v4996_v41  ;;  %vm1735_vm4 = vcmp.eq.f32.partialorder %v4710_v7, %v1728_v58 }
 0x1cd   :  { %v1832_v60 = vpop.xlane.xlu1 %1831 }
 0x1ce   :  { %1567 = vmin.xlane.f32.xlu1 %v5005_v1  ;;  %vm1839_vm2 = vcmp.eq.f32.partialorder %v4716_v10, %v1832_v60 }
 0x1cf   :  { %v1936_v18 = vpop.xlane.xlu0 %1935 }
 0x1d0   :  { %1331 = vmin.xlane.f32.xlu0 %v5012_v33  ;;  %vm1943_vm6 = vcmp.eq.f32.partialorder %v4719_v12, %v1936_v18 }
 0x1d1   :  { %v1626_v3 = vpop.xlane.xlu1 %1625 }
 0x1d2   :  { %1269 = vmin.xlane.f32.xlu1 %v5017_v20  ;;  %vm1632_vm8 = vcmp.eq.f32.partialorder %v4722_v15, %v1626_v3 }
 0x1d3   :  { %v1730_v19 = vpop.xlane.xlu0 %1729 }
 0x1d4   :  { %1539 = vmin.xlane.f32.xlu0 %v5024_v54  ;;  %vm1736_vm0 = vcmp.eq.f32.partialorder %v4725_v17, %v1730_v19  ;;  %v5043_v17 = vcvt.s32.f32 %v1370_v48  ;;  %v5047_v19 = vsel %vm1631_vm1, %v4865_v49, 128 }
 0x1d5   :  { %v5036_v1 = vsel %vm1736_vm0, %v4865_v49, 128  ;;  %6601 = vst [vmem:[#allocation50_spill] sm:$0xff] %v5047_v19  ;;  %v1640_v43 = vshra.s32 %v5047_v19, 16 }
 0x1d6   :  { %v1758_v61 = vshra.s32 %v5036_v1, 16  ;;  %1477 = vmin.xlane.f32.xlu1 %v5029_v45  ;;  %6600 = vst [vmem:[#allocation49_spill] sm:$0xff] %v5043_v17  ;;  %v5061_v45 = vsel %vm1839_vm2, %v4865_v49, 128 }
 0x1d7   :  { %v1834_v6 = vpop.xlane.xlu1 %1833  ;;  %6602 = vst [vmem:[#allocation51_spill] sm:$0xff] %v5061_v45  ;;  %v1848_v19 = vshra.s32 %v5061_v45, 16 }
 0x1d8   :  { %v5041_v57 = vcvt.s32.f32 %v1758_v61  ;;  %v5057_v61 = vcvt.s32.f32 %v1578_v27  ;;  %v5073_v27 = vcvt.s32.f32 %v1640_v43  ;;  %vm1840_vm10 = vcmp.eq.f32.partialorder %v4729_v21, %v1834_v6 }
 0x1d9   :  { %v1938_v47 = vpop.xlane.xlu0 %1937 }
 0x1da   :  { %vm1944_vm3 = vcmp.eq.f32.partialorder %v4731_v0, %v1938_v47  ;;  %1761 = vmin.xlane.f32.xlu0 %v5041_v57  ;;  %1373 = vmin.xlane.f32.xlu1 %v5043_v17  ;;  %6603 = vst [vmem:[#allocation52_spill] sm:$0xff] %v5073_v27  ;;  %v5077_v17 = vsel %vm1735_vm4, %v4865_v49, 128 }
 0x1db   :  { %v5054_v5 = vsel %vm1944_vm3, %v4865_v49, 128  ;;  %v1628_v52 = vpop.xlane.xlu1 %1627  ;;  %6604 = vst [vmem:[#allocation53_spill] sm:$0xff] %v5077_v17  ;;  %v1744_v43 = vshra.s32 %v5077_v17, 16  ;;  %v5104_v17 = vsel %vm1632_vm8, %v4865_v49, 128 }
 0x1dc   :  { %v1966_v48 = vshra.s32 %v5054_v5, 16  ;;  %6607 = vst [vmem:[#allocation56_spill] sm:$0xff] %v5104_v17  ;;  %vm1633_vm11 = vcmp.eq.f32.partialorder %v4734_v24, %v1628_v52 }
 0x1dd   :  { %v1732_v10 = vpop.xlane.xlu0 %1731 }
 0x1de   :  { %vm1737_vm5 = vcmp.eq.f32.partialorder %v4737_v28, %v1732_v10  ;;  %v5065_v0 = vcvt.s32.f32 %v1966_v48  ;;  %1581 = vmin.xlane.f32.xlu1 %v5057_v61  ;;  %v5085_v48 = vcvt.s32.f32 %v1848_v19  ;;  %v5089_v10 = vsel %vm1943_vm6, %v4865_v49, 128 }
 0x1df   :  { %v5069_v47 = vsel %vm1737_vm5, %v4865_v49, 128  ;;  %6605 = vst [vmem:[#allocation54_spill] sm:$0xff] %v5089_v10 }
 0x1e0   :  { %1969 = vmin.xlane.f32.xlu0 %v5065_v0  ;;  %v1772_v60 = vshra.s32 %v5069_v47, 16 }
 0x1e1   :  { %v1836_v7 = vpop.xlane.xlu1 %1835 }
 0x1e2   :  { %v5080_v28 = vcvt.s32.f32 %v1772_v60  ;;  %1643 = vmin.xlane.f32.xlu1 %v5073_v27  ;;  %v5100_v60 = vcvt.s32.f32 %v1744_v43  ;;  %vm1841_vm13 = vcmp.eq.f32.partialorder %v4741_v31, %v1836_v7 }
 0x1e3   :  { %v1940_v58 = vpop.xlane.xlu0 %1939 }
 0x1e4   :  { %vm1945_vm7 = vcmp.eq.f32.partialorder %v4743_v36, %v1940_v58  ;;  %1775 = vmin.xlane.f32.xlu0 %v5080_v28  ;;  %6606 = vst [vmem:[#allocation55_spill] sm:$0xff] %v5100_v60  ;;  %v1952_v58 = vshra.s32 %v5089_v10, 16 }
 0x1e5   :  { %v5092_v45 = vsel %vm1945_vm7, %v4865_v49, 128  ;;  %v1630_v12 = vpop.xlane.xlu1 %1629 }
 0x1e6   :  { %v1980_v18 = vshra.s32 %v5092_v45, 16  ;;  %1851 = vmin.xlane.f32.xlu1 %v5085_v48  ;;  %v5115_v43 = vcvt.s32.f32 %v1952_v58  ;;  %vm1634_vm15 = vcmp.eq.f32.partialorder %v4746_v40, %v1630_v12 }
 0x1e7   :  { %v1734_v36 = vpop.xlane.xlu0 %1733 }
 0x1e8   :  { %vm1738_vm9 = vcmp.eq.f32.partialorder %v4749_v44, %v1734_v36  ;;  %v5098_v19 = vcvt.s32.f32 %v1980_v18  ;;  %v1654_v18 = vshra.s32 %v5104_v17, 16  ;;  %v5119_v36 = vsel %vm1840_vm10, %v4865_v49, 128 }
 0x1e9   :  { %v5107_v27 = vsel %vm1738_vm9, %v4865_v49, 128  ;;  %6608 = vst [vmem:[#allocation57_spill] sm:$0xff] %v5119_v36  ;;  %v5133_v17 = vsel %vm1633_vm11, %v4865_v49, 128 }
 0x1ea   :  { %1983 = vmin.xlane.f32.xlu0 %v5098_v19  ;;  %v1786_v15 = vshra.s32 %v5107_v27, 16  ;;  %1747 = vmin.xlane.f32.xlu1 %v5100_v60  ;;  %v5129_v58 = vcvt.s32.f32 %v1654_v18  ;;  %6610 = vst [vmem:[#allocation59_spill] sm:$0xff] %v5133_v17  ;;  %v5145_v18 = vsel %vm1841_vm13, %v4865_v49, 128 }
 0x1eb   :  { %v1838_v44 = vpop.xlane.xlu1 %1837  ;;  %6612 = vst [vmem:[#allocation61_spill] sm:$0xff] %v5145_v18 }
 0x1ec   :  { %v5113_v3 = vcvt.s32.f32 %v1786_v15  ;;  %6609 = vst [vmem:[#allocation58_spill] sm:$0xff] %v5129_v58  ;;  %v1862_v15 = vshra.s32 %v5119_v36, 16  ;;  %vm1842_vm1 = vcmp.eq.f32.partialorder %v4755_v51, %v1838_v44 }
 0x1ed   :  { %v1942_v10 = vpop.xlane.xlu0 %1941 }
 0x1ee   :  { %vm1946_vm12 = vcmp.eq.f32.partialorder %v4757_v56, %v1942_v10  ;;  %1789 = vmin.xlane.f32.xlu0 %v5113_v3  ;;  %1955 = vmin.xlane.f32.xlu1 %v5115_v43  ;;  %v5141_v52 = vcvt.s32.f32 %v1862_v15  ;;  %v1668_v10 = vshra.s32 %v5133_v17, 16  ;;  %v5160_v17 = vsel %vm1634_vm15, %v4865_v49, 128 }
 0x1ef   :  { %v5126_v21 = vsel %vm1946_vm12, %v4865_v49, 128  ;;  %6614 = vst [vmem:[#allocation63_spill] sm:$0xff] %v5160_v17 }
 0x1f0   :  { %v1994_v6 = vshra.s32 %v5126_v21, 16  ;;  %6611 = vst [vmem:[#allocation60_spill] sm:$0xff] %v5141_v52  ;;  %v5156_v15 = vcvt.s32.f32 %v1668_v10 }
 0x1f1   :  { %v2040_v60 = vpop.xlane.xlu1 %2039 }
 0x1f2   :  { %v5136_v24 = vcvt.s32.f32 %v1994_v6  ;;  %1657 = vmin.xlane.f32.xlu1 %v5129_v58  ;;  %6613 = vst [vmem:[#allocation62_spill] sm:$0xff] %v5156_v15  ;;  %vm2047_vm3 = vcmp.eq.f32.partialorder %v4770_v4, %v2040_v60 }
 0x1f3   :  { %v2144_v56 = vpop.xlane.xlu0 %2143 }
 0x1f4   :  { %vm2151_vm14 = vcmp.eq.f32.partialorder %v4772_v8, %v2144_v56  ;;  %1997 = vmin.xlane.f32.xlu0 %v5136_v24  ;;  %v1876_v56 = vshra.s32 %v5145_v18, 16  ;;  %v5176_v18 = vsel %vm1842_vm1, %v4865_v49, 128 }
 0x1f5   :  { %v5148_v36 = vsel %vm2151_vm14, %v4865_v49, 128  ;;  %v2248_v31 = vpop.xlane.xlu1 %2247  ;;  %6616 = vst [vmem:[#allocation65_spill] sm:$0xff] %v5176_v18 }
 0x1f6   :  { %v2160_v7 = vshra.s32 %v5148_v36, 16  ;;  %1865 = vmin.xlane.f32.xlu1 %v5141_v52  ;;  %vm2255_vm5 = vcmp.eq.f32.partialorder %v4778_v11, %v2248_v31 }
 0x1f7   :  { %v2352_v8 = vpop.xlane.xlu0 %2351  ;;  %v5205_v52 = vsel %vm2255_vm5, %v4865_v49, 128 }
 0x1f8   :  { %vm2359_vm0 = vcmp.eq.f32.partialorder %v4781_v13, %v2352_v8  ;;  %v5154_v6 = vcvt.s32.f32 %v2160_v7  ;;  %v5172_v7 = vcvt.s32.f32 %v1876_v56  ;;  %v1682_v8 = vshra.s32 %v5160_v17, 16  ;;  %6620 = vst [vmem:[#allocation69_spill] sm:$0xff] %v5205_v52 }
 0x1f9   :  { %v5163_v58 = vsel %vm2359_vm0, %v4865_v49, 128  ;;  %v2042_v40 = vpop.xlane.xlu1 %2041  ;;  %v5191_v17 = vsel %vm2047_vm3, %v4865_v49, 128 }
 0x1fa   :  { %v2368_v12 = vshra.s32 %v5163_v58, 16  ;;  %2163 = vmin.xlane.f32.xlu0 %v5154_v6  ;;  %1671 = vmin.xlane.f32.xlu1 %v5156_v15  ;;  %6615 = vst [vmem:[#allocation64_spill] sm:$0xff] %v5172_v7  ;;  %6618 = vst [vmem:[#allocation67_spill] sm:$0xff] %v5191_v17  ;;  %vm2048_vm7 = vcmp.eq.f32.partialorder %v4784_v16, %v2042_v40 }
 0x1fb   :  { %v2146_v13 = vpop.xlane.xlu0 %2145 }
 0x1fc   :  { %vm2152_vm2 = vcmp.eq.f32.partialorder %v4787_v30, %v2146_v13  ;;  %v5170_v10 = vcvt.s32.f32 %v2368_v12  ;;  %v5187_v12 = vcvt.s32.f32 %v1682_v8  ;;  %v1890_v13 = vshra.s32 %v5176_v18, 16 }
 0x1fd   :  { %v5179_v51 = vsel %vm2152_vm2, %v4865_v49, 128  ;;  %v2056_v18 = vshra.s32 %v5191_v17, 16 }
 0x1fe   :  { %v2174_v44 = vshra.s32 %v5179_v51, 16  ;;  %v2250_v15 = vpop.xlane.xlu1 %2249  ;;  %2371 = vmin.xlane.f32.xlu0 %v5170_v10  ;;  %1879 = vmin.xlane.f32.xlu1 %v5172_v7  ;;  %6617 = vst [vmem:[#allocation66_spill] sm:$0xff] %v5187_v12  ;;  %v5201_v7 = vcvt.s32.f32 %v1890_v13 }
 0x1ff   :  { %v5218_v17 = vcvt.s32.f32 %v2056_v18  ;;  %vm2256_vm8 = vcmp.eq.f32.partialorder %v4791_v23, %v2250_v15 }
 0x200   :  { %v2354_v30 = vpop.xlane.xlu0 %2353  ;;  %v5185_v56 = vcvt.s32.f32 %v2174_v44  ;;  %6619 = vst [vmem:[#allocation68_spill] sm:$0xff] %v5201_v7 }
 0x201   :  { %vm2360_vm4 = vcmp.eq.f32.partialorder %v4793_v29, %v2354_v30  ;;  %v2264_v30 = vshra.s32 %v5205_v52, 16  ;;  %6623 = vst [vmem:[#allocation72_spill] sm:$0xff] %v5218_v17 }
 0x202   :  { %v5196_v4 = vsel %vm2360_vm4, %v4865_v49, 128  ;;  %v2044_v60 = vpop.xlane.xlu1 %2043  ;;  %2177 = vmin.xlane.f32.xlu0 %v5185_v56  ;;  %1685 = vmin.xlane.f32.xlu1 %v5187_v12  ;;  %v2918_v12 = vld [vmem:[#allocation7 + $0x178] sm:$0xff] }
 0x203   :  { %v2382_v8 = vshra.s32 %v5196_v4, 16  ;;  %v5233_v52 = vcvt.s32.f32 %v2264_v30  ;;  %vm2049_vm11 = vcmp.eq.f32.partialorder %v4796_v38, %v2044_v60 }
 0x204   :  { %v2148_v44 = vpop.xlane.xlu0 %2147 }
 0x205   :  { %vm2153_vm6 = vcmp.eq.f32.partialorder %v4799_v46, %v2148_v44  ;;  %v5208_v11 = vcvt.s32.f32 %v2382_v8  ;;  %v5221_v46 = vsel %vm2048_vm7, %v4865_v49, 128  ;;  %6627 = vst [vmem:[#allocation76_spill] sm:$0xff] %v5233_v52 }
 0x206   :  { %v5212_v29 = vsel %vm2153_vm6, %v4865_v49, 128  ;;  %1893 = vmin.xlane.f32.xlu1 %v5201_v7  ;;  %6624 = vst [vmem:[#allocation73_spill] sm:$0xff] %v5221_v46  ;;  %v2070_v40 = vshra.s32 %v5221_v46, 16  ;;  %v5252_v7 = vsel %vm2049_vm11, %v4865_v49, 128 }
 0x207   :  { %6621 = vst [vmem:[#allocation70_spill] sm:$0xff] %v5208_v11  ;;  %6622 = vst [vmem:[#allocation71_spill] sm:$0xff] %v5212_v29  ;;  %v2188_v31 = vshra.s32 %v5212_v29, 16  ;;  %2385 = vmin.xlane.f32.xlu0 %v5208_v11  ;;  %v2084_v60 = vshra.s32 %v5252_v7, 16  ;;  %v2930_v11 = vld [vmem:[#allocation7 + $0x1d8] sm:$0xff] }
 0x208   :  { %v2252_v13 = vpop.xlane.xlu1 %2251  ;;  %6632 = vst [vmem:[#allocation81_spill] sm:$0xff] %v5252_v7  ;;  %v6641_v7 = vld [vmem:[#allocation19_spill] sm:$0xff] }
 0x209   :  { %v5223_v8 = vcvt.s32.f32 %v2188_v31  ;;  %v5236_v31 = vsel %vm2256_vm8, %v4865_v49, 128  ;;  %vm2257_vm13 = vcmp.eq.f32.partialorder %v4803_v63, %v2252_v13 }
 0x20a   :  { %v2356_v16 = vpop.xlane.xlu0 %2355  ;;  %2059 = vmin.xlane.f32.xlu1 %v5218_v17  ;;  %6628 = vst [vmem:[#allocation77_spill] sm:$0xff] %v5236_v31  ;;  %v2278_v30 = vshra.s32 %v5236_v31, 16  ;;  %v5249_v17 = vcvt.s32.f32 %v2070_v40  ;;  %v5271_v63 = vsel %vm2257_vm13, %v4865_v49, 128 }
 0x20b   :  { %6625 = vst [vmem:[#allocation74_spill] sm:$0xff] %v5223_v8  ;;  %vm2361_vm9 = vcmp.eq.f32.partialorder %v4805_v9, %v2356_v16  ;;  %2191 = vmin.xlane.f32.xlu0 %v5223_v8  ;;  %6637 = vst [vmem:[#allocation86_spill] sm:$0xff] %v5271_v63  ;;  %v2916_v8 = vld [vmem:[#allocation7 + $0x168] sm:$0xff] }
 0x20c   :  { %v5231_v44 = vsel %vm2361_vm9, %v4865_v49, 128  ;;  %v2046_v18 = vpop.xlane.xlu1 %2045  ;;  %6631 = vst [vmem:[#allocation80_spill] sm:$0xff] %v5249_v17 }
 0x20d   :  { %6626 = vst [vmem:[#allocation75_spill] sm:$0xff] %v5231_v44  ;;  %v2396_v23 = vshra.s32 %v5231_v44, 16  ;;  %vm2050_vm10 = vcmp.eq.f32.partialorder %v4808_v14, %v2046_v18  ;;  %v2932_v44 = vld [vmem:[#allocation7 + $0x1e8] sm:$0xff] }
 0x20e   :  { %v5242_v9 = vsel %vm2050_vm10, %v4865_v49, 128  ;;  %v2150_v15 = vpop.xlane.xlu0 %2149  ;;  %2267 = vmin.xlane.f32.xlu1 %v5233_v52 }
 0x20f   :  { %6629 = vst [vmem:[#allocation78_spill] sm:$0xff] %v5242_v9  ;;  %v2098_v16 = vshra.s32 %v5242_v9, 16  ;;  %v5246_v46 = vcvt.s32.f32 %v2396_v23  ;;  %vm2154_vm12 = vcmp.eq.f32.partialorder %v4811_v22, %v2150_v15  ;;  %v5268_v23 = vcvt.s32.f32 %v2278_v30 }
 0x210   :  { %v5263_v40 = vsel %vm2154_vm12, %v4865_v49, 128  ;;  %v5284_v9 = vcvt.s32.f32 %v2084_v60  ;;  %v6645_v60 = vld [vmem:[#allocation20_spill] sm:$0xff] }
 0x211   :  { %6630 = vst [vmem:[#allocation79_spill] sm:$0xff] %v5246_v46  ;;  %2399 = vmin.xlane.f32.xlu0 %v5246_v46  ;;  %v5259_v14 = vcvt.s32.f32 %v2098_v16  ;;  %6634 = vst [vmem:[#allocation83_spill] sm:$0xff] %v5263_v40  ;;  %v2292_v16 = vshra.s32 %v5271_v63, 16  ;;  %v6648_v63 = vld [vmem:[#allocation21_spill] sm:$0xff]  ;;  %v2898_v46 = vld [vmem:[#allocation7 + $0xd8] sm:$0xff] }
 0x212   :  { %v2254_v38 = vpop.xlane.xlu1 %2253  ;;  %2073 = vmin.xlane.f32.xlu1 %v5249_v17  ;;  %6636 = vst [vmem:[#allocation85_spill] sm:$0xff] %v5268_v23  ;;  %6640 = vst [vmem:[#allocation89_spill] sm:$0xff] %v5284_v9 }
 0x213   :  { %vm2258_vm14 = vcmp.eq.f32.partialorder %v4815_v34, %v2254_v38  ;;  %6633 = vst [vmem:[#allocation82_spill] sm:$0xff] %v5259_v14  ;;  %v2202_v34 = vshra.s32 %v5263_v40, 16  ;;  %v2917_v40 = vld [vmem:[#allocation7 + $0x170] sm:$0xff] }
 0x214   :  { %v5266_v18 = vsel %vm2258_vm14, %v4865_v49, 128  ;;  %v2358_v22 = vpop.xlane.xlu0 %2357 }
 0x215   :  { %6635 = vst [vmem:[#allocation84_spill] sm:$0xff] %v5266_v18  ;;  %v2306_v13 = vshra.s32 %v5266_v18, 16  ;;  %vm2362_vm15 = vcmp.eq.f32.partialorder %v4817_v53, %v2358_v22  ;;  %2101 = vmin.xlane.f32.xlu0 %v5259_v14  ;;  %v5290_v22 = vcvt.s32.f32 %v2202_v34  ;;  %v5295_v18 = vcvt.s32.f32 %v2292_v16 }
 0x216   :  { %2281 = vmin.xlane.f32.xlu1 %v5268_v23  ;;  %v5282_v30 = vsel %vm2362_vm15, %v4865_v49, 128 }
 0x217   :  { %v5278_v15 = vcvt.s32.f32 %v2306_v13  ;;  %6639 = vst [vmem:[#allocation88_spill] sm:$0xff] %v5282_v30  ;;  %v2410_v53 = vshra.s32 %v5282_v30, 16  ;;  %6642 = vst [vmem:[#allocation19_spill] sm:$0xff] %v5290_v22 }
 0x218   :  { %v2456_v38 = vpop.xlane.xlu0 %2455  ;;  %6644 = vst [vmem:[#allocation91_spill] sm:$0xff] %v5295_v18 }
 0x219   :  { %6638 = vst [vmem:[#allocation87_spill] sm:$0xff] %v5278_v15  ;;  %vm2463_vm0 = vcmp.eq.f32.partialorder %v6641_v7, %v2456_v38  ;;  %2309 = vmin.xlane.f32.xlu0 %v5278_v15  ;;  %v5301_v38 = vcvt.s32.f32 %v2410_v53  ;;  %v6651_v53 = vld [vmem:[#allocation22_spill] sm:$0xff] }
 0x21a   :  { %2087 = vmin.xlane.f32.xlu1 %v5284_v9  ;;  %v5293_v13 = vsel %vm2463_vm0, %v4865_v49, 128 }
 0x21b   :  { %6643 = vst [vmem:[#allocation90_spill] sm:$0xff] %v5293_v13  ;;  %v2472_v7 = vshra.s32 %v5293_v13, 16  ;;  %6646 = vst [vmem:[#allocation20_spill] sm:$0xff] %v5301_v38 }
 0x21d   :  { %v2664_v14 = vpop.xlane.xlu0 %2663  ;;  %2205 = vmin.xlane.f32.xlu0 %v5290_v22  ;;  %v5309_v9 = vcvt.s32.f32 %v2472_v7  ;;  %v6654_v7 = vld [vmem:[#allocation23_spill] sm:$0xff] }
 0x21e   :  { %vm2671_vm1 = vcmp.eq.f32.partialorder %v6645_v60, %v2664_v14  ;;  %2295 = vmin.xlane.f32.xlu1 %v5295_v18  ;;  %v2934_v22 = vld [vmem:[#allocation7 + $0x1f8] sm:$0xff] }
 0x21f   :  { %v5304_v15 = vsel %vm2671_vm1, %v4865_v49, 128  ;;  %6649 = vst [vmem:[#allocation21_spill] sm:$0xff] %v5309_v9  ;;  %4039 = vmatprep.subr.mxu1 %v2934_v22  ;;  %v2899_v22 = vld [vmem:[#allocation7 + $0xe0] sm:$0xff] }
 0x220   :  { %6647 = vst [vmem:[#allocation92_spill] sm:$0xff] %v5304_v15  ;;  %v2680_v16 = vshra.s32 %v5304_v15, 16  ;;  %4040 = vmatpush3.msra.mxu1 %v2918_v12  ;;  %v6684_v12 = vld [vmem:[#allocation29_spill] sm:$0xff] }
 0x221   :  { %v2560_v34 = vpop.xlane.xlu0 %2559  ;;  %2413 = vmin.xlane.f32.xlu0 %v5301_v38 }
 0x222   :  { %vm2567_vm2 = vcmp.eq.f32.partialorder %v6648_v63, %v2560_v34  ;;  %v5317_v18 = vcvt.s32.f32 %v2680_v16  ;;  %v6657_v16 = vld [vmem:[#allocation24_spill] sm:$0xff] }
 0x223   :  { %v5312_v14 = vsel %vm2567_vm2, %v4865_v49, 128 }
 0x224   :  { %6650 = vst [vmem:[#allocation93_spill] sm:$0xff] %v5312_v14  ;;  %v2576_v13 = vshra.s32 %v5312_v14, 16  ;;  %6652 = vst [vmem:[#allocation22_spill] sm:$0xff] %v5317_v18 }
 0x225   :  { %v2768_v60 = vpop.xlane.xlu0 %2767  ;;  %2475 = vmin.xlane.f32.xlu0 %v5309_v9 }
 0x226   :  { %vm2775_vm3 = vcmp.eq.f32.partialorder %v6651_v53, %v2768_v60  ;;  %v5325_v15 = vcvt.s32.f32 %v2576_v13  ;;  %v6658_v53 = vld [vmem:[#allocation26_spill] sm:$0xff]  ;;  %v6661_v13 = vld [vmem:[#allocation27_spill] sm:$0xff] }
 0x227   :  { %v5320_v23 = vsel %vm2775_vm3, %v4865_v49, 128  ;;  %v1223_v31 = vand.u32 65535, %v6658_v53  ;;  %v6666_v53 = vld [vmem:[#allocation28_spill] sm:$0xff] }
 0x228   :  { %6653 = vst [vmem:[#allocation94_spill] sm:$0xff] %v5320_v23  ;;  %v2784_v34 = vshra.s32 %v5320_v23, 16  ;;  %6655 = vst [vmem:[#allocation23_spill] sm:$0xff] %v5325_v15 }
 0x229   :  { %v2458_v63 = vpop.xlane.xlu0 %2457  ;;  %2683 = vmin.xlane.f32.xlu0 %v5317_v18  ;;  %v6662_v18 = vld [vmem:[#allocation25_spill] sm:$0xff] }
 0x22a   :  { %vm2464_vm4 = vcmp.eq.f32.partialorder %v6654_v7, %v2458_v63  ;;  %v5334_v14 = vcvt.s32.f32 %v2784_v34  ;;  %v1431_v23 = vand.u32 65535, %v6662_v18 }
 0x22b   :  { %v5328_v9 = vsel %vm2464_vm4, %v4865_v49, 128 }
 0x22c   :  { %6656 = vst [vmem:[#allocation95_spill] sm:$0xff] %v5328_v9  ;;  %v2486_v17 = vshra.s32 %v5328_v9, 16  ;;  %6659 = vst [vmem:[#allocation24_spill] sm:$0xff] %v5334_v14 }
 0x22d   :  { %v2666_v60 = vpop.xlane.xlu0 %2665  ;;  %2579 = vmin.xlane.f32.xlu0 %v5325_v15 }
 0x22e   :  { %vm2672_vm5 = vcmp.eq.f32.partialorder %v6657_v16, %v2666_v60  ;;  %v5343_v52 = vcvt.s32.f32 %v2486_v17  ;;  %v1225_v16 = vcvt.s32.f32 %v1223_v31  ;;  %v1433_v31 = vcvt.s32.f32 %v1431_v23 }
 0x22f   :  { %v5337_v63 = vsel %vm2672_vm5, %v4865_v49, 128 }
 0x230   :  { %6660 = vst [vmem:[#allocation26_spill] sm:$0xff] %v5337_v63  ;;  %v2694_v15 = vshra.s32 %v5337_v63, 16  ;;  %6663 = vst [vmem:[#allocation27_spill] sm:$0xff] %v5343_v52  ;;  %v6670_v63 = vld [vmem:[#allocation30_spill] sm:$0xff] }
 0x231   :  { %v2562_v7 = vpop.xlane.xlu0 %2561  ;;  %2787 = vmin.xlane.f32.xlu0 %v5334_v14 }
 0x232   :  { %vm2568_vm6 = vcmp.eq.f32.partialorder %v6661_v13, %v2562_v7  ;;  %v5355_v17 = vcvt.s32.f32 %v2694_v15 }
 0x233   :  { %v5345_v60 = vpop.xlane.xlu1 %1227  ;;  %v5348_v34 = vsel %vm2568_vm6, %v4865_v49, 128 }
 0x234   :  { %6664 = vst [vmem:[#allocation25_spill] sm:$0xff] %v5345_v60  ;;  %6665 = vst [vmem:[#allocation96_spill] sm:$0xff] %v5348_v34  ;;  %vm1229_vm7 = vcmp.eq.f32.partialorder %v6666_v53, %v5345_v60  ;;  %v2590_v18 = vshra.s32 %v5348_v34, 16  ;;  %v2885_v34 = vld [vmem:[#allocation7 + $0x70] sm:$0xff] }
 0x235   :  { %v2770_v9 = vpop.xlane.xlu0 %2769  ;;  %2489 = vmin.xlane.f32.xlu0 %v5343_v52  ;;  %v1230_v14 = vsel %vm1229_vm7, %v1225_v16, inf  ;;  %6667 = vst [vmem:[#allocation28_spill] sm:$0xff] %v5355_v17 }
 0x236   :  { %vm2776_vm8 = vcmp.eq.f32.partialorder %v4889_v55, %v2770_v9  ;;  %1231 = vmin.xlane.f32.xlu1 %v1230_v14  ;;  %v5368_v9 = vcvt.s32.f32 %v2590_v18 }
 0x237   :  { %v5357_v7 = vpop.xlane.xlu1 %1435  ;;  %v5360_v13 = vsel %vm2776_vm8, %v4865_v49, 128 }
 0x238   :  { %6668 = vst [vmem:[#allocation97_spill] sm:$0xff] %v5357_v7  ;;  %6669 = vst [vmem:[#allocation98_spill] sm:$0xff] %v5360_v13  ;;  %vm1437_vm9 = vcmp.eq.f32.partialorder %v6670_v63, %v5357_v7  ;;  %v2798_v55 = vshra.s32 %v5360_v13, 16  ;;  %v2886_v13 = vld [vmem:[#allocation7 + $0x78] sm:$0xff] }
 0x239   :  { %v5364_v53 = vpop.xlane.xlu0 %2459  ;;  %2697 = vmin.xlane.f32.xlu0 %v5355_v17  ;;  %v1438_v16 = vsel %vm1437_vm9, %v1433_v31, inf  ;;  %6671 = vst [vmem:[#allocation30_spill] sm:$0xff] %v5368_v9 }
 0x23a   :  { %1439 = vmin.xlane.f32.xlu1 %v1438_v16  ;;  %v5375_v23 = vcvt.s32.f32 %v2798_v55  ;;  %vm2465_vm14 = vcmp.eq.f32.partialorder %v6684_v12, %v5364_v53  ;;  %v2895_v53 = vld [vmem:[#allocation7 + $0xc0] sm:$0xff] }
 0x23b   :  { %v5370_v15 = vpop.xlane.xlu1 %1241 }
 0x23c   :  { %6672 = vst [vmem:[#allocation99_spill] sm:$0xff] %v5370_v15  ;;  %6673 = vst [vmem:[#allocation100_spill] sm:$0xff] %v5375_v23  ;;  %vm1243_vm13 = vcmp.eq.f32.partialorder %v4910_v35, %v5370_v15  ;;  %v6686_v35 = vld [vmem:[#allocation33_spill] sm:$0xff] }
 0x23d   :  { %v5372_v14 = vpop.xlane.xlu0 %2667  ;;  %2593 = vmin.xlane.f32.xlu0 %v5368_v9  ;;  %v2902_v9 = vld [vmem:[#allocation7 + $0xf8] sm:$0xff] }
 0x23e   :  { %3995 = vmatprep.subr.mxu0 %v2902_v9 }
 0x23f   :  { %v5377_v60 = vpop.xlane.xlu1 %1449  ;;  %3996 = vmatpush3.msra.mxu0 %v2886_v13 }
 0x241   :  { %v2564_v63 = vpop.xlane.xlu0 %2563  ;;  %2801 = vmin.xlane.f32.xlu0 %v5375_v23 }
 0x242   :  { %vm2569_vm10 = vcmp.eq.f32.partialorder %v4929_v62, %v2564_v63 }
 0x243   :  { %v5382_v31 = vsel %vm2569_vm10, %v4865_v49, 128  ;;  %v5384_v18 = vpop.xlane.xlu1 %1345 }
 0x244   :  { %6674 = vst [vmem:[#allocation101_spill] sm:$0xff] %v5382_v31  ;;  %v2604_v16 = vshra.s32 %v5382_v31, 16  ;;  %vm1347_vm2 = vcmp.eq.f32.partialorder %v4934_v2, %v5384_v18 }
 0x245   :  { %v5387_v7 = vpop.xlane.xlu0 %2771 }
 0x246   :  { %v5389_v17 = vcvt.s32.f32 %v2604_v16  ;;  %v2901_v16 = vld [vmem:[#allocation7 + $0xf0] sm:$0xff]  ;;  %vm2777_vm1 = vcmp.eq.f32.partialorder %v4941_v37, %v5387_v7  ;;  %v2878_v37 = vld [vmem:[#allocation7 + $0x38] sm:$0xff]  ;;  %v2912_v7 = vld [vmem:[#allocation7 + $0x148] sm:$0xff] }
 0x247   :  { %v5391_v55 = vpop.xlane.xlu1 %1553  ;;  %3997 = vmatprep.subr.mxu0 %v2901_v16  ;;  %v2933_v16 = vld [vmem:[#allocation7 + $0x1f0] sm:$0xff] }
 0x248   :  { %6675 = vst [vmem:[#allocation102_spill] sm:$0xff] %v5389_v17  ;;  %2607 = vmin.xlane.f32.xlu0 %v5389_v17  ;;  %v2900_v17 = vld [vmem:[#allocation7 + $0xe8] sm:$0xff]  ;;  %3998 = vmatpush3.msra.mxu0 %v2885_v34  ;;  %v2883_v34 = vld [vmem:[#allocation7 + $0x60] sm:$0xff]  ;;  %vm1555_vm5 = vcmp.eq.f32.partialorder %v4949_v42, %v5391_v55 }
 0x249   :  { %v2462_v52 = vpop.xlane.xlu0 %2461  ;;  %3999 = vmatprep.subr.mxu0 %v2900_v17  ;;  %4041 = vmatprep.subr.mxu1 %v2933_v16  ;;  %v2915_v16 = vld [vmem:[#allocation7 + $0x160] sm:$0xff] }
 0x24a   :  { %vm2466_vm11 = vcmp.eq.f32.partialorder %v4946_v25, %v2462_v52  ;;  %4042 = vmatpush3.msra.mxu1 %v2917_v40 }
 0x24b   :  { %v5396_v62 = vsel %vm2466_vm11, %v4865_v49, 128  ;;  %v5398_v63 = vpop.xlane.xlu1 %1255  ;;  %4043 = vmatprep.subr.mxu1 %v2932_v44 }
 0x24c   :  { %6676 = vst [vmem:[#allocation103_spill] sm:$0xff] %v5396_v62  ;;  %v2514_v31 = vshra.s32 %v5396_v62, 16  ;;  %v6680_v62 = vld [vmem:[#allocation31_spill] sm:$0xff]  ;;  %4044 = vmatpush3.msra.mxu1 %v2916_v8  ;;  %vm1257_vm7 = vcmp.eq.f32.partialorder %v4961_v59, %v5398_v63 }
 0x24d   :  { %v2670_v23 = vpop.xlane.xlu0 %2669  ;;  %v1237_v30 = vand.u32 65535, %v6680_v62  ;;  %v1327_v62 = vand.u32 65535, %v4984_v50  ;;  %v2897_v50 = vld [vmem:[#allocation7 + $0xd0] sm:$0xff]  ;;  %v2914_v8 = vld [vmem:[#allocation7 + $0x158] sm:$0xff] }
 0x24e   :  { %vm2674_vm12 = vcmp.eq.f32.partialorder %v4958_v26, %v2670_v23  ;;  %v5402_v38 = vcvt.s32.f32 %v2514_v31  ;;  %v2884_v31 = vld [vmem:[#allocation7 + $0x68] sm:$0xff] }
 0x24f   :  { %v5405_v25 = vsel %vm2674_vm12, %v4865_v49, 128  ;;  %v5407_v52 = vpop.xlane.xlu1 %1463  ;;  %4000 = vmatpush3.msra.mxu0 %v2884_v31  ;;  %v1329_v40 = vcvt.s32.f32 %v1327_v62  ;;  %v2929_v62 = vld [vmem:[#allocation7 + $0x1d0] sm:$0xff] }
 0x250   :  { %6677 = vst [vmem:[#allocation104_spill] sm:$0xff] %v5402_v38  ;;  %6678 = vst [vmem:[#allocation105_spill] sm:$0xff] %v5405_v25  ;;  %v2722_v9 = vshra.s32 %v5405_v25, 16  ;;  %2517 = vmin.xlane.f32.xlu1 %v5402_v38  ;;  %v6683_v38 = vld [vmem:[#allocation34_spill] sm:$0xff]  ;;  %4001 = vmatprep.subr.mxu0 %v2899_v22 }
 0x251   :  { %6679 = vst [vmem:[#allocation106_spill] sm:$0xff] %v5407_v52  ;;  %v5412_v26 = vpop.xlane.xlu0 %2565  ;;  %v1445_v25 = vand.u32 65535, %v6683_v38  ;;  %4002 = vmatpush3.msra.mxu0 %v2883_v34  ;;  %v2931_v38 = vld [vmem:[#allocation7 + $0x1e0] sm:$0xff]  ;;  %v2881_v22 = vld [vmem:[#allocation7 + $0x50] sm:$0xff]  ;;  %v1535_v34 = vand.u32 65535, %v5002_v32  ;;  %v5444_v32 = vsel %vm2465_vm14, %v4865_v49, 128 }
 0x252   :  { %v5414_v13 = vcvt.s32.f32 %v2722_v9  ;;  %v1239_v9 = vcvt.s32.f32 %v1237_v30  ;;  %4003 = vmatprep.subr.mxu0 %v2898_v46  ;;  %v6685_v30 = vld [vmem:[#allocation35_spill] sm:$0xff]  ;;  %4045 = vmatprep.subr.mxu1 %v2931_v38  ;;  %vm2570_vm6 = vcmp.eq.f32.partialorder %v4979_v39, %v5412_v26  ;;  %v2909_v39 = vld [vmem:[#allocation7 + $0x130] sm:$0xff] }
 0x253   :  { %v5416_v23 = vpop.xlane.xlu1 %1359  ;;  %vm1451_vm15 = vcmp.eq.f32.partialorder %v6685_v30, %v5377_v60  ;;  %v1447_v46 = vcvt.s32.f32 %v1445_v25  ;;  %4046 = vmatpush3.msra.mxu1 %v2915_v16  ;;  %v1537_v30 = vcvt.s32.f32 %v1535_v34  ;;  %v2879_v16 = vld [vmem:[#allocation7 + $0x40] sm:$0xff]  ;;  %v5503_v59 = vsel %vm2570_vm6, %v4865_v49, 128 }
 0x254   :  { %6681 = vst [vmem:[#allocation31_spill] sm:$0xff] %v5414_v13  ;;  %6682 = vst [vmem:[#allocation107_spill] sm:$0xff] %v5416_v23  ;;  %2725 = vmin.xlane.f32.xlu1 %v5414_v13  ;;  %v2882_v13 = vld [vmem:[#allocation7 + $0x58] sm:$0xff]  ;;  %v1244_v31 = vsel %vm1243_vm13, %v1239_v9, inf  ;;  %v1341_v9 = vand.u32 65535, %v6686_v35  ;;  %4047 = vmatprep.subr.mxu1 %v2930_v11 }
 0x255   :  { %v5423_v17 = vpop.xlane.xlu0 %2773  ;;  %4004 = vmatpush3.msra.mxu0 %v2882_v13  ;;  %v1452_v25 = vsel %vm1451_vm15, %v1447_v46, inf  ;;  %4048 = vmatpush3.msra.mxu1 %v2914_v8  ;;  %v5465_v46 = vsel %vm2777_vm1, %v4865_v49, 128  ;;  %6691 = vst [vmem:[#allocation34_spill] sm:$0xff] %v5503_v59  ;;  %v6693_v26 = vld [vmem:[#allocation39_spill] sm:$0xff] }
 0x256   :  { %4005 = vmatprep.subr.mxu0 %v2897_v50  ;;  %v6687_v50 = vld [vmem:[#allocation36_spill] sm:$0xff]  ;;  %v1343_v35 = vcvt.s32.f32 %v1341_v9  ;;  %4049 = vmatprep.subr.mxu1 %v2929_v62  ;;  %v2812_v8 = vshra.s32 %v5465_v46, 16  ;;  %v2893_v62 = vld [vmem:[#allocation7 + $0xb0] sm:$0xff]  ;;  %vm2778_vm8 = vcmp.eq.f32.partialorder %v4996_v41, %v5423_v17 }
 0x257   :  { %v5428_v29 = vpop.xlane.xlu1 %1567  ;;  %4006 = vmatpush3.msra.mxu0 %v2881_v22  ;;  %v1549_v38 = vand.u32 65535, %v6687_v50  ;;  %v2500_v22 = vshra.s32 %v5444_v32, 16  ;;  %v2928_v9 = vld [vmem:[#allocation7 + $0x1c8] sm:$0xff]  ;;  %v2927_v50 = vld [vmem:[#allocation7 + $0x1c0] sm:$0xff] }
 0x258   :  { %1245 = vmin.xlane.f32.xlu1 %v1244_v31  ;;  %v2896_v31 = vld [vmem:[#allocation7 + $0xc8] sm:$0xff]  ;;  %v1348_v11 = vsel %vm1347_vm2, %v1343_v35, inf }
 0x259   :  { %v5436_v15 = vpop.xlane.xlu0 %1331  ;;  %4007 = vmatprep.subr.mxu0 %v2896_v31  ;;  %v6688_v31 = vld [vmem:[#allocation32_spill] sm:$0xff]  ;;  %v1551_v2 = vcvt.s32.f32 %v1549_v38 }
 0x25a   :  { %vm1333_vm0 = vcmp.eq.f32.partialorder %v5012_v33, %v5436_v15  ;;  %v2880_v33 = vld [vmem:[#allocation7 + $0x48] sm:$0xff]  ;;  %vm2673_vm4 = vcmp.eq.f32.partialorder %v6688_v31, %v5372_v14  ;;  %v5497_v31 = vcvt.s32.f32 %v2812_v8 }
 0x25b   :  { %v1334_v44 = vsel %vm1333_vm0, %v1329_v40, inf  ;;  %v5449_v13 = vpop.xlane.xlu1 %1269  ;;  %4008 = vmatpush3.msra.mxu0 %v2880_v33  ;;  %v2913_v40 = vld [vmem:[#allocation7 + $0x150] sm:$0xff]  ;;  %v5484_v42 = vsel %vm2673_vm4, %v4865_v49, 128  ;;  %v2892_v14 = vld [vmem:[#allocation7 + $0xa8] sm:$0xff] }
 0x25c   :  { %1335 = vmin.xlane.f32.xlu0 %v1334_v44  ;;  %1453 = vmin.xlane.f32.xlu1 %v1452_v25  ;;  %v6689_v25 = vld [vmem:[#allocation37_spill] sm:$0xff]  ;;  %v6692_v8 = vld [vmem:[#allocation40_spill] sm:$0xff]  ;;  %vm1271_vm13 = vcmp.eq.f32.partialorder %v5017_v20, %v5449_v13 }
 0x25d   :  { %v5456_v12 = vpop.xlane.xlu0 %1539  ;;  %4009 = vmatprep.subr.mxu0 %v2895_v53  ;;  %v1251_v33 = vand.u32 65535, %v6689_v25  ;;  %4050 = vmatpush3.msra.mxu1 %v2913_v40  ;;  %v5478_v53 = vcvt.s32.f32 %v2500_v22  ;;  %v2911_v22 = vld [vmem:[#allocation7 + $0x140] sm:$0xff]  ;;  %v2926_v40 = vld [vmem:[#allocation7 + $0x1b8] sm:$0xff]  ;;  %vm1465_vm9 = vcmp.eq.f32.partialorder %v6692_v8, %v5407_v52 }
 0x25e   :  { %vm1541_vm3 = vcmp.eq.f32.partialorder %v5024_v54, %v5456_v12  ;;  %v2894_v54 = vld [vmem:[#allocation7 + $0xb8] sm:$0xff]  ;;  %4010 = vmatpush3.msra.mxu0 %v2879_v16  ;;  %4051 = vmatprep.subr.mxu1 %v2928_v9  ;;  %v2877_v16 = vld [vmem:[#allocation7 + $0x30] sm:$0xff]  ;;  %v2708_v9 = vshra.s32 %v5484_v42, 16  ;;  %v2919_v20 = vld [vmem:[#allocation7 + $0x180] sm:$0xff] }
 0x25f   :  { %v1542_v44 = vsel %vm1541_vm3, %v1537_v30, inf  ;;  %v5470_v34 = vpop.xlane.xlu1 %1477  ;;  %4011 = vmatprep.subr.mxu0 %v2894_v54  ;;  %v1556_v30 = vsel %vm1555_vm5, %v1551_v2, inf  ;;  %4052 = vmatpush3.msra.mxu1 %v2912_v7  ;;  %v1253_v54 = vcvt.s32.f32 %v1251_v33  ;;  %v2910_v7 = vld [vmem:[#allocation7 + $0x138] sm:$0xff]  ;;  %v2891_v33 = vld [vmem:[#allocation7 + $0xa0] sm:$0xff] }
 0x260   :  { %1543 = vmin.xlane.f32.xlu0 %v1542_v44  ;;  %1349 = vmin.xlane.f32.xlu1 %v1348_v11  ;;  %v6690_v44 = vld [vmem:[#allocation38_spill] sm:$0xff] }
 0x261   :  { %4012 = vmatpush3.msra.mxu0 %v2878_v37  ;;  %v1459_v11 = vand.u32 65535, %v6690_v44  ;;  %4053 = vmatprep.subr.mxu1 %v2927_v50  ;;  %v2876_v37 = vld [vmem:[#allocation7 + $0x28] sm:$0xff]  ;;  %v1258_v25 = vsel %vm1257_vm7, %v1253_v54, inf  ;;  %v2875_v50 = vld [vmem:[#allocation7 + $0x20] sm:$0xff]  ;;  %v2890_v44 = vld [vmem:[#allocation7 + $0x98] sm:$0xff] }
 0x262   :  { %4013 = vmatprep.subr.mxu0 %v2893_v62  ;;  %4054 = vmatpush3.msra.mxu1 %v2911_v22  ;;  %v2925_v62 = vld [vmem:[#allocation7 + $0x1b0] sm:$0xff]  ;;  %v2924_v54 = vld [vmem:[#allocation7 + $0x1a8] sm:$0xff] }
 0x263   :  { %v5486_v35 = vpop.xlane.xlu0 %1761  ;;  %v5488_v38 = vpop.xlane.xlu1 %1373  ;;  %4014 = vmatpush3.msra.mxu0 %v2877_v16  ;;  %4055 = vmatprep.subr.mxu1 %v2926_v40  ;;  %v1461_v16 = vcvt.s32.f32 %v1459_v11  ;;  %v5516_v40 = vcvt.s32.f32 %v2708_v9  ;;  %v6696_v9 = vld [vmem:[#allocation42_spill] sm:$0xff] }
 0x264   :  { %2503 = vmin.xlane.f32.xlu0 %v5478_v53  ;;  %1557 = vmin.xlane.f32.xlu1 %v1556_v30  ;;  %v1355_v30 = vand.u32 65535, %v6693_v26  ;;  %vm1361_vm10 = vcmp.eq.f32.partialorder %v6696_v9, %v5416_v23  ;;  %v6697_v26 = vld [vmem:[#allocation41_spill] sm:$0xff]  ;;  %vm1763_vm12 = vcmp.eq.f32.partialorder %v5041_v57, %v5486_v35 }
 0x265   :  { %4015 = vmatprep.subr.mxu0 %v2892_v14  ;;  %4056 = vmatpush3.msra.mxu1 %v2910_v7  ;;  %v2618_v14 = vshra.s32 %v5503_v59, 16  ;;  %6694 = vst [vmem:[#allocation29_spill] sm:$0xff] %v5516_v40  ;;  %v1466_v8 = vsel %vm1465_vm9, %v1461_v16, inf  ;;  %v2908_v7 = vld [vmem:[#allocation7 + $0x128] sm:$0xff]  ;;  %v1563_v52 = vand.u32 65535, %v6697_v26  ;;  %v2873_v16 = vld [vmem:[#allocation7 + $0x10] sm:$0xff] }
 0x266   :  { %4016 = vmatpush3.msra.mxu0 %v2876_v37  ;;  %4057 = vmatprep.subr.mxu1 %v2925_v62  ;;  %v2874_v37 = vld [vmem:[#allocation7 + $0x18] sm:$0xff]  ;;  %v2923_v62 = vld [vmem:[#allocation7 + $0x1a0] sm:$0xff]  ;;  %v1357_v41 = vcvt.s32.f32 %v1355_v30  ;;  %v2888_v9 = vld [vmem:[#allocation7 + $0x88] sm:$0xff] }
 0x267   :  { %v5505_v2 = vpop.xlane.xlu1 %1581  ;;  %4017 = vmatprep.subr.mxu0 %v2891_v33  ;;  %4058 = vmatpush3.msra.mxu1 %v2909_v39  ;;  %v2889_v33 = vld [vmem:[#allocation7 + $0x90] sm:$0xff]  ;;  %v5533_v39 = vcvt.s32.f32 %v2618_v14  ;;  %v2922_v26 = vld [vmem:[#allocation7 + $0x198] sm:$0xff]  ;;  %v6699_v30 = vld [vmem:[#allocation44_spill] sm:$0xff] }
 0x268   :  { %2815 = vmin.xlane.f32.xlu0 %v5497_v31  ;;  %1259 = vmin.xlane.f32.xlu1 %v1258_v25  ;;  %v5522_v25 = vsel %vm2778_vm8, %v4865_v49, 128  ;;  %vm1569_vm11 = vcmp.eq.f32.partialorder %v6699_v30, %v5428_v29  ;;  %v2906_v14 = vld [vmem:[#allocation7 + $0x118] sm:$0xff]  ;;  %v2871_v30 = vld [vmem:[#allocation7] sm:$0xff]  ;;  %vm1583_vm3 = vcmp.eq.f32.partialorder %v5057_v61, %v5505_v2 }
 0x269   :  { %v5513_v22 = vpop.xlane.xlu0 %1969  ;;  %6695 = vst [vmem:[#allocation35_spill] sm:$0xff] %v5522_v25  ;;  %4018 = vmatpush3.msra.mxu0 %v2875_v50  ;;  %4059 = vmatprep.subr.mxu1 %v2924_v54  ;;  %v2826_v50 = vshra.s32 %v5522_v25, 16  ;;  %6698 = vst [vmem:[#allocation33_spill] sm:$0xff] %v5533_v39  ;;  %v6700_v54 = vld [vmem:[#allocation43_spill] sm:$0xff]  ;;  %v1565_v25 = vcvt.s32.f32 %v1563_v52  ;;  %v6701_v52 = vld [vmem:[#allocation45_spill] sm:$0xff] }
 0x26a   :  { %4019 = vmatprep.subr.mxu0 %v2890_v44  ;;  %4060 = vmatpush3.msra.mxu1 %v2908_v7  ;;  %v2872_v44 = vld [vmem:[#allocation7 + $0x8] sm:$0xff]  ;;  %v1757_v7 = vand.u32 65535, %v5036_v1  ;;  %vm1971_vm14 = vcmp.eq.f32.partialorder %v5065_v0, %v5513_v22 }
 0x26b   :  { %v5524_v11 = vpop.xlane.xlu1 %1643  ;;  %4020 = vmatpush3.msra.mxu0 %v2874_v37  ;;  %4061 = vmatprep.subr.mxu1 %v2923_v62  ;;  %v1265_v37 = vand.u32 65535, %v6700_v54  ;;  %v2921_v62 = vld [vmem:[#allocation7 + $0x190] sm:$0xff]  ;;  %v2920_v1 = vld [vmem:[#allocation7 + $0x188] sm:$0xff] }
 0x26c   :  { %2711 = vmin.xlane.f32.xlu0 %v5516_v40  ;;  %1467 = vmin.xlane.f32.xlu1 %v1466_v8  ;;  %v2907_v8 = vld [vmem:[#allocation7 + $0x120] sm:$0xff]  ;;  %v1362_v40 = vsel %vm1361_vm10, %v1357_v41, inf  ;;  %v5542_v41 = vcvt.s32.f32 %v2826_v50  ;;  %v2905_v54 = vld [vmem:[#allocation7 + $0x110] sm:$0xff]  ;;  %v1965_v50 = vand.u32 65535, %v5054_v5 }
 0x26d   :  { %v5530_v17 = vpop.xlane.xlu0 %1775  ;;  %4021 = vmatprep.subr.mxu0 %v2889_v33  ;;  %4062 = vmatpush3.msra.mxu1 %v2907_v8  ;;  %v2887_v33 = vld [vmem:[#allocation7 + $0x80] sm:$0xff]  ;;  %v1267_v8 = vcvt.s32.f32 %v1265_v37  ;;  %v6703_v37 = vld [vmem:[#allocation46_spill] sm:$0xff]  ;;  %v6704_v0 = vld [vmem:[#allocation49_spill] sm:$0xff] }
 0x26e   :  { %4022 = vmatpush3.msra.mxu0 %v2873_v16  ;;  %4063 = vmatprep.subr.mxu1 %v2922_v26  ;;  %v1759_v16 = vcvt.s32.f32 %v1757_v7  ;;  %v6702_v5 = vld [vmem:[#allocation47_spill] sm:$0xff]  ;;  %v1369_v7 = vand.u32 65535, %v6703_v37  ;;  %vm1777_vm0 = vcmp.eq.f32.partialorder %v5080_v28, %v5530_v17  ;;  %vm1375_vm1 = vcmp.eq.f32.partialorder %v6704_v0, %v5488_v38  ;;  %v6706_v28 = vld [vmem:[#allocation50_spill] sm:$0xff]  ;;  %v6707_v61 = vld [vmem:[#allocation52_spill] sm:$0xff] }
 0x26f   :  { %v5535_v59 = vpop.xlane.xlu1 %1851  ;;  %4023 = vmatprep.subr.mxu0 %v2888_v9  ;;  %4064 = vmatpush3.msra.mxu1 %v2906_v14  ;;  %v2904_v9 = vld [vmem:[#allocation7 + $0x108] sm:$0xff]  ;;  %vm1479_vm15 = vcmp.eq.f32.partialorder %v6702_v5, %v5470_v34  ;;  %v2903_v14 = vld [vmem:[#allocation7 + $0x100] sm:$0xff]  ;;  %v1785_v5 = vand.u32 65535, %v5107_v27  ;;  %vm1645_vm5 = vcmp.eq.f32.partialorder %v6707_v61, %v5524_v11  ;;  %v1993_v27 = vand.u32 65535, %v5126_v21 }
 0x270   :  { %2621 = vmin.xlane.f32.xlu0 %v5533_v39  ;;  %1363 = vmin.xlane.f32.xlu1 %v1362_v40  ;;  %v1570_v39 = vsel %vm1569_vm11, %v1565_v25, inf  ;;  %v1473_v25 = vand.u32 65535, %v6701_v52  ;;  %v1764_v26 = vsel %vm1763_vm12, %v1759_v16, inf  ;;  %v6705_v16 = vld [vmem:[#allocation48_spill] sm:$0xff]  ;;  %vm1853_vm7 = vcmp.eq.f32.partialorder %v5085_v48, %v5535_v59  ;;  %v6712_v48 = vld [vmem:[#allocation54_spill] sm:$0xff] }
 0x271   :  { %4024 = vmatpush3.msra.mxu0 %v2872_v44  ;;  %4065 = vmatprep.subr.mxu1 %v2921_v62  ;;  %v1967_v62 = vcvt.s32.f32 %v1965_v50  ;;  %v1371_v50 = vcvt.s32.f32 %v1369_v7 }
 0x272   :  { %4025 = vmatprep.subr.mxu0 %v2887_v33  ;;  %4066 = vmatpush3.msra.mxu1 %v2905_v54  ;;  %v1771_v33 = vand.u32 65535, %v5069_v47  ;;  %v1979_v47 = vand.u32 65535, %v5092_v45 }
 0x273   :  { %v5544_v40 = vpop.xlane.xlu0 %1983  ;;  %v5546_v23 = vpop.xlane.xlu1 %1747  ;;  %4026 = vmatpush3.msra.mxu0 %v2871_v30  ;;  %4067 = vmatprep.subr.mxu1 %v2920_v1  ;;  %v1475_v30 = vcvt.s32.f32 %v1473_v25  ;;  %v1972_v54 = vsel %vm1971_vm14, %v1967_v62, inf }
 0x274   :  { %2829 = vmin.xlane.f32.xlu0 %v5542_v41  ;;  %1571 = vmin.xlane.f32.xlu1 %v1570_v39  ;;  %v1272_v39 = vsel %vm1271_vm13, %v1267_v8, inf  ;;  %v1577_v8 = vand.u32 65535, %v6705_v16  ;;  %v1773_v25 = vcvt.s32.f32 %v1771_v33  ;;  %vm1985_vm2 = vcmp.eq.f32.partialorder %v5098_v19, %v5544_v40  ;;  %v6708_v19 = vld [vmem:[#allocation51_spill] sm:$0xff] }
 0x275   :  { %4068 = vmatpush3.msra.mxu1 %v2904_v9  ;;  %v1480_v1 = vsel %vm1479_vm15, %v1475_v30, inf  ;;  %v2966_v30 = vld [vmem:[#allocation7 + $0x2f8] sm:$0xff] }
 0x276   :  { %4069 = vmatprep.subr.mxu1 %v2919_v20  ;;  %v1639_v20 = vand.u32 65535, %v6706_v28  ;;  %v1579_v45 = vcvt.s32.f32 %v1577_v8  ;;  %4083 = vmatprep.subr.mxu0 %v2966_v30 }
 0x277   :  { %v5555_v44 = vpop.xlane.xlu0 %1789  ;;  %v5557_v57 = vpop.xlane.xlu1 %1955  ;;  %4070 = vmatpush3.msra.mxu1 %v2903_v14  ;;  %v1981_v14 = vcvt.s32.f32 %v1979_v47 }
 0x278   :  { %1765 = vmin.xlane.f32.xlu0 %v1764_v26  ;;  %1273 = vmin.xlane.f32.xlu1 %v1272_v39  ;;  %v1778_v26 = vsel %vm1777_vm0, %v1773_v25, inf  ;;  %v1376_v39 = vsel %vm1375_vm1, %v1371_v50, inf  ;;  %v1584_v33 = vsel %vm1583_vm3, %v1579_v45, inf  ;;  %vm1791_vm4 = vcmp.eq.f32.partialorder %v5113_v3, %v5555_v44  ;;  %v2998_v50 = vld [vmem:[#allocation7 + $0x3f8] sm:$0xff]  ;;  %v6709_v3 = vld [vmem:[#allocation53_spill] sm:$0xff] }
 0x279   :  { %v1986_v7 = vsel %vm1985_vm2, %v1981_v14, inf  ;;  %v1641_v0 = vcvt.s32.f32 %v1639_v20  ;;  %v1743_v21 = vand.u32 65535, %v6709_v3  ;;  %4127 = vmatprep.subr.mxu1 %v2998_v50  ;;  %v1951_v45 = vand.u32 65535, %v6712_v48  ;;  %v6716_v3 = vld [vmem:[#allocation58_spill] sm:$0xff] }
 0x27a   :  { %vm1957_vm11 = vcmp.eq.f32.partialorder %v5115_v43, %v5557_v57  ;;  %v6717_v43 = vld [vmem:[#allocation57_spill] sm:$0xff] }
 0x27b   :  { %v5565_v52 = vpop.xlane.xlu1 %1657  ;;  %v1646_v8 = vsel %vm1645_vm5, %v1641_v0, inf  ;;  %v1953_v0 = vcvt.s32.f32 %v1951_v45  ;;  %v6721_v45 = vld [vmem:[#allocation71_spill] sm:$0xff] }
 0x27c   :  { %1973 = vmin.xlane.f32.xlu0 %v1972_v54  ;;  %1481 = vmin.xlane.f32.xlu1 %v1480_v1  ;;  %v1847_v54 = vand.u32 65535, %v6708_v19  ;;  %v1787_v1 = vcvt.s32.f32 %v1785_v5  ;;  %vm1659_vm13 = vcmp.eq.f32.partialorder %v6716_v3, %v5565_v52 }
 0x27d   :  { %v5573_v9 = vpop.xlane.xlu0 %1997 }
 0x27e   :  { %v1792_v16 = vsel %vm1791_vm4, %v1787_v1, inf  ;;  %vm1999_vm6 = vcmp.eq.f32.partialorder %v5136_v24, %v5573_v9  ;;  %v1849_v28 = vcvt.s32.f32 %v1847_v54  ;;  %v6711_v24 = vld [vmem:[#allocation55_spill] sm:$0xff]  ;;  %v6714_v54 = vld [vmem:[#allocation56_spill] sm:$0xff] }
 0x27f   :  { %v5581_v37 = vpop.xlane.xlu1 %1865  ;;  %vm1749_vm9 = vcmp.eq.f32.partialorder %v6711_v24, %v5546_v23  ;;  %v6720_v24 = vld [vmem:[#allocation59_spill] sm:$0xff] }
 0x280   :  { %1779 = vmin.xlane.f32.xlu0 %v1778_v26  ;;  %1377 = vmin.xlane.f32.xlu1 %v1376_v39  ;;  %v2159_v26 = vand.u32 65535, %v5148_v36  ;;  %v1995_v39 = vcvt.s32.f32 %v1993_v27  ;;  %v1854_v5 = vsel %vm1853_vm7, %v1849_v28, inf  ;;  %v1653_v27 = vand.u32 65535, %v6714_v54 }
 0x281   :  { %v1667_v48 = vand.u32 65535, %v6720_v24 }
 0x282   :  { %v2000_v20 = vsel %vm1999_vm6, %v1995_v39, inf  ;;  %v2161_v36 = vcvt.s32.f32 %v2159_v26  ;;  %v1655_v39 = vcvt.s32.f32 %v1653_v27  ;;  %v6723_v27 = vld [vmem:[#allocation74_spill] sm:$0xff] }
 0x283   :  { %v5583_v62 = vpop.xlane.xlu0 %2163  ;;  %v5593_v25 = vpop.xlane.xlu1 %1671 }
 0x284   :  { %1987 = vmin.xlane.f32.xlu0 %v1986_v7  ;;  %1585 = vmin.xlane.f32.xlu1 %v1584_v33  ;;  %vm2165_vm8 = vcmp.eq.f32.partialorder %v5154_v6, %v5583_v62  ;;  %v2367_v7 = vand.u32 65535, %v5163_v58  ;;  %v1745_v33 = vcvt.s32.f32 %v1743_v21  ;;  %v2173_v58 = vand.u32 65535, %v5179_v51 }
 0x285   :  { %v2166_v61 = vsel %vm2165_vm8, %v2161_v36, inf  ;;  %v1861_v21 = vand.u32 65535, %v6717_v43  ;;  %v2381_v51 = vand.u32 65535, %v5196_v4  ;;  %v1669_v43 = vcvt.s32.f32 %v1667_v48 }
 0x286   :  { %v1750_v19 = vsel %vm1749_vm9, %v1745_v33, inf  ;;  %v2369_v1 = vcvt.s32.f32 %v2367_v7  ;;  %v2175_v26 = vcvt.s32.f32 %v2173_v58  ;;  %v2187_v7 = vand.u32 65535, %v6721_v45  ;;  %v6724_v58 = vld [vmem:[#allocation62_spill] sm:$0xff] }
 0x287   :  { %v5591_v47 = vpop.xlane.xlu0 %2371  ;;  %v5609_v30 = vpop.xlane.xlu1 %1879  ;;  %v2383_v36 = vcvt.s32.f32 %v2381_v51  ;;  %v1863_v33 = vcvt.s32.f32 %v1861_v21  ;;  %vm1673_vm1 = vcmp.eq.f32.partialorder %v6724_v58, %v5593_v25 }
 0x288   :  { %1793 = vmin.xlane.f32.xlu0 %v1792_v16  ;;  %1647 = vmin.xlane.f32.xlu1 %v1646_v8  ;;  %vm2373_vm10 = vcmp.eq.f32.partialorder %v5170_v10, %v5591_v47  ;;  %v1958_v8 = vsel %vm1957_vm11, %v1953_v0, inf  ;;  %v2189_v3 = vcvt.s32.f32 %v2187_v7  ;;  %v6731_v7 = vld [vmem:[#allocation83_spill] sm:$0xff] }
 0x289   :  { %v2374_v16 = vsel %vm2373_vm10, %v2369_v1, inf  ;;  %v6725_v1 = vld [vmem:[#allocation61_spill] sm:$0xff]  ;;  %v2201_v48 = vand.u32 65535, %v6731_v7 }
 0x28a   :  { %v1875_v0 = vand.u32 65535, %v6725_v1 }
 0x28b   :  { %v5601_v14 = vpop.xlane.xlu0 %2177  ;;  %v5619_v50 = vpop.xlane.xlu1 %1685 }
 0x28c   :  { %6710 = vst [vmem:[#allocation36_spill] sm:$0xff] %v5601_v14  ;;  %2001 = vmin.xlane.f32.xlu0 %v2000_v20  ;;  %1855 = vmin.xlane.f32.xlu1 %v1854_v5  ;;  %vm2179_vm12 = vcmp.eq.f32.partialorder %v5185_v56, %v5601_v14  ;;  %v1660_v20 = vsel %vm1659_vm13, %v1655_v39, inf  ;;  %v6718_v5 = vld [vmem:[#allocation70_spill] sm:$0xff]  ;;  %v6719_v56 = vld [vmem:[#allocation60_spill] sm:$0xff]  ;;  %v1877_v45 = vcvt.s32.f32 %v1875_v0  ;;  %v2203_v0 = vcvt.s32.f32 %v2201_v48 }
 0x28d   :  { %v2180_v28 = vsel %vm2179_vm12, %v2175_v26, inf  ;;  %vm1867_vm15 = vcmp.eq.f32.partialorder %v6719_v56, %v5581_v37  ;;  %v1674_v26 = vsel %vm1673_vm1, %v1669_v43, inf }
 0x28e   :  { %v1868_v54 = vsel %vm1867_vm15, %v1863_v33, inf }
 0x290   :  { %2167 = vmin.xlane.f32.xlu0 %v2166_v61  ;;  %1751 = vmin.xlane.f32.xlu1 %v1750_v19  ;;  %v5613_v6 = vpop.xlane.xlu0 %2385  ;;  %v5635_v61 = vpop.xlane.xlu1 %1893 }
 0x291   :  { %6713 = vst [vmem:[#allocation32_spill] sm:$0xff] %v5613_v6  ;;  %vm2387_vm14 = vcmp.eq.f32.partialorder %v6718_v5, %v5613_v6  ;;  %v6730_v5 = vld [vmem:[#allocation63_spill] sm:$0xff]  ;;  %v1560_v6 = vcvt.f32.s32 %v5391_v55 }
 0x292   :  { %v2388_v19 = vsel %vm2387_vm14, %v2383_v36, inf  ;;  %v1681_v56 = vand.u32 65535, %v6730_v5  ;;  %v6740_v5 = vld [vmem:[#allocation67_spill] sm:$0xff] }
 0x294   :  { %2375 = vmin.xlane.f32.xlu0 %v2374_v16  ;;  %1959 = vmin.xlane.f32.xlu1 %v1958_v8  ;;  %v5623_v10 = vpop.xlane.xlu0 %2191  ;;  %v6726_v16 = vld [vmem:[#allocation75_spill] sm:$0xff]  ;;  %v5647_v39 = vpop.xlane.xlu1 %2059  ;;  %v1683_v1 = vcvt.s32.f32 %v1681_v56 }
 0x295   :  { %6715 = vst [vmem:[#allocation37_spill] sm:$0xff] %v5623_v10  ;;  %vm2193_vm0 = vcmp.eq.f32.partialorder %v6723_v27, %v5623_v10  ;;  %v2395_v8 = vand.u32 65535, %v6726_v16  ;;  %v6734_v27 = vld [vmem:[#allocation65_spill] sm:$0xff] }
 0x296   :  { %v2194_v51 = vsel %vm2193_vm0, %v2189_v3, inf  ;;  %v1889_v58 = vand.u32 65535, %v6734_v27  ;;  %v6736_v3 = vld [vmem:[#allocation88_spill] sm:$0xff]  ;;  %v6762_v10 = vld [vmem:[#allocation89_spill] sm:$0xff] }
 0x297   :  { %v2397_v24 = vcvt.s32.f32 %v2395_v8  ;;  %v2409_v43 = vand.u32 65535, %v6736_v3 }
 0x298   :  { %2181 = vmin.xlane.f32.xlu0 %v2180_v28  ;;  %1661 = vmin.xlane.f32.xlu1 %v1660_v20  ;;  %v6728_v28 = vld [vmem:[#allocation79_spill] sm:$0xff]  ;;  %v6729_v20 = vld [vmem:[#allocation64_spill] sm:$0xff]  ;;  %v5660_v16 = vpop.xlane.xlu1 %2267  ;;  %v1891_v56 = vcvt.s32.f32 %v1889_v58 }
 0x299   :  { %vm1881_vm3 = vcmp.eq.f32.partialorder %v6729_v20, %v5609_v30  ;;  %6735 = vst [vmem:[#allocation42_spill] sm:$0xff] %v5660_v16  ;;  %v2411_v7 = vcvt.s32.f32 %v2409_v43  ;;  %v6747_v43 = vld [vmem:[#allocation76_spill] sm:$0xff] }
 0x29a   :  { %v5637_v4 = vpop.xlane.xlu0 %2399  ;;  %vm2269_vm9 = vcmp.eq.f32.partialorder %v6747_v43, %v5660_v16 }
 0x29b   :  { %6722 = vst [vmem:[#allocation38_spill] sm:$0xff] %v5637_v4  ;;  %vm2401_vm2 = vcmp.eq.f32.partialorder %v6728_v28, %v5637_v4  ;;  %v6739_v28 = vld [vmem:[#allocation68_spill] sm:$0xff] }
 0x29c   :  { %2389 = vmin.xlane.f32.xlu0 %v2388_v19  ;;  %1869 = vmin.xlane.f32.xlu1 %v1868_v54  ;;  %v2402_v33 = vsel %vm2401_vm2, %v2397_v24, inf  ;;  %v1882_v19 = vsel %vm1881_vm3, %v1877_v45, inf  ;;  %v6733_v54 = vld [vmem:[#allocation66_spill] sm:$0xff]  ;;  %vm1895_vm6 = vcmp.eq.f32.partialorder %v6739_v28, %v5635_v61  ;;  %v2055_v24 = vand.u32 65535, %v6740_v5 }
 0x29d   :  { %vm1687_vm4 = vcmp.eq.f32.partialorder %v6733_v54, %v5619_v50  ;;  %v1896_v48 = vsel %vm1895_vm6, %v1891_v56, inf  ;;  %v6744_v54 = vld [vmem:[#allocation72_spill] sm:$0xff]  ;;  %v6750_v56 = vld [vmem:[#allocation93_spill] sm:$0xff] }
 0x29e   :  { %v5645_v21 = vpop.xlane.xlu0 %2101  ;;  %vm2061_vm8 = vcmp.eq.f32.partialorder %v6744_v54, %v5647_v39  ;;  %v6752_v54 = vld [vmem:[#allocation80_spill] sm:$0xff] }
 0x29f   :  { %6727 = vst [vmem:[#allocation40_spill] sm:$0xff] %v5645_v21 }
 0x2a0   :  { %2195 = vmin.xlane.f32.xlu0 %v2194_v51  ;;  %1675 = vmin.xlane.f32.xlu1 %v1674_v26  ;;  %v6738_v51 = vld [vmem:[#allocation19_spill] sm:$0xff]  ;;  %v1688_v26 = vsel %vm1687_vm4, %v1683_v1, inf  ;;  %v6745_v1 = vld [vmem:[#allocation69_spill] sm:$0xff] }
 0x2a1   :  { %v2263_v3 = vand.u32 65535, %v6745_v1 }
 0x2a2   :  { %v5655_v36 = vpop.xlane.xlu0 %2309 }
 0x2a3   :  { %6732 = vst [vmem:[#allocation39_spill] sm:$0xff] %v5655_v36  ;;  %v2265_v5 = vcvt.s32.f32 %v2263_v3  ;;  %v6757_v3 = vld [vmem:[#allocation23_spill] sm:$0xff] }
 0x2a4   :  { %2403 = vmin.xlane.f32.xlu0 %v2402_v33  ;;  %1883 = vmin.xlane.f32.xlu1 %v1882_v19  ;;  %v6742_v33 = vld [vmem:[#allocation20_spill] sm:$0xff]  ;;  %v5674_v19 = vpop.xlane.xlu1 %2073 }
 0x2a5   :  { %6743 = vst [vmem:[#allocation43_spill] sm:$0xff] %v5674_v19  ;;  %vm2075_vm10 = vcmp.eq.f32.partialorder %v6752_v54, %v5674_v19 }
 0x2a6   :  { %v5663_v8 = vpop.xlane.xlu0 %2205 }
 0x2a7   :  { %6737 = vst [vmem:[#allocation41_spill] sm:$0xff] %v5663_v8  ;;  %vm2207_vm5 = vcmp.eq.f32.partialorder %v6738_v51, %v5663_v8 }
 0x2a8   :  { %1689 = vmin.xlane.f32.xlu1 %v1688_v26  ;;  %v2208_v20 = vsel %vm2207_vm5, %v2203_v0, inf  ;;  %v2057_v0 = vcvt.s32.f32 %v2055_v24  ;;  %v6748_v26 = vld [vmem:[#allocation73_spill] sm:$0xff] }
 0x2a9   :  { %2209 = vmin.xlane.f32.xlu0 %v2208_v20  ;;  %v2069_v28 = vand.u32 65535, %v6748_v26  ;;  %v5684_v20 = vpop.xlane.xlu1 %2281  ;;  %v6753_v24 = vld [vmem:[#allocation77_spill] sm:$0xff] }
 0x2aa   :  { %v5670_v45 = vpop.xlane.xlu0 %2413  ;;  %v2062_v58 = vsel %vm2061_vm8, %v2057_v0, inf  ;;  %6749 = vst [vmem:[#allocation47_spill] sm:$0xff] %v5684_v20  ;;  %v6754_v0 = vld [vmem:[#allocation94_spill] sm:$0xff] }
 0x2ab   :  { %6741 = vst [vmem:[#allocation44_spill] sm:$0xff] %v5670_v45  ;;  %vm2415_vm7 = vcmp.eq.f32.partialorder %v6742_v33, %v5670_v45  ;;  %v2575_v33 = vand.u32 65535, %v6750_v56  ;;  %v2071_v1 = vcvt.s32.f32 %v2069_v28  ;;  %v2783_v43 = vand.u32 65535, %v6754_v0 }
 0x2ac   :  { %1897 = vmin.xlane.f32.xlu1 %v1896_v48  ;;  %v2416_v27 = vsel %vm2415_vm7, %v2411_v7, inf  ;;  %v2270_v7 = vsel %vm2269_vm9, %v2265_v5, inf  ;;  %v6758_v5 = vld [vmem:[#allocation85_spill] sm:$0xff] }
 0x2ad   :  { %2417 = vmin.xlane.f32.xlu0 %v2416_v27  ;;  %v2277_v27 = vand.u32 65535, %v6753_v24  ;;  %v2577_v26 = vcvt.s32.f32 %v2575_v33  ;;  %v5695_v45 = vpop.xlane.xlu1 %2087  ;;  %v2076_v56 = vsel %vm2075_vm10, %v2071_v1, inf  ;;  %vm2283_vm12 = vcmp.eq.f32.partialorder %v6758_v5, %v5684_v20  ;;  %v6761_v33 = vld [vmem:[#allocation24_spill] sm:$0xff] }
 0x2ae   :  { %v5679_v51 = vpop.xlane.xlu0 %2475  ;;  %6756 = vst [vmem:[#allocation48_spill] sm:$0xff] %v5695_v45  ;;  %v2785_v0 = vcvt.s32.f32 %v2783_v43  ;;  %vm2089_vm14 = vcmp.eq.f32.partialorder %v6762_v10, %v5695_v45  ;;  %v6766_v43 = vld [vmem:[#allocation91_spill] sm:$0xff] }
 0x2af   :  { %6746 = vst [vmem:[#allocation45_spill] sm:$0xff] %v5679_v51  ;;  %v2279_v28 = vcvt.s32.f32 %v2277_v27 }
 0x2b0   :  { %2063 = vmin.xlane.f32.xlu1 %v2062_v58 }
 0x2b1   :  { %v2284_v4 = vsel %vm2283_vm12, %v2279_v28, inf }
 0x2b2   :  { %v5687_v48 = vpop.xlane.xlu0 %2683 }
 0x2b3   :  { %6751 = vst [vmem:[#allocation46_spill] sm:$0xff] %v5687_v48 }
 0x2b4   :  { %2271 = vmin.xlane.f32.xlu1 %v2270_v7  ;;  %v6759_v7 = vld [vmem:[#allocation81_spill] sm:$0xff] }
 0x2b5   :  { %v2083_v8 = vand.u32 65535, %v6759_v7  ;;  %v6767_v7 = vld [vmem:[#allocation78_spill] sm:$0xff] }
 0x2b6   :  { %v5693_v58 = vpop.xlane.xlu0 %2579  ;;  %v2097_v28 = vand.u32 65535, %v6767_v7 }
 0x2b7   :  { %6755 = vst [vmem:[#allocation49_spill] sm:$0xff] %v5693_v58  ;;  %vm2581_vm11 = vcmp.eq.f32.partialorder %v6757_v3, %v5693_v58  ;;  %v6763_v3 = vld [vmem:[#allocation86_spill] sm:$0xff] }
 0x2b8   :  { %2077 = vmin.xlane.f32.xlu1 %v2076_v56  ;;  %v2582_v54 = vsel %vm2581_vm11, %v2577_v26, inf  ;;  %v2291_v5 = vand.u32 65535, %v6763_v3  ;;  %v5709_v56 = vpop.xlane.xlu1 %2295  ;;  %v2085_v26 = vcvt.s32.f32 %v2083_v8  ;;  %v6770_v3 = vld [vmem:[#allocation82_spill] sm:$0xff]  ;;  %v6771_v8 = vld [vmem:[#allocation84_spill] sm:$0xff]  ;;  %v2099_v58 = vcvt.s32.f32 %v2097_v28 }
 0x2b9   :  { %2583 = vmin.xlane.f32.xlu0 %v2582_v54  ;;  %6764 = vst [vmem:[#allocation52_spill] sm:$0xff] %v5709_v56  ;;  %vm2297_vm15 = vcmp.eq.f32.partialorder %v6766_v43, %v5709_v56  ;;  %vm2103_vm0 = vcmp.eq.f32.partialorder %v6770_v3, %v5645_v21  ;;  %v6774_v43 = vld [vmem:[#allocation30_spill] sm:$0xff]  ;;  %v6779_v21 = vld [vmem:[#allocation21_spill] sm:$0xff] }
 0x2ba   :  { %v5702_v24 = vpop.xlane.xlu0 %2787  ;;  %v2090_v27 = vsel %vm2089_vm14, %v2085_v26, inf  ;;  %v6772_v26 = vld [vmem:[#allocation98_spill] sm:$0xff]  ;;  %vm2477_vm4 = vcmp.eq.f32.partialorder %v6779_v21, %v5679_v51 }
 0x2bb   :  { %6760 = vst [vmem:[#allocation50_spill] sm:$0xff] %v5702_v24  ;;  %vm2789_vm13 = vcmp.eq.f32.partialorder %v6761_v33, %v5702_v24  ;;  %v2293_v33 = vcvt.s32.f32 %v2291_v5  ;;  %v6768_v24 = vld [vmem:[#allocation96_spill] sm:$0xff]  ;;  %v2797_v45 = vand.u32 65535, %v6772_v26  ;;  %v2104_v5 = vsel %vm2103_vm0, %v2099_v58, inf }
 0x2bc   :  { %2285 = vmin.xlane.f32.xlu1 %v2284_v4  ;;  %v2790_v1 = vsel %vm2789_vm13, %v2785_v0, inf  ;;  %v2589_v10 = vand.u32 65535, %v6768_v24  ;;  %v6775_v24 = vld [vmem:[#allocation87_spill] sm:$0xff]  ;;  %v6778_v26 = vld [vmem:[#allocation100_spill] sm:$0xff] }
 0x2bd   :  { %2791 = vmin.xlane.f32.xlu0 %v2790_v1  ;;  %v2298_v0 = vsel %vm2297_vm15, %v2293_v33, inf  ;;  %v2305_v1 = vand.u32 65535, %v6771_v8  ;;  %vm2311_vm2 = vcmp.eq.f32.partialorder %v6775_v24, %v5655_v36  ;;  %v6776_v33 = vld [vmem:[#allocation90_spill] sm:$0xff]  ;;  %v2799_v28 = vcvt.s32.f32 %v2797_v45  ;;  %v6783_v45 = vld [vmem:[#allocation95_spill] sm:$0xff] }
 0x2be   :  { %v5711_v54 = vpop.xlane.xlu0 %2489  ;;  %v2471_v3 = vand.u32 65535, %v6776_v33 }
 0x2bf   :  { %6765 = vst [vmem:[#allocation51_spill] sm:$0xff] %v5711_v54 }
 0x2c0   :  { %2091 = vmin.xlane.f32.xlu1 %v2090_v27  ;;  %v2591_v27 = vcvt.s32.f32 %v2589_v10  ;;  %v2473_v33 = vcvt.s32.f32 %v2471_v3  ;;  %v6786_v3 = vld [vmem:[#allocation27_spill] sm:$0xff] }
 0x2c1   :  { %vm2491_vm7 = vcmp.eq.f32.partialorder %v6786_v3, %v5711_v54  ;;  %v6790_v3 = vld [vmem:[#allocation97_spill] sm:$0xff] }
 0x2c2   :  { %v5717_v4 = vpop.xlane.xlu0 %2697 }
 0x2c3   :  { %6769 = vst [vmem:[#allocation53_spill] sm:$0xff] %v5717_v4 }
 0x2c4   :  { %2299 = vmin.xlane.f32.xlu1 %v2298_v0  ;;  %v2307_v0 = vcvt.s32.f32 %v2305_v1  ;;  %v2478_v1 = vsel %vm2477_vm4, %v2473_v33, inf }
 0x2c6   :  { %v5723_v20 = vpop.xlane.xlu0 %2593  ;;  %v2312_v10 = vsel %vm2311_vm2, %v2307_v0, inf }
 0x2c7   :  { %6773 = vst [vmem:[#allocation55_spill] sm:$0xff] %v5723_v20  ;;  %vm2595_vm1 = vcmp.eq.f32.partialorder %v6774_v43, %v5723_v20  ;;  %v6780_v43 = vld [vmem:[#allocation92_spill] sm:$0xff]  ;;  %v6782_v20 = vld [vmem:[#allocation22_spill] sm:$0xff] }
 0x2c8   :  { %2105 = vmin.xlane.f32.xlu1 %v2104_v5  ;;  %v2596_v7 = vsel %vm2595_vm1, %v2591_v27, inf  ;;  %v2679_v24 = vand.u32 65535, %v6780_v43  ;;  %v6781_v5 = vld [vmem:[#allocation101_spill] sm:$0xff]  ;;  %vm2685_vm5 = vcmp.eq.f32.partialorder %v6782_v20, %v5687_v48 }
 0x2c9   :  { %2597 = vmin.xlane.f32.xlu0 %v2596_v7  ;;  %v2603_v27 = vand.u32 65535, %v6781_v5  ;;  %v1232_v7 = vpop.xlane.xlu1 %1231 }
 0x2ca   :  { %v5730_v8 = vpop.xlane.xlu0 %2801  ;;  %v2681_v21 = vcvt.s32.f32 %v2679_v24 }
 0x2cb   :  { %6777 = vst [vmem:[#allocation54_spill] sm:$0xff] %v5730_v8  ;;  %vm2803_vm3 = vcmp.eq.f32.partialorder %v6778_v26, %v5730_v8  ;;  %v2485_v26 = vand.u32 65535, %v6783_v45  ;;  %v2605_v8 = vcvt.s32.f32 %v2603_v27  ;;  %v6788_v45 = vld [vmem:[#allocation28_spill] sm:$0xff] }
 0x2cc   :  { %2313 = vmin.xlane.f32.xlu1 %v2312_v10  ;;  %v2804_v58 = vsel %vm2803_vm3, %v2799_v28, inf  ;;  %v6785_v28 = vld [vmem:[#allocation102_spill] sm:$0xff]  ;;  %v2686_v43 = vsel %vm2685_vm5, %v2681_v21, inf  ;;  %vm2699_vm8 = vcmp.eq.f32.partialorder %v6788_v45, %v5717_v4  ;;  %v6789_v21 = vld [vmem:[#allocation25_spill] sm:$0xff] }
 0x2cd   :  { %2805 = vmin.xlane.f32.xlu0 %v2804_v58  ;;  %v1440_v5 = vpop.xlane.xlu1 %1439  ;;  %v6787_v58 = vld [vmem:[#allocation26_spill] sm:$0xff]  ;;  %v2487_v33 = vcvt.s32.f32 %v2485_v26  ;;  %v2499_v26 = vand.u32 65535, %v5444_v32 }
 0x2ce   :  { %v2693_v20 = vand.u32 65535, %v6787_v58  ;;  %v1456_v58 = vcvt.f32.s32 %v5377_v60  ;;  %v1441_v48 = vcvt.f32.s32 %v1440_v5 }
 0x2cf   :  { %v2501_v19 = vcvt.s32.f32 %v2499_v26 }
 0x2d0   :  { %2479 = vmin.xlane.f32.xlu1 %v2478_v1  ;;  %v2492_v1 = vsel %vm2491_vm7, %v2487_v33, inf  ;;  %v2695_v27 = vcvt.s32.f32 %v2693_v20  ;;  %v1352_v33 = vcvt.f32.s32 %v5384_v18  ;;  %v1338_v20 = vcvt.f32.s32 %v5436_v15 }
 0x2d1   :  { %v5741_v0 = vpop.xlane.xlu0 %2607  ;;  %v1457_v60 = vshll.u32 %v1456_v58, 16 }
 0x2d2   :  { %6784 = vst [vmem:[#allocation56_spill] sm:$0xff] %v5741_v0  ;;  %vm2609_vm6 = vcmp.eq.f32.partialorder %v6785_v28, %v5741_v0  ;;  %v2700_v28 = vsel %vm2699_vm8, %v2695_v27, inf  ;;  %v1234_v0 = vcvt.f32.s32 %v6789_v21  ;;  %v6792_v27 = vld [vmem:[#allocation18_spill] sm:$0xff]  ;;  %v1353_v36 = vshll.u32 %v1352_v33, 16 }
 0x2d3   :  { %v2610_v10 = vsel %vm2609_vm6, %v2605_v8, inf  ;;  %v1199_v21 = vadd.s32 8, %v6792_v27  ;;  %v1339_v15 = vshll.u32 %v1338_v20, 16 }
 0x2d4   :  { %2611 = vmin.xlane.f32.xlu0 %v2610_v10  ;;  %2687 = vmin.xlane.f32.xlu1 %v2686_v43  ;;  %v1442_v10 = vcvt.f32.s32 %v6790_v3  ;;  %v6791_v43 = vld [vmem:[#allocation99_spill] sm:$0xff]  ;;  %v1235_v4 = vshll.u32 %v1234_v0, 16 }
 0x2d5   :  { %v1248_v54 = vcvt.f32.s32 %v6791_v43  ;;  %v1546_v43 = vcvt.f32.s32 %v5456_v12 }
 0x2d6   :  { %v1443_v3 = vshll.u32 %v1442_v10, 16  ;;  %v5770_v10 = vmul.u32 16, %v1199_v21  ;;  %v1561_v21 = vshll.u32 %v1560_v6, 16 }
 0x2d7   :  { %v1249_v51 = vshll.u32 %v1248_v54, 16  ;;  %v1547_v12 = vshll.u32 %v1546_v43, 16 }
 0x2d8   :  { %2493 = vmin.xlane.f32.xlu1 %v2492_v1  ;;  %v1233_v1 = vcvt.f32.s32 %v1232_v7  ;;  %v1444_v54 = vadd.s32 %v1443_v3, %v1441_v48  ;;  %v1384_v55 = vadd.s32 1, %v5770_v10  ;;  %v2811_v48 = vand.u32 65535, %v5465_v46  ;;  %v2950_v3 = vld [vmem:[#allocation7 + $0x278] sm:$0xff] }
 0x2d9   :  { %v5750_v24 = vpop.xlane.xlu1 %2517  ;;  %v1592_v46 = vadd.s32 3, %v5770_v10  ;;  %vm1284_vm3 = vcmp.lt.s32.totalorder %v5770_v10, 512 }
 0x2da   :  { %v1236_v18 = vadd.s32 %v1235_v4, %v1233_v1  ;;  %vm1495_vm14 = vcmp.eq.s32.totalorder %v4865_v49, %v1444_v54  ;;  %vm1388_vm2 = vcmp.lt.s32.totalorder %v1384_v55, 512  ;;  %v2707_v54 = vand.u32 65535, %v5484_v42  ;;  %v2981_v55 = vld [vmem:[#allocation7 + $0x370] sm:$0xff] }
 0x2db   :  { %v1200_v42 = vadd.s32 16, %v6792_v27 }
 0x2dc   :  { %2701 = vmin.xlane.f32.xlu1 %v2700_v28  ;;  %v5762_v28 = vmul.u32 16, %v6792_v27  ;;  %vm1287_vm11 = vcmp.eq.s32.totalorder %v4865_v49, %v1236_v18  ;;  %v1488_v18 = vadd.s32 2, %v5770_v10 }
 0x2dd   :  { %v5752_v8 = vpop.xlane.xlu1 %2725 }
 0x2de   :  { %v1383_v32 = vadd.s32 1, %v5762_v28  ;;  %vm1283_vm9 = vcmp.lt.s32.totalorder %v5762_v28, 512  ;;  %v1487_v5 = vadd.s32 2, %v5762_v28  ;;  %v1591_v4 = vadd.s32 3, %v5762_v28 }
 0x2df   :  { %vm1299_vm0 = vmand %vm1287_vm11, %vm1283_vm9  ;;  %vm1596_vm11 = vcmp.lt.s32.totalorder %v1592_v46, 512 }
 0x2e0   :  { %vm1387_vm10 = vcmp.lt.s32.totalorder %v1383_v32, 512  ;;  %vm1491_vm13 = vcmp.lt.s32.totalorder %v1487_v5, 512  ;;  %vm1595_vm1 = vcmp.lt.s32.totalorder %v1591_v4, 512  ;;  %v2997_v5 = vld [vmem:[#allocation7 + $0x3f0] sm:$0xff]  ;;  %v2813_v4 = vcvt.s32.f32 %v2811_v48  ;;  %v2996_v48 = vld [vmem:[#allocation7 + $0x3e8] sm:$0xff] }
 0x2e1   :  { %v1246_v45 = vpop.xlane.xlu1 %1245  ;;  %vm5793_vm4 = vmand %vm1495_vm14, %vm1491_vm13  ;;  %vm1492_vm13 = vcmp.lt.s32.totalorder %v1488_v18, 512 }
 0x2e2   :  { %v1247_v16 = vcvt.f32.s32 %v1246_v45 }
 0x2e4   :  { %v1250_v1 = vadd.s32 %v1249_v51, %v1247_v16  ;;  %v6565_v51 = vmov 1.0  }
 0x2e5   :  { %v1336_v7 = vpop.xlane.xlu0 %1335  ;;  %v1454_v56 = vpop.xlane.xlu1 %1453 }
 0x2e6   :  { %v1337_v0 = vcvt.f32.s32 %v1336_v7  ;;  %v1455_v26 = vcvt.f32.s32 %v1454_v56  ;;  %vm1288_vm7 = vcmp.eq.s32.totalorder %v4865_v49, %v1250_v1  ;;  %v6795_v1 = vld [vmem:[#allocation103_spill] sm:$0xff] }
 0x2e8   :  { %v1340_v14 = vadd.s32 %v1339_v15, %v1337_v0  ;;  %v1458_v6 = vadd.s32 %v1457_v60, %v1455_v26  ;;  %v2982_v15 = vld [vmem:[#allocation7 + $0x378] sm:$0xff]  ;;  %v2964_v26 = vld [vmem:[#allocation7 + $0x2e8] sm:$0xff] }
 0x2e9   :  { %v1544_v58 = vpop.xlane.xlu0 %1543  ;;  %v1350_v33 = vpop.xlane.xlu1 %1349 }
 0x2ea   :  { %v1545_v45 = vcvt.f32.s32 %v1544_v58  ;;  %v1351_v20 = vcvt.f32.s32 %v1350_v33  ;;  %vm1391_vm12 = vcmp.eq.s32.totalorder %v4865_v49, %v1340_v14  ;;  %v2965_v14 = vld [vmem:[#allocation7 + $0x2f0] sm:$0xff]  ;;  %vm1496_vm14 = vcmp.eq.s32.totalorder %v4865_v49, %v1458_v6  ;;  %v2948_v33 = vld [vmem:[#allocation7 + $0x268] sm:$0xff] }
 0x2eb   :  { %vm1403_vm15 = vmand %vm1391_vm12, %vm1387_vm10  ;;  %v6800_v6 = vld [vmem:[#allocation29_spill] sm:$0xff] }
 0x2ec   :  { %v1548_v56 = vadd.s32 %v1547_v12, %v1545_v45  ;;  %v1354_v16 = vadd.s32 %v1353_v36, %v1351_v20  ;;  %3931 = vmatprep.mubr.msk.f32.mxu0 %vm1403_vm15, %v6565_v51  ;;  %vm1300_vm12 = vmand %vm1288_vm7, %vm1284_vm3  ;;  %v2513_v45 = vand.u32 65535, %v6795_v1  ;;  %v1262_v20 = vcvt.f32.s32 %v5398_v63  ;;  %v2947_v63 = vld [vmem:[#allocation7 + $0x260] sm:$0xff] }
 0x2ed   :  { %3932 = vmatmul.mubr.msk.f32.vlgmr.msra.gmra.mxu0 %vm1299_vm0, %v6565_v51  ;;  %v5786_v43 = vpop.xlane.xlu0 %2503  ;;  %v1558_v32 = vpop.xlane.xlu1 %1557  ;;  %v6799_v36 = vld [vmem:[#allocation107_spill] sm:$0xff] }
 0x2ee   :  { %vm2505_vm5 = vcmp.eq.f32.partialorder %v5478_v53, %v5786_v43  ;;  %v1559_v60 = vcvt.f32.s32 %v1558_v32  ;;  %vm1599_vm6 = vcmp.eq.s32.totalorder %v4865_v49, %v1548_v56  ;;  %4084 = vmatpush3.msra.mxu0 %v2950_v3  ;;  %vm1392_vm9 = vcmp.eq.s32.totalorder %v4865_v49, %v1354_v16  ;;  %v2949_v53 = vld [vmem:[#allocation7 + $0x270] sm:$0xff] }
 0x2ef   :  { %vm1611_vm8 = vmand %vm1599_vm6, %vm1595_vm1  ;;  %v2506_v7 = vsel %vm2505_vm5, %v2501_v19, inf  ;;  %4085 = vmatprep.subr.mxu0 %v2965_v14  ;;  %v6797_v56 = vld [vmem:[#allocation106_spill] sm:$0xff]  ;;  %v2709_v32 = vcvt.s32.f32 %v2707_v54  ;;  %v1263_v1 = vshll.u32 %v1262_v20, 16 }
 0x2f0   :  { %v1562_v0 = vadd.s32 %v1561_v21, %v1559_v60  ;;  %3939 = vmatprep.mubr.msk.f32.mxu1 %vm1611_vm8, %v6565_v51  ;;  %2507 = vmin.xlane.f32.xlu1 %v2506_v7  ;;  %vm1404_vm10 = vmand %vm1392_vm9, %vm1388_vm2  ;;  %v6796_v21 = vld [vmem:[#allocation34_spill] sm:$0xff]  ;;  %v1470_v16 = vcvt.f32.s32 %v6797_v56  ;;  %v1366_v60 = vcvt.f32.s32 %v6799_v36  ;;  %v5840_v7 = vmul.u32 16, %v1200_v42  ;;  %v6803_v56 = vld [vmem:[#allocation35_spill] sm:$0xff] }
 0x2f1   :  { %3940 = vmatmul.mubr.msk.f32.vlgmr.msra.gmra.mxu1 %vm5793_vm4, %v6565_v51  ;;  %v5809_v19 = vpop.xlane.xlu0 %2815  ;;  %3933 = vmatprep.mubr.msk.f32.mxu0 %vm1404_vm10, %v6565_v51  ;;  %v5812_v12 = vpop.xlane.xlu1 %1259  ;;  %vm1508_vm2 = vmand %vm1496_vm14, %vm1492_vm13  ;;  %v2617_v3 = vand.u32 65535, %v6796_v21  ;;  %v2515_v42 = vcvt.s32.f32 %v2513_v45  ;;  %v2979_v21 = vld [vmem:[#allocation7 + $0x360] sm:$0xff]  ;;  %v2825_v36 = vand.u32 65535, %v6803_v56 }
 0x2f2   :  { %vm2817_vm15 = vcmp.eq.f32.partialorder %v5497_v31, %v5809_v19  ;;  %3934 = vmatmul.mubr.msk.f32.gmra.mxu0 %vm1300_vm12, %v6565_v51  ;;  %vm1600_vm0 = vcmp.eq.s32.totalorder %v4865_v49, %v1562_v0  ;;  %4128 = vmatpush3.msra.mxu1 %v2982_v15  ;;  %v2963_v31 = vld [vmem:[#allocation7 + $0x2e0] sm:$0xff]  ;;  %v1261_v18 = vcvt.f32.s32 %v5812_v12  ;;  %v2962_v15 = vld [vmem:[#allocation7 + $0x2d8] sm:$0xff]  ;;  %v2980_v0 = vld [vmem:[#allocation7 + $0x368] sm:$0xff]  ;;  %v1367_v20 = vshll.u32 %v1366_v60, 16 }
 0x2f3   :  { %v2818_v58 = vsel %vm2817_vm15, %v2813_v4, inf  ;;  %vm1612_vm1 = vmand %vm1600_vm0, %vm1596_vm11  ;;  %4086 = vmatpush3.msra.mxu0 %v2949_v53  ;;  %4129 = vmatprep.subr.mxu1 %v2997_v5  ;;  %v6801_v53 = vld [vmem:[#allocation105_spill] sm:$0xff]  ;;  %v1574_v4 = vcvt.f32.s32 %v5428_v29  ;;  %v6802_v12 = vld [vmem:[#allocation104_spill] sm:$0xff]  ;;  %vm1285_vm8 = vcmp.lt.s32.totalorder %v5840_v7, 512 }
 0x2f4   :  { %2819 = vmin.xlane.f32.xlu0 %v2818_v58  ;;  %3941 = vmatprep.mubr.msk.f32.mxu1 %vm1612_vm1, %v6565_v51  ;;  %v2721_v5 = vand.u32 65535, %v6801_v53  ;;  %v2995_v58 = vld [vmem:[#allocation7 + $0x3e0] sm:$0xff]  ;;  %vm2519_vm4 = vcmp.eq.f32.partialorder %v6802_v12, %v5750_v24  ;;  %v1264_v53 = vadd.s32 %v1263_v1, %v1261_v18  ;;  %v2978_v60 = vld [vmem:[#allocation7 + $0x358] sm:$0xff] }
 0x2f5   :  { %v5833_v46 = vpop.xlane.xlu0 %2711  ;;  %v1468_v14 = vpop.xlane.xlu1 %1467  ;;  %3942 = vmatmul.mubr.msk.f32.gmra.mxu1 %vm1508_vm2, %v6565_v51  ;;  %4087 = vmatprep.subr.mxu0 %v2964_v26  ;;  %v2946_v26 = vld [vmem:[#allocation7 + $0x258] sm:$0xff] }
 0x2f6   :  { %6798 = vst [vmem:[#allocation58_spill] sm:$0xff] %v5833_v46  ;;  %vm2713_vm3 = vcmp.eq.f32.partialorder %v6800_v6, %v5833_v46  ;;  %4088 = vmatpush3.msra.mxu0 %v2948_v33  ;;  %4130 = vmatpush3.msra.mxu1 %v2981_v55  ;;  %v1385_v33 = vadd.s32 1, %v5840_v7  ;;  %v2961_v55 = vld [vmem:[#allocation7 + $0x2d0] sm:$0xff]  ;;  %v1471_v6 = vshll.u32 %v1470_v16, 16  ;;  %v1469_v29 = vcvt.f32.s32 %v1468_v14  ;;  %v2994_v51 = vld [vmem:[#allocation7 + $0x3d8] sm:$0xff] }
 0x2f7   :  { %v2714_v54 = vsel %vm2713_vm3, %v2709_v32, inf  ;;  %4089 = vmatprep.subr.mxu0 %v2963_v31  ;;  %4131 = vmatprep.subr.mxu1 %v2996_v48  ;;  %v2619_v48 = vcvt.s32.f32 %v2617_v3  ;;  %v1575_v46 = vshll.u32 %v1574_v4, 16  ;;  %v2520_v16 = vsel %vm2519_vm4, %v2515_v42, inf  ;;  %v2960_v3 = vld [vmem:[#allocation7 + $0x2c8] sm:$0xff]  ;;  %v6805_v18 = vld [vmem:[#allocation31_spill] sm:$0xff] }
 0x2f8   :  { %2715 = vmin.xlane.f32.xlu1 %v2714_v54  ;;  %4090 = vmatpush3.msra.mxu0 %v2947_v63  ;;  %v6804_v54 = vld [vmem:[#allocation33_spill] sm:$0xff]  ;;  %v2723_v56 = vcvt.s32.f32 %v2721_v5  ;;  %vm2727_vm6 = vcmp.eq.f32.partialorder %v6805_v18, %v5752_v8  ;;  %vm1389_vm7 = vcmp.lt.s32.totalorder %v1385_v33, 512  ;;  %v2827_v5 = vcvt.s32.f32 %v2825_v36 }
 0x2f9   :  { %v5848_v32 = vpop.xlane.xlu0 %2621  ;;  %v1364_v31 = vpop.xlane.xlu1 %1363  ;;  %4091 = vmatprep.subr.mxu0 %v2962_v15  ;;  %4132 = vmatpush3.msra.mxu1 %v2980_v0  ;;  %v2945_v63 = vld [vmem:[#allocation7 + $0x250] sm:$0xff]  ;;  %v1593_v0 = vadd.s32 3, %v5840_v7  ;;  %v2944_v4 = vld [vmem:[#allocation7 + $0x248] sm:$0xff]  ;;  %v1489_v42 = vadd.s32 2, %v5840_v7  ;;  %vm1289_vm11 = vcmp.eq.s32.totalorder %v4865_v49, %v1264_v53  ;;  %v1201_v33 = vadd.s32 24, %v6792_v27 }
 0x2fa   :  { %vm2623_vm5 = vcmp.eq.f32.partialorder %v6804_v54, %v5848_v32  ;;  %v1365_v45 = vcvt.f32.s32 %v1364_v31  ;;  %4092 = vmatpush3.msra.mxu0 %v2946_v26  ;;  %4133 = vmatprep.subr.mxu1 %v2995_v58  ;;  %v2993_v26 = vld [vmem:[#allocation7 + $0x3d0] sm:$0xff]  ;;  %v1472_v58 = vadd.s32 %v1471_v6, %v1469_v29  ;;  %v2728_v36 = vsel %vm2727_vm6, %v2723_v56, inf  ;;  %v2992_v31 = vld [vmem:[#allocation7 + $0x3c8] sm:$0xff]  ;;  %vm1301_vm14 = vmand %vm1289_vm11, %vm1285_vm8 }
 0x2fb   :  { %v2624_v14 = vsel %vm2623_vm5, %v2619_v48, inf  ;;  %4093 = vmatprep.subr.mxu0 %v2961_v55  ;;  %4134 = vmatpush3.msra.mxu1 %v2979_v21  ;;  %v2959_v21 = vld [vmem:[#allocation7 + $0x2c0] sm:$0xff]  ;;  %vm1597_vm13 = vcmp.lt.s32.totalorder %v1593_v0, 512  ;;  %vm1493_vm15 = vcmp.lt.s32.totalorder %v1489_v42, 512  ;;  %v2976_v53 = vld [vmem:[#allocation7 + $0x348] sm:$0xff]  ;;  %v2941_v56 = vld [vmem:[#allocation7 + $0x230] sm:$0xff] }
 0x2fc   :  { %v1368_v15 = vadd.s32 %v1367_v20, %v1365_v45  ;;  %2521 = vmin.xlane.f32.xlu1 %v2520_v16  ;;  %2625 = vmin.xlane.f32.xlu0 %v2624_v14  ;;  %v6806_v20 = vmov 1.0   ;;  %vm1497_vm0 = vcmp.eq.s32.totalorder %v4865_v49, %v1472_v58  ;;  %v2942_v45 = vld [vmem:[#allocation7 + $0x238] sm:$0xff]  ;;  %v2957_v16 = vld [vmem:[#allocation7 + $0x2b0] sm:$0xff]  ;;  %v2991_v14 = vld [vmem:[#allocation7 + $0x3c0] sm:$0xff]  ;;  %v5891_v0 = vmul.u32 16, %v1201_v33 }
 0x2fd   :  { %v5858_v1 = vpop.xlane.xlu0 %2829  ;;  %v1572_v12 = vpop.xlane.xlu1 %1571  ;;  %4094 = vmatpush3.msra.mxu0 %v2945_v63  ;;  %4135 = vmatprep.subr.mxu1 %v2994_v51  ;;  %v2977_v51 = vld [vmem:[#allocation7 + $0x350] sm:$0xff]  ;;  %v1276_v63 = vcvt.f32.s32 %v5449_v13  ;;  %vm1509_vm3 = vmand %vm1497_vm0, %vm1493_vm15  ;;  %v2975_v13 = vld [vmem:[#allocation7 + $0x340] sm:$0xff] }
 0x2fe   :  { %vm2831_vm9 = vcmp.eq.f32.partialorder %v5542_v41, %v5858_v1  ;;  %v1573_v55 = vcvt.f32.s32 %v1572_v12  ;;  %vm1393_vm10 = vcmp.eq.s32.totalorder %v4865_v49, %v1368_v15  ;;  %4095 = vmatprep.subr.mxu0 %v2960_v3  ;;  %4136 = vmatpush3.msra.mxu1 %v2978_v60  ;;  %v2943_v41 = vld [vmem:[#allocation7 + $0x240] sm:$0xff]  ;;  %v2956_v18 = vld [vmem:[#allocation7 + $0x2a8] sm:$0xff]  ;;  %v1380_v15 = vcvt.f32.s32 %v5488_v38  ;;  %v2938_v33 = vld [vmem:[#allocation7 + $0x218] sm:$0xff] }
 0x2ff   :  { %v2832_v6 = vsel %vm2831_vm9, %v2827_v5, inf  ;;  %vm1405_vm12 = vmand %vm1393_vm10, %vm1389_vm7  ;;  %4096 = vmatpush3.msra.mxu0 %v2944_v4  ;;  %4137 = vmatprep.subr.mxu1 %v2993_v26  ;;  %v2990_v4 = vld [vmem:[#allocation7 + $0x3b8] sm:$0xff]  ;;  %v2940_v26 = vld [vmem:[#allocation7 + $0x228] sm:$0xff]  ;;  %v1277_v58 = vshll.u32 %v1276_v63, 16  ;;  %v1484_v12 = vcvt.f32.s32 %v5470_v34  ;;  %v1588_v34 = vcvt.f32.s32 %v5505_v2 }
 0x300   :  { %v1576_v29 = vadd.s32 %v1575_v46, %v1573_v55  ;;  %2729 = vmin.xlane.f32.xlu1 %v2728_v36  ;;  %2833 = vmin.xlane.f32.xlu0 %v2832_v6  ;;  %v2958_v46 = vld [vmem:[#allocation7 + $0x2b8] sm:$0xff]  ;;  %v2955_v42 = vld [vmem:[#allocation7 + $0x2a0] sm:$0xff]  ;;  %v1386_v55 = vadd.s32 1, %v5891_v0  ;;  %v2937_v2 = vld [vmem:[#allocation7 + $0x210] sm:$0xff]  ;;  %vm1286_vm5 = vcmp.lt.s32.totalorder %v5891_v0, 512 }
 0x301   :  { %v5870_v48 = vpop.xlane.xlu0 %1765  ;;  %3935 = vmatprep.mubr.msk.f32.mxu0 %vm1405_vm12, %v6806_v20  ;;  %v1274_v54 = vpop.xlane.xlu1 %1273  ;;  %4097 = vmatprep.subr.mxu0 %v2959_v21  ;;  %v2974_v5 = vld [vmem:[#allocation7 + $0x338] sm:$0xff]  ;;  %v2989_v21 = vld [vmem:[#allocation7 + $0x3b0] sm:$0xff]  ;;  %v2939_v36 = vld [vmem:[#allocation7 + $0x220] sm:$0xff] }
 0x302   :  { %3936 = vmatmul.mubr.msk.f32.gmra.mxu0 %vm1301_vm14, %v6806_v20  ;;  %vm1601_vm1 = vcmp.eq.s32.totalorder %v4865_v49, %v1576_v29  ;;  %4138 = vmatpush3.msra.mxu1 %v2977_v51  ;;  %v1275_v3 = vcvt.f32.s32 %v1274_v54  ;;  %v2973_v29 = vld [vmem:[#allocation7 + $0x330] sm:$0xff]  ;;  %vm1390_vm4 = vcmp.lt.s32.totalorder %v1386_v55, 512 }
 0x303   :  { %vm1613_vm2 = vmand %vm1601_vm1, %vm1597_vm13  ;;  %4098 = vmatpush3.msra.mxu0 %v2943_v41  ;;  %4139 = vmatprep.subr.mxu1 %v2992_v31  ;;  %v2954_v41 = vld [vmem:[#allocation7 + $0x298] sm:$0xff]  ;;  %v1381_v31 = vshll.u32 %v1380_v15, 16  ;;  %v2971_v15 = vld [vmem:[#allocation7 + $0x320] sm:$0xff] }
 0x304   :  { %3943 = vmatprep.mubr.msk.f32.mxu1 %vm1613_vm2, %v6806_v20  ;;  %4099 = vmatprep.subr.mxu0 %v2958_v46  ;;  %v1278_v38 = vadd.s32 %v1277_v58, %v1275_v3  ;;  %v2988_v46 = vld [vmem:[#allocation7 + $0x3a8] sm:$0xff]  ;;  %v2987_v3 = vld [vmem:[#allocation7 + $0x3a0] sm:$0xff] }
 0x305   :  { %v5887_v27 = vpop.xlane.xlu0 %1973  ;;  %v1482_v60 = vpop.xlane.xlu1 %1481  ;;  %3944 = vmatmul.mubr.msk.f32.gmra.mxu1 %vm1509_vm3, %v6806_v20  ;;  %4100 = vmatpush3.msra.mxu0 %v2942_v45  ;;  %v1485_v45 = vshll.u32 %v1484_v12, 16  ;;  %v2952_v58 = vld [vmem:[#allocation7 + $0x288] sm:$0xff]  ;;  %v2986_v12 = vld [vmem:[#allocation7 + $0x398] sm:$0xff] }
 0x306   :  { %4140 = vmatpush3.msra.mxu1 %v2976_v53  ;;  %4101 = vmatprep.subr.mxu0 %v2957_v16  ;;  %v1483_v6 = vcvt.f32.s32 %v1482_v60  ;;  %v2972_v53 = vld [vmem:[#allocation7 + $0x328] sm:$0xff]  ;;  %v2953_v16 = vld [vmem:[#allocation7 + $0x290] sm:$0xff]  ;;  %vm1290_vm6 = vcmp.eq.s32.totalorder %v4865_v49, %v1278_v38  ;;  %v2935_v38 = vld [vmem:[#allocation7 + $0x200] sm:$0xff] }
 0x307   :  { %4141 = vmatprep.subr.mxu1 %v2991_v14  ;;  %4102 = vmatpush3.msra.mxu0 %v2941_v56  ;;  %v1594_v56 = vadd.s32 3, %v5891_v0  ;;  %vm1302_vm9 = vmand %vm1290_vm6, %vm1286_vm5 }
 0x308   :  { %4142 = vmatpush3.msra.mxu1 %v2975_v13  ;;  %4103 = vmatprep.subr.mxu0 %v2956_v18  ;;  %v1486_v60 = vadd.s32 %v1485_v45, %v1483_v6  ;;  %v1490_v18 = vadd.s32 2, %v5891_v0  ;;  %v2968_v45 = vld [vmem:[#allocation7 + $0x308] sm:$0xff] }
 0x309   :  { %v1378_v51 = vpop.xlane.xlu1 %1377  ;;  %4143 = vmatprep.subr.mxu1 %v2990_v4  ;;  %4104 = vmatpush3.msra.mxu0 %v2940_v26  ;;  %v5896_v63 = vpop.xlane.xlu0 %1779  ;;  %v1589_v4 = vshll.u32 %v1588_v34, 16  ;;  %vm1598_vm10 = vcmp.lt.s32.totalorder %v1594_v56, 512  ;;  %v1768_v34 = vcvt.f32.s32 %v5486_v35  ;;  %v1767_v35 = vcvt.f32.s32 %v5870_v48 }
 0x30a   :  { %v1379_v54 = vcvt.f32.s32 %v1378_v51  ;;  %4144 = vmatpush3.msra.mxu1 %v2974_v5  ;;  %4105 = vmatprep.subr.mxu0 %v2955_v42  ;;  %v2936_v5 = vld [vmem:[#allocation7 + $0x208] sm:$0xff]  ;;  %vm1494_vm11 = vcmp.lt.s32.totalorder %v1490_v18, 512  ;;  %vm1498_vm12 = vcmp.eq.s32.totalorder %v4865_v49, %v1486_v60  ;;  %v2985_v51 = vld [vmem:[#allocation7 + $0x390] sm:$0xff]  ;;  %v1858_v56 = vcvt.f32.s32 %v5535_v59  ;;  %v3062_v18 = vld [vmem:[#allocation7 + $0x5f8] sm:$0xff] }
 0x30b   :  { %4145 = vmatprep.subr.mxu1 %v2989_v21  ;;  %4106 = vmatpush3.msra.mxu0 %v2939_v36  ;;  %v2970_v21 = vld [vmem:[#allocation7 + $0x318] sm:$0xff]  ;;  %v2951_v36 = vld [vmem:[#allocation7 + $0x280] sm:$0xff]  ;;  %vm1510_vm15 = vmand %vm1498_vm12, %vm1494_vm11  ;;  %v1769_v60 = vshll.u32 %v1768_v34, 16  ;;  %v1695_v48 = vadd.s32 4, %v5762_v28 }
 0x30c   :  { %v1382_v14 = vadd.s32 %v1381_v31, %v1379_v54  ;;  %4146 = vmatpush3.msra.mxu1 %v2973_v29  ;;  %4107 = vmatprep.subr.mxu0 %v2954_v41  ;;  %v1650_v29 = vcvt.f32.s32 %v5524_v11  ;;  %v2969_v41 = vld [vmem:[#allocation7 + $0x310] sm:$0xff]  ;;  %v3030_v31 = vld [vmem:[#allocation7 + $0x4f8] sm:$0xff]  ;;  %v2984_v54 = vld [vmem:[#allocation7 + $0x388] sm:$0xff] }
 0x30d   :  { %v1586_v13 = vpop.xlane.xlu1 %1585  ;;  %4147 = vmatprep.subr.mxu1 %v2988_v46  ;;  %4108 = vmatpush3.msra.mxu0 %v2938_v33  ;;  %v5909_v6 = vpop.xlane.xlu0 %1987  ;;  %v1976_v46 = vcvt.f32.s32 %v5513_v22  ;;  %v2967_v22 = vld [vmem:[#allocation7 + $0x300] sm:$0xff]  ;;  %v1770_v59 = vadd.s32 %v1769_v60, %v1767_v35  ;;  %vm1699_vm1 = vcmp.lt.s32.totalorder %v1695_v48, 512  ;;  %v1990_v35 = vcvt.f32.s32 %v5544_v40  ;;  %v3028_v40 = vld [vmem:[#allocation7 + $0x4e8] sm:$0xff] }
 0x30e   :  { %v1587_v26 = vcvt.f32.s32 %v1586_v13  ;;  %vm1394_vm7 = vcmp.eq.s32.totalorder %v4865_v49, %v1382_v14  ;;  %4148 = vmatpush3.msra.mxu1 %v2972_v53  ;;  %4109 = vmatprep.subr.mxu0 %v2953_v16  ;;  %v1754_v53 = vcvt.f32.s32 %v5546_v23  ;;  %v2983_v16 = vld [vmem:[#allocation7 + $0x380] sm:$0xff]  ;;  %v1651_v14 = vshll.u32 %v1650_v29, 16 }
 0x30f   :  { %vm1406_vm8 = vmand %vm1394_vm7, %vm1390_vm4  ;;  %4149 = vmatprep.subr.mxu1 %v2987_v3  ;;  %4110 = vmatpush3.msra.mxu0 %v2937_v2  ;;  %v1962_v3 = vcvt.f32.s32 %v5557_v57  ;;  %v1799_v13 = vadd.s32 5, %v5762_v28  ;;  %v1977_v23 = vshll.u32 %v1976_v46, 16  ;;  %v1800_v57 = vadd.s32 5, %v5770_v10 }
 0x310   :  { %v1590_v42 = vadd.s32 %v1589_v4, %v1587_v26  ;;  %3937 = vmatprep.mubr.msk.f32.mxu0 %vm1406_vm8, %v6806_v20  ;;  %4150 = vmatpush3.msra.mxu1 %v2971_v15  ;;  %vm1808_vm5 = vcmp.eq.s32.totalorder %v4865_v49, %v1770_v59  ;;  %v2008_v46 = vadd.s32 7, %v5770_v10  ;;  %v3011_v59 = vld [vmem:[#allocation7 + $0x460] sm:$0xff] }
 0x311   :  { %v1648_v55 = vpop.xlane.xlu1 %1647  ;;  %3938 = vmatmul.mubr.msk.f32.gmra.mxu0 %vm1302_vm9, %v6806_v20  ;;  %4111 = vmatprep.subr.mxu0 %v2952_v58  ;;  %v5927_v2 = vpop.xlane.xlu0 %1793  ;;  %v1755_v58 = vshll.u32 %v1754_v53, 16  ;;  %vm1803_vm0 = vcmp.lt.s32.totalorder %v1799_v13, 512  ;;  %vm1804_vm4 = vcmp.lt.s32.totalorder %v1800_v57, 512  ;;  %v3012_v13 = vld [vmem:[#allocation7 + $0x468] sm:$0xff]  ;;  %v1678_v57 = vcvt.f32.s32 %v5593_v25 }
 0x312   :  { %vm1602_vm13 = vcmp.eq.s32.totalorder %v4865_v49, %v1590_v42  ;;  %4151 = vmatprep.subr.mxu1 %v2986_v12  ;;  %4112 = vmatpush3.msra.mxu0 %v2936_v5  ;;  %v1649_v33 = vcvt.f32.s32 %v1648_v55  ;;  %v1782_v5 = vcvt.f32.s32 %v5530_v17  ;;  %v1859_v42 = vshll.u32 %v1858_v56, 16  ;;  %vm1820_vm11 = vmand %vm1808_vm5, %vm1804_vm4 }
 0x313   :  { %vm1614_vm14 = vmand %vm1602_vm13, %vm1598_vm10  ;;  %4152 = vmatpush3.msra.mxu1 %v2970_v21  ;;  %4113 = vmatprep.subr.mxu0 %v2951_v36  ;;  %v1963_v21 = vshll.u32 %v1962_v3, 16  ;;  %v1975_v36 = vcvt.f32.s32 %v5887_v27  ;;  %v1664_v55 = vcvt.f32.s32 %v5565_v52  ;;  %v1781_v27 = vcvt.f32.s32 %v5896_v63 }
 0x314   :  { %3945 = vmatprep.mubr.msk.f32.mxu1 %vm1614_vm14, %v6806_v20  ;;  %4153 = vmatprep.subr.mxu1 %v2985_v51  ;;  %v1652_v15 = vadd.s32 %v1651_v14, %v1649_v33  ;;  %v1783_v53 = vshll.u32 %v1782_v5, 16  ;;  %v1872_v56 = vcvt.f32.s32 %v5581_v37  ;;  %vm2012_vm14 = vcmp.lt.s32.totalorder %v2008_v46, 512 }
 0x315   :  { %v1856_v11 = vpop.xlane.xlu1 %1855  ;;  %3946 = vmatmul.mubr.msk.f32.gmra.mxu1 %vm1510_vm15, %v6806_v20  ;;  %4114 = vmatpush3.msra.mxu0 %v2935_v38  ;;  %v2007_v38 = vadd.s32 7, %v5762_v28  ;;  %v5937_v29 = vpop.xlane.xlu0 %2001  ;;  %v1978_v52 = vadd.s32 %v1977_v23, %v1975_v36  ;;  %v1665_v14 = vshll.u32 %v1664_v55, 16  ;;  %v1801_v37 = vadd.s32 5, %v5840_v7  ;;  %v3026_v36 = vld [vmem:[#allocation7 + $0x4d8] sm:$0xff]  ;;  %v3060_v55 = vld [vmem:[#allocation7 + $0x5e8] sm:$0xff] }
 0x316   :  { %4154 = vmatpush3.msra.mxu1 %v2969_v41  ;;  %4171 = vmatprep.subr.mxu0 %v3030_v31  ;;  %v1857_v4 = vcvt.f32.s32 %v1856_v11  ;;  %vm1703_vm2 = vcmp.eq.s32.totalorder %v4865_v49, %v1652_v15  ;;  %v1903_v41 = vadd.s32 6, %v5762_v28  ;;  %v3029_v11 = vld [vmem:[#allocation7 + $0x4f0] sm:$0xff]  ;;  %v1989_v23 = vcvt.f32.s32 %v5909_v6  ;;  %v3027_v15 = vld [vmem:[#allocation7 + $0x4e0] sm:$0xff] }
 0x317   :  { %4155 = vmatprep.subr.mxu1 %v2984_v54  ;;  %v3014_v54 = vld [vmem:[#allocation7 + $0x478] sm:$0xff]  ;;  %vm1715_vm7 = vmand %vm1703_vm2, %vm1699_vm1  ;;  %vm2011_vm8 = vcmp.lt.s32.totalorder %v2007_v38, 512  ;;  %vm2016_vm15 = vcmp.eq.s32.totalorder %v4865_v49, %v1978_v52  ;;  %v1873_v6 = vshll.u32 %v1872_v56, 16  ;;  %vm1805_vm5 = vcmp.lt.s32.totalorder %v1801_v37, 512  ;;  %v3044_v52 = vld [vmem:[#allocation7 + $0x568] sm:$0xff] }
 0x318   :  { %4156 = vmatpush3.msra.mxu1 %v2968_v45  ;;  %v1860_v31 = vadd.s32 %v1859_v42, %v1857_v4  ;;  %v1696_v45 = vadd.s32 4, %v5770_v10  ;;  %vm1907_vm9 = vcmp.lt.s32.totalorder %v1903_v41, 512  ;;  %v1991_v4 = vshll.u32 %v1990_v35, 16  ;;  %vm2028_vm2 = vmand %vm2016_vm15, %vm2012_vm14  ;;  %v3045_v42 = vld [vmem:[#allocation7 + $0x570] sm:$0xff]  ;;  %v3010_v38 = vld [vmem:[#allocation7 + $0x458] sm:$0xff] }
 0x319   :  { %v1752_v26 = vpop.xlane.xlu1 %1751  ;;  %4157 = vmatprep.subr.mxu1 %v2983_v16  ;;  %v3013_v16 = vld [vmem:[#allocation7 + $0x470] sm:$0xff]  ;;  %v5956_v60 = vpop.xlane.xlu0 %2167  ;;  %v2009_v41 = vadd.s32 7, %v5840_v7  ;;  %v1679_v46 = vshll.u32 %v1678_v57, 16  ;;  %v2004_v35 = vcvt.f32.s32 %v5573_v9  ;;  %v1802_v9 = vadd.s32 5, %v5891_v0 }
 0x31a   :  { %v1753_v12 = vcvt.f32.s32 %v1752_v26  ;;  %4158 = vmatpush3.msra.mxu1 %v2967_v22  ;;  %vm1911_vm10 = vcmp.eq.s32.totalorder %v4865_v49, %v1860_v31  ;;  %v1784_v22 = vadd.s32 %v1783_v53, %v1781_v27  ;;  %vm1700_vm1 = vcmp.lt.s32.totalorder %v1696_v45, 512  ;;  %v3025_v27 = vld [vmem:[#allocation7 + $0x4d0] sm:$0xff]  ;;  %v3043_v45 = vld [vmem:[#allocation7 + $0x560] sm:$0xff]  ;;  %v3024_v53 = vld [vmem:[#allocation7 + $0x4c8] sm:$0xff] }
 0x31b   :  { %4215 = vmatprep.subr.mxu1 %v3062_v18  ;;  %v3046_v18 = vld [vmem:[#allocation7 + $0x578] sm:$0xff]  ;;  %v1992_v25 = vadd.s32 %v1991_v4, %v1989_v23  ;;  %v1886_v31 = vcvt.f32.s32 %v5609_v30  ;;  %v3059_v30 = vld [vmem:[#allocation7 + $0x5e0] sm:$0xff]  ;;  %v1905_v4 = vadd.s32 6, %v5840_v7  ;;  %v1900_v57 = vcvt.f32.s32 %v5635_v61  ;;  %v3040_v61 = vld [vmem:[#allocation7 + $0x548] sm:$0xff] }
 0x31c   :  { %v1756_v51 = vadd.s32 %v1755_v58, %v1753_v12  ;;  %v3061_v58 = vld [vmem:[#allocation7 + $0x5f0] sm:$0xff]  ;;  %v1904_v12 = vadd.s32 6, %v5770_v10  ;;  %v3042_v23 = vld [vmem:[#allocation7 + $0x558] sm:$0xff] }
 0x31d   :  { %v1960_v17 = vpop.xlane.xlu1 %1959  ;;  %v1887_v56 = vshll.u32 %v1886_v31, 16  ;;  %v1698_v31 = vadd.s32 4, %v5891_v0 }
 0x31e   :  { %v1961_v34 = vcvt.f32.s32 %v1960_v17  ;;  %vm1807_vm3 = vcmp.eq.s32.totalorder %v4865_v49, %v1756_v51  ;;  %v5980_v17 = vpop.xlane.xlu0 %2375 }
 0x31f   :  { %vm1819_vm6 = vmand %vm1807_vm3, %vm1803_vm0 }
 0x320   :  { %v1964_v33 = vadd.s32 %v1963_v21, %v1961_v34  ;;  %3947 = vmatprep.mubr.msk.f32.mxu0 %vm1819_vm6, %v6806_v20  ;;  %vm1923_vm0 = vmand %vm1911_vm10, %vm1907_vm9  ;;  %v1796_v21 = vcvt.f32.s32 %v5555_v44  ;;  %vm1809_vm6 = vcmp.eq.s32.totalorder %v4865_v49, %v1784_v22  ;;  %v1795_v44 = vcvt.f32.s32 %v5927_v2  ;;  %v3009_v2 = vld [vmem:[#allocation7 + $0x450] sm:$0xff]  ;;  %v3008_v22 = vld [vmem:[#allocation7 + $0x448] sm:$0xff] }
 0x321   :  { %v1662_v63 = vpop.xlane.xlu1 %1661  ;;  %3948 = vmatmul.mubr.msk.f32.vlgmr.msra.gmra.mxu0 %vm1715_vm7, %v6806_v20  ;;  %vm1908_vm7 = vcmp.lt.s32.totalorder %v1904_v12, 512 }
 0x322   :  { %v1663_v3 = vcvt.f32.s32 %v1662_v63  ;;  %4172 = vmatpush3.msra.mxu0 %v3014_v54  ;;  %3949 = vmatprep.mubr.msk.f32.mxu0 %vm1820_vm11, %v6806_v20  ;;  %vm2015_vm12 = vcmp.eq.s32.totalorder %v4865_v49, %v1964_v33  ;;  %v1697_v54 = vadd.s32 4, %v5840_v7  ;;  %vm2013_vm11 = vcmp.lt.s32.totalorder %v2009_v41, 512  ;;  %v3021_v41 = vld [vmem:[#allocation7 + $0x4b0] sm:$0xff] }
 0x323   :  { %4173 = vmatprep.subr.mxu0 %v3029_v11  ;;  %vm2027_vm13 = vmand %vm2015_vm12, %vm2011_vm8  ;;  %v1797_v11 = vshll.u32 %v1796_v21, 16  ;;  %vm2017_vm12 = vcmp.eq.s32.totalorder %v4865_v49, %v1992_v25 }
 0x324   :  { %v1666_v48 = vadd.s32 %v1665_v14, %v1663_v3  ;;  %4174 = vmatpush3.msra.mxu0 %v3013_v16  ;;  %3955 = vmatprep.mubr.msk.f32.mxu1 %vm2027_vm13, %v6806_v20  ;;  %vm1821_vm8 = vmand %vm1809_vm6, %vm1805_vm5  ;;  %v3058_v14 = vld [vmem:[#allocation7 + $0x5d8] sm:$0xff]  ;;  %vm1701_vm13 = vcmp.lt.s32.totalorder %v1697_v54, 512  ;;  %v1901_v54 = vshll.u32 %v1900_v57, 16  ;;  %v2377_v16 = vcvt.f32.s32 %v5980_v17 }
 0x325   :  { %4175 = vmatprep.subr.mxu0 %v3028_v40  ;;  %v1870_v26 = vpop.xlane.xlu1 %1869  ;;  %3956 = vmatmul.mubr.msk.f32.vlgmr.msra.gmra.mxu1 %vm1923_vm0, %v6806_v20  ;;  %v1798_v3 = vadd.s32 %v1797_v11, %v1795_v44  ;;  %vm2029_vm15 = vmand %vm2017_vm12, %vm2013_vm11  ;;  %v2066_v11 = vcvt.f32.s32 %v5647_v39  ;;  %v2215_v39 = vadd.s32 9, %v5762_v28  ;;  %v2111_v57 = vadd.s32 8, %v5762_v28 }
 0x326   :  { %v1871_v5 = vcvt.f32.s32 %v1870_v26  ;;  %4176 = vmatpush3.msra.mxu0 %v3012_v13  ;;  %4216 = vmatpush3.msra.mxu1 %v3046_v18  ;;  %vm1704_vm3 = vcmp.eq.s32.totalorder %v4865_v49, %v1666_v48  ;;  %v1692_v13 = vcvt.f32.s32 %v5619_v50  ;;  %v2003_v18 = vcvt.f32.s32 %v5937_v29  ;;  %v3023_v48 = vld [vmem:[#allocation7 + $0x4c0] sm:$0xff]  ;;  %v3057_v50 = vld [vmem:[#allocation7 + $0x5d0] sm:$0xff] }
 0x327   :  { %3957 = vmatprep.mubr.msk.f32.mxu1 %vm2028_vm2, %v6806_v20  ;;  %4177 = vmatprep.subr.mxu0 %v3027_v15  ;;  %vm1716_vm4 = vmand %vm1704_vm3, %vm1700_vm1  ;;  %v6000_v15 = vpop.xlane.xlu0 %2181  ;;  %v3007_v29 = vld [vmem:[#allocation7 + $0x440] sm:$0xff]  ;;  %v2005_v26 = vshll.u32 %v2004_v35, 16  ;;  %vm1806_vm1 = vcmp.lt.s32.totalorder %v1802_v9, 512  ;;  %vm1810_vm2 = vcmp.eq.s32.totalorder %v4865_v49, %v1798_v3  ;;  %vm1909_vm3 = vcmp.lt.s32.totalorder %v1905_v4, 512 }
 0x328   :  { %v1874_v51 = vadd.s32 %v1873_v6, %v1871_v5  ;;  %4217 = vmatprep.subr.mxu1 %v3061_v58  ;;  %4178 = vmatpush3.msra.mxu0 %v3011_v59  ;;  %v3041_v59 = vld [vmem:[#allocation7 + $0x550] sm:$0xff]  ;;  %v2170_v6 = vcvt.f32.s32 %v5583_v62  ;;  %v3022_v5 = vld [vmem:[#allocation7 + $0x4b8] sm:$0xff]  ;;  %v2169_v62 = vcvt.f32.s32 %v5956_v60  ;;  %vm1822_vm5 = vmand %vm1810_vm2, %vm1806_vm1 }
 0x329   :  { %4218 = vmatpush3.msra.mxu1 %v3045_v42  ;;  %3950 = vmatmul.mubr.msk.f32.gmra.mxu0 %vm1716_vm4, %v6806_v20  ;;  %v1676_v34 = vpop.xlane.xlu1 %1675  ;;  %v3056_v42 = vld [vmem:[#allocation7 + $0x5c8] sm:$0xff]  ;;  %v3055_v60 = vld [vmem:[#allocation7 + $0x5c0] sm:$0xff] }
 0x32a   :  { %4179 = vmatprep.subr.mxu0 %v3026_v36  ;;  %4219 = vmatprep.subr.mxu1 %v3060_v55  ;;  %v1677_v33 = vcvt.f32.s32 %v1676_v34  ;;  %vm1912_vm9 = vcmp.eq.s32.totalorder %v4865_v49, %v1874_v51  ;;  %v1693_v36 = vshll.u32 %v1692_v13, 16  ;;  %v2006_v55 = vadd.s32 %v2005_v26, %v2003_v18  ;;  %v3006_v51 = vld [vmem:[#allocation7 + $0x438] sm:$0xff]  ;;  %v3005_v34 = vld [vmem:[#allocation7 + $0x430] sm:$0xff] }
 0x32b   :  { %3951 = vmatprep.mubr.msk.f32.mxu0 %vm1821_vm8, %v6806_v20  ;;  %4180 = vmatpush3.msra.mxu0 %v3010_v38  ;;  %vm5991_vm10 = vmand %vm1912_vm9, %vm1908_vm7  ;;  %v2010_v38 = vadd.s32 7, %v5891_v0  ;;  %vm1702_vm9 = vcmp.lt.s32.totalorder %v1698_v31, 512  ;;  %v1906_v13 = vadd.s32 6, %v5891_v0  ;;  %v3037_v18 = vld [vmem:[#allocation7 + $0x530] sm:$0xff]  ;;  %v3018_v26 = vld [vmem:[#allocation7 + $0x498] sm:$0xff] }
 0x32c   :  { %v1680_v63 = vadd.s32 %v1679_v46, %v1677_v33  ;;  %4220 = vmatpush3.msra.mxu1 %v3044_v52  ;;  %4181 = vmatprep.subr.mxu0 %v3025_v27  ;;  %v2171_v52 = vshll.u32 %v2170_v6, 16  ;;  %v2378_v27 = vcvt.f32.s32 %v5591_v47  ;;  %v6029_v46 = vpop.xlane.xlu0 %2389  ;;  %v3039_v33 = vld [vmem:[#allocation7 + $0x540] sm:$0xff]  ;;  %v3054_v47 = vld [vmem:[#allocation7 + $0x5b8] sm:$0xff]  ;;  %vm2018_vm8 = vcmp.eq.s32.totalorder %v4865_v49, %v2006_v55  ;;  %v3036_v55 = vld [vmem:[#allocation7 + $0x528] sm:$0xff] }
 0x32d   :  { %4221 = vmatprep.subr.mxu1 %v3059_v30  ;;  %4182 = vmatpush3.msra.mxu0 %v3009_v2  ;;  %v1884_v40 = vpop.xlane.xlu1 %1883  ;;  %v3020_v30 = vld [vmem:[#allocation7 + $0x4a8] sm:$0xff]  ;;  %vm2014_vm7 = vcmp.lt.s32.totalorder %v2010_v38, 512  ;;  %v3051_v38 = vld [vmem:[#allocation7 + $0x5a0] sm:$0xff] }
 0x32e   :  { %4222 = vmatpush3.msra.mxu1 %v3043_v45  ;;  %4183 = vmatprep.subr.mxu0 %v3024_v53  ;;  %v1885_v37 = vcvt.f32.s32 %v1884_v40  ;;  %vm1705_vm14 = vcmp.eq.s32.totalorder %v4865_v49, %v1680_v63  ;;  %v2172_v35 = vadd.s32 %v2171_v52, %v2169_v62  ;;  %v3004_v63 = vld [vmem:[#allocation7 + $0x428] sm:$0xff]  ;;  %vm2030_vm11 = vmand %vm2018_vm8, %vm2014_vm7  ;;  %v3053_v40 = vld [vmem:[#allocation7 + $0x5b0] sm:$0xff]  ;;  %v2379_v17 = vshll.u32 %v2378_v27, 16 }
 0x32f   :  { %3958 = vmatmul.mubr.msk.f32.gmra.mxu1 %vm5991_vm10, %v6806_v20  ;;  %4223 = vmatprep.subr.mxu1 %v3058_v14  ;;  %vm6011_vm0 = vmand %vm1705_vm14, %vm1701_vm13  ;;  %v3038_v14 = vld [vmem:[#allocation7 + $0x538] sm:$0xff]  ;;  %vm2219_vm13 = vcmp.lt.s32.totalorder %v2215_v39, 512 }
 0x330   :  { %v1888_v58 = vadd.s32 %v1887_v56, %v1885_v37  ;;  %3959 = vmatprep.mubr.msk.f32.mxu1 %vm2029_vm15, %v6806_v20  ;;  %4184 = vmatpush3.msra.mxu0 %v3008_v22  ;;  %v3019_v56 = vld [vmem:[#allocation7 + $0x4a0] sm:$0xff]  ;;  %v6060_v4 = vpop.xlane.xlu0 %2195  ;;  %vm2223_vm14 = vcmp.eq.s32.totalorder %v4865_v49, %v2172_v35  ;;  %v2380_v6 = vadd.s32 %v2379_v17, %v2377_v16  ;;  %vm1910_vm15 = vcmp.lt.s32.totalorder %v1906_v13, 512  ;;  %v3034_v45 = vld [vmem:[#allocation7 + $0x518] sm:$0xff]  ;;  %v3033_v13 = vld [vmem:[#allocation7 + $0x510] sm:$0xff] }
 0x331   :  { %4224 = vmatpush3.msra.mxu1 %v3042_v23  ;;  %4185 = vmatprep.subr.mxu0 %v3023_v48  ;;  %v1690_v21 = vpop.xlane.xlu1 %1689  ;;  %v3003_v22 = vld [vmem:[#allocation7 + $0x420] sm:$0xff]  ;;  %vm2235_vm1 = vmand %vm2223_vm14, %vm2219_vm13  ;;  %v2391_v35 = vcvt.f32.s32 %v6029_v46  ;;  %v6821_v46 = vld [vmem:[#allocation37_spill] sm:$0xff] }
 0x332   :  { %4225 = vmatprep.subr.mxu1 %v3057_v50  ;;  %4186 = vmatpush3.msra.mxu0 %v3007_v29  ;;  %v1691_v25 = vcvt.f32.s32 %v1690_v21  ;;  %vm1913_vm4 = vcmp.eq.s32.totalorder %v4865_v49, %v1888_v58  ;;  %v6815_v48 = vld [vmem:[#allocation36_spill] sm:$0xff]  ;;  %v2067_v29 = vshll.u32 %v2066_v11, 16  ;;  %v2183_v21 = vcvt.f32.s32 %v6000_v15  ;;  %v3001_v15 = vld [vmem:[#allocation7 + $0x410] sm:$0xff]  ;;  %v6818_v52 = vld [vmem:[#allocation43_spill] sm:$0xff] }
 0x333   :  { %4226 = vmatpush3.msra.mxu1 %v3041_v59  ;;  %3952 = vmatmul.mubr.msk.f32.gmra.mxu0 %vm6011_vm0, %v6806_v20  ;;  %vm6036_vm6 = vmand %vm1913_vm4, %vm1909_vm3  ;;  %v2184_v50 = vcvt.f32.s32 %v6815_v48  ;;  %v3052_v58 = vld [vmem:[#allocation7 + $0x5a8] sm:$0xff]  ;;  %v6816_v59 = vld [vmem:[#allocation42_spill] sm:$0xff]  ;;  %v2080_v27 = vcvt.f32.s32 %v6818_v52  ;;  %vm2431_vm4 = vcmp.eq.s32.totalorder %v4865_v49, %v2380_v6 }
 0x334   :  { %4187 = vmatprep.subr.mxu0 %v3022_v5  ;;  %4227 = vmatprep.subr.mxu1 %v3056_v42  ;;  %v1694_v44 = vadd.s32 %v1693_v36, %v1691_v25  ;;  %v2274_v12 = vcvt.f32.s32 %v6816_v59  ;;  %v3002_v5 = vld [vmem:[#allocation7 + $0x418] sm:$0xff]  ;;  %v2423_v42 = vadd.s32 11, %v5762_v28  ;;  %v3017_v25 = vld [vmem:[#allocation7 + $0x490] sm:$0xff]  ;;  %v3000_v11 = vld [vmem:[#allocation7 + $0x408] sm:$0xff]  ;;  %v2424_v59 = vadd.s32 11, %v5770_v10 }
 0x335   :  { %3953 = vmatprep.mubr.msk.f32.mxu0 %vm1822_vm5, %v6806_v20  ;;  %4188 = vmatpush3.msra.mxu0 %v3006_v51  ;;  %v1898_v2 = vpop.xlane.xlu1 %1897  ;;  %vm2115_vm5 = vcmp.lt.s32.totalorder %v2111_v57, 512  ;;  %v3015_v16 = vld [vmem:[#allocation7 + $0x480] sm:$0xff]  ;;  %v2081_v17 = vshll.u32 %v2080_v27, 16  ;;  %v3048_v48 = vld [vmem:[#allocation7 + $0x588] sm:$0xff]  ;;  %v3078_v57 = vld [vmem:[#allocation7 + $0x678] sm:$0xff] }
 0x336   :  { %4228 = vmatpush3.msra.mxu1 %v3040_v61  ;;  %4189 = vmatprep.subr.mxu0 %v3021_v41  ;;  %v1899_v53 = vcvt.f32.s32 %v1898_v2  ;;  %vm1706_vm10 = vcmp.eq.s32.totalorder %v4865_v49, %v1694_v44  ;;  %v2185_v61 = vshll.u32 %v2184_v50, 16  ;;  %v6817_v41 = vld [vmem:[#allocation32_spill] sm:$0xff]  ;;  %vm2427_vm3 = vcmp.lt.s32.totalorder %v2423_v42, 512  ;;  %v6085_v2 = vpop.xlane.xlu0 %2403  ;;  %v3094_v50 = vld [vmem:[#allocation7 + $0x6f8] sm:$0xff] }
 0x337   :  { %4229 = vmatprep.subr.mxu1 %v3055_v60  ;;  %4190 = vmatpush3.msra.mxu0 %v3005_v34  ;;  %vm6055_vm12 = vmand %vm1706_vm10, %vm1702_vm9  ;;  %v2392_v31 = vcvt.f32.s32 %v6817_v41  ;;  %v3035_v44 = vld [vmem:[#allocation7 + $0x520] sm:$0xff]  ;;  %v3016_v60 = vld [vmem:[#allocation7 + $0x488] sm:$0xff]  ;;  %v2275_v34 = vshll.u32 %v2274_v12, 16  ;;  %v2197_v12 = vcvt.f32.s32 %v6060_v4  ;;  %v2112_v42 = vadd.s32 8, %v5770_v10 }
 0x338   :  { %4230 = vmatpush3.msra.mxu1 %v3039_v33  ;;  %4191 = vmatprep.subr.mxu0 %v3020_v30  ;;  %v1902_v3 = vadd.s32 %v1901_v54, %v1899_v53  ;;  %v3050_v33 = vld [vmem:[#allocation7 + $0x598] sm:$0xff]  ;;  %v2186_v30 = vadd.s32 %v2185_v61, %v2183_v21  ;;  %v2216_v53 = vadd.s32 9, %v5770_v10  ;;  %vm2443_vm7 = vmand %vm2431_vm4, %vm2427_vm3  ;;  %v3093_v21 = vld [vmem:[#allocation7 + $0x6f0] sm:$0xff]  ;;  %v2217_v54 = vadd.s32 9, %v5840_v7 }
 0x339   :  { %3960 = vmatmul.mubr.msk.f32.gmra.mxu1 %vm6036_vm6, %v6806_v20  ;;  %4231 = vmatprep.subr.mxu1 %v3054_v47  ;;  %v2064_v9 = vpop.xlane.xlu1 %2063  ;;  %v6825_v4 = vld [vmem:[#allocation38_spill] sm:$0xff]  ;;  %v6828_v41 = vld [vmem:[#allocation48_spill] sm:$0xff] }
 0x33a   :  { %3961 = vmatprep.mubr.msk.f32.mxu1 %vm2030_vm11, %v6806_v20  ;;  %4192 = vmatpush3.msra.mxu0 %v3004_v63  ;;  %v2065_v23 = vcvt.f32.s32 %v2064_v9  ;;  %vm1914_vm0 = vcmp.eq.s32.totalorder %v4865_v49, %v1902_v3  ;;  %v2319_v63 = vadd.s32 10, %v5762_v28  ;;  %vm2220_vm9 = vcmp.lt.s32.totalorder %v2216_v53, 512  ;;  %v3076_v27 = vld [vmem:[#allocation7 + $0x668] sm:$0xff]  ;;  %v3125_v53 = vld [vmem:[#allocation7 + $0x7f0] sm:$0xff] }
 0x33b   :  { %4232 = vmatpush3.msra.mxu1 %v3038_v14  ;;  %4193 = vmatprep.subr.mxu0 %v3019_v56  ;;  %vm6080_vm2 = vmand %vm1914_vm0, %vm1910_vm15  ;;  %v3049_v14 = vld [vmem:[#allocation7 + $0x590] sm:$0xff]  ;;  %v2999_v56 = vld [vmem:[#allocation7 + $0x400] sm:$0xff]  ;;  %vm2224_vm10 = vcmp.eq.s32.totalorder %v4865_v49, %v2186_v30  ;;  %vm2428_vm15 = vcmp.lt.s32.totalorder %v2424_v59, 512  ;;  %v2113_v59 = vadd.s32 8, %v5840_v7 }
 0x33c   :  { %4233 = vmatprep.subr.mxu1 %v3053_v40  ;;  %4194 = vmatpush3.msra.mxu0 %v3003_v22  ;;  %v2068_v36 = vadd.s32 %v2067_v29, %v2065_v23  ;;  %v2393_v40 = vshll.u32 %v2392_v31, 16  ;;  %v2198_v22 = vcvt.f32.s32 %v6821_v46  ;;  %v6106_v23 = vpop.xlane.xlu0 %2209  ;;  %vm2323_vm11 = vcmp.lt.s32.totalorder %v2319_v63, 512  ;;  %vm2236_vm13 = vmand %vm2224_vm10, %vm2220_vm9  ;;  %v3110_v30 = vld [vmem:[#allocation7 + $0x778] sm:$0xff]  ;;  %v3124_v9 = vld [vmem:[#allocation7 + $0x7e8] sm:$0xff] }
 0x33d   :  { %4234 = vmatpush3.msra.mxu1 %v3037_v18  ;;  %3954 = vmatmul.mubr.msk.f32.gmra.mxu0 %vm6055_vm12, %v6806_v20  ;;  %v2272_v51 = vpop.xlane.xlu1 %2271  ;;  %v6824_v18 = vld [vmem:[#allocation47_spill] sm:$0xff]  ;;  %v2094_v31 = vcvt.f32.s32 %v6828_v41  ;;  %v3072_v41 = vld [vmem:[#allocation7 + $0x648] sm:$0xff] }
 0x33e   :  { %4195 = vmatprep.subr.mxu0 %v3018_v26  ;;  %4235 = vmatprep.subr.mxu1 %v3052_v58  ;;  %v2273_v62 = vcvt.f32.s32 %v2272_v51  ;;  %vm2119_vm6 = vcmp.eq.s32.totalorder %v4865_v49, %v2068_v36  ;;  %v2288_v37 = vcvt.f32.s32 %v6824_v18  ;;  %v2394_v26 = vadd.s32 %v2393_v40, %v2391_v35  ;;  %v3032_v58 = vld [vmem:[#allocation7 + $0x508] sm:$0xff]  ;;  %v3031_v36 = vld [vmem:[#allocation7 + $0x500] sm:$0xff] }
 0x33f   :  { %4196 = vmatpush3.msra.mxu0 %v3002_v5  ;;  %3963 = vmatprep.mubr.msk.f32.mxu0 %vm2235_vm1, %v6806_v20  ;;  %vm6101_vm8 = vmand %vm2119_vm6, %vm2115_vm5  ;;  %v3047_v5 = vld [vmem:[#allocation7 + $0x580] sm:$0xff]  ;;  %vm2116_vm1 = vcmp.lt.s32.totalorder %v2112_v42, 512  ;;  %v2095_v40 = vshll.u32 %v2094_v31, 16  ;;  %vm2221_vm5 = vcmp.lt.s32.totalorder %v2217_v54, 512  ;;  %v2218_v31 = vadd.s32 9, %v5891_v0 }
 0x340   :  { %4236 = vmatpush3.msra.mxu1 %v3036_v55  ;;  %4197 = vmatprep.subr.mxu0 %v3017_v25  ;;  %v2276_v39 = vadd.s32 %v2275_v34, %v2273_v62  ;;  %v2199_v55 = vshll.u32 %v2198_v22, 16  ;;  %v2406_v25 = vcvt.f32.s32 %v6825_v4  ;;  %v2289_v61 = vshll.u32 %v2288_v37, 16  ;;  %v6131_v52 = vpop.xlane.xlu0 %2417  ;;  %v3075_v35 = vld [vmem:[#allocation7 + $0x660] sm:$0xff]  ;;  %v3090_v22 = vld [vmem:[#allocation7 + $0x6d8] sm:$0xff] }
 0x341   :  { %4237 = vmatprep.subr.mxu1 %v3051_v38  ;;  %4198 = vmatpush3.msra.mxu0 %v3001_v15  ;;  %v2078_v47 = vpop.xlane.xlu1 %2077  ;;  %v3077_v38 = vld [vmem:[#allocation7 + $0x670] sm:$0xff]  ;;  %vm2432_vm0 = vcmp.eq.s32.totalorder %v4865_v49, %v2394_v26  ;;  %v3074_v37 = vld [vmem:[#allocation7 + $0x658] sm:$0xff]  ;;  %v3108_v26 = vld [vmem:[#allocation7 + $0x768] sm:$0xff]  ;;  %v2321_v54 = vadd.s32 10, %v5840_v7 }
 0x342   :  { %4238 = vmatpush3.msra.mxu1 %v3035_v44  ;;  %4199 = vmatprep.subr.mxu0 %v3016_v60  ;;  %v2079_v3 = vcvt.f32.s32 %v2078_v47  ;;  %vm2327_vm12 = vcmp.eq.s32.totalorder %v4865_v49, %v2276_v39  ;;  %v3092_v44 = vld [vmem:[#allocation7 + $0x6e8] sm:$0xff]  ;;  %v3126_v60 = vld [vmem:[#allocation7 + $0x7f8] sm:$0xff]  ;;  %v2200_v34 = vadd.s32 %v2199_v55, %v2197_v12  ;;  %vm2444_vm3 = vmand %vm2432_vm0, %vm2428_vm15  ;;  %v2407_v39 = vshll.u32 %v2406_v25, 16 }
 0x343   :  { %3962 = vmatmul.mubr.msk.f32.gmra.mxu1 %vm6080_vm2, %v6806_v20  ;;  %4239 = vmatprep.subr.mxu1 %v3050_v33  ;;  %vm6124_vm14 = vmand %vm2327_vm12, %vm2323_vm11  ;;  %v2405_v33 = vcvt.f32.s32 %v6085_v2  ;;  %v6834_v4 = vld [vmem:[#allocation44_spill] sm:$0xff] }
 0x344   :  { %4200 = vmatpush3.msra.mxu0 %v3000_v11  ;;  %4240 = vmatpush3.msra.mxu1 %v3034_v45  ;;  %v2082_v6 = vadd.s32 %v2081_v17, %v2079_v3  ;;  %v3091_v11 = vld [vmem:[#allocation7 + $0x6e0] sm:$0xff]  ;;  %v2320_v45 = vadd.s32 10, %v5770_v10  ;;  %v6154_v46 = vpop.xlane.xlu0 %2583  ;;  %vm2225_vm6 = vcmp.eq.s32.totalorder %v4865_v49, %v2200_v34  ;;  %v2420_v25 = vcvt.f32.s32 %v6834_v4  ;;  %v3106_v34 = vld [vmem:[#allocation7 + $0x758] sm:$0xff] }
 0x345   :  { %3971 = vmatprep.mubr.msk.f32.mxu1 %vm2443_vm7, %v6806_v20  ;;  %4201 = vmatprep.subr.mxu0 %v3015_v16  ;;  %v2286_v29 = vpop.xlane.xlu1 %2285  ;;  %v3109_v16 = vld [vmem:[#allocation7 + $0x770] sm:$0xff]  ;;  %v2408_v18 = vadd.s32 %v2407_v39, %v2405_v33  ;;  %vm2237_vm9 = vmand %vm2225_vm6, %vm2221_vm5 }
 0x346   :  { %4241 = vmatprep.subr.mxu1 %v3049_v14  ;;  %4202 = vmatpush3.msra.mxu0 %v2999_v56  ;;  %v2287_v15 = vcvt.f32.s32 %v2286_v29  ;;  %vm2120_vm2 = vcmp.eq.s32.totalorder %v4865_v49, %v2082_v6  ;;  %v6831_v56 = vld [vmem:[#allocation41_spill] sm:$0xff]  ;;  %vm2324_vm7 = vcmp.lt.s32.totalorder %v2320_v45, 512  ;;  %v3086_v14 = vld [vmem:[#allocation7 + $0x6b8] sm:$0xff] }
 0x347   :  { %4242 = vmatpush3.msra.mxu1 %v3033_v13  ;;  %3964 = vmatmul.mubr.msk.f32.vlgmr.msra.gmra.mxu0 %vm6101_vm8, %v6806_v20  ;;  %vm6149_vm4 = vmand %vm2120_vm2, %vm2116_vm1  ;;  %v2212_v3 = vcvt.f32.s32 %v6831_v56  ;;  %v6832_v13 = vld [vmem:[#allocation52_spill] sm:$0xff]  ;;  %v3073_v6 = vld [vmem:[#allocation7 + $0x650] sm:$0xff]  ;;  %vm2433_vm12 = vcmp.eq.s32.totalorder %v4865_v49, %v2408_v18  ;;  %vm2222_vm1 = vcmp.lt.s32.totalorder %v2218_v31, 512 }
 0x348   :  { %4243 = vmatprep.subr.mxu1 %v3048_v48  ;;  %4259 = vmatprep.subr.mxu0 %v3094_v50  ;;  %v2290_v47 = vadd.s32 %v2289_v61, %v2287_v15  ;;  %v2302_v17 = vcvt.f32.s32 %v6832_v13  ;;  %v2425_v48 = vadd.s32 11, %v5840_v7  ;;  %v2211_v50 = vcvt.f32.s32 %v6106_v23  ;;  %v3123_v23 = vld [vmem:[#allocation7 + $0x7e0] sm:$0xff]  ;;  %v3122_v15 = vld [vmem:[#allocation7 + $0x7d8] sm:$0xff]  ;;  %v6182_v61 = vpop.xlane.xlu0 %2791  ;;  %v6840_v39 = vld [vmem:[#allocation49_spill] sm:$0xff] }
 0x349   :  { %3965 = vmatprep.mubr.msk.f32.mxu0 %vm2236_vm13, %v6806_v20  ;;  %4244 = vmatpush3.msra.mxu1 %v3032_v58  ;;  %v2092_v62 = vpop.xlane.xlu1 %2091  ;;  %v3089_v58 = vld [vmem:[#allocation7 + $0x6d0] sm:$0xff]  ;;  %v2213_v42 = vshll.u32 %v2212_v3, 16  ;;  %vm2117_vm13 = vcmp.lt.s32.totalorder %v2113_v59, 512  ;;  %v3120_v56 = vld [vmem:[#allocation7 + $0x7c8] sm:$0xff]  ;;  %v2426_v13 = vadd.s32 11, %v5891_v0  ;;  %v3103_v59 = vld [vmem:[#allocation7 + $0x740] sm:$0xff] }
 0x34a   :  { %4260 = vmatpush3.msra.mxu0 %v3078_v57  ;;  %4245 = vmatprep.subr.mxu1 %v3047_v5  ;;  %v2093_v63 = vcvt.f32.s32 %v2092_v62  ;;  %vm2328_vm8 = vcmp.eq.s32.totalorder %v4865_v49, %v2290_v47  ;;  %v6833_v57 = vld [vmem:[#allocation40_spill] sm:$0xff]  ;;  %v2303_v51 = vshll.u32 %v2302_v17, 16  ;;  %vm2429_vm11 = vcmp.lt.s32.totalorder %v2425_v48, 512  ;;  %v3085_v48 = vld [vmem:[#allocation7 + $0x6b0] sm:$0xff]  ;;  %v3102_v31 = vld [vmem:[#allocation7 + $0x738] sm:$0xff] }
 0x34b   :  { %4261 = vmatprep.subr.mxu0 %v3093_v21  ;;  %4246 = vmatpush3.msra.mxu1 %v3031_v36  ;;  %v2108_v5 = vcvt.f32.s32 %v6833_v57  ;;  %v3107_v21 = vld [vmem:[#allocation7 + $0x760] sm:$0xff]  ;;  %v3088_v36 = vld [vmem:[#allocation7 + $0x6c8] sm:$0xff]  ;;  %vm6177_vm10 = vmand %vm2328_vm8, %vm2324_vm7  ;;  %v2214_v62 = vadd.s32 %v2213_v42, %v2211_v50  ;;  %v2421_v47 = vshll.u32 %v2420_v25, 16  ;;  %v2585_v17 = vcvt.f32.s32 %v6154_v46 }
 0x34c   :  { %4262 = vmatpush3.msra.mxu0 %v3077_v38  ;;  %3972 = vmatmul.mubr.msk.f32.vlgmr.msra.gmra.mxu1 %vm6124_vm14, %v6806_v20  ;;  %v2096_v29 = vadd.s32 %v2095_v40, %v2093_v63  ;;  %vm2445_vm15 = vmand %vm2433_vm12, %vm2429_vm11  ;;  %v6839_v63 = vld [vmem:[#allocation39_spill] sm:$0xff]  ;;  %v2114_v50 = vadd.s32 8, %v5891_v0  ;;  %v3069_v46 = vld [vmem:[#allocation7 + $0x630] sm:$0xff]  ;;  %vm2430_vm7 = vcmp.lt.s32.totalorder %v2426_v13, 512  ;;  %v2631_v38 = vadd.s32 13, %v5762_v28 }
 0x34d   :  { %4263 = vmatprep.subr.mxu0 %v3092_v44  ;;  %4303 = vmatprep.subr.mxu1 %v3126_v60  ;;  %v6143_v2 = vpop.xlane.xlu1 %2299  ;;  %v2419_v60 = vcvt.f32.s32 %v6131_v52  ;;  %v2109_v45 = vshll.u32 %v2108_v5, 16  ;;  %vm2226_vm2 = vcmp.eq.s32.totalorder %v4865_v49, %v2214_v62  ;;  %v6841_v57 = vld [vmem:[#allocation45_spill] sm:$0xff]  ;;  %v6842_v42 = vld [vmem:[#allocation50_spill] sm:$0xff] }
 0x34e   :  { %3973 = vmatprep.mubr.msk.f32.mxu1 %vm2444_vm3, %v6806_v20  ;;  %4264 = vmatpush3.msra.mxu0 %v3076_v27  ;;  %v2301_v55 = vcvt.f32.s32 %v6143_v2  ;;  %vm2121_vm14 = vcmp.eq.s32.totalorder %v4865_v49, %v2096_v29  ;;  %v3087_v27 = vld [vmem:[#allocation7 + $0x6c0] sm:$0xff]  ;;  %v2316_v2 = vcvt.f32.s32 %v6839_v63  ;;  %vm2325_vm3 = vcmp.lt.s32.totalorder %v2321_v54, 512  ;;  %vm2238_vm5 = vmand %vm2226_vm2, %vm2222_vm1  ;;  %v3068_v25 = vld [vmem:[#allocation7 + $0x628] sm:$0xff] }
 0x34f   :  { %4304 = vmatpush3.msra.mxu1 %v3110_v30  ;;  %4265 = vmatprep.subr.mxu0 %v3091_v11  ;;  %v3121_v30 = vld [vmem:[#allocation7 + $0x7d0] sm:$0xff]  ;;  %v3071_v11 = vld [vmem:[#allocation7 + $0x640] sm:$0xff]  ;;  %vm6201_vm0 = vmand %vm2121_vm14, %vm2117_vm13  ;;  %v2482_v5 = vcvt.f32.s32 %v6841_v57  ;;  %vm2635_vm13 = vcmp.lt.s32.totalorder %v2631_v38, 512 }
 0x350   :  { %4305 = vmatprep.subr.mxu1 %v3125_v53  ;;  %4266 = vmatpush3.msra.mxu0 %v3075_v35  ;;  %v2304_v33 = vadd.s32 %v2303_v51, %v2301_v55  ;;  %v3105_v53 = vld [vmem:[#allocation7 + $0x750] sm:$0xff]  ;;  %v3119_v29 = vld [vmem:[#allocation7 + $0x7c0] sm:$0xff]  ;;  %v3118_v55 = vld [vmem:[#allocation7 + $0x7b8] sm:$0xff] }
 0x351   :  { %4306 = vmatpush3.msra.mxu1 %v3109_v16  ;;  %3966 = vmatmul.mubr.msk.f32.gmra.mxu0 %vm6149_vm4, %v6806_v20  ;;  %v6165_v12 = vpop.xlane.xlu1 %2105  ;;  %v2586_v16 = vcvt.f32.s32 %v6840_v39  ;;  %v2483_v63 = vshll.u32 %v2482_v5, 16  ;;  %v3116_v39 = vld [vmem:[#allocation7 + $0x7a8] sm:$0xff]  ;;  %v6852_v57 = vld [vmem:[#allocation54_spill] sm:$0xff] }
 0x352   :  { %4267 = vmatprep.subr.mxu0 %v3090_v22  ;;  %4307 = vmatprep.subr.mxu1 %v3124_v9  ;;  %v2107_v52 = vcvt.f32.s32 %v6165_v12  ;;  %v6208_v3 = vpop.xlane.xlu0 %2597  ;;  %v2422_v22 = vadd.s32 %v2421_v47, %v2419_v60  ;;  %v3070_v9 = vld [vmem:[#allocation7 + $0x638] sm:$0xff]  ;;  %vm2329_vm4 = vcmp.eq.s32.totalorder %v4865_v49, %v2304_v33  ;;  %v3084_v12 = vld [vmem:[#allocation7 + $0x6a8] sm:$0xff]  ;;  %v2808_v5 = vcvt.f32.s32 %v6852_v57 }
 0x353   :  { %3967 = vmatprep.mubr.msk.f32.mxu0 %vm2237_vm9, %v6806_v20  ;;  %4268 = vmatpush3.msra.mxu0 %v3074_v37  ;;  %v3104_v37 = vld [vmem:[#allocation7 + $0x748] sm:$0xff]  ;;  %vm6231_vm6 = vmand %vm2329_vm4, %vm2325_vm3  ;;  %vm2118_vm9 = vcmp.lt.s32.totalorder %v2114_v50, 512  ;;  %v3114_v38 = vld [vmem:[#allocation7 + $0x798] sm:$0xff] }
 0x354   :  { %4308 = vmatpush3.msra.mxu1 %v3108_v26  ;;  %4269 = vmatprep.subr.mxu0 %v3089_v58  ;;  %v2110_v18 = vadd.s32 %v2109_v45, %v2107_v52  ;;  %v2317_v26 = vshll.u32 %v2316_v2, 16  ;;  %v2587_v58 = vshll.u32 %v2586_v16, 16  ;;  %vm2434_vm8 = vcmp.eq.s32.totalorder %v4865_v49, %v2422_v22  ;;  %v6847_v45 = vld [vmem:[#allocation55_spill] sm:$0xff]  ;;  %v3112_v35 = vld [vmem:[#allocation7 + $0x788] sm:$0xff] }
 0x355   :  { %4309 = vmatprep.subr.mxu1 %v3123_v23  ;;  %4270 = vmatpush3.msra.mxu0 %v3073_v6  ;;  %v6186_v44 = vpop.xlane.xlu1 %2313  ;;  %vm2446_vm11 = vmand %vm2434_vm8, %vm2430_vm7  ;;  %v2600_v47 = vcvt.f32.s32 %v6847_v45  ;;  %v3082_v2 = vld [vmem:[#allocation7 + $0x698] sm:$0xff]  ;;  %v2839_v16 = vadd.s32 15, %v5762_v28  ;;  %v2527_v22 = vadd.s32 12, %v5762_v28  ;;  %v3097_v45 = vld [vmem:[#allocation7 + $0x710] sm:$0xff] }
 0x356   :  { %4310 = vmatpush3.msra.mxu1 %v3107_v21  ;;  %4271 = vmatprep.subr.mxu0 %v3088_v36  ;;  %v2315_v23 = vcvt.f32.s32 %v6186_v44  ;;  %v2794_v21 = vcvt.f32.s32 %v6842_v42  ;;  %v2588_v4 = vadd.s32 %v2587_v58, %v2585_v17  ;;  %v6236_v51 = vpop.xlane.xlu0 %2805  ;;  %v3083_v44 = vld [vmem:[#allocation7 + $0x6a0] sm:$0xff]  ;;  %v3100_v17 = vld [vmem:[#allocation7 + $0x728] sm:$0xff]  ;;  %v3065_v58 = vld [vmem:[#allocation7 + $0x610] sm:$0xff]  ;;  %v2632_v36 = vadd.s32 13, %v5770_v10 }
 0x357   :  { %3974 = vmatmul.mubr.msk.f32.gmra.mxu1 %vm6177_vm10, %v6806_v20  ;;  %4311 = vmatprep.subr.mxu1 %v3122_v15  ;;  %vm2122_vm10 = vcmp.eq.s32.totalorder %v4865_v49, %v2110_v18  ;;  %v6845_v15 = vld [vmem:[#allocation46_spill] sm:$0xff]  ;;  %v2601_v50 = vshll.u32 %v2600_v47, 16  ;;  %v3099_v42 = vld [vmem:[#allocation7 + $0x720] sm:$0xff]  ;;  %vm2843_vm2 = vcmp.lt.s32.totalorder %v2839_v16, 512  ;;  %vm2531_vm3 = vcmp.lt.s32.totalorder %v2527_v22, 512 }
 0x358   :  { %3975 = vmatprep.mubr.msk.f32.mxu1 %vm2445_vm15, %v6806_v20  ;;  %4272 = vmatpush3.msra.mxu0 %v3072_v41  ;;  %v2690_v62 = vcvt.f32.s32 %v6845_v15  ;;  %v2793_v41 = vcvt.f32.s32 %v6182_v61  ;;  %v2318_v60 = vadd.s32 %v2317_v26, %v2315_v23  ;;  %v2322_v61 = vadd.s32 10, %v5891_v0  ;;  %vm6258_vm12 = vmand %vm2122_vm10, %vm2118_vm9  ;;  %v3081_v18 = vld [vmem:[#allocation7 + $0x690] sm:$0xff]  ;;  %v3115_v26 = vld [vmem:[#allocation7 + $0x7a0] sm:$0xff] }
 0x359   :  { %4312 = vmatpush3.msra.mxu1 %v3106_v34  ;;  %4273 = vmatprep.subr.mxu0 %v3087_v27  ;;  %v6210_v40 = vpop.xlane.xlu1 %2479  ;;  %v3117_v34 = vld [vmem:[#allocation7 + $0x7b0] sm:$0xff]  ;;  %v3067_v27 = vld [vmem:[#allocation7 + $0x620] sm:$0xff]  ;;  %vm2639_vm14 = vcmp.eq.s32.totalorder %v4865_v49, %v2588_v4  ;;  %v2807_v15 = vcvt.f32.s32 %v6236_v51  ;;  %vm2636_vm9 = vcmp.lt.s32.totalorder %v2632_v36, 512  ;;  %v2633_v47 = vadd.s32 13, %v5840_v7 }
 0x35a   :  { %4313 = vmatprep.subr.mxu1 %v3121_v30  ;;  %4274 = vmatpush3.msra.mxu0 %v3071_v11  ;;  %v2481_v54 = vcvt.f32.s32 %v6210_v40  ;;  %v2795_v30 = vshll.u32 %v2794_v21, 16  ;;  %v6846_v11 = vld [vmem:[#allocation51_spill] sm:$0xff]  ;;  %v2599_v40 = vcvt.f32.s32 %v6208_v3  ;;  %vm2326_vm15 = vcmp.lt.s32.totalorder %v2322_v61, 512  ;;  %vm2651_vm1 = vmand %vm2639_vm14, %vm2635_vm13  ;;  %v3080_v21 = vld [vmem:[#allocation7 + $0x688] sm:$0xff] }
 0x35b   :  { %4314 = vmatpush3.msra.mxu1 %v3105_v53  ;;  %3968 = vmatmul.mubr.msk.f32.gmra.mxu0 %vm6201_vm0, %v6806_v20  ;;  %v2496_v52 = vcvt.f32.s32 %v6846_v11  ;;  %v3101_v53 = vld [vmem:[#allocation7 + $0x730] sm:$0xff]  ;;  %vm2330_vm0 = vcmp.eq.s32.totalorder %v4865_v49, %v2318_v60  ;;  %v2735_v60 = vadd.s32 14, %v5762_v28  ;;  %v3063_v11 = vld [vmem:[#allocation7 + $0x600] sm:$0xff]  ;;  %v2736_v16 = vadd.s32 14, %v5770_v10 }
 0x35c   :  { %4275 = vmatprep.subr.mxu0 %v3086_v14  ;;  %4315 = vmatprep.subr.mxu1 %v3120_v56  ;;  %v2691_v14 = vshll.u32 %v2690_v62, 16  ;;  %v2796_v56 = vadd.s32 %v2795_v30, %v2793_v41  ;;  %v2484_v13 = vadd.s32 %v2483_v63, %v2481_v54  ;;  %vm6283_vm4 = vmand %vm2330_vm0, %vm2326_vm15  ;;  %v3064_v62 = vld [vmem:[#allocation7 + $0x608] sm:$0xff]  ;;  %v3098_v41 = vld [vmem:[#allocation7 + $0x718] sm:$0xff]  ;;  %v2809_v30 = vshll.u32 %v2808_v5, 16 }
 0x35d   :  { %3969 = vmatprep.mubr.msk.f32.mxu0 %vm2238_vm5, %v6806_v20  ;;  %4276 = vmatpush3.msra.mxu0 %v3070_v9  ;;  %v6224_v6 = vpop.xlane.xlu1 %2687  ;;  %v3066_v9 = vld [vmem:[#allocation7 + $0x618] sm:$0xff]  ;;  %v2497_v3 = vshll.u32 %v2496_v52, 16  ;;  %v3079_v54 = vld [vmem:[#allocation7 + $0x680] sm:$0xff]  ;;  %v3113_v51 = vld [vmem:[#allocation7 + $0x790] sm:$0xff]  ;;  %v2840_v63 = vadd.s32 15, %v5770_v10  ;;  %vm2739_vm13 = vcmp.lt.s32.totalorder %v2735_v60, 512 }
 0x35e   :  { %4316 = vmatpush3.msra.mxu1 %v3104_v37  ;;  %4277 = vmatprep.subr.mxu0 %v3085_v48  ;;  %v2612_v37 = vpop.xlane.xlu0 %2611  ;;  %vm2847_vm5 = vcmp.eq.s32.totalorder %v4865_v49, %v2796_v56  ;;  %v3095_v56 = vld [vmem:[#allocation7 + $0x700] sm:$0xff]  ;;  %v2634_v5 = vadd.s32 13, %v5891_v0 }
 0x35f   :  { %4317 = vmatprep.subr.mxu1 %v3119_v29  ;;  %4278 = vmatpush3.msra.mxu0 %v3069_v46  ;;  %v6850_v29 = vld [vmem:[#allocation56_spill] sm:$0xff]  ;;  %v2613_v4 = vcvt.f32.s32 %v2612_v37  ;;  %vm2859_vm7 = vmand %vm2847_vm5, %vm2843_vm2  ;;  %v2841_v37 = vadd.s32 15, %v5840_v7 }
 0x360   :  { %4318 = vmatpush3.msra.mxu1 %v3103_v59  ;;  %4279 = vmatprep.subr.mxu0 %v3084_v12  ;;  %v2614_v46 = vcvt.f32.s32 %v6850_v29  ;;  %v2689_v59 = vcvt.f32.s32 %v6224_v6  ;;  %v6851_v12 = vld [vmem:[#allocation53_spill] sm:$0xff] }
 0x361   :  { %3976 = vmatmul.mubr.msk.f32.gmra.mxu1 %vm6231_vm6, %v6806_v20  ;;  %4319 = vmatprep.subr.mxu1 %v3118_v55  ;;  %v6250_v33 = vpop.xlane.xlu1 %2493  ;;  %v2704_v23 = vcvt.f32.s32 %v6851_v12  ;;  %vm2535_vm6 = vcmp.eq.s32.totalorder %v4865_v49, %v2484_v13  ;;  %v2822_v13 = vcvt.f32.s32 %v5809_v19  ;;  %v2524_v19 = vcvt.f32.s32 %v5750_v24 }
 0x362   :  { %3977 = vmatprep.mubr.msk.f32.mxu1 %vm2446_vm11, %v6806_v20  ;;  %4280 = vmatpush3.msra.mxu0 %v3068_v25  ;;  %v2495_v48 = vcvt.f32.s32 %v6250_v33  ;;  %v2602_v25 = vadd.s32 %v2601_v50, %v2599_v40  ;;  %vm6301_vm8 = vmand %vm2535_vm6, %vm2531_vm3  ;;  %vm2740_vm6 = vcmp.lt.s32.totalorder %v2736_v16, 512  ;;  %v2529_v40 = vadd.s32 12, %v5840_v7  ;;  %v6857_v50 = vld [vmem:[#allocation58_spill] sm:$0xff] }
 0x363   :  { %4320 = vmatpush3.msra.mxu1 %v3102_v31  ;;  %4281 = vmatprep.subr.mxu0 %v3083_v44  ;;  %v2528_v44 = vadd.s32 12, %v5770_v10  ;;  %v2705_v33 = vshll.u32 %v2704_v23, 16  ;;  %v2510_v10 = vcvt.f32.s32 %v5786_v43  ;;  %v2718_v29 = vcvt.f32.s32 %v6857_v50 }
 0x364   :  { %4321 = vmatprep.subr.mxu1 %v3117_v34  ;;  %4282 = vmatpush3.msra.mxu0 %v3067_v27  ;;  %v2498_v31 = vadd.s32 %v2497_v3, %v2495_v48  ;;  %v2615_v34 = vshll.u32 %v2614_v46, 16  ;;  %v2692_v27 = vadd.s32 %v2691_v14, %v2689_v59  ;;  %vm2640_vm10 = vcmp.eq.s32.totalorder %v4865_v49, %v2602_v25  ;;  %v3111_v14 = vld [vmem:[#allocation7 + $0x780] sm:$0xff] }
 0x365   :  { %4322 = vmatpush3.msra.mxu1 %v3101_v53  ;;  %3970 = vmatmul.mubr.msk.f32.gmra.mxu0 %vm6258_vm12, %v6806_v20  ;;  %v2702_v55 = vpop.xlane.xlu1 %2701  ;;  %v2810_v53 = vadd.s32 %v2809_v30, %v2807_v15  ;;  %vm2532_vm11 = vcmp.lt.s32.totalorder %v2528_v44, 512  ;;  %vm2652_vm15 = vmand %vm2640_vm10, %vm2636_vm9  ;;  %v2823_v3 = vshll.u32 %v2822_v13, 16  ;;  %v2719_v59 = vshll.u32 %v2718_v29, 16 }
 0x366   :  { %4283 = vmatprep.subr.mxu0 %v3082_v2  ;;  %4323 = vmatprep.subr.mxu1 %v3116_v39  ;;  %v2703_v61 = vcvt.f32.s32 %v2702_v55  ;;  %v2616_v52 = vadd.s32 %v2615_v34, %v2613_v4  ;;  %vm2536_vm12 = vcmp.eq.s32.totalorder %v4865_v49, %v2498_v31  ;;  %vm2743_vm14 = vcmp.eq.s32.totalorder %v4865_v49, %v2692_v27  ;;  %v3096_v2 = vld [vmem:[#allocation7 + $0x708] sm:$0xff] }
 0x367   :  { %4284 = vmatpush3.msra.mxu0 %v3066_v9  ;;  %3979 = vmatprep.mubr.msk.f32.mxu0 %vm2651_vm1, %v6806_v20  ;;  %vm2548_vm0 = vmand %vm2536_vm12, %vm2532_vm11  ;;  %vm2637_vm1 = vcmp.lt.s32.totalorder %v2633_v47, 512  ;;  %vm2848_vm5 = vcmp.eq.s32.totalorder %v4865_v49, %v2810_v53  ;;  %v2511_v9 = vshll.u32 %v2510_v10, 16  ;;  %vm2533_vm11 = vcmp.lt.s32.totalorder %v2529_v40, 512 }
 0x368   :  { %4324 = vmatpush3.msra.mxu1 %v3100_v17  ;;  %4285 = vmatprep.subr.mxu0 %v3081_v18  ;;  %v2706_v39 = vadd.s32 %v2705_v33, %v2703_v61  ;;  %vm2641_vm2 = vcmp.eq.s32.totalorder %v4865_v49, %v2616_v52  ;;  %vm2755_vm3 = vmand %vm2743_vm14, %vm2739_vm13  ;;  %vm2845_vm14 = vcmp.lt.s32.totalorder %v2841_v37, 512  ;;  %v2628_v12 = vcvt.f32.s32 %v5848_v32 }
 0x369   :  { %4325 = vmatprep.subr.mxu1 %v3115_v26  ;;  %4286 = vmatpush3.msra.mxu0 %v3065_v58  ;;  %v2737_v26 = vadd.s32 14, %v5840_v7  ;;  %v2836_v7 = vcvt.f32.s32 %v5858_v1  ;;  %v2530_v55 = vadd.s32 12, %v5891_v0  ;;  %v2842_v15 = vadd.s32 15, %v5891_v0 }
 0x36a   :  { %4326 = vmatpush3.msra.mxu1 %v3099_v42  ;;  %4287 = vmatprep.subr.mxu0 %v3080_v21  ;;  %v2525_v42 = vshll.u32 %v2524_v19, 16  ;;  %v2732_v21 = vcvt.f32.s32 %v5752_v8  ;;  %v2629_v32 = vshll.u32 %v2628_v12, 16  ;;  %v2738_v31 = vadd.s32 14, %v5891_v0 }
 0x36b   :  { %3978 = vmatmul.mubr.msk.f32.gmra.mxu1 %vm6283_vm4, %v6806_v20  ;;  %4327 = vmatprep.subr.mxu1 %v3114_v38  ;;  %vm2844_vm4 = vcmp.lt.s32.totalorder %v2840_v63, 512 }
 0x36c   :  { %4288 = vmatpush3.msra.mxu0 %v3064_v62  ;;  %4328 = vmatpush3.msra.mxu1 %v3098_v41  ;;  %vm2860_vm9 = vmand %vm2848_vm5, %vm2844_vm4  ;;  %vm2638_vm4 = vcmp.lt.s32.totalorder %v2634_v5, 512  ;;  %v2733_v8 = vshll.u32 %v2732_v21, 16  ;;  %v2837_v62 = vshll.u32 %v2836_v7, 16  ;;  %vm2534_vm5 = vcmp.lt.s32.totalorder %v2530_v55, 512 }
 0x36d   :  { %3987 = vmatprep.mubr.msk.f32.mxu1 %vm2859_vm7, %v6806_v20  ;;  %4289 = vmatprep.subr.mxu0 %v3079_v54  ;;  %vm2744_vm7 = vcmp.eq.s32.totalorder %v4865_v49, %v2706_v39 }
 0x36e   :  { %4329 = vmatprep.subr.mxu1 %v3113_v51  ;;  %4290 = vmatpush3.msra.mxu0 %v3063_v11  ;;  %vm2756_vm10 = vmand %vm2744_vm7, %vm2740_vm6 }
 0x36f   :  { %4330 = vmatpush3.msra.mxu1 %v3097_v45  ;;  %3980 = vmatmul.mubr.msk.f32.vlgmr.msra.gmra.mxu0 %vm6301_vm8, %v6806_v20  ;;  %vm2653_vm8 = vmand %vm2641_vm2, %vm2637_vm1  ;;  %vm2741_vm1 = vcmp.lt.s32.totalorder %v2737_v26, 512 }
 0x370   :  { %4331 = vmatprep.subr.mxu1 %v3112_v35  ;;  %3981 = vmatprep.mubr.msk.f32.mxu0 %vm2652_vm15, %v6806_v20 }
 0x371   :  { %4332 = vmatpush3.msra.mxu1 %v3096_v2 }
 0x372   :  { %4333 = vmatprep.subr.mxu1 %v3111_v14 }
 0x373   :  { %4334 = vmatpush3.msra.mxu1 %v3095_v56  ;;  %3982 = vmatmul.mubr.msk.f32.gmra.mxu0 %vm2548_vm0, %v6806_v20 }
 0x374   :  { %3988 = vmatmul.mubr.msk.f32.vlgmr.msra.gmra.mxu1 %vm2755_vm3, %v6806_v20  ;;  %3983 = vmatprep.mubr.msk.f32.mxu0 %vm2653_vm8, %v6806_v20 }
 0x375   :  { %3989 = vmatprep.mubr.msk.f32.mxu1 %vm2860_vm9, %v6806_v20 }
 0x378   :  { %3990 = vmatmul.mubr.msk.f32.gmra.mxu1 %vm2756_vm10, %v6806_v20  ;;  %vm2846_vm10 = vcmp.lt.s32.totalorder %v2842_v15, 512 }
 0x379   :  { %v2508_v22 = vpop.xlane.xlu1 %2507 }
 0x37a   :  { %v2509_v17 = vcvt.f32.s32 %v2508_v22 }
 0x37c   :  { %v2512_v18 = vadd.s32 %v2511_v9, %v2509_v17 }
 0x37d   :  { %v2820_v48 = vpop.xlane.xlu0 %2819 }
 0x37e   :  { %v2821_v46 = vcvt.f32.s32 %v2820_v48  ;;  %vm2537_vm12 = vcmp.eq.s32.totalorder %v4865_v49, %v2512_v18 }
 0x37f   :  { %vm2549_vm13 = vmand %vm2537_vm12, %vm2533_vm11  ;;  %vm2742_vm11 = vcmp.lt.s32.totalorder %v2738_v31, 512 }
 0x380   :  { %v2824_v43 = vadd.s32 %v2823_v3, %v2821_v46  ;;  %3984 = vmatmul.mubr.msk.f32.gmra.mxu0 %vm2549_vm13, %v6806_v20 }
 0x381   :  { %v2716_v58 = vpop.xlane.xlu1 %2715 }
 0x382   :  { %v2717_v23 = vcvt.f32.s32 %v2716_v58  ;;  %vm2849_vm15 = vcmp.eq.s32.totalorder %v4865_v49, %v2824_v43 }
 0x383   :  { %vm2861_vm0 = vmand %vm2849_vm15, %vm2845_vm14 }
 0x384   :  { %v2720_v57 = vadd.s32 %v2719_v59, %v2717_v23  ;;  %3991 = vmatprep.mubr.msk.f32.mxu1 %vm2861_vm0, %v6806_v20 }
 0x385   :  { %v2522_v24 = vpop.xlane.xlu1 %2521  ;;  %v2626_v36 = vpop.xlane.xlu0 %2625 }
 0x386   :  { %v2523_v25 = vcvt.f32.s32 %v2522_v24  ;;  %v2627_v4 = vcvt.f32.s32 %v2626_v36  ;;  %vm2745_vm2 = vcmp.eq.s32.totalorder %v4865_v49, %v2720_v57 }
 0x387   :  { %vm2757_vm3 = vmand %vm2745_vm2, %vm2741_vm1 }
 0x388   :  { %v2526_v6 = vadd.s32 %v2525_v42, %v2523_v25  ;;  %v2630_v38 = vadd.s32 %v2629_v32, %v2627_v4  ;;  %3992 = vmatmul.mubr.msk.f32.gmra.mxu1 %vm2757_vm3, %v6806_v20 }
 0x389   :  { %v2730_v1 = vpop.xlane.xlu1 %2729  ;;  %v2834_v41 = vpop.xlane.xlu0 %2833 }
 0x38a   :  { %v2731_v44 = vcvt.f32.s32 %v2730_v1  ;;  %v2835_v34 = vcvt.f32.s32 %v2834_v41  ;;  %vm2642_vm6 = vcmp.eq.s32.totalorder %v4865_v49, %v2630_v38  ;;  %vm2538_vm7 = vcmp.eq.s32.totalorder %v4865_v49, %v2526_v6 }
 0x38b   :  { %vm2654_vm8 = vmand %vm2642_vm6, %vm2638_vm4 }
 0x38c   :  { %v2734_v60 = vadd.s32 %v2733_v8, %v2731_v44  ;;  %v2838_v27 = vadd.s32 %v2837_v62, %v2835_v34  ;;  %3985 = vmatprep.mubr.msk.f32.mxu0 %vm2654_vm8, %v6806_v20  ;;  %vm2550_vm9 = vmand %vm2538_vm7, %vm2534_vm5 }
 0x38d   :  { %3986 = vmatmul.mubr.msk.f32.gmra.mxu0 %vm2550_vm9, %v6806_v20 }
 0x38e   :  { %vm2746_vm12 = vcmp.eq.s32.totalorder %v4865_v49, %v2734_v60  ;;  %vm2850_vm13 = vcmp.eq.s32.totalorder %v4865_v49, %v2838_v27 }
 0x38f   :  { %vm2862_vm14 = vmand %vm2850_vm13, %vm2846_vm10 }
 0x390   :  { %3993 = vmatprep.mubr.msk.f32.mxu1 %vm2862_vm14, %v6806_v20  ;;  %vm2758_vm15 = vmand %vm2746_vm12, %vm2742_vm11 }
 0x391   :  { %3994 = vmatmul.mubr.msk.f32.gmra.mxu1 %vm2758_vm15, %v6806_v20 }
 0x3ad   :  { %v4027_v0 = vpop.f32.mrf.mxu0 }
 0x3af   :  { %v4028_v54 = vpop.f32.mrf.mxu0 }
 0x3b0   :  { %v4029_v7 = vadd.f32 %v4028_v54, %v4027_v0 }
 0x3b1   :  { %v4071_v61 = vpop.f32.mrf.mxu1 }
 0x3b2   :  { %v4030_v33 = vpop.f32.mrf.mxu0 }
 0x3b3   :  { %v4072_v30 = vpop.f32.mrf.mxu1 }
 0x3b4   :  { %v4031_v51 = vpop.f32.mrf.mxu0  ;;  %v4073_v42 = vadd.f32 %v4072_v30, %v4071_v61 }
 0x3b5   :  { %v4074_v11 = vpop.f32.mrf.mxu1  ;;  %v4032_v38 = vadd.f32 %v4031_v51, %v4030_v33 }
 0x3b6   :  { %v3279_v55 = vadd.f32 %v4073_v42, %v4029_v7 }
 0x3b7   :  { %v4075_v52 = vpop.f32.mrf.mxu1 }
 0x3b8   :  { %v4076_v32 = vadd.f32 %v4075_v52, %v4074_v11 }
 0x3ba   :  { %v3284_v41 = vadd.f32 %v4076_v32, %v4032_v38 }
 0x3c2   :  { %v6361_v28 = vpop.f32.mrf.mxu0 }
 0x3c4   :  { %v6363_v45 = vpop.f32.mrf.mxu0 }
 0x3c5   :  { %v6365_v47 = vpop.f32.mrf.mxu1 }
 0x3c7   :  { %v6369_v53 = vpop.f32.mrf.mxu1 }
 0x3d1   :  { %v6367_v49 = vpop.f32.mrf.mxu0 }
 0x3d3   :  { %v6371_v35 = vpop.f32.mrf.mxu0 }
 0x3d5   :  { %v6373_v20 = vpop.f32.mrf.mxu1 }
 0x3d7   :  { %v6375_v2 = vpop.f32.mrf.mxu1 }
 0x3e1   :  { %v4115_v63 = vpop.f32.mrf.mxu0 }
 0x3e3   :  { %v4116_v39 = vpop.f32.mrf.mxu0 }
 0x3e4   :  { %v4117_v24 = vadd.f32 %v4116_v39, %v4115_v63 }
 0x3e5   :  { %v4159_v16 = vpop.f32.mrf.mxu1 }
 0x3e6   :  { %v3364_v15 = vadd.f32 %v4117_v24, %v3279_v55 }
 0x3e7   :  { %v4160_v56 = vpop.f32.mrf.mxu1 }
 0x3e8   :  { %v4161_v25 = vadd.f32 %v4160_v56, %v4159_v16 }
 0x3e9   :  { %v4118_v14 = vpop.f32.mrf.mxu0 }
 0x3ea   :  { %v3449_v31 = vadd.f32 %v4161_v25, %v3364_v15 }
 0x3eb   :  { %v4119_v10 = vpop.f32.mrf.mxu0 }
 0x3ec   :  { %v4120_v8 = vadd.f32 %v4119_v10, %v4118_v14 }
 0x3ee   :  { %v3369_v0 = vadd.f32 %v4120_v8, %v3284_v41 }
 0x3ef   :  { %v4162_v40 = vpop.f32.mrf.mxu1 }
 0x3f1   :  { %v4163_v9 = vpop.f32.mrf.mxu1 }
 0x3f2   :  { %v4164_v44 = vadd.f32 %v4163_v9, %v4162_v40 }
 0x3f3   :  { %v6377_v22 = vpop.f32.mrf.mxu0 }
 0x3f4   :  { %v3454_v63 = vadd.f32 %v4164_v44, %v3369_v0  ;;  %v4362_v0 = vld [vmem:[#allocation2 + $0x10] sm:$0xff] }
 0x3f5   :  { %v6379_v13 = vpop.f32.mrf.mxu0 }
 0x3f9   :  { %v6381_v17 = vpop.f32.mrf.mxu1 }
 0x3fb   :  { %v6385_v37 = vpop.f32.mrf.mxu1 }
 0x3fc   :  { %v4167_v55 = vadd.f32 %v6385_v37, %v6381_v17 }
 0x3fd   :  { %v6383_v18 = vpop.f32.mrf.mxu0 }
 0x3ff   :  { %v6387_v48 = vpop.f32.mrf.mxu0 }
 0x403   :  { %v6389_v3 = vpop.f32.mrf.mxu1 }
 0x405   :  { %v6391_v29 = vpop.f32.mrf.mxu1 }
 0x406   :  { %v4170_v17 = vadd.f32 %v6391_v29, %v6389_v3  ;;  %v4361_v3 = vld [vmem:[#allocation2] sm:$0xff] }
 0x407   :  { %v4203_v50 = vpop.f32.mrf.mxu0 }
 0x409   :  { %v4204_v46 = vpop.f32.mrf.mxu0 }
 0x40a   :  { %v4205_v62 = vadd.f32 %v4204_v46, %v4203_v50 }
 0x40c   :  { %v4247_v43 = vpop.f32.mrf.mxu1  ;;  %v3534_v54 = vadd.f32 %v4205_v62, %v3449_v31 }
 0x40e   :  { %v4248_v19 = vpop.f32.mrf.mxu1 }
 0x40f   :  { %v4249_v34 = vadd.f32 %v4248_v19, %v4247_v43 }
 0x411   :  { %v4206_v26 = vpop.f32.mrf.mxu0  ;;  %v3619_v39 = vadd.f32 %v4249_v34, %v3534_v54 }
 0x413   :  { %v4207_v58 = vpop.f32.mrf.mxu0 }
 0x414   :  { %v4208_v61 = vadd.f32 %v4207_v58, %v4206_v26  ;;  %v4079_v26 = vadd.f32 %v6369_v53, %v6365_v47  ;;  %v4082_v47 = vadd.f32 %v6375_v2, %v6373_v20 }
 0x416   :  { %v3539_v14 = vadd.f32 %v4208_v61, %v3454_v63 }
 0x417   :  { %v4250_v59 = vpop.f32.mrf.mxu1 }
 0x419   :  { %v4251_v23 = vpop.f32.mrf.mxu1 }
 0x41a   :  { %v4252_v16 = vadd.f32 %v4251_v23, %v4250_v59  ;;  %v4035_v59 = vadd.f32 %v6363_v45, %v6361_v28  ;;  %v4123_v23 = vadd.f32 %v6379_v13, %v6377_v22  ;;  %v4038_v28 = vadd.f32 %v6371_v35, %v6367_v49 }
 0x41b   :  { %v4209_v12 = vpop.f32.mrf.mxu0  ;;  %v4126_v45 = vadd.f32 %v6387_v48, %v6383_v18  ;;  %v4360_v48 = vld [vmem:[#allocation2 + $0x8] sm:$0xff] }
 0x41c   :  { %v3624_v40 = vadd.f32 %v4252_v16, %v3539_v14  ;;  %v3289_v24 = vadd.f32 %v4079_v26, %v4035_v59 }
 0x41d   :  { %v4210_v57 = vpop.f32.mrf.mxu0 }
 0x41e   :  { %v3374_v32 = vadd.f32 %v4123_v23, %v3289_v24  ;;  %v4211_v25 = vadd.f32 %v4210_v57, %v4209_v12 }
 0x420   :  { %v3459_v15 = vadd.f32 %v4167_v55, %v3374_v32 }
 0x421   :  { %v4253_v5 = vpop.f32.mrf.mxu1 }
 0x422   :  { %v3544_v53 = vadd.f32 %v4211_v25, %v3459_v15 }
 0x423   :  { %v4254_v36 = vpop.f32.mrf.mxu1 }
 0x424   :  { %v4255_v8 = vadd.f32 %v4254_v36, %v4253_v5 }
 0x425   :  { %v6393_v21 = vpop.f32.mrf.mxu0 }
 0x426   :  { %v3629_v13 = vadd.f32 %v4255_v8, %v3544_v53 }
 0x427   :  { %v4213_v4 = vpop.f32.mrf.mxu0 }
 0x428   :  { %v4214_v20 = vadd.f32 %v4213_v4, %v6393_v21 }
 0x42b   :  { %v6395_v6 = vpop.f32.mrf.mxu1 }
 0x42d   :  { %v4257_v27 = vpop.f32.mrf.mxu1 }
 0x42e   :  { %v4258_v49 = vadd.f32 %v4257_v27, %v6395_v6  ;;  %v4363_v27 = vld [vmem:[#allocation2 + $0x18] sm:$0xff] }
 0x42f   :  { %v4291_v1 = vpop.f32.mrf.mxu0 }
 0x431   :  { %v4292_v60 = vpop.f32.mrf.mxu0 }
 0x432   :  { %v4293_v30 = vadd.f32 %v4292_v60, %v4291_v1  ;;  %v3294_v1 = vadd.f32 %v4082_v47, %v4038_v28 }
 0x433   :  { %v4294_v11 = vpop.f32.mrf.mxu0 }
 0x434   :  { %v4335_v52 = vpop.f32.mrf.mxu1  ;;  %v3704_v56 = vadd.f32 %v4293_v30, %v3619_v39  ;;  %v3379_v5 = vadd.f32 %v4126_v45, %v3294_v1 }
 0x435   :  { %v4295_v33 = vpop.f32.mrf.mxu0 }
 0x436   :  { %v4336_v51 = vpop.f32.mrf.mxu1  ;;  %v4296_v50 = vadd.f32 %v4295_v33, %v4294_v11  ;;  %v3464_v41 = vadd.f32 %v4170_v17, %v3379_v5 }
 0x437   :  { %v4337_v10 = vadd.f32 %v4336_v51, %v4335_v52 }
 0x438   :  { %v4338_v46 = vpop.f32.mrf.mxu1  ;;  %v3709_v19 = vadd.f32 %v4296_v50, %v3624_v40  ;;  %v3549_v18 = vadd.f32 %v4214_v20, %v3464_v41 }
 0x439   :  { %v3789_v9 = vadd.f32 %v4337_v10, %v3704_v56 }
 0x43a   :  { %v4339_v43 = vpop.f32.mrf.mxu1  ;;  %v3634_v60 = vadd.f32 %v4258_v49, %v3549_v18 }
 0x43b   :  { %3807 = vst [vmem:[#allocation10] sm:$0xff] %v3789_v9  ;;  %v4340_v42 = vadd.f32 %v4339_v43, %v4338_v46  ;;  %v3811_v29 = vsub.f32 %v3789_v9, %v4361_v3 }
 0x43d   :  { %v3794_v58 = vadd.f32 %v4340_v42, %v3709_v19  ;;  %v3815_v11 = vmul.f32 %v3811_v29, %v3811_v29 }
 0x43f   :  { %3808 = vst [vmem:[#allocation10 + $0x8] sm:$0xff] %v3794_v58  ;;  %v3812_v31 = vsub.f32 %v3794_v58, %v4360_v48 }
 0x440   :  { %v4297_v7 = vpop.f32.mrf.mxu0 }
 0x441   :  { %v3816_v30 = vmul.f32 %v3812_v31, %v3812_v31 }
 0x442   :  { %v4298_v38 = vpop.f32.mrf.mxu0 }
 0x443   :  { %v4299_v62 = vadd.f32 %v4298_v38, %v4297_v7  ;;  %v3819_v6 = vadd.f32 %v3816_v30, %v3815_v11 }
 0x445   :  { %v3714_v12 = vadd.f32 %v4299_v62, %v3629_v13 }
 0x448   :  { %v4341_v22 = vpop.f32.mrf.mxu1 }
 0x44a   :  { %v4342_v37 = vpop.f32.mrf.mxu1 }
 0x44b   :  { %v4343_v57 = vadd.f32 %v4342_v37, %v4341_v22 }
 0x44d   :  { %v3799_v2 = vadd.f32 %v4343_v57, %v3714_v12  ;;  %v4300_v36 = vpop.f32.mrf.mxu0 }
 0x44f   :  { %3809 = vst [vmem:[#allocation10 + $0x10] sm:$0xff] %v3799_v2  ;;  %v4301_v35 = vpop.f32.mrf.mxu0  ;;  %v3813_v54 = vsub.f32 %v3799_v2, %v4362_v0 }
 0x450   :  { %v4302_v44 = vadd.f32 %v4301_v35, %v4300_v36 }
 0x451   :  { %v4344_v34 = vpop.f32.mrf.mxu1  ;;  %v3817_v52 = vmul.f32 %v3813_v54, %v3813_v54 }
 0x452   :  { %v3719_v21 = vadd.f32 %v4302_v44, %v3634_v60 }
 0x453   :  { %v4345_v61 = vpop.f32.mrf.mxu1  ;;  %v3820_v33 = vadd.f32 %v3819_v6, %v3817_v52 }
 0x454   :  { %v4346_v4 = vadd.f32 %v4345_v61, %v4344_v34 }
 0x456   :  { %v3804_v63 = vadd.f32 %v4346_v4, %v3719_v21 }
 0x458   :  { %3810 = vst [vmem:[#allocation10 + $0x18] sm:$0xff] %v3804_v63  ;;  %v3814_v39 = vsub.f32 %v3804_v63, %v4363_v27 }
 0x45a   :  { %v3818_v16 = vmul.f32 %v3814_v39, %v3814_v39 }
 0x45c   :  { %v3821_v51 = vadd.f32 %v3820_v33, %v3818_v16 }
 0x45e   :  { %3822 = vadd.xlane.f32.xlu0 %v3821_v51 }
 0x45f   :  { %4455 = shalt.err (!%p4452_p10)
}
 0x460   :  { %3845 = dma.vmem_to_hbm [thread:$0]  %s3840_s3, 512, %s6428_s4, [#allocation4], %s4496_s22, %s4496_s22, %s4498_s28   ;;  %vm3832_vm0 = vcmask 0  }
 0x461   :  { %s4504_s17 = smov [#allocation11]  }
 0x462   :  { %s3852_s18 = sshll.u32 %s4504_s17, 4  ;;  %s3853_s18 = int_to_ptr.vmem [resolvable:$true] %s3852_s18 }
 0x463   :  { %s4464_s20 = scalar_lea.vmem %s3853_s18, 16  ;;  %s4468_s21 = scalar_lea.vmem %s3853_s18, 32 }
 0x464   :  { %p4465_p11 = scmp.ne.s32.totalorder %s3853_s18, %s4464_s20  ;;  %p4469_p12 = scmp.lt.s32.totalorder %s3853_s18, %s3853_s18 }
 0x465   :  { %p4470_p13 = scmp.lt.s32.totalorder %s4468_s21, %s4464_s20 }
 0x467   :  { %p4471_p0 = por %p4470_p13, %p4469_p12 }
 0x469   :  { %p4472_p1 = pnand %p4471_p0, %p4465_p11 }
 0x4e7   :  { %v3823_v14 = vpop.xlane.xlu0 %3822 }
 0x4e8   :  { %v3824_v56 = vrot.slane %v3823_v14, 4 }
 0x4ea   :  { %v3825_v10 = vadd.f32 %v3824_v56, %v3823_v14 }
 0x4ec   :  { %v3826_v50 = vrot.slane %v3825_v10, 2 }
 0x4ee   :  { %v3827_v46 = vadd.f32 %v3826_v50, %v3825_v10 }
 0x4f0   :  { %v3828_v40 = vrot.slane %v3827_v46, 1 }
 0x4f2   :  { %v3829_v9 = vadd.f32 %v3828_v40, %v3827_v46 }
 0x4f4   :  { %4347 = vpush %v3829_v9 }
 0x525   :  { %s4348_s19 = spop %4347 }
 0x526   :  { %v3831_v43 = vstv %s4348_s19 }
 0x527   :  { %3833 = vst.msk [vmem:[#allocation11] sm:$0x1] %vm3832_vm0, %v3831_v43 }
 0x528   :  { %4475 = shalt.err (!%p4472_p1)
}
 0x529   :  { %3855 = dma.vmem_to_hbm [thread:$0]  %s3853_s18, 16, %s6429_s5, [#allocation12]  }
 0x52a   :  { %4490 = dma.done.wait [#allocation4], 512  }
 0x52b   :  { %4491 = vsyncadd [#allocation4], 4294966784 }
 0x52c   :  { %4492 = dma.done.wait [#allocation12], 16  }
 0x52d   :  { %4493 = vsyncadd [#allocation12], 4294967280 }
 0x52e   :  { %3862 = vsyncpa [#allocation3], 1 }
 0x52f   :  { %3863 = vsyncpa [#allocation6], 1 }
 0x530   :  { %3864 = vsyncpa [#allocation9], 1 }
 0x531   :  { %3865 = vsyncpa [#allocation4], 1 }
 0x532   :  { %3866 = vsyncpa [#allocation12], 1 }

// kernel: tpu_custom_call.1
= control target key start
LH: loop header
LB: loop body
LE: loop exit
PB: predicated region body
PF: predicated region fallthrough
CT: control target
= control target key end

     0   :  { %11 = vsyncpa [#allocation3], 0  ;;  %s6424_s0 = inlined_call_operand.hbm [shape: f32[32,128], index: 0, kind: input, shape index: {}]   ;;  %s6425_s1 = inlined_call_operand.hbm [shape: f32[128,2048], index: 1, kind: input, shape index: {}]   ;;  %s6426_s2 = inlined_call_operand.hbm [shape: f32[2048,128], index: 2, kind: input, shape index: {}]   ;;  %s6427_s3 = inlined_call_operand.hbm [shape: f32[1,2048], index: 3, kind: input, shape index: {}]   ;;  %s6428_s4 = inlined_call_operand.hbm [shape: f32[32,128], index: 4, kind: output, shape index: {0}]   ;;  %s6429_s5 = inlined_call_operand.hbm [shape: f32[1,1,1], index: 5, kind: output, shape index: {1}]  }
   0x1   :  { %12 = vsyncpa [#allocation6], 0 }
   0x2   :  { %13 = vsyncpa [#allocation9], 0 }
   0x3   :  { %14 = vsyncpa [#allocation4], 0 }
   0x4   :  { %15 = vsyncpa [#allocation12], 0  ;;  %s4494_s18 = smov [#allocation5]  }
   0x5   :  { %s33_s19 = sshll.u32 %s4494_s18, 4  ;;  %s34_s19 = int_to_ptr.vmem [resolvable:$true] %s33_s19 }
   0x6   :  { %s4372_s20 = scalar_lea.vmem %s34_s19, 32768  ;;  %p4377_p1 = scmp.lt.s32.totalorder %s34_s19, %s34_s19 }
   0x7   :  { %p4373_p0 = scmp.ne.s32.totalorder %s34_s19, %s4372_s20  ;;  %p4378_p2 = scmp.lt.s32.totalorder %s4372_s20, %s4372_s20 }
   0x9   :  { %p4379_p3 = por %p4378_p2, %p4377_p1 }
   0xb   :  { %p4380_p4 = pnand %p4379_p3, %p4373_p0 }
   0xd   :  { %4383 = shalt.err (!%p4380_p4)
}
   0xe   :  { %s4495_s21 = smov 2048   ;;  %s4496_s22 = smov 128  }
   0xf   :  { %39 = dma.hbm_to_vmem [thread:$0]  %s6425_s1, 32768, %s34_s19, [#allocation6], %s4495_s21, %s4495_s21, %s4496_s22  }
  0x10   :  { %s4497_s25 = smov [#allocation2]  }
  0x11   :  { %s21_s26 = sshll.u32 %s4497_s25, 4  ;;  %s22_s26 = int_to_ptr.vmem [resolvable:$true] %s21_s26 }
  0x12   :  { %s4392_s27 = scalar_lea.vmem %s22_s26, 512  ;;  %p4397_p6 = scmp.lt.s32.totalorder %s22_s26, %s22_s26 }
  0x13   :  { %p4393_p5 = scmp.ne.s32.totalorder %s22_s26, %s4392_s27  ;;  %p4398_p7 = scmp.lt.s32.totalorder %s4392_s27, %s4392_s27 }
  0x15   :  { %p4399_p8 = por %p4398_p7, %p4397_p6 }
  0x17   :  { %p4400_p9 = pnand %p4399_p8, %p4393_p5 }
  0x19   :  { %4403 = shalt.err (!%p4400_p9)
}
  0x1a   :  { %s4498_s28 = smov 8   ;;  %s4499_s6 = smov [#allocation7]  }
  0x1b   :  { %27 = dma.hbm_to_vmem [thread:$0]  %s6424_s0, 512, %s22_s26, [#allocation3], %s4496_s22, %s4496_s22, %s4498_s28  }
  0x1c   :  { %s45_s1 = sshll.u32 %s4499_s6, 4  ;;  %s4500_s7 = smov [#allocation8]   ;;  %s46_s1 = int_to_ptr.vmem [resolvable:$true] %s45_s1 }
  0x1d   :  { %s58_s8 = sshll.u32 %s4500_s7, 4  ;;  %s4412_s9 = scalar_lea.vmem %s46_s1, 32768  ;;  %s59_s8 = int_to_ptr.vmem [resolvable:$true] %s58_s8 }
  0x1e   :  { %p4413_p10 = scmp.ne.s32.totalorder %s46_s1, %s4412_s9  ;;  %p4417_p11 = scmp.lt.s32.totalorder %s46_s1, %s46_s1 }
  0x1f   :  { %p4418_p12 = scmp.lt.s32.totalorder %s4412_s9, %s4412_s9 }
  0x21   :  { %p4419_p13 = por %p4418_p12, %p4417_p11 }
  0x23   :  { %p4420_p0 = pnand %p4419_p13, %p4413_p10 }
  0x25   :  { %4423 = shalt.err (!%p4420_p0)
}
  0x26   :  { %51 = dma.hbm_to_vmem [thread:$0]  %s6426_s2, 32768, %s46_s1, [#allocation6], %s4496_s22, %s4496_s22, %s4498_s28  }
  0x27   :  { %s4432_s0 = scalar_lea.vmem %s59_s8, 256  ;;  %p4437_p2 = scmp.lt.s32.totalorder %s59_s8, %s59_s8 }
  0x28   :  { %p4433_p1 = scmp.ne.s32.totalorder %s59_s8, %s4432_s0  ;;  %p4438_p3 = scmp.lt.s32.totalorder %s4432_s0, %s4432_s0 }
  0x2a   :  { %p4439_p4 = por %p4438_p3, %p4437_p2 }
  0x2c   :  { %p4440_p5 = pnand %p4439_p4, %p4433_p1 }
  0x2e   :  { %4443 = shalt.err (!%p4440_p5)
}
  0x2f   :  { %61 = dma.hbm_to_vmem [thread:$0]  %s6427_s3, 256, %s59_s8, [#allocation9]  }
  0x30   :  { %4484 = dma.done.wait [#allocation3], 512  }
  0x31   :  { %4485 = vsyncadd [#allocation3], 4294966784 }
  0x32   :  { %4486 = dma.done.wait [#allocation6], 65536  }
  0x33   :  { %4487 = vsyncadd [#allocation6], 4294901760 }
  0x34   :  { %4488 = dma.done.wait [#allocation9], 256  }
  0x35   :  { %4489 = vsyncadd [#allocation9], 4294967040  ;;  %v4501_v0 = vmov 0.0   ;;  %v319_v1 = vld [vmem:[#allocation5 + $0x788] sm:$0xff]  ;;  %v321_v2 = vld [vmem:[#allocation5 + $0x798] sm:$0xff]  ;;  %s4503_s2 = smov [#allocation10]  }
  0x36   :  { %398 = vmatprep.mubr.f32.mxu0 %v4501_v0  ;;  %487 = vmatprep.mubr.f32.mxu1 %v4501_v0  ;;  %v318_v3 = vld [vmem:[#allocation5 + $0x780] sm:$0xff]  ;;  %v320_v4 = vld [vmem:[#allocation5 + $0x790] sm:$0xff]  ;;  %v303_v5 = vld [vmem:[#allocation5 + $0x708] sm:$0xff]  ;;  %s3839_s3 = sshll.u32 %s4503_s2, 4  ;;  %s3840_s3 = int_to_ptr.vmem [resolvable:$true] %s3839_s3 }
  0x37   :  { %334 = vmatprep.subr.mxu0 %v319_v1  ;;  %423 = vmatprep.subr.mxu1 %v321_v2  ;;  %v305_v6 = vld [vmem:[#allocation5 + $0x718] sm:$0xff]  ;;  %v302_v7 = vld [vmem:[#allocation5 + $0x700] sm:$0xff]  ;;  %v304_v8 = vld [vmem:[#allocation5 + $0x710] sm:$0xff]  ;;  %s4444_s14 = scalar_lea.vmem %s3840_s3, 512  ;;  %p4449_p7 = scmp.lt.s32.totalorder %s3840_s3, %s3840_s3 }
  0x38   :  { %335 = vmatpush1.msra.mxu0 %v318_v3  ;;  %424 = vmatpush1.msra.mxu1 %v320_v4  ;;  %v287_v9 = vld [vmem:[#allocation5 + $0x688] sm:$0xff]  ;;  %v289_v10 = vld [vmem:[#allocation5 + $0x698] sm:$0xff]  ;;  %v286_v11 = vld [vmem:[#allocation5 + $0x680] sm:$0xff]  ;;  %p4445_p6 = scmp.ne.s32.totalorder %s3840_s3, %s4444_s14  ;;  %p4450_p8 = scmp.lt.s32.totalorder %s4444_s14, %s4444_s14 }
  0x39   :  { %336 = vmatprep.subr.mxu0 %v303_v5  ;;  %425 = vmatprep.subr.mxu1 %v305_v6  ;;  %v288_v12 = vld [vmem:[#allocation5 + $0x690] sm:$0xff]  ;;  %v271_v13 = vld [vmem:[#allocation5 + $0x608] sm:$0xff]  ;;  %v273_v14 = vld [vmem:[#allocation5 + $0x618] sm:$0xff] }
  0x3a   :  { %337 = vmatpush1.msra.mxu0 %v302_v7  ;;  %426 = vmatpush1.msra.mxu1 %v304_v8  ;;  %v270_v15 = vld [vmem:[#allocation5 + $0x600] sm:$0xff]  ;;  %v272_v16 = vld [vmem:[#allocation5 + $0x610] sm:$0xff]  ;;  %v255_v17 = vld [vmem:[#allocation5 + $0x588] sm:$0xff]  ;;  %p4451_p9 = por %p4450_p8, %p4449_p7 }
  0x3b   :  { %338 = vmatprep.subr.mxu0 %v287_v9  ;;  %427 = vmatprep.subr.mxu1 %v289_v10  ;;  %v257_v18 = vld [vmem:[#allocation5 + $0x598] sm:$0xff]  ;;  %v254_v19 = vld [vmem:[#allocation5 + $0x580] sm:$0xff]  ;;  %v256_v20 = vld [vmem:[#allocation5 + $0x590] sm:$0xff] }
  0x3c   :  { %339 = vmatpush1.msra.mxu0 %v286_v11  ;;  %428 = vmatpush1.msra.mxu1 %v288_v12  ;;  %v239_v21 = vld [vmem:[#allocation5 + $0x508] sm:$0xff]  ;;  %v241_v22 = vld [vmem:[#allocation5 + $0x518] sm:$0xff]  ;;  %v238_v23 = vld [vmem:[#allocation5 + $0x500] sm:$0xff]  ;;  %p4452_p10 = pnand %p4451_p9, %p4445_p6 }
  0x3d   :  { %340 = vmatprep.subr.mxu0 %v271_v13  ;;  %429 = vmatprep.subr.mxu1 %v273_v14  ;;  %v240_v24 = vld [vmem:[#allocation5 + $0x510] sm:$0xff]  ;;  %v223_v25 = vld [vmem:[#allocation5 + $0x488] sm:$0xff]  ;;  %v225_v26 = vld [vmem:[#allocation5 + $0x498] sm:$0xff] }
  0x3e   :  { %341 = vmatpush1.msra.mxu0 %v270_v15  ;;  %430 = vmatpush1.msra.mxu1 %v272_v16  ;;  %v222_v27 = vld [vmem:[#allocation5 + $0x480] sm:$0xff]  ;;  %v224_v28 = vld [vmem:[#allocation5 + $0x490] sm:$0xff]  ;;  %v207_v29 = vld [vmem:[#allocation5 + $0x408] sm:$0xff] }
  0x3f   :  { %342 = vmatprep.subr.mxu0 %v255_v17  ;;  %431 = vmatprep.subr.mxu1 %v257_v18  ;;  %v209_v30 = vld [vmem:[#allocation5 + $0x418] sm:$0xff]  ;;  %v206_v31 = vld [vmem:[#allocation5 + $0x400] sm:$0xff]  ;;  %v208_v32 = vld [vmem:[#allocation5 + $0x410] sm:$0xff] }
  0x40   :  { %343 = vmatpush1.msra.mxu0 %v254_v19  ;;  %432 = vmatpush1.msra.mxu1 %v256_v20  ;;  %v191_v33 = vld [vmem:[#allocation5 + $0x388] sm:$0xff]  ;;  %v193_v34 = vld [vmem:[#allocation5 + $0x398] sm:$0xff]  ;;  %v190_v35 = vld [vmem:[#allocation5 + $0x380] sm:$0xff] }
  0x41   :  { %344 = vmatprep.subr.mxu0 %v239_v21  ;;  %433 = vmatprep.subr.mxu1 %v241_v22  ;;  %v192_v36 = vld [vmem:[#allocation5 + $0x390] sm:$0xff]  ;;  %v175_v37 = vld [vmem:[#allocation5 + $0x308] sm:$0xff]  ;;  %v177_v38 = vld [vmem:[#allocation5 + $0x318] sm:$0xff] }
  0x42   :  { %345 = vmatpush1.msra.mxu0 %v238_v23  ;;  %434 = vmatpush1.msra.mxu1 %v240_v24  ;;  %v174_v39 = vld [vmem:[#allocation5 + $0x300] sm:$0xff]  ;;  %v176_v40 = vld [vmem:[#allocation5 + $0x310] sm:$0xff]  ;;  %v159_v41 = vld [vmem:[#allocation5 + $0x288] sm:$0xff] }
  0x43   :  { %346 = vmatprep.subr.mxu0 %v223_v25  ;;  %435 = vmatprep.subr.mxu1 %v225_v26  ;;  %v161_v42 = vld [vmem:[#allocation5 + $0x298] sm:$0xff]  ;;  %v158_v43 = vld [vmem:[#allocation5 + $0x280] sm:$0xff]  ;;  %v160_v44 = vld [vmem:[#allocation5 + $0x290] sm:$0xff] }
  0x44   :  { %347 = vmatpush1.msra.mxu0 %v222_v27  ;;  %436 = vmatpush1.msra.mxu1 %v224_v28  ;;  %v143_v45 = vld [vmem:[#allocation5 + $0x208] sm:$0xff]  ;;  %v145_v46 = vld [vmem:[#allocation5 + $0x218] sm:$0xff]  ;;  %v142_v47 = vld [vmem:[#allocation5 + $0x200] sm:$0xff] }
  0x45   :  { %348 = vmatprep.subr.mxu0 %v207_v29  ;;  %437 = vmatprep.subr.mxu1 %v209_v30  ;;  %v144_v48 = vld [vmem:[#allocation5 + $0x210] sm:$0xff]  ;;  %v127_v49 = vld [vmem:[#allocation5 + $0x188] sm:$0xff]  ;;  %v129_v50 = vld [vmem:[#allocation5 + $0x198] sm:$0xff] }
  0x46   :  { %349 = vmatpush1.msra.mxu0 %v206_v31  ;;  %438 = vmatpush1.msra.mxu1 %v208_v32  ;;  %v126_v51 = vld [vmem:[#allocation5 + $0x180] sm:$0xff]  ;;  %v128_v52 = vld [vmem:[#allocation5 + $0x190] sm:$0xff]  ;;  %v111_v53 = vld [vmem:[#allocation5 + $0x108] sm:$0xff] }
  0x47   :  { %350 = vmatprep.subr.mxu0 %v191_v33  ;;  %439 = vmatprep.subr.mxu1 %v193_v34  ;;  %v113_v54 = vld [vmem:[#allocation5 + $0x118] sm:$0xff]  ;;  %v110_v55 = vld [vmem:[#allocation5 + $0x100] sm:$0xff]  ;;  %v112_v56 = vld [vmem:[#allocation5 + $0x110] sm:$0xff] }
  0x48   :  { %351 = vmatpush1.msra.mxu0 %v190_v35  ;;  %440 = vmatpush1.msra.mxu1 %v192_v36  ;;  %v95_v57 = vld [vmem:[#allocation5 + $0x88] sm:$0xff]  ;;  %v97_v58 = vld [vmem:[#allocation5 + $0x98] sm:$0xff]  ;;  %v94_v59 = vld [vmem:[#allocation5 + $0x80] sm:$0xff] }
  0x49   :  { %352 = vmatprep.subr.mxu0 %v175_v37  ;;  %441 = vmatprep.subr.mxu1 %v177_v38  ;;  %v96_v60 = vld [vmem:[#allocation5 + $0x90] sm:$0xff]  ;;  %v79_v61 = vld [vmem:[#allocation5 + $0x8] sm:$0xff]  ;;  %v81_v62 = vld [vmem:[#allocation5 + $0x18] sm:$0xff] }
  0x4a   :  { %353 = vmatpush1.msra.mxu0 %v174_v39  ;;  %442 = vmatpush1.msra.mxu1 %v176_v40  ;;  %v78_v63 = vld [vmem:[#allocation5] sm:$0xff]  ;;  %v80_v1 = vld [vmem:[#allocation5 + $0x10] sm:$0xff]  ;;  %v323_v3 = vld [vmem:[#allocation5 + $0x7a8] sm:$0xff] }
  0x4b   :  { %354 = vmatprep.subr.mxu0 %v159_v41  ;;  %443 = vmatprep.subr.mxu1 %v161_v42  ;;  %v4556_v2 = vld [vmem:[#allocation2] sm:$0xff]  ;;  %v325_v4 = vld [vmem:[#allocation5 + $0x7b8] sm:$0xff]  ;;  %v324_v6 = vld [vmem:[#allocation5 + $0x7b0] sm:$0xff] }
  0x4c   :  { %355 = vmatpush1.msra.mxu0 %v158_v43  ;;  %444 = vmatpush1.msra.mxu1 %v160_v44  ;;  %v322_v5 = vld [vmem:[#allocation5 + $0x7a0] sm:$0xff]  ;;  %v307_v7 = vld [vmem:[#allocation5 + $0x728] sm:$0xff]  ;;  %v309_v8 = vld [vmem:[#allocation5 + $0x738] sm:$0xff] }
  0x4d   :  { %356 = vmatprep.subr.mxu0 %v143_v45  ;;  %445 = vmatprep.subr.mxu1 %v145_v46  ;;  %v306_v9 = vld [vmem:[#allocation5 + $0x720] sm:$0xff]  ;;  %v291_v10 = vld [vmem:[#allocation5 + $0x6a8] sm:$0xff]  ;;  %v308_v11 = vld [vmem:[#allocation5 + $0x730] sm:$0xff] }
  0x4e   :  { %357 = vmatpush1.msra.mxu0 %v142_v47  ;;  %446 = vmatpush1.msra.mxu1 %v144_v48  ;;  %v290_v12 = vld [vmem:[#allocation5 + $0x6a0] sm:$0xff]  ;;  %v293_v13 = vld [vmem:[#allocation5 + $0x6b8] sm:$0xff]  ;;  %v4561_v14 = vld [vmem:[#allocation2 + $0x8] sm:$0xff] }
  0x4f   :  { %358 = vmatprep.subr.mxu0 %v127_v49  ;;  %447 = vmatprep.subr.mxu1 %v129_v50  ;;  %v275_v15 = vld [vmem:[#allocation5 + $0x628] sm:$0xff]  ;;  %v274_v16 = vld [vmem:[#allocation5 + $0x620] sm:$0xff]  ;;  %v292_v17 = vld [vmem:[#allocation5 + $0x6b0] sm:$0xff] }
  0x50   :  { %359 = vmatpush1.msra.mxu0 %v126_v51  ;;  %448 = vmatpush1.msra.mxu1 %v128_v52  ;;  %v259_v18 = vld [vmem:[#allocation5 + $0x5a8] sm:$0xff]  ;;  %v277_v19 = vld [vmem:[#allocation5 + $0x638] sm:$0xff]  ;;  %v258_v20 = vld [vmem:[#allocation5 + $0x5a0] sm:$0xff] }
  0x51   :  { %360 = vmatprep.subr.mxu0 %v111_v53  ;;  %449 = vmatprep.subr.mxu1 %v113_v54  ;;  %v276_v21 = vld [vmem:[#allocation5 + $0x630] sm:$0xff]  ;;  %v243_v22 = vld [vmem:[#allocation5 + $0x528] sm:$0xff]  ;;  %v261_v23 = vld [vmem:[#allocation5 + $0x5b8] sm:$0xff] }
  0x52   :  { %361 = vmatpush1.msra.mxu0 %v110_v55  ;;  %450 = vmatpush1.msra.mxu1 %v112_v56  ;;  %v242_v24 = vld [vmem:[#allocation5 + $0x520] sm:$0xff]  ;;  %v260_v25 = vld [vmem:[#allocation5 + $0x5b0] sm:$0xff]  ;;  %v227_v26 = vld [vmem:[#allocation5 + $0x4a8] sm:$0xff] }
  0x53   :  { %362 = vmatprep.subr.mxu0 %v95_v57  ;;  %451 = vmatprep.subr.mxu1 %v97_v58  ;;  %v245_v27 = vld [vmem:[#allocation5 + $0x538] sm:$0xff]  ;;  %v226_v28 = vld [vmem:[#allocation5 + $0x4a0] sm:$0xff]  ;;  %v244_v29 = vld [vmem:[#allocation5 + $0x530] sm:$0xff] }
  0x54   :  { %363 = vmatpush1.msra.mxu0 %v94_v59  ;;  %452 = vmatpush1.msra.mxu1 %v96_v60  ;;  %v4566_v30 = vld [vmem:[#allocation2 + $0x10] sm:$0xff]  ;;  %v211_v31 = vld [vmem:[#allocation5 + $0x428] sm:$0xff]  ;;  %v229_v32 = vld [vmem:[#allocation5 + $0x4b8] sm:$0xff] }
  0x55   :  { %364 = vmatprep.subr.mxu0 %v79_v61  ;;  %453 = vmatprep.subr.mxu1 %v81_v62  ;;  %v210_v33 = vld [vmem:[#allocation5 + $0x420] sm:$0xff]  ;;  %v228_v34 = vld [vmem:[#allocation5 + $0x4b0] sm:$0xff]  ;;  %v195_v35 = vld [vmem:[#allocation5 + $0x3a8] sm:$0xff] }
  0x56   :  { %365 = vmatpush1.msra.mxu0 %v78_v63  ;;  %454 = vmatpush1.msra.mxu1 %v80_v1  ;;  %v213_v36 = vld [vmem:[#allocation5 + $0x438] sm:$0xff]  ;;  %v194_v37 = vld [vmem:[#allocation5 + $0x3a0] sm:$0xff]  ;;  %v212_v38 = vld [vmem:[#allocation5 + $0x430] sm:$0xff] }
  0x57   :  { %399 = vmatmul.mubr.f32.vlgmr.msra.gmra.mxu0 %v4556_v2  ;;  %488 = vmatmul.mubr.f32.vlgmr.msra.gmra.mxu1 %v4556_v2  ;;  %v179_v39 = vld [vmem:[#allocation5 + $0x328] sm:$0xff]  ;;  %v197_v40 = vld [vmem:[#allocation5 + $0x3b8] sm:$0xff]  ;;  %v178_v41 = vld [vmem:[#allocation5 + $0x320] sm:$0xff] }
  0x58   :  { %512 = vmatprep.subr.mxu0 %v323_v3  ;;  %601 = vmatprep.subr.mxu1 %v325_v4  ;;  %v196_v42 = vld [vmem:[#allocation5 + $0x3b0] sm:$0xff]  ;;  %v163_v43 = vld [vmem:[#allocation5 + $0x2a8] sm:$0xff]  ;;  %v181_v44 = vld [vmem:[#allocation5 + $0x338] sm:$0xff] }
  0x59   :  { %513 = vmatpush1.msra.mxu0 %v322_v5  ;;  %602 = vmatpush1.msra.mxu1 %v324_v6  ;;  %v162_v45 = vld [vmem:[#allocation5 + $0x2a0] sm:$0xff]  ;;  %v180_v46 = vld [vmem:[#allocation5 + $0x330] sm:$0xff]  ;;  %v4572_v47 = vld [vmem:[#allocation2 + $0x18] sm:$0xff] }
  0x5a   :  { %514 = vmatprep.subr.mxu0 %v307_v7  ;;  %603 = vmatprep.subr.mxu1 %v309_v8  ;;  %v147_v48 = vld [vmem:[#allocation5 + $0x228] sm:$0xff]  ;;  %v165_v49 = vld [vmem:[#allocation5 + $0x2b8] sm:$0xff]  ;;  %v146_v50 = vld [vmem:[#allocation5 + $0x220] sm:$0xff] }
  0x5b   :  { %515 = vmatpush1.msra.mxu0 %v306_v9  ;;  %404 = vmatprep.mubr.f32.mxu0 %v4501_v0  ;;  %v164_v51 = vld [vmem:[#allocation5 + $0x2b0] sm:$0xff]  ;;  %v131_v52 = vld [vmem:[#allocation5 + $0x1a8] sm:$0xff]  ;;  %v149_v53 = vld [vmem:[#allocation5 + $0x238] sm:$0xff] }
  0x5c   :  { %516 = vmatprep.subr.mxu0 %v291_v10  ;;  %604 = vmatpush1.msra.mxu1 %v308_v11  ;;  %v130_v54 = vld [vmem:[#allocation5 + $0x1a0] sm:$0xff]  ;;  %v148_v55 = vld [vmem:[#allocation5 + $0x230] sm:$0xff]  ;;  %v115_v56 = vld [vmem:[#allocation5 + $0x128] sm:$0xff] }
  0x5d   :  { %517 = vmatpush1.msra.mxu0 %v290_v12  ;;  %605 = vmatprep.subr.mxu1 %v293_v13  ;;  %v133_v57 = vld [vmem:[#allocation5 + $0x1b8] sm:$0xff]  ;;  %v114_v58 = vld [vmem:[#allocation5 + $0x120] sm:$0xff]  ;;  %v132_v59 = vld [vmem:[#allocation5 + $0x1b0] sm:$0xff] }
  0x5e   :  { %405 = vmatmul.mubr.f32.gmra.mxu0 %v4561_v14  ;;  %518 = vmatprep.subr.mxu0 %v275_v15  ;;  %v99_v60 = vld [vmem:[#allocation5 + $0xa8] sm:$0xff]  ;;  %v117_v61 = vld [vmem:[#allocation5 + $0x138] sm:$0xff]  ;;  %v98_v62 = vld [vmem:[#allocation5 + $0xa0] sm:$0xff] }
  0x5f   :  { %519 = vmatpush1.msra.mxu0 %v274_v16  ;;  %606 = vmatpush1.msra.mxu1 %v292_v17  ;;  %v116_v63 = vld [vmem:[#allocation5 + $0x130] sm:$0xff]  ;;  %v83_v1 = vld [vmem:[#allocation5 + $0x28] sm:$0xff]  ;;  %v101_v3 = vld [vmem:[#allocation5 + $0xb8] sm:$0xff] }
  0x60   :  { %520 = vmatprep.subr.mxu0 %v259_v18  ;;  %607 = vmatprep.subr.mxu1 %v277_v19  ;;  %v82_v4 = vld [vmem:[#allocation5 + $0x20] sm:$0xff]  ;;  %v100_v5 = vld [vmem:[#allocation5 + $0xb0] sm:$0xff]  ;;  %v85_v6 = vld [vmem:[#allocation5 + $0x38] sm:$0xff] }
  0x61   :  { %493 = vmatprep.mubr.f32.mxu1 %v4501_v0  ;;  %521 = vmatpush1.msra.mxu0 %v258_v20  ;;  %v327_v7 = vld [vmem:[#allocation5 + $0x7c8] sm:$0xff]  ;;  %v84_v8 = vld [vmem:[#allocation5 + $0x30] sm:$0xff]  ;;  %v326_v9 = vld [vmem:[#allocation5 + $0x7c0] sm:$0xff] }
  0x62   :  { %608 = vmatpush1.msra.mxu1 %v276_v21  ;;  %522 = vmatprep.subr.mxu0 %v243_v22  ;;  %v311_v10 = vld [vmem:[#allocation5 + $0x748] sm:$0xff]  ;;  %v329_v11 = vld [vmem:[#allocation5 + $0x7d8] sm:$0xff]  ;;  %v310_v12 = vld [vmem:[#allocation5 + $0x740] sm:$0xff] }
  0x63   :  { %494 = vmatmul.mubr.f32.gmra.mxu1 %v4561_v14  ;;  %609 = vmatprep.subr.mxu1 %v261_v23  ;;  %v328_v13 = vld [vmem:[#allocation5 + $0x7d0] sm:$0xff]  ;;  %v295_v15 = vld [vmem:[#allocation5 + $0x6c8] sm:$0xff]  ;;  %v313_v16 = vld [vmem:[#allocation5 + $0x758] sm:$0xff] }
  0x64   :  { %523 = vmatpush1.msra.mxu0 %v242_v24  ;;  %610 = vmatpush1.msra.mxu1 %v260_v25  ;;  %v294_v17 = vld [vmem:[#allocation5 + $0x6c0] sm:$0xff]  ;;  %v312_v18 = vld [vmem:[#allocation5 + $0x750] sm:$0xff]  ;;  %v279_v19 = vld [vmem:[#allocation5 + $0x648] sm:$0xff] }
  0x65   :  { %524 = vmatprep.subr.mxu0 %v227_v26  ;;  %611 = vmatprep.subr.mxu1 %v245_v27  ;;  %v297_v20 = vld [vmem:[#allocation5 + $0x6d8] sm:$0xff]  ;;  %v278_v21 = vld [vmem:[#allocation5 + $0x640] sm:$0xff]  ;;  %v296_v22 = vld [vmem:[#allocation5 + $0x6d0] sm:$0xff] }
  0x66   :  { %410 = vmatprep.mubr.f32.mxu0 %v4501_v0  ;;  %525 = vmatpush1.msra.mxu0 %v226_v28  ;;  %v263_v23 = vld [vmem:[#allocation5 + $0x5c8] sm:$0xff]  ;;  %v281_v24 = vld [vmem:[#allocation5 + $0x658] sm:$0xff]  ;;  %v262_v25 = vld [vmem:[#allocation5 + $0x5c0] sm:$0xff] }
  0x67   :  { %612 = vmatpush1.msra.mxu1 %v244_v29  ;;  %411 = vmatmul.mubr.f32.gmra.mxu0 %v4566_v30  ;;  %v280_v26 = vld [vmem:[#allocation5 + $0x650] sm:$0xff]  ;;  %v247_v27 = vld [vmem:[#allocation5 + $0x548] sm:$0xff]  ;;  %v265_v28 = vld [vmem:[#allocation5 + $0x5d8] sm:$0xff] }
  0x68   :  { %526 = vmatprep.subr.mxu0 %v211_v31  ;;  %613 = vmatprep.subr.mxu1 %v229_v32  ;;  %v246_v29 = vld [vmem:[#allocation5 + $0x540] sm:$0xff]  ;;  %v264_v31 = vld [vmem:[#allocation5 + $0x5d0] sm:$0xff]  ;;  %v231_v32 = vld [vmem:[#allocation5 + $0x4c8] sm:$0xff] }
  0x69   :  { %527 = vmatpush1.msra.mxu0 %v210_v33  ;;  %614 = vmatpush1.msra.mxu1 %v228_v34  ;;  %v249_v33 = vld [vmem:[#allocation5 + $0x558] sm:$0xff]  ;;  %v230_v34 = vld [vmem:[#allocation5 + $0x4c0] sm:$0xff] }
  0x6a   :  { %528 = vmatprep.subr.mxu0 %v195_v35  ;;  %615 = vmatprep.subr.mxu1 %v213_v36  ;;  %v248_v35 = vld [vmem:[#allocation5 + $0x550] sm:$0xff]  ;;  %v215_v36 = vld [vmem:[#allocation5 + $0x448] sm:$0xff] }
  0x6b   :  { %499 = vmatprep.mubr.f32.mxu1 %v4501_v0  ;;  %529 = vmatpush1.msra.mxu0 %v194_v37  ;;  %v233_v37 = vld [vmem:[#allocation5 + $0x4d8] sm:$0xff] }
  0x6c   :  { %616 = vmatpush1.msra.mxu1 %v212_v38  ;;  %530 = vmatprep.subr.mxu0 %v179_v39  ;;  %v214_v38 = vld [vmem:[#allocation5 + $0x440] sm:$0xff]  ;;  %v232_v39 = vld [vmem:[#allocation5 + $0x4d0] sm:$0xff] }
  0x6d   :  { %500 = vmatmul.mubr.f32.gmra.mxu1 %v4566_v30  ;;  %617 = vmatprep.subr.mxu1 %v197_v40  ;;  %v199_v40 = vld [vmem:[#allocation5 + $0x3c8] sm:$0xff] }
  0x6e   :  { %531 = vmatpush1.msra.mxu0 %v178_v41  ;;  %618 = vmatpush1.msra.mxu1 %v196_v42  ;;  %v217_v41 = vld [vmem:[#allocation5 + $0x458] sm:$0xff]  ;;  %v198_v42 = vld [vmem:[#allocation5 + $0x3c0] sm:$0xff] }
  0x6f   :  { %532 = vmatprep.subr.mxu0 %v163_v43  ;;  %619 = vmatprep.subr.mxu1 %v181_v44  ;;  %v216_v43 = vld [vmem:[#allocation5 + $0x450] sm:$0xff]  ;;  %v183_v44 = vld [vmem:[#allocation5 + $0x348] sm:$0xff] }
  0x70   :  { %416 = vmatprep.mubr.f32.mxu0 %v4501_v0  ;;  %533 = vmatpush1.msra.mxu0 %v162_v45  ;;  %v201_v45 = vld [vmem:[#allocation5 + $0x3d8] sm:$0xff] }
  0x71   :  { %620 = vmatpush1.msra.mxu1 %v180_v46  ;;  %417 = vmatmul.mubr.f32.gmra.mxu0 %v4572_v47  ;;  %v182_v46 = vld [vmem:[#allocation5 + $0x340] sm:$0xff] }
  0x72   :  { %534 = vmatprep.subr.mxu0 %v147_v48  ;;  %621 = vmatprep.subr.mxu1 %v165_v49  ;;  %v200_v48 = vld [vmem:[#allocation5 + $0x3d0] sm:$0xff]  ;;  %v167_v49 = vld [vmem:[#allocation5 + $0x2c8] sm:$0xff] }
  0x73   :  { %535 = vmatpush1.msra.mxu0 %v146_v50  ;;  %622 = vmatpush1.msra.mxu1 %v164_v51  ;;  %v185_v50 = vld [vmem:[#allocation5 + $0x358] sm:$0xff]  ;;  %v166_v51 = vld [vmem:[#allocation5 + $0x2c0] sm:$0xff] }
  0x74   :  { %536 = vmatprep.subr.mxu0 %v131_v52  ;;  %623 = vmatprep.subr.mxu1 %v149_v53  ;;  %v184_v52 = vld [vmem:[#allocation5 + $0x350] sm:$0xff]  ;;  %v151_v53 = vld [vmem:[#allocation5 + $0x248] sm:$0xff] }
  0x75   :  { %505 = vmatprep.mubr.f32.mxu1 %v4501_v0  ;;  %537 = vmatpush1.msra.mxu0 %v130_v54  ;;  %v169_v54 = vld [vmem:[#allocation5 + $0x2d8] sm:$0xff] }
  0x76   :  { %624 = vmatpush1.msra.mxu1 %v148_v55  ;;  %538 = vmatprep.subr.mxu0 %v115_v56  ;;  %v150_v55 = vld [vmem:[#allocation5 + $0x240] sm:$0xff]  ;;  %v168_v56 = vld [vmem:[#allocation5 + $0x2d0] sm:$0xff] }
  0x77   :  { %506 = vmatmul.mubr.f32.gmra.mxu1 %v4572_v47  ;;  %625 = vmatprep.subr.mxu1 %v133_v57  ;;  %v135_v57 = vld [vmem:[#allocation5 + $0x1c8] sm:$0xff] }
  0x78   :  { %539 = vmatpush1.msra.mxu0 %v114_v58  ;;  %626 = vmatpush1.msra.mxu1 %v132_v59  ;;  %v153_v58 = vld [vmem:[#allocation5 + $0x258] sm:$0xff]  ;;  %v134_v59 = vld [vmem:[#allocation5 + $0x1c0] sm:$0xff] }
  0x79   :  { %540 = vmatprep.subr.mxu0 %v99_v60  ;;  %627 = vmatprep.subr.mxu1 %v117_v61  ;;  %v152_v60 = vld [vmem:[#allocation5 + $0x250] sm:$0xff]  ;;  %v119_v61 = vld [vmem:[#allocation5 + $0x148] sm:$0xff] }
  0x7a   :  { %541 = vmatpush1.msra.mxu0 %v98_v62  ;;  %628 = vmatpush1.msra.mxu1 %v116_v63  ;;  %v137_v62 = vld [vmem:[#allocation5 + $0x1d8] sm:$0xff]  ;;  %v118_v63 = vld [vmem:[#allocation5 + $0x140] sm:$0xff] }
  0x7b   :  { %542 = vmatprep.subr.mxu0 %v83_v1  ;;  %629 = vmatprep.subr.mxu1 %v101_v3  ;;  %v136_v1 = vld [vmem:[#allocation5 + $0x1d0] sm:$0xff]  ;;  %v103_v3 = vld [vmem:[#allocation5 + $0xc8] sm:$0xff] }
  0x7c   :  { %543 = vmatpush1.msra.mxu0 %v82_v4  ;;  %576 = vmatprep.mubr.f32.mxu0 %v4501_v0  ;;  %v121_v4 = vld [vmem:[#allocation5 + $0x158] sm:$0xff] }
  0x7d   :  { %630 = vmatpush1.msra.mxu1 %v100_v5  ;;  %577 = vmatmul.mubr.f32.vlgmr.msra.gmra.mxu0 %v4556_v2  ;;  %v102_v5 = vld [vmem:[#allocation5 + $0xc0] sm:$0xff] }
  0x7e   :  { %631 = vmatprep.subr.mxu1 %v85_v6  ;;  %690 = vmatprep.subr.mxu0 %v327_v7  ;;  %v120_v6 = vld [vmem:[#allocation5 + $0x150] sm:$0xff]  ;;  %v87_v7 = vld [vmem:[#allocation5 + $0x48] sm:$0xff] }
  0x7f   :  { %632 = vmatpush1.msra.mxu1 %v84_v8  ;;  %665 = vmatprep.mubr.f32.mxu1 %v4501_v0  ;;  %v105_v8 = vld [vmem:[#allocation5 + $0xd8] sm:$0xff] }
  0x80   :  { %691 = vmatpush1.msra.mxu0 %v326_v9  ;;  %666 = vmatmul.mubr.f32.vlgmr.msra.gmra.mxu1 %v4556_v2  ;;  %v86_v9 = vld [vmem:[#allocation5 + $0x40] sm:$0xff] }
  0x81   :  { %692 = vmatprep.subr.mxu0 %v311_v10  ;;  %779 = vmatprep.subr.mxu1 %v329_v11  ;;  %v104_v10 = vld [vmem:[#allocation5 + $0xd0] sm:$0xff]  ;;  %v89_v11 = vld [vmem:[#allocation5 + $0x58] sm:$0xff] }
  0x82   :  { %693 = vmatpush1.msra.mxu0 %v310_v12  ;;  %780 = vmatpush1.msra.mxu1 %v328_v13  ;;  %v331_v12 = vld [vmem:[#allocation5 + $0x7e8] sm:$0xff]  ;;  %v88_v13 = vld [vmem:[#allocation5 + $0x50] sm:$0xff] }
  0x83   :  { %694 = vmatprep.subr.mxu0 %v295_v15  ;;  %781 = vmatprep.subr.mxu1 %v313_v16  ;;  %v330_v15 = vld [vmem:[#allocation5 + $0x7e0] sm:$0xff]  ;;  %v315_v16 = vld [vmem:[#allocation5 + $0x768] sm:$0xff] }
  0x84   :  { %582 = vmatprep.mubr.f32.mxu0 %v4501_v0  ;;  %695 = vmatpush1.msra.mxu0 %v294_v17  ;;  %v333_v17 = vld [vmem:[#allocation5 + $0x7f8] sm:$0xff] }
  0x85   :  { %782 = vmatpush1.msra.mxu1 %v312_v18  ;;  %583 = vmatmul.mubr.f32.gmra.mxu0 %v4561_v14  ;;  %v314_v18 = vld [vmem:[#allocation5 + $0x760] sm:$0xff] }
  0x86   :  { %696 = vmatprep.subr.mxu0 %v279_v19  ;;  %783 = vmatprep.subr.mxu1 %v297_v20  ;;  %v299_v19 = vld [vmem:[#allocation5 + $0x6e8] sm:$0xff]  ;;  %v332_v20 = vld [vmem:[#allocation5 + $0x7f0] sm:$0xff] }
  0x87   :  { %697 = vmatpush1.msra.mxu0 %v278_v21  ;;  %784 = vmatpush1.msra.mxu1 %v296_v22  ;;  %v298_v21 = vld [vmem:[#allocation5 + $0x6e0] sm:$0xff]  ;;  %v317_v22 = vld [vmem:[#allocation5 + $0x778] sm:$0xff] }
  0x88   :  { %698 = vmatprep.subr.mxu0 %v263_v23  ;;  %785 = vmatprep.subr.mxu1 %v281_v24  ;;  %v283_v23 = vld [vmem:[#allocation5 + $0x668] sm:$0xff]  ;;  %v282_v24 = vld [vmem:[#allocation5 + $0x660] sm:$0xff] }
  0x89   :  { %671 = vmatprep.mubr.f32.mxu1 %v4501_v0  ;;  %699 = vmatpush1.msra.mxu0 %v262_v25  ;;  %v316_v25 = vld [vmem:[#allocation5 + $0x770] sm:$0xff] }
  0x8a   :  { %786 = vmatpush1.msra.mxu1 %v280_v26  ;;  %700 = vmatprep.subr.mxu0 %v247_v27  ;;  %v267_v26 = vld [vmem:[#allocation5 + $0x5e8] sm:$0xff]  ;;  %v301_v27 = vld [vmem:[#allocation5 + $0x6f8] sm:$0xff] }
  0x8b   :  { %672 = vmatmul.mubr.f32.gmra.mxu1 %v4561_v14  ;;  %787 = vmatprep.subr.mxu1 %v265_v28  ;;  %v266_v28 = vld [vmem:[#allocation5 + $0x5e0] sm:$0xff] }
  0x8c   :  { %701 = vmatpush1.msra.mxu0 %v246_v29  ;;  %788 = vmatpush1.msra.mxu1 %v264_v31  ;;  %v300_v29 = vld [vmem:[#allocation5 + $0x6f0] sm:$0xff]  ;;  %v251_v31 = vld [vmem:[#allocation5 + $0x568] sm:$0xff] }
  0x8d   :  { %702 = vmatprep.subr.mxu0 %v231_v32  ;;  %789 = vmatprep.subr.mxu1 %v249_v33  ;;  %v285_v32 = vld [vmem:[#allocation5 + $0x678] sm:$0xff]  ;;  %v250_v33 = vld [vmem:[#allocation5 + $0x560] sm:$0xff] }
  0x8e   :  { %588 = vmatprep.mubr.f32.mxu0 %v4501_v0  ;;  %703 = vmatpush1.msra.mxu0 %v230_v34  ;;  %v284_v34 = vld [vmem:[#allocation5 + $0x670] sm:$0xff] }
  0x8f   :  { %790 = vmatpush1.msra.mxu1 %v248_v35  ;;  %589 = vmatmul.mubr.f32.gmra.mxu0 %v4566_v30  ;;  %v235_v35 = vld [vmem:[#allocation5 + $0x4e8] sm:$0xff] }
  0x90   :  { %704 = vmatprep.subr.mxu0 %v215_v36  ;;  %791 = vmatprep.subr.mxu1 %v233_v37  ;;  %v269_v36 = vld [vmem:[#allocation5 + $0x5f8] sm:$0xff]  ;;  %v234_v37 = vld [vmem:[#allocation5 + $0x4e0] sm:$0xff] }
  0x91   :  { %705 = vmatpush1.msra.mxu0 %v214_v38  ;;  %792 = vmatpush1.msra.mxu1 %v232_v39  ;;  %v268_v38 = vld [vmem:[#allocation5 + $0x5f0] sm:$0xff]  ;;  %v219_v39 = vld [vmem:[#allocation5 + $0x468] sm:$0xff] }
  0x92   :  { %706 = vmatprep.subr.mxu0 %v199_v40  ;;  %793 = vmatprep.subr.mxu1 %v217_v41  ;;  %v253_v40 = vld [vmem:[#allocation5 + $0x578] sm:$0xff]  ;;  %v218_v41 = vld [vmem:[#allocation5 + $0x460] sm:$0xff] }
  0x93   :  { %677 = vmatprep.mubr.f32.mxu1 %v4501_v0  ;;  %707 = vmatpush1.msra.mxu0 %v198_v42  ;;  %v252_v42 = vld [vmem:[#allocation5 + $0x570] sm:$0xff] }
  0x94   :  { %794 = vmatpush1.msra.mxu1 %v216_v43  ;;  %708 = vmatprep.subr.mxu0 %v183_v44  ;;  %v203_v43 = vld [vmem:[#allocation5 + $0x3e8] sm:$0xff]  ;;  %v237_v44 = vld [vmem:[#allocation5 + $0x4f8] sm:$0xff] }
  0x95   :  { %678 = vmatmul.mubr.f32.gmra.mxu1 %v4566_v30  ;;  %795 = vmatprep.subr.mxu1 %v201_v45  ;;  %v202_v45 = vld [vmem:[#allocation5 + $0x3e0] sm:$0xff] }
  0x96   :  { %709 = vmatpush1.msra.mxu0 %v182_v46  ;;  %796 = vmatpush1.msra.mxu1 %v200_v48  ;;  %v236_v46 = vld [vmem:[#allocation5 + $0x4f0] sm:$0xff]  ;;  %v187_v48 = vld [vmem:[#allocation5 + $0x368] sm:$0xff] }
  0x97   :  { %710 = vmatprep.subr.mxu0 %v167_v49  ;;  %797 = vmatprep.subr.mxu1 %v185_v50  ;;  %v221_v49 = vld [vmem:[#allocation5 + $0x478] sm:$0xff]  ;;  %v186_v50 = vld [vmem:[#allocation5 + $0x360] sm:$0xff] }
  0x98   :  { %594 = vmatprep.mubr.f32.mxu0 %v4501_v0  ;;  %711 = vmatpush1.msra.mxu0 %v166_v51  ;;  %v220_v51 = vld [vmem:[#allocation5 + $0x470] sm:$0xff] }
  0x99   :  { %798 = vmatpush1.msra.mxu1 %v184_v52  ;;  %595 = vmatmul.mubr.f32.gmra.mxu0 %v4572_v47  ;;  %v171_v52 = vld [vmem:[#allocation5 + $0x2e8] sm:$0xff] }
  0x9a   :  { %712 = vmatprep.subr.mxu0 %v151_v53  ;;  %799 = vmatprep.subr.mxu1 %v169_v54  ;;  %v205_v53 = vld [vmem:[#allocation5 + $0x3f8] sm:$0xff]  ;;  %v170_v54 = vld [vmem:[#allocation5 + $0x2e0] sm:$0xff] }
  0x9b   :  { %713 = vmatpush1.msra.mxu0 %v150_v55  ;;  %800 = vmatpush1.msra.mxu1 %v168_v56  ;;  %v204_v55 = vld [vmem:[#allocation5 + $0x3f0] sm:$0xff]  ;;  %v155_v56 = vld [vmem:[#allocation5 + $0x268] sm:$0xff] }
  0x9c   :  { %714 = vmatprep.subr.mxu0 %v135_v57  ;;  %801 = vmatprep.subr.mxu1 %v153_v58  ;;  %v189_v57 = vld [vmem:[#allocation5 + $0x378] sm:$0xff]  ;;  %v154_v58 = vld [vmem:[#allocation5 + $0x260] sm:$0xff] }
  0x9d   :  { %683 = vmatprep.mubr.f32.mxu1 %v4501_v0  ;;  %715 = vmatpush1.msra.mxu0 %v134_v59  ;;  %v188_v59 = vld [vmem:[#allocation5 + $0x370] sm:$0xff] }
  0x9e   :  { %802 = vmatpush1.msra.mxu1 %v152_v60  ;;  %716 = vmatprep.subr.mxu0 %v119_v61  ;;  %v139_v60 = vld [vmem:[#allocation5 + $0x1e8] sm:$0xff]  ;;  %v173_v61 = vld [vmem:[#allocation5 + $0x2f8] sm:$0xff] }
  0x9f   :  { %684 = vmatmul.mubr.f32.gmra.mxu1 %v4572_v47  ;;  %803 = vmatprep.subr.mxu1 %v137_v62  ;;  %v138_v62 = vld [vmem:[#allocation5 + $0x1e0] sm:$0xff] }
  0xa0   :  { %717 = vmatpush1.msra.mxu0 %v118_v63  ;;  %804 = vmatpush1.msra.mxu1 %v136_v1  ;;  %v172_v63 = vld [vmem:[#allocation5 + $0x2f0] sm:$0xff]  ;;  %v123_v1 = vld [vmem:[#allocation5 + $0x168] sm:$0xff] }
  0xa1   :  { %718 = vmatprep.subr.mxu0 %v103_v3  ;;  %805 = vmatprep.subr.mxu1 %v121_v4  ;;  %v157_v3 = vld [vmem:[#allocation5 + $0x278] sm:$0xff]  ;;  %v122_v4 = vld [vmem:[#allocation5 + $0x160] sm:$0xff] }
  0xa2   :  { %719 = vmatpush1.msra.mxu0 %v102_v5  ;;  %806 = vmatpush1.msra.mxu1 %v120_v6  ;;  %v156_v5 = vld [vmem:[#allocation5 + $0x270] sm:$0xff]  ;;  %v107_v6 = vld [vmem:[#allocation5 + $0xe8] sm:$0xff] }
  0xa3   :  { %720 = vmatprep.subr.mxu0 %v87_v7  ;;  %807 = vmatprep.subr.mxu1 %v105_v8  ;;  %v141_v7 = vld [vmem:[#allocation5 + $0x1f8] sm:$0xff]  ;;  %v106_v8 = vld [vmem:[#allocation5 + $0xe0] sm:$0xff] }
  0xa4   :  { %721 = vmatpush1.msra.mxu0 %v86_v9  ;;  %754 = vmatprep.mubr.f32.mxu0 %v4501_v0  ;;  %v140_v9 = vld [vmem:[#allocation5 + $0x1f0] sm:$0xff] }
  0xa5   :  { %808 = vmatpush1.msra.mxu1 %v104_v10  ;;  %755 = vmatmul.mubr.f32.vlgmr.msra.gmra.mxu0 %v4556_v2  ;;  %v91_v10 = vld [vmem:[#allocation5 + $0x68] sm:$0xff] }
  0xa6   :  { %809 = vmatprep.subr.mxu1 %v89_v11  ;;  %868 = vmatprep.subr.mxu0 %v331_v12  ;;  %v125_v11 = vld [vmem:[#allocation5 + $0x178] sm:$0xff]  ;;  %v90_v12 = vld [vmem:[#allocation5 + $0x60] sm:$0xff] }
  0xa7   :  { %810 = vmatpush1.msra.mxu1 %v88_v13  ;;  %843 = vmatprep.mubr.f32.mxu1 %v4501_v0  ;;  %v124_v13 = vld [vmem:[#allocation5 + $0x170] sm:$0xff] }
  0xa8   :  { %869 = vmatpush1.msra.mxu0 %v330_v15  ;;  %844 = vmatmul.mubr.f32.vlgmr.msra.gmra.mxu1 %v4556_v2  ;;  %v109_v15 = vld [vmem:[#allocation5 + $0xf8] sm:$0xff] }
  0xa9   :  { %870 = vmatprep.subr.mxu0 %v315_v16  ;;  %957 = vmatprep.subr.mxu1 %v333_v17  ;;  %v108_v16 = vld [vmem:[#allocation5 + $0xf0] sm:$0xff]  ;;  %v93_v17 = vld [vmem:[#allocation5 + $0x78] sm:$0xff] }
  0xaa   :  { %871 = vmatpush1.msra.mxu0 %v314_v18  ;;  %760 = vmatprep.mubr.f32.mxu0 %v4501_v0  ;;  %v92_v18 = vld [vmem:[#allocation5 + $0x70] sm:$0xff] }
  0xab   :  { %872 = vmatprep.subr.mxu0 %v299_v19  ;;  %958 = vmatpush1.msra.mxu1 %v332_v20 }
  0xac   :  { %873 = vmatpush1.msra.mxu0 %v298_v21  ;;  %959 = vmatprep.subr.mxu1 %v317_v22  ;;  %v4631_v21 = vld [vmem:[#allocation8] sm:$0xff] }
  0xad   :  { %761 = vmatmul.mubr.f32.gmra.mxu0 %v4561_v14  ;;  %874 = vmatprep.subr.mxu0 %v283_v23 }
  0xae   :  { %875 = vmatpush1.msra.mxu0 %v282_v24  ;;  %960 = vmatpush1.msra.mxu1 %v316_v25 }
  0xaf   :  { %876 = vmatprep.subr.mxu0 %v267_v26  ;;  %961 = vmatprep.subr.mxu1 %v301_v27 }
  0xb0   :  { %849 = vmatprep.mubr.f32.mxu1 %v4501_v0  ;;  %877 = vmatpush1.msra.mxu0 %v266_v28 }
  0xb1   :  { %962 = vmatpush1.msra.mxu1 %v300_v29  ;;  %878 = vmatprep.subr.mxu0 %v251_v31 }
  0xb2   :  { %850 = vmatmul.mubr.f32.gmra.mxu1 %v4561_v14  ;;  %963 = vmatprep.subr.mxu1 %v285_v32 }
  0xb3   :  { %879 = vmatpush1.msra.mxu0 %v250_v33  ;;  %964 = vmatpush1.msra.mxu1 %v284_v34 }
  0xb4   :  { %880 = vmatprep.subr.mxu0 %v235_v35  ;;  %965 = vmatprep.subr.mxu1 %v269_v36 }
  0xb5   :  { %766 = vmatprep.mubr.f32.mxu0 %v4501_v0  ;;  %881 = vmatpush1.msra.mxu0 %v234_v37 }
  0xb6   :  { %966 = vmatpush1.msra.mxu1 %v268_v38  ;;  %767 = vmatmul.mubr.f32.gmra.mxu0 %v4566_v30 }
  0xb7   :  { %882 = vmatprep.subr.mxu0 %v219_v39  ;;  %967 = vmatprep.subr.mxu1 %v253_v40 }
  0xb8   :  { %883 = vmatpush1.msra.mxu0 %v218_v41  ;;  %968 = vmatpush1.msra.mxu1 %v252_v42 }
  0xb9   :  { %884 = vmatprep.subr.mxu0 %v203_v43  ;;  %969 = vmatprep.subr.mxu1 %v237_v44 }
  0xba   :  { %855 = vmatprep.mubr.f32.mxu1 %v4501_v0  ;;  %885 = vmatpush1.msra.mxu0 %v202_v45 }
  0xbb   :  { %970 = vmatpush1.msra.mxu1 %v236_v46  ;;  %886 = vmatprep.subr.mxu0 %v187_v48 }
  0xbc   :  { %856 = vmatmul.mubr.f32.gmra.mxu1 %v4566_v30  ;;  %971 = vmatprep.subr.mxu1 %v221_v49 }
  0xbd   :  { %887 = vmatpush1.msra.mxu0 %v186_v50  ;;  %972 = vmatpush1.msra.mxu1 %v220_v51 }
  0xbe   :  { %888 = vmatprep.subr.mxu0 %v171_v52  ;;  %973 = vmatprep.subr.mxu1 %v205_v53 }
  0xbf   :  { %772 = vmatprep.mubr.f32.mxu0 %v4501_v0  ;;  %889 = vmatpush1.msra.mxu0 %v170_v54 }
  0xc0   :  { %974 = vmatpush1.msra.mxu1 %v204_v55  ;;  %773 = vmatmul.mubr.f32.gmra.mxu0 %v4572_v47 }
  0xc1   :  { %890 = vmatprep.subr.mxu0 %v155_v56  ;;  %975 = vmatprep.subr.mxu1 %v189_v57 }
  0xc2   :  { %891 = vmatpush1.msra.mxu0 %v154_v58  ;;  %976 = vmatpush1.msra.mxu1 %v188_v59 }
  0xc3   :  { %892 = vmatprep.subr.mxu0 %v139_v60  ;;  %977 = vmatprep.subr.mxu1 %v173_v61 }
  0xc4   :  { %861 = vmatprep.mubr.f32.mxu1 %v4501_v0  ;;  %893 = vmatpush1.msra.mxu0 %v138_v62 }
  0xc5   :  { %978 = vmatpush1.msra.mxu1 %v172_v63  ;;  %894 = vmatprep.subr.mxu0 %v123_v1 }
  0xc6   :  { %862 = vmatmul.mubr.f32.gmra.mxu1 %v4572_v47  ;;  %979 = vmatprep.subr.mxu1 %v157_v3 }
  0xc7   :  { %895 = vmatpush1.msra.mxu0 %v122_v4  ;;  %980 = vmatpush1.msra.mxu1 %v156_v5 }
  0xc8   :  { %896 = vmatprep.subr.mxu0 %v107_v6  ;;  %981 = vmatprep.subr.mxu1 %v141_v7 }
  0xc9   :  { %897 = vmatpush1.msra.mxu0 %v106_v8  ;;  %982 = vmatpush1.msra.mxu1 %v140_v9 }
  0xca   :  { %898 = vmatprep.subr.mxu0 %v91_v10  ;;  %983 = vmatprep.subr.mxu1 %v125_v11 }
  0xcb   :  { %899 = vmatpush1.msra.mxu0 %v90_v12  ;;  %932 = vmatprep.mubr.f32.mxu0 %v4501_v0 }
  0xcc   :  { %984 = vmatpush1.msra.mxu1 %v124_v13  ;;  %933 = vmatmul.mubr.f32.vlgmr.msra.gmra.mxu0 %v4556_v2 }
  0xcd   :  { %985 = vmatprep.subr.mxu1 %v109_v15  ;;  %1021 = vmatprep.mubr.f32.mxu1 %v4501_v0 }
  0xce   :  { %986 = vmatpush1.msra.mxu1 %v108_v16  ;;  %938 = vmatprep.mubr.f32.mxu0 %v4501_v0 }
  0xcf   :  { %987 = vmatprep.subr.mxu1 %v93_v17 }
  0xd0   :  { %988 = vmatpush1.msra.mxu1 %v92_v18  ;;  %939 = vmatmul.mubr.f32.gmra.mxu0 %v4561_v14 }
  0xd1   :  { %1022 = vmatmul.mubr.f32.vlgmr.msra.gmra.mxu1 %v4556_v2  ;;  %944 = vmatprep.mubr.f32.mxu0 %v4501_v0  ;;  %v6430_v2 = vlaneseq }
  0xd2   :  { %1027 = vmatprep.mubr.f32.mxu1 %v4501_v0 }
  0xd3   :  { %v4627_v19 = vshrl.u32 %v6430_v2, 7 }
  0xd4   :  { %945 = vmatmul.mubr.f32.gmra.mxu0 %v4566_v30 }
  0xd5   :  { %1028 = vmatmul.mubr.f32.gmra.mxu1 %v4561_v14  ;;  %950 = vmatprep.mubr.f32.mxu0 %v4501_v0  ;;  %6568 = vst [vmem:[#allocation18_spill] sm:$0xff] %v4627_v19  ;;  %v1052_v20 = vsub.s32 0, %v4627_v19  ;;  %v1060_v14 = vsub.s32 2, %v4627_v19  ;;  %v1064_v22 = vsub.s32 3, %v4627_v19  ;;  %v1068_v55 = vsub.s32 4, %v4627_v19 }
  0xd6   :  { %1033 = vmatprep.mubr.f32.mxu1 %v4501_v0  ;;  %v1072_v58 = vsub.s32 5, %v4627_v19  ;;  %v1076_v60 = vsub.s32 6, %v4627_v19  ;;  %v1080_v1 = vsub.s32 7, %v4627_v19 }
  0xd7   :  { %v1065_v23 = vrot.slane %v4631_v21, %v1064_v22  ;;  %v1069_v62 = vrot.slane %v4631_v21, %v1068_v55 }
  0xd8   :  { %951 = vmatmul.mubr.f32.gmra.mxu0 %v4572_v47  ;;  %v1073_v63 = vrot.slane %v4631_v21, %v1072_v58  ;;  %v1077_v4 = vrot.slane %v4631_v21, %v1076_v60  ;;  %v1081_v9 = vrot.slane %v4631_v21, %v1080_v1 }
  0xd9   :  { %1034 = vmatmul.mubr.f32.gmra.mxu1 %v4566_v30  ;;  %v1053_v30 = vrot.slane %v4631_v21, %v1052_v20 }
  0xda   :  { %1039 = vmatprep.mubr.f32.mxu1 %v4501_v0  ;;  %v1061_v0 = vrot.slane %v4631_v21, %v1060_v14 }
  0xdd   :  { %1040 = vmatmul.mubr.f32.gmra.mxu1 %v4572_v47  ;;  %v1056_v47 = vsub.s32 1, %v4627_v19 }
  0xdf   :  { %v1057_v28 = vrot.slane %v4631_v21, %v1056_v47 }
 0x117   :  { %v400_v24 = vpop.f32.mrf.mxu0  ;;  %v489_v25 = vpop.f32.mrf.mxu1 }
 0x118   :  { %v4644_v26 = vsub.f32 %v1053_v30, %v400_v24  ;;  %v4646_v27 = vsub.f32 %v1061_v0, %v489_v25 }
 0x119   :  { %v402_v29 = vpop.f32.mrf.mxu0  ;;  %v491_v31 = vpop.f32.mrf.mxu1 }
 0x11a   :  { %1415 = vmin.xlane.f32.xlu1 %v4646_v27  ;;  %1207 = vmin.xlane.f32.xlu0 %v4644_v26  ;;  %v4653_v32 = vsub.f32 %v1065_v23, %v491_v31  ;;  %v4655_v33 = vsub.f32 %v1057_v28, %v402_v29 }
 0x11e   :  { %v406_v34 = vpop.f32.mrf.mxu0  ;;  %1519 = vmin.xlane.f32.xlu1 %v4653_v32  ;;  %1311 = vmin.xlane.f32.xlu0 %v4655_v33 }
 0x11f   :  { %v4659_v35 = vsub.f32 %v1053_v30, %v406_v34 }
 0x120   :  { %v408_v36 = vpop.f32.mrf.mxu0 }
 0x121   :  { %v4661_v37 = vsub.f32 %v1057_v28, %v408_v36 }
 0x122   :  { %1209 = vmin.xlane.f32.xlu1 %v4659_v35 }
 0x123   :  { %v495_v38 = vpop.f32.mrf.mxu1  ;;  %1313 = vmin.xlane.f32.xlu0 %v4661_v37 }
 0x124   :  { %v4665_v39 = vsub.f32 %v1061_v0, %v495_v38 }
 0x125   :  { %v497_v40 = vpop.f32.mrf.mxu1 }
 0x126   :  { %v4667_v41 = vsub.f32 %v1065_v23, %v497_v40  ;;  %1417 = vmin.xlane.f32.xlu1 %v4665_v39 }
 0x127   :  { %v412_v42 = vpop.f32.mrf.mxu0 }
 0x128   :  { %v4670_v43 = vsub.f32 %v1053_v30, %v412_v42  ;;  %1521 = vmin.xlane.f32.xlu0 %v4667_v41 }
 0x129   :  { %v414_v44 = vpop.f32.mrf.mxu0 }
 0x12a   :  { %v4673_v45 = vsub.f32 %v1057_v28, %v414_v44  ;;  %1211 = vmin.xlane.f32.xlu1 %v4670_v43 }
 0x12c   :  { %1315 = vmin.xlane.f32.xlu0 %v4673_v45 }
 0x12d   :  { %v501_v46 = vpop.f32.mrf.mxu1 }
 0x12e   :  { %v4677_v48 = vsub.f32 %v1061_v0, %v501_v46 }
 0x12f   :  { %v503_v49 = vpop.f32.mrf.mxu1 }
 0x130   :  { %v4679_v50 = vsub.f32 %v1065_v23, %v503_v49  ;;  %1419 = vmin.xlane.f32.xlu1 %v4677_v48  ;;  %v4753_v49 = vld [vmem:[#allocation8 + $0x8] sm:$0xff] }
 0x131   :  { %v418_v51 = vpop.f32.mrf.mxu0 }
 0x132   :  { %v4682_v52 = vsub.f32 %v1053_v30, %v418_v51  ;;  %1523 = vmin.xlane.f32.xlu0 %v4679_v50 }
 0x133   :  { %v420_v53 = vpop.f32.mrf.mxu0 }
 0x134   :  { %v4685_v54 = vsub.f32 %v1057_v28, %v420_v53  ;;  %1213 = vmin.xlane.f32.xlu1 %v4682_v52 }
 0x136   :  { %1317 = vmin.xlane.f32.xlu0 %v4685_v54 }
 0x137   :  { %v507_v56 = vpop.f32.mrf.mxu1 }
 0x138   :  { %v4690_v57 = vsub.f32 %v1061_v0, %v507_v56 }
 0x139   :  { %v509_v59 = vpop.f32.mrf.mxu1 }
 0x13a   :  { %v4694_v61 = vsub.f32 %v1065_v23, %v509_v59  ;;  %1421 = vmin.xlane.f32.xlu1 %v4690_v57  ;;  %v1085_v59 = vrot.slane %v4753_v49, %v1052_v20  ;;  %v1097_v20 = vrot.slane %v4753_v49, %v1064_v22 }
 0x13c   :  { %1525 = vmin.xlane.f32.xlu0 %v4694_v61 }
 0x13d   :  { %v578_v3 = vpop.f32.mrf.mxu0 }
 0x13e   :  { %v4708_v5 = vsub.f32 %v1069_v62, %v578_v3  ;;  %v1093_v3 = vrot.slane %v4753_v49, %v1060_v14 }
 0x13f   :  { %v580_v6 = vpop.f32.mrf.mxu0 }
 0x140   :  { %v4710_v7 = vsub.f32 %v1073_v63, %v580_v6  ;;  %v667_v8 = vpop.f32.mrf.mxu1  ;;  %1623 = vmin.xlane.f32.xlu1 %v4708_v5 }
 0x141   :  { %v4716_v10 = vsub.f32 %v1077_v4, %v667_v8 }
 0x142   :  { %v669_v11 = vpop.f32.mrf.mxu1  ;;  %1727 = vmin.xlane.f32.xlu0 %v4710_v7 }
 0x143   :  { %v4719_v12 = vsub.f32 %v1081_v9, %v669_v11 }
 0x144   :  { %1831 = vmin.xlane.f32.xlu1 %v4716_v10 }
 0x145   :  { %v584_v13 = vpop.f32.mrf.mxu0 }
 0x146   :  { %v4722_v15 = vsub.f32 %v1069_v62, %v584_v13  ;;  %1935 = vmin.xlane.f32.xlu0 %v4719_v12 }
 0x147   :  { %v586_v16 = vpop.f32.mrf.mxu0 }
 0x148   :  { %v4725_v17 = vsub.f32 %v1073_v63, %v586_v16  ;;  %1625 = vmin.xlane.f32.xlu1 %v4722_v15 }
 0x14a   :  { %1729 = vmin.xlane.f32.xlu0 %v4725_v17 }
 0x14b   :  { %v673_v18 = vpop.f32.mrf.mxu1 }
 0x14c   :  { %v4729_v21 = vsub.f32 %v1077_v4, %v673_v18 }
 0x14d   :  { %v675_v30 = vpop.f32.mrf.mxu1 }
 0x14e   :  { %v4731_v0 = vsub.f32 %v1081_v9, %v675_v30  ;;  %1833 = vmin.xlane.f32.xlu1 %v4729_v21 }
 0x14f   :  { %v590_v23 = vpop.f32.mrf.mxu0 }
 0x150   :  { %v4734_v24 = vsub.f32 %v1069_v62, %v590_v23  ;;  %1937 = vmin.xlane.f32.xlu0 %v4731_v0 }
 0x151   :  { %v592_v25 = vpop.f32.mrf.mxu0 }
 0x152   :  { %v4737_v28 = vsub.f32 %v1073_v63, %v592_v25  ;;  %1627 = vmin.xlane.f32.xlu1 %v4734_v24 }
 0x154   :  { %1731 = vmin.xlane.f32.xlu0 %v4737_v28 }
 0x155   :  { %v679_v29 = vpop.f32.mrf.mxu1 }
 0x156   :  { %v4741_v31 = vsub.f32 %v1077_v4, %v679_v29 }
 0x157   :  { %v681_v34 = vpop.f32.mrf.mxu1 }
 0x158   :  { %v4743_v36 = vsub.f32 %v1081_v9, %v681_v34  ;;  %1835 = vmin.xlane.f32.xlu1 %v4741_v31 }
 0x159   :  { %v596_v38 = vpop.f32.mrf.mxu0 }
 0x15a   :  { %v4746_v40 = vsub.f32 %v1069_v62, %v596_v38  ;;  %1939 = vmin.xlane.f32.xlu0 %v4743_v36  ;;  %v1089_v62 = vrot.slane %v4753_v49, %v1056_v47 }
 0x15b   :  { %v598_v42 = vpop.f32.mrf.mxu0 }
 0x15c   :  { %v4749_v44 = vsub.f32 %v1073_v63, %v598_v42  ;;  %1629 = vmin.xlane.f32.xlu1 %v4746_v40 }
 0x15e   :  { %1733 = vmin.xlane.f32.xlu0 %v4749_v44 }
 0x15f   :  { %v685_v46 = vpop.f32.mrf.mxu1 }
 0x160   :  { %v4755_v51 = vsub.f32 %v1077_v4, %v685_v46 }
 0x161   :  { %v687_v53 = vpop.f32.mrf.mxu1 }
 0x162   :  { %v4757_v56 = vsub.f32 %v1081_v9, %v687_v53  ;;  %1837 = vmin.xlane.f32.xlu1 %v4755_v51 }
 0x164   :  { %1941 = vmin.xlane.f32.xlu0 %v4757_v56 }
 0x165   :  { %v756_v63 = vpop.f32.mrf.mxu0 }
 0x166   :  { %v4770_v4 = vsub.f32 %v1085_v59, %v756_v63 }
 0x167   :  { %v758_v6 = vpop.f32.mrf.mxu0 }
 0x168   :  { %v4772_v8 = vsub.f32 %v1089_v62, %v758_v6  ;;  %v845_v9 = vpop.f32.mrf.mxu1  ;;  %2039 = vmin.xlane.f32.xlu1 %v4770_v4 }
 0x169   :  { %v4778_v11 = vsub.f32 %v1093_v3, %v845_v9 }
 0x16a   :  { %v847_v47 = vpop.f32.mrf.mxu1  ;;  %2143 = vmin.xlane.f32.xlu0 %v4772_v8 }
 0x16b   :  { %v4781_v13 = vsub.f32 %v1097_v20, %v847_v47 }
 0x16c   :  { %2247 = vmin.xlane.f32.xlu1 %v4778_v11 }
 0x16d   :  { %v762_v14 = vpop.f32.mrf.mxu0 }
 0x16e   :  { %v4784_v16 = vsub.f32 %v1085_v59, %v762_v14  ;;  %2351 = vmin.xlane.f32.xlu0 %v4781_v13 }
 0x16f   :  { %v764_v18 = vpop.f32.mrf.mxu0 }
 0x170   :  { %v4787_v30 = vsub.f32 %v1089_v62, %v764_v18  ;;  %2041 = vmin.xlane.f32.xlu1 %v4784_v16 }
 0x172   :  { %v851_v22 = vpop.f32.mrf.mxu1  ;;  %2145 = vmin.xlane.f32.xlu0 %v4787_v30 }
 0x173   :  { %v4791_v23 = vsub.f32 %v1093_v3, %v851_v22 }
 0x174   :  { %v853_v25 = vpop.f32.mrf.mxu1 }
 0x175   :  { %v4793_v29 = vsub.f32 %v1097_v20, %v853_v25  ;;  %2249 = vmin.xlane.f32.xlu1 %v4791_v23 }
 0x176   :  { %v768_v34 = vpop.f32.mrf.mxu0 }
 0x177   :  { %v4796_v38 = vsub.f32 %v1085_v59, %v768_v34  ;;  %2353 = vmin.xlane.f32.xlu0 %v4793_v29 }
 0x178   :  { %v770_v42 = vpop.f32.mrf.mxu0 }
 0x179   :  { %v4799_v46 = vsub.f32 %v1089_v62, %v770_v42  ;;  %2043 = vmin.xlane.f32.xlu1 %v4796_v38 }
 0x17b   :  { %2147 = vmin.xlane.f32.xlu0 %v4799_v46 }
 0x17c   :  { %v857_v53 = vpop.f32.mrf.mxu1 }
 0x17d   :  { %v4803_v63 = vsub.f32 %v1093_v3, %v857_v53 }
 0x17e   :  { %v859_v6 = vpop.f32.mrf.mxu1 }
 0x17f   :  { %v4805_v9 = vsub.f32 %v1097_v20, %v859_v6  ;;  %2251 = vmin.xlane.f32.xlu1 %v4803_v63 }
 0x180   :  { %v774_v47 = vpop.f32.mrf.mxu0 }
 0x181   :  { %v4808_v14 = vsub.f32 %v1085_v59, %v774_v47  ;;  %2355 = vmin.xlane.f32.xlu0 %v4805_v9  ;;  %v4823_v59 = vrot.slane %v4753_v49, %v1068_v55  ;;  %v4838_v47 = vrot.slane %v4753_v49, %v1072_v58 }
 0x182   :  { %v776_v18 = vpop.f32.mrf.mxu0 }
 0x183   :  { %v4811_v22 = vsub.f32 %v1089_v62, %v776_v18  ;;  %2045 = vmin.xlane.f32.xlu1 %v4808_v14 }
 0x185   :  { %2149 = vmin.xlane.f32.xlu0 %v4811_v22 }
 0x186   :  { %v863_v25 = vpop.f32.mrf.mxu1 }
 0x187   :  { %v4815_v34 = vsub.f32 %v1093_v3, %v863_v25  ;;  %v4832_v3 = vrot.slane %v4753_v49, %v1076_v60  ;;  %v4850_v60 = vrot.slane %v4753_v49, %v1080_v1  ;;  %v6575_v1 = vlaneseq }
 0x188   :  { %v865_v42 = vpop.f32.mrf.mxu1 }
 0x189   :  { %v4817_v53 = vsub.f32 %v1097_v20, %v865_v42  ;;  %2253 = vmin.xlane.f32.xlu1 %v4815_v34  ;;  %v4865_v49 = vand.u32 127, %v6575_v1 }
 0x18b   :  { %2357 = vmin.xlane.f32.xlu0 %v4817_v53 }
 0x18c   :  { %v934_v62 = vpop.f32.mrf.mxu0 }
 0x18d   :  { %v4827_v6 = vsub.f32 %v4823_v59, %v934_v62 }
 0x18e   :  { %v936_v18 = vpop.f32.mrf.mxu0 }
 0x18f   :  { %6569 = vst [vmem:[#allocation19_spill] sm:$0xff] %v4827_v6  ;;  %2455 = vmin.xlane.f32.xlu0 %v4827_v6  ;;  %v4845_v25 = vsub.f32 %v4838_v47, %v936_v18 }
 0x190   :  { %v940_v62 = vpop.f32.mrf.mxu0 }
 0x191   :  { %v1023_v20 = vpop.f32.mrf.mxu1  ;;  %6571 = vst [vmem:[#allocation21_spill] sm:$0xff] %v4845_v25 }
 0x192   :  { %v4841_v55 = vsub.f32 %v4832_v3, %v1023_v20  ;;  %v4857_v20 = vsub.f32 %v4823_v59, %v940_v62  ;;  %v942_v19 = vpop.f32.mrf.mxu0 }
 0x193   :  { %v1025_v42 = vpop.f32.mrf.mxu1  ;;  %v4877_v62 = vsub.f32 %v4838_v47, %v942_v19 }
 0x194   :  { %6570 = vst [vmem:[#allocation20_spill] sm:$0xff] %v4841_v55  ;;  %2663 = vmin.xlane.f32.xlu0 %v4841_v55  ;;  %v4854_v58 = vsub.f32 %v4850_v60, %v1025_v42  ;;  %6573 = vst [vmem:[#allocation23_spill] sm:$0xff] %v4857_v20  ;;  %v946_v19 = vpop.f32.mrf.mxu0 }
 0x195   :  { %v1029_v2 = vpop.f32.mrf.mxu1  ;;  %6578 = vst [vmem:[#allocation27_spill] sm:$0xff] %v4877_v62 }
 0x196   :  { %6572 = vst [vmem:[#allocation22_spill] sm:$0xff] %v4854_v58  ;;  %v4861_v18 = vsub.f32 %v4832_v3, %v1029_v2 }
 0x197   :  { %v1031_v1 = vpop.f32.mrf.mxu1 }
 0x198   :  { %2559 = vmin.xlane.f32.xlu0 %v4845_v25  ;;  %6574 = vst [vmem:[#allocation24_spill] sm:$0xff] %v4861_v18 }
 0x19c   :  { %2767 = vmin.xlane.f32.xlu0 %v4854_v58 }
 0x1a0   :  { %2457 = vmin.xlane.f32.xlu0 %v4857_v20 }
 0x1a3   :  { %v1416_v25 = vpop.xlane.xlu1 %1415  ;;  %v1208_v55 = vpop.xlane.xlu0 %1207 }
 0x1a4   :  { %2665 = vmin.xlane.f32.xlu0 %v4861_v18  ;;  %vm1423_vm0 = vcmp.eq.f32.partialorder %v4646_v27, %v1416_v25  ;;  %vm1215_vm1 = vcmp.eq.f32.partialorder %v4644_v26, %v1208_v55  ;;  %v4889_v55 = vsub.f32 %v4850_v60, %v1031_v1  ;;  %v4893_v18 = vsub.f32 %v4823_v59, %v946_v19 }
 0x1a5   :  { %v4871_v42 = vsel %vm1423_vm0, %v4865_v49, 128  ;;  %v4874_v2 = vsel %vm1215_vm1, %v4865_v49, 128 }
 0x1a6   :  { %6576 = vst [vmem:[#allocation25_spill] sm:$0xff] %v4871_v42  ;;  %6577 = vst [vmem:[#allocation26_spill] sm:$0xff] %v4874_v2  ;;  %v1224_v20 = vshra.s32 %v4874_v2, 16  ;;  %v1432_v26 = vshra.s32 %v4871_v42, 16 }
 0x1a7   :  { %v4880_v58 = vpop.xlane.xlu1 %1519  ;;  %v4882_v6 = vpop.xlane.xlu0 %1311  ;;  %6580 = vst [vmem:[#allocation29_spill] sm:$0xff] %v4893_v18 }
 0x1a8   :  { %2561 = vmin.xlane.f32.xlu0 %v4877_v62  ;;  %v4885_v27 = vcvt.s32.f32 %v1224_v20  ;;  %v4897_v62 = vcvt.s32.f32 %v1432_v26  ;;  %vm1319_vm10 = vcmp.eq.f32.partialorder %v4655_v33, %v4882_v6  ;;  %vm1527_vm12 = vcmp.eq.f32.partialorder %v4653_v32, %v4880_v58 }
 0x1a9   :  { %v5002_v32 = vsel %vm1527_vm12, %v4865_v49, 128 }
 0x1aa   :  { %6579 = vst [vmem:[#allocation28_spill] sm:$0xff] %v4885_v27  ;;  %1227 = vmin.xlane.f32.xlu1 %v4885_v27  ;;  %6581 = vst [vmem:[#allocation30_spill] sm:$0xff] %v4897_v62  ;;  %v1035_v27 = vpop.f32.mrf.mxu1 }
 0x1ab   :  { %v1210_v25 = vpop.xlane.xlu1 %1209  ;;  %v4906_v19 = vsub.f32 %v4832_v3, %v1035_v27 }
 0x1ac   :  { %2769 = vmin.xlane.f32.xlu0 %v4889_v55  ;;  %vm1216_vm2 = vcmp.eq.f32.partialorder %v4659_v35, %v1210_v25  ;;  %v1314_v2 = vpop.xlane.xlu0 %1313  ;;  %v948_v25 = vpop.f32.mrf.mxu0 }
 0x1ad   :  { %v4900_v20 = vsel %vm1216_vm2, %v4865_v49, 128  ;;  %vm1320_vm3 = vcmp.eq.f32.partialorder %v4661_v37, %v1314_v2  ;;  %6583 = vst [vmem:[#allocation32_spill] sm:$0xff] %v4906_v19 }
 0x1ae   :  { %6582 = vst [vmem:[#allocation31_spill] sm:$0xff] %v4900_v20  ;;  %1435 = vmin.xlane.f32.xlu1 %v4897_v62  ;;  %v1238_v1 = vshra.s32 %v4900_v20, 16  ;;  %v4913_v26 = vsel %vm1320_vm3, %v4865_v49, 128  ;;  %v4929_v62 = vsub.f32 %v4838_v47, %v948_v25 }
 0x1af   :  { %v1418_v42 = vpop.xlane.xlu1 %1417  ;;  %6584 = vst [vmem:[#allocation33_spill] sm:$0xff] %v4913_v26 }
 0x1b0   :  { %2459 = vmin.xlane.f32.xlu0 %v4893_v18  ;;  %vm1424_vm4 = vcmp.eq.f32.partialorder %v4665_v39, %v1418_v42  ;;  %v4910_v35 = vcvt.s32.f32 %v1238_v1  ;;  %v1342_v42 = vshra.s32 %v4913_v26, 16 }
 0x1b1   :  { %v4916_v37 = vsel %vm1424_vm4, %v4865_v49, 128  ;;  %v1522_v2 = vpop.xlane.xlu0 %1521 }
 0x1b2   :  { %6585 = vst [vmem:[#allocation34_spill] sm:$0xff] %v4916_v37  ;;  %vm1528_vm5 = vcmp.eq.f32.partialorder %v4667_v41, %v1522_v2  ;;  %1241 = vmin.xlane.f32.xlu1 %v4910_v35  ;;  %v1446_v27 = vshra.s32 %v4916_v37, 16  ;;  %v1037_v41 = vpop.f32.mrf.mxu1  ;;  %v4934_v2 = vcvt.s32.f32 %v1342_v42 }
 0x1b3   :  { %v1212_v20 = vpop.xlane.xlu1 %1211  ;;  %v4926_v1 = vsel %vm1528_vm5, %v4865_v49, 128  ;;  %v4941_v37 = vsub.f32 %v4850_v60, %v1037_v41 }
 0x1b4   :  { %2667 = vmin.xlane.f32.xlu0 %v4906_v19  ;;  %v4922_v39 = vcvt.s32.f32 %v1446_v27  ;;  %6587 = vst [vmem:[#allocation36_spill] sm:$0xff] %v4926_v1  ;;  %vm1217_vm6 = vcmp.eq.f32.partialorder %v4670_v43, %v1212_v20  ;;  %v1550_v27 = vshra.s32 %v4926_v1, 16  ;;  %v952_v43 = vpop.f32.mrf.mxu0 }
 0x1b5   :  { %v1316_v18 = vpop.xlane.xlu0 %1315  ;;  %v4938_v19 = vsel %vm1217_vm6, %v4865_v49, 128  ;;  %v4946_v25 = vsub.f32 %v4823_v59, %v952_v43 }
 0x1b6   :  { %6586 = vst [vmem:[#allocation35_spill] sm:$0xff] %v4922_v39  ;;  %1449 = vmin.xlane.f32.xlu1 %v4922_v39  ;;  %6588 = vst [vmem:[#allocation37_spill] sm:$0xff] %v4938_v19  ;;  %v4949_v42 = vcvt.s32.f32 %v1550_v27  ;;  %v1252_v1 = vshra.s32 %v4938_v19, 16  ;;  %vm1321_vm8 = vcmp.eq.f32.partialorder %v4673_v45, %v1316_v18  ;;  %v954_v45 = vpop.f32.mrf.mxu0 }
 0x1b7   :  { %v4965_v43 = vsel %vm1321_vm8, %v4865_v49, 128 }
 0x1b8   :  { %2563 = vmin.xlane.f32.xlu0 %v4929_v62  ;;  %v4961_v59 = vcvt.s32.f32 %v1252_v1  ;;  %6590 = vst [vmem:[#allocation39_spill] sm:$0xff] %v4965_v43  ;;  %v1356_v1 = vshra.s32 %v4965_v43, 16 }
 0x1b9   :  { %v1420_v26 = vpop.xlane.xlu1 %1419 }
 0x1ba   :  { %vm1425_vm7 = vcmp.eq.f32.partialorder %v4677_v48, %v1420_v26  ;;  %1345 = vmin.xlane.f32.xlu1 %v4934_v2  ;;  %v1041_v48 = vpop.f32.mrf.mxu1 }
 0x1bb   :  { %v1524_v20 = vpop.xlane.xlu0 %1523  ;;  %v4953_v39 = vsel %vm1425_vm7, %v4865_v49, 128  ;;  %v4958_v26 = vsub.f32 %v4832_v3, %v1041_v48 }
 0x1bc   :  { %2771 = vmin.xlane.f32.xlu0 %v4941_v37  ;;  %6589 = vst [vmem:[#allocation38_spill] sm:$0xff] %v4953_v39  ;;  %v1460_v27 = vshra.s32 %v4953_v39, 16  ;;  %vm1529_vm9 = vcmp.eq.f32.partialorder %v4679_v50, %v1524_v20  ;;  %v4979_v39 = vsub.f32 %v4838_v47, %v954_v45  ;;  %v4984_v50 = vsel %vm1319_vm10, %v4865_v49, 128  ;;  %v1043_v33 = vpop.f32.mrf.mxu1 }
 0x1bd   :  { %v1214_v41 = vpop.xlane.xlu1 %1213  ;;  %v4976_v48 = vsel %vm1529_vm9, %v4865_v49, 128  ;;  %v4989_v20 = vcvt.s32.f32 %v1356_v1  ;;  %v1328_v45 = vshra.s32 %v4984_v50, 16 }
 0x1be   :  { %1553 = vmin.xlane.f32.xlu1 %v4949_v42  ;;  %v4972_v3 = vcvt.s32.f32 %v1460_v27  ;;  %6592 = vst [vmem:[#allocation41_spill] sm:$0xff] %v4976_v48  ;;  %vm1218_vm11 = vcmp.eq.f32.partialorder %v4682_v52, %v1214_v41  ;;  %v1564_v27 = vshra.s32 %v4976_v48, 16  ;;  %v4996_v41 = vsub.f32 %v4850_v60, %v1043_v33 }
 0x1bf   :  { %v1318_v19 = vpop.xlane.xlu0 %1317  ;;  %6593 = vst [vmem:[#allocation42_spill] sm:$0xff] %v4989_v20  ;;  %v4993_v47 = vsel %vm1218_vm11, %v4865_v49, 128  ;;  %v5012_v33 = vcvt.s32.f32 %v1328_v45 }
 0x1c0   :  { %2461 = vmin.xlane.f32.xlu0 %v4946_v25  ;;  %6591 = vst [vmem:[#allocation40_spill] sm:$0xff] %v4972_v3  ;;  %6594 = vst [vmem:[#allocation43_spill] sm:$0xff] %v4993_v47  ;;  %v5005_v1 = vcvt.s32.f32 %v1564_v27  ;;  %v1266_v48 = vshra.s32 %v4993_v47, 16  ;;  %vm1322_vm14 = vcmp.eq.f32.partialorder %v4685_v54, %v1318_v19 }
 0x1c1   :  { %v5021_v47 = vsel %vm1322_vm14, %v4865_v49, 128 }
 0x1c2   :  { %1255 = vmin.xlane.f32.xlu1 %v4961_v59  ;;  %6595 = vst [vmem:[#allocation44_spill] sm:$0xff] %v5005_v1  ;;  %6597 = vst [vmem:[#allocation46_spill] sm:$0xff] %v5021_v47 }
 0x1c3   :  { %v1422_v18 = vpop.xlane.xlu1 %1421 }
 0x1c4   :  { %2669 = vmin.xlane.f32.xlu0 %v4958_v26  ;;  %vm1426_vm13 = vcmp.eq.f32.partialorder %v4690_v57, %v1422_v18  ;;  %v1536_v57 = vshra.s32 %v5002_v32, 16 }
 0x1c5   :  { %v1526_v6 = vpop.xlane.xlu0 %1525  ;;  %v5009_v43 = vsel %vm1426_vm13, %v4865_v49, 128 }
 0x1c6   :  { %1463 = vmin.xlane.f32.xlu1 %v4972_v3  ;;  %6596 = vst [vmem:[#allocation45_spill] sm:$0xff] %v5009_v43  ;;  %v1474_v27 = vshra.s32 %v5009_v43, 16  ;;  %vm1530_vm15 = vcmp.eq.f32.partialorder %v4694_v61, %v1526_v6  ;;  %v5024_v54 = vcvt.s32.f32 %v1536_v57 }
 0x1c7   :  { %v5033_v43 = vsel %vm1530_vm15, %v4865_v49, 128 }
 0x1c8   :  { %2565 = vmin.xlane.f32.xlu0 %v4979_v39  ;;  %v5029_v45 = vcvt.s32.f32 %v1474_v27  ;;  %6599 = vst [vmem:[#allocation48_spill] sm:$0xff] %v5033_v43  ;;  %v1578_v27 = vshra.s32 %v5033_v43, 16 }
 0x1c9   :  { %v1624_v52 = vpop.xlane.xlu1 %1623 }
 0x1ca   :  { %1359 = vmin.xlane.f32.xlu1 %v4989_v20  ;;  %v5017_v20 = vcvt.s32.f32 %v1266_v48  ;;  %6598 = vst [vmem:[#allocation47_spill] sm:$0xff] %v5029_v45  ;;  %v1370_v48 = vshra.s32 %v5021_v47, 16  ;;  %vm1631_vm1 = vcmp.eq.f32.partialorder %v4708_v5, %v1624_v52 }
 0x1cb   :  { %v1728_v58 = vpop.xlane.xlu0 %1727 }
 0x1cc   :  { %2773 = vmin.xlane.f32.xlu0 %v4996_v41  ;;  %vm1735_vm4 = vcmp.eq.f32.partialorder %v4710_v7, %v1728_v58 }
 0x1cd   :  { %v1832_v60 = vpop.xlane.xlu1 %1831 }
 0x1ce   :  { %1567 = vmin.xlane.f32.xlu1 %v5005_v1  ;;  %vm1839_vm2 = vcmp.eq.f32.partialorder %v4716_v10, %v1832_v60 }
 0x1cf   :  { %v1936_v18 = vpop.xlane.xlu0 %1935 }
 0x1d0   :  { %1331 = vmin.xlane.f32.xlu0 %v5012_v33  ;;  %vm1943_vm6 = vcmp.eq.f32.partialorder %v4719_v12, %v1936_v18 }
 0x1d1   :  { %v1626_v3 = vpop.xlane.xlu1 %1625 }
 0x1d2   :  { %1269 = vmin.xlane.f32.xlu1 %v5017_v20  ;;  %vm1632_vm8 = vcmp.eq.f32.partialorder %v4722_v15, %v1626_v3 }
 0x1d3   :  { %v1730_v19 = vpop.xlane.xlu0 %1729 }
 0x1d4   :  { %1539 = vmin.xlane.f32.xlu0 %v5024_v54  ;;  %vm1736_vm0 = vcmp.eq.f32.partialorder %v4725_v17, %v1730_v19  ;;  %v5043_v17 = vcvt.s32.f32 %v1370_v48  ;;  %v5047_v19 = vsel %vm1631_vm1, %v4865_v49, 128 }
 0x1d5   :  { %v5036_v1 = vsel %vm1736_vm0, %v4865_v49, 128  ;;  %6601 = vst [vmem:[#allocation50_spill] sm:$0xff] %v5047_v19  ;;  %v1640_v43 = vshra.s32 %v5047_v19, 16 }
 0x1d6   :  { %v1758_v61 = vshra.s32 %v5036_v1, 16  ;;  %1477 = vmin.xlane.f32.xlu1 %v5029_v45  ;;  %6600 = vst [vmem:[#allocation49_spill] sm:$0xff] %v5043_v17  ;;  %v5061_v45 = vsel %vm1839_vm2, %v4865_v49, 128 }
 0x1d7   :  { %v1834_v6 = vpop.xlane.xlu1 %1833  ;;  %6602 = vst [vmem:[#allocation51_spill] sm:$0xff] %v5061_v45  ;;  %v1848_v19 = vshra.s32 %v5061_v45, 16 }
 0x1d8   :  { %v5041_v57 = vcvt.s32.f32 %v1758_v61  ;;  %v5057_v61 = vcvt.s32.f32 %v1578_v27  ;;  %v5073_v27 = vcvt.s32.f32 %v1640_v43  ;;  %vm1840_vm10 = vcmp.eq.f32.partialorder %v4729_v21, %v1834_v6 }
 0x1d9   :  { %v1938_v47 = vpop.xlane.xlu0 %1937 }
 0x1da   :  { %vm1944_vm3 = vcmp.eq.f32.partialorder %v4731_v0, %v1938_v47  ;;  %1761 = vmin.xlane.f32.xlu0 %v5041_v57  ;;  %1373 = vmin.xlane.f32.xlu1 %v5043_v17  ;;  %6603 = vst [vmem:[#allocation52_spill] sm:$0xff] %v5073_v27  ;;  %v5077_v17 = vsel %vm1735_vm4, %v4865_v49, 128 }
 0x1db   :  { %v5054_v5 = vsel %vm1944_vm3, %v4865_v49, 128  ;;  %v1628_v52 = vpop.xlane.xlu1 %1627  ;;  %6604 = vst [vmem:[#allocation53_spill] sm:$0xff] %v5077_v17  ;;  %v1744_v43 = vshra.s32 %v5077_v17, 16  ;;  %v5104_v17 = vsel %vm1632_vm8, %v4865_v49, 128 }
 0x1dc   :  { %v1966_v48 = vshra.s32 %v5054_v5, 16  ;;  %6607 = vst [vmem:[#allocation56_spill] sm:$0xff] %v5104_v17  ;;  %vm1633_vm11 = vcmp.eq.f32.partialorder %v4734_v24, %v1628_v52 }
 0x1dd   :  { %v1732_v10 = vpop.xlane.xlu0 %1731 }
 0x1de   :  { %vm1737_vm5 = vcmp.eq.f32.partialorder %v4737_v28, %v1732_v10  ;;  %v5065_v0 = vcvt.s32.f32 %v1966_v48  ;;  %1581 = vmin.xlane.f32.xlu1 %v5057_v61  ;;  %v5085_v48 = vcvt.s32.f32 %v1848_v19  ;;  %v5089_v10 = vsel %vm1943_vm6, %v4865_v49, 128 }
 0x1df   :  { %v5069_v47 = vsel %vm1737_vm5, %v4865_v49, 128  ;;  %6605 = vst [vmem:[#allocation54_spill] sm:$0xff] %v5089_v10 }
 0x1e0   :  { %1969 = vmin.xlane.f32.xlu0 %v5065_v0  ;;  %v1772_v60 = vshra.s32 %v5069_v47, 16 }
 0x1e1   :  { %v1836_v7 = vpop.xlane.xlu1 %1835 }
 0x1e2   :  { %v5080_v28 = vcvt.s32.f32 %v1772_v60  ;;  %1643 = vmin.xlane.f32.xlu1 %v5073_v27  ;;  %v5100_v60 = vcvt.s32.f32 %v1744_v43  ;;  %vm1841_vm13 = vcmp.eq.f32.partialorder %v4741_v31, %v1836_v7 }
 0x1e3   :  { %v1940_v58 = vpop.xlane.xlu0 %1939 }
 0x1e4   :  { %vm1945_vm7 = vcmp.eq.f32.partialorder %v4743_v36, %v1940_v58  ;;  %1775 = vmin.xlane.f32.xlu0 %v5080_v28  ;;  %6606 = vst [vmem:[#allocation55_spill] sm:$0xff] %v5100_v60  ;;  %v1952_v58 = vshra.s32 %v5089_v10, 16 }
 0x1e5   :  { %v5092_v45 = vsel %vm1945_vm7, %v4865_v49, 128  ;;  %v1630_v12 = vpop.xlane.xlu1 %1629 }
 0x1e6   :  { %v1980_v18 = vshra.s32 %v5092_v45, 16  ;;  %1851 = vmin.xlane.f32.xlu1 %v5085_v48  ;;  %v5115_v43 = vcvt.s32.f32 %v1952_v58  ;;  %vm1634_vm15 = vcmp.eq.f32.partialorder %v4746_v40, %v1630_v12 }
 0x1e7   :  { %v1734_v36 = vpop.xlane.xlu0 %1733 }
 0x1e8   :  { %vm1738_vm9 = vcmp.eq.f32.partialorder %v4749_v44, %v1734_v36  ;;  %v5098_v19 = vcvt.s32.f32 %v1980_v18  ;;  %v1654_v18 = vshra.s32 %v5104_v17, 16  ;;  %v5119_v36 = vsel %vm1840_vm10, %v4865_v49, 128 }
 0x1e9   :  { %v5107_v27 = vsel %vm1738_vm9, %v4865_v49, 128  ;;  %6608 = vst [vmem:[#allocation57_spill] sm:$0xff] %v5119_v36  ;;  %v5133_v17 = vsel %vm1633_vm11, %v4865_v49, 128 }
 0x1ea   :  { %1983 = vmin.xlane.f32.xlu0 %v5098_v19  ;;  %v1786_v15 = vshra.s32 %v5107_v27, 16  ;;  %1747 = vmin.xlane.f32.xlu1 %v5100_v60  ;;  %v5129_v58 = vcvt.s32.f32 %v1654_v18  ;;  %6610 = vst [vmem:[#allocation59_spill] sm:$0xff] %v5133_v17  ;;  %v5145_v18 = vsel %vm1841_vm13, %v4865_v49, 128 }
 0x1eb   :  { %v1838_v44 = vpop.xlane.xlu1 %1837  ;;  %6612 = vst [vmem:[#allocation61_spill] sm:$0xff] %v5145_v18 }
 0x1ec   :  { %v5113_v3 = vcvt.s32.f32 %v1786_v15  ;;  %6609 = vst [vmem:[#allocation58_spill] sm:$0xff] %v5129_v58  ;;  %v1862_v15 = vshra.s32 %v5119_v36, 16  ;;  %vm1842_vm1 = vcmp.eq.f32.partialorder %v4755_v51, %v1838_v44 }
 0x1ed   :  { %v1942_v10 = vpop.xlane.xlu0 %1941 }
 0x1ee   :  { %vm1946_vm12 = vcmp.eq.f32.partialorder %v4757_v56, %v1942_v10  ;;  %1789 = vmin.xlane.f32.xlu0 %v5113_v3  ;;  %1955 = vmin.xlane.f32.xlu1 %v5115_v43  ;;  %v5141_v52 = vcvt.s32.f32 %v1862_v15  ;;  %v1668_v10 = vshra.s32 %v5133_v17, 16  ;;  %v5160_v17 = vsel %vm1634_vm15, %v4865_v49, 128 }
 0x1ef   :  { %v5126_v21 = vsel %vm1946_vm12, %v4865_v49, 128  ;;  %6614 = vst [vmem:[#allocation63_spill] sm:$0xff] %v5160_v17 }
 0x1f0   :  { %v1994_v6 = vshra.s32 %v5126_v21, 16  ;;  %6611 = vst [vmem:[#allocation60_spill] sm:$0xff] %v5141_v52  ;;  %v5156_v15 = vcvt.s32.f32 %v1668_v10 }
 0x1f1   :  { %v2040_v60 = vpop.xlane.xlu1 %2039 }
 0x1f2   :  { %v5136_v24 = vcvt.s32.f32 %v1994_v6  ;;  %1657 = vmin.xlane.f32.xlu1 %v5129_v58  ;;  %6613 = vst [vmem:[#allocation62_spill] sm:$0xff] %v5156_v15  ;;  %vm2047_vm3 = vcmp.eq.f32.partialorder %v4770_v4, %v2040_v60 }
 0x1f3   :  { %v2144_v56 = vpop.xlane.xlu0 %2143 }
 0x1f4   :  { %vm2151_vm14 = vcmp.eq.f32.partialorder %v4772_v8, %v2144_v56  ;;  %1997 = vmin.xlane.f32.xlu0 %v5136_v24  ;;  %v1876_v56 = vshra.s32 %v5145_v18, 16  ;;  %v5176_v18 = vsel %vm1842_vm1, %v4865_v49, 128 }
 0x1f5   :  { %v5148_v36 = vsel %vm2151_vm14, %v4865_v49, 128  ;;  %v2248_v31 = vpop.xlane.xlu1 %2247  ;;  %6616 = vst [vmem:[#allocation65_spill] sm:$0xff] %v5176_v18 }
 0x1f6   :  { %v2160_v7 = vshra.s32 %v5148_v36, 16  ;;  %1865 = vmin.xlane.f32.xlu1 %v5141_v52  ;;  %vm2255_vm5 = vcmp.eq.f32.partialorder %v4778_v11, %v2248_v31 }
 0x1f7   :  { %v2352_v8 = vpop.xlane.xlu0 %2351  ;;  %v5205_v52 = vsel %vm2255_vm5, %v4865_v49, 128 }
 0x1f8   :  { %vm2359_vm0 = vcmp.eq.f32.partialorder %v4781_v13, %v2352_v8  ;;  %v5154_v6 = vcvt.s32.f32 %v2160_v7  ;;  %v5172_v7 = vcvt.s32.f32 %v1876_v56  ;;  %v1682_v8 = vshra.s32 %v5160_v17, 16  ;;  %6620 = vst [vmem:[#allocation69_spill] sm:$0xff] %v5205_v52 }
 0x1f9   :  { %v5163_v58 = vsel %vm2359_vm0, %v4865_v49, 128  ;;  %v2042_v40 = vpop.xlane.xlu1 %2041  ;;  %v5191_v17 = vsel %vm2047_vm3, %v4865_v49, 128 }
 0x1fa   :  { %v2368_v12 = vshra.s32 %v5163_v58, 16  ;;  %2163 = vmin.xlane.f32.xlu0 %v5154_v6  ;;  %1671 = vmin.xlane.f32.xlu1 %v5156_v15  ;;  %6615 = vst [vmem:[#allocation64_spill] sm:$0xff] %v5172_v7  ;;  %6618 = vst [vmem:[#allocation67_spill] sm:$0xff] %v5191_v17  ;;  %vm2048_vm7 = vcmp.eq.f32.partialorder %v4784_v16, %v2042_v40 }
 0x1fb   :  { %v2146_v13 = vpop.xlane.xlu0 %2145 }
 0x1fc   :  { %vm2152_vm2 = vcmp.eq.f32.partialorder %v4787_v30, %v2146_v13  ;;  %v5170_v10 = vcvt.s32.f32 %v2368_v12  ;;  %v5187_v12 = vcvt.s32.f32 %v1682_v8  ;;  %v1890_v13 = vshra.s32 %v5176_v18, 16 }
 0x1fd   :  { %v5179_v51 = vsel %vm2152_vm2, %v4865_v49, 128  ;;  %v2056_v18 = vshra.s32 %v5191_v17, 16 }
 0x1fe   :  { %v2174_v44 = vshra.s32 %v5179_v51, 16  ;;  %v2250_v15 = vpop.xlane.xlu1 %2249  ;;  %2371 = vmin.xlane.f32.xlu0 %v5170_v10  ;;  %1879 = vmin.xlane.f32.xlu1 %v5172_v7  ;;  %6617 = vst [vmem:[#allocation66_spill] sm:$0xff] %v5187_v12  ;;  %v5201_v7 = vcvt.s32.f32 %v1890_v13 }
 0x1ff   :  { %v5218_v17 = vcvt.s32.f32 %v2056_v18  ;;  %vm2256_vm8 = vcmp.eq.f32.partialorder %v4791_v23, %v2250_v15 }
 0x200   :  { %v2354_v30 = vpop.xlane.xlu0 %2353  ;;  %v5185_v56 = vcvt.s32.f32 %v2174_v44  ;;  %6619 = vst [vmem:[#allocation68_spill] sm:$0xff] %v5201_v7 }
 0x201   :  { %vm2360_vm4 = vcmp.eq.f32.partialorder %v4793_v29, %v2354_v30  ;;  %v2264_v30 = vshra.s32 %v5205_v52, 16  ;;  %6623 = vst [vmem:[#allocation72_spill] sm:$0xff] %v5218_v17 }
 0x202   :  { %v5196_v4 = vsel %vm2360_vm4, %v4865_v49, 128  ;;  %v2044_v60 = vpop.xlane.xlu1 %2043  ;;  %2177 = vmin.xlane.f32.xlu0 %v5185_v56  ;;  %1685 = vmin.xlane.f32.xlu1 %v5187_v12  ;;  %v2918_v12 = vld [vmem:[#allocation7 + $0x178] sm:$0xff] }
 0x203   :  { %v2382_v8 = vshra.s32 %v5196_v4, 16  ;;  %v5233_v52 = vcvt.s32.f32 %v2264_v30  ;;  %vm2049_vm11 = vcmp.eq.f32.partialorder %v4796_v38, %v2044_v60 }
 0x204   :  { %v2148_v44 = vpop.xlane.xlu0 %2147 }
 0x205   :  { %vm2153_vm6 = vcmp.eq.f32.partialorder %v4799_v46, %v2148_v44  ;;  %v5208_v11 = vcvt.s32.f32 %v2382_v8  ;;  %v5221_v46 = vsel %vm2048_vm7, %v4865_v49, 128  ;;  %6627 = vst [vmem:[#allocation76_spill] sm:$0xff] %v5233_v52 }
 0x206   :  { %v5212_v29 = vsel %vm2153_vm6, %v4865_v49, 128  ;;  %1893 = vmin.xlane.f32.xlu1 %v5201_v7  ;;  %6624 = vst [vmem:[#allocation73_spill] sm:$0xff] %v5221_v46  ;;  %v2070_v40 = vshra.s32 %v5221_v46, 16  ;;  %v5252_v7 = vsel %vm2049_vm11, %v4865_v49, 128 }
 0x207   :  { %6621 = vst [vmem:[#allocation70_spill] sm:$0xff] %v5208_v11  ;;  %6622 = vst [vmem:[#allocation71_spill] sm:$0xff] %v5212_v29  ;;  %v2188_v31 = vshra.s32 %v5212_v29, 16  ;;  %2385 = vmin.xlane.f32.xlu0 %v5208_v11  ;;  %v2084_v60 = vshra.s32 %v5252_v7, 16  ;;  %v2930_v11 = vld [vmem:[#allocation7 + $0x1d8] sm:$0xff] }
 0x208   :  { %v2252_v13 = vpop.xlane.xlu1 %2251  ;;  %6632 = vst [vmem:[#allocation81_spill] sm:$0xff] %v5252_v7  ;;  %v6641_v7 = vld [vmem:[#allocation19_spill] sm:$0xff] }
 0x209   :  { %v5223_v8 = vcvt.s32.f32 %v2188_v31  ;;  %v5236_v31 = vsel %vm2256_vm8, %v4865_v49, 128  ;;  %vm2257_vm13 = vcmp.eq.f32.partialorder %v4803_v63, %v2252_v13 }
 0x20a   :  { %v2356_v16 = vpop.xlane.xlu0 %2355  ;;  %2059 = vmin.xlane.f32.xlu1 %v5218_v17  ;;  %6628 = vst [vmem:[#allocation77_spill] sm:$0xff] %v5236_v31  ;;  %v2278_v30 = vshra.s32 %v5236_v31, 16  ;;  %v5249_v17 = vcvt.s32.f32 %v2070_v40  ;;  %v5271_v63 = vsel %vm2257_vm13, %v4865_v49, 128 }
 0x20b   :  { %6625 = vst [vmem:[#allocation74_spill] sm:$0xff] %v5223_v8  ;;  %vm2361_vm9 = vcmp.eq.f32.partialorder %v4805_v9, %v2356_v16  ;;  %2191 = vmin.xlane.f32.xlu0 %v5223_v8  ;;  %6637 = vst [vmem:[#allocation86_spill] sm:$0xff] %v5271_v63  ;;  %v2916_v8 = vld [vmem:[#allocation7 + $0x168] sm:$0xff] }
 0x20c   :  { %v5231_v44 = vsel %vm2361_vm9, %v4865_v49, 128  ;;  %v2046_v18 = vpop.xlane.xlu1 %2045  ;;  %6631 = vst [vmem:[#allocation80_spill] sm:$0xff] %v5249_v17 }
 0x20d   :  { %6626 = vst [vmem:[#allocation75_spill] sm:$0xff] %v5231_v44  ;;  %v2396_v23 = vshra.s32 %v5231_v44, 16  ;;  %vm2050_vm10 = vcmp.eq.f32.partialorder %v4808_v14, %v2046_v18  ;;  %v2932_v44 = vld [vmem:[#allocation7 + $0x1e8] sm:$0xff] }
 0x20e   :  { %v5242_v9 = vsel %vm2050_vm10, %v4865_v49, 128  ;;  %v2150_v15 = vpop.xlane.xlu0 %2149  ;;  %2267 = vmin.xlane.f32.xlu1 %v5233_v52 }
 0x20f   :  { %6629 = vst [vmem:[#allocation78_spill] sm:$0xff] %v5242_v9  ;;  %v2098_v16 = vshra.s32 %v5242_v9, 16  ;;  %v5246_v46 = vcvt.s32.f32 %v2396_v23  ;;  %vm2154_vm12 = vcmp.eq.f32.partialorder %v4811_v22, %v2150_v15  ;;  %v5268_v23 = vcvt.s32.f32 %v2278_v30 }
 0x210   :  { %v5263_v40 = vsel %vm2154_vm12, %v4865_v49, 128  ;;  %v5284_v9 = vcvt.s32.f32 %v2084_v60  ;;  %v6645_v60 = vld [vmem:[#allocation20_spill] sm:$0xff] }
 0x211   :  { %6630 = vst [vmem:[#allocation79_spill] sm:$0xff] %v5246_v46  ;;  %2399 = vmin.xlane.f32.xlu0 %v5246_v46  ;;  %v5259_v14 = vcvt.s32.f32 %v2098_v16  ;;  %6634 = vst [vmem:[#allocation83_spill] sm:$0xff] %v5263_v40  ;;  %v2292_v16 = vshra.s32 %v5271_v63, 16  ;;  %v6648_v63 = vld [vmem:[#allocation21_spill] sm:$0xff]  ;;  %v2898_v46 = vld [vmem:[#allocation7 + $0xd8] sm:$0xff] }
 0x212   :  { %v2254_v38 = vpop.xlane.xlu1 %2253  ;;  %2073 = vmin.xlane.f32.xlu1 %v5249_v17  ;;  %6636 = vst [vmem:[#allocation85_spill] sm:$0xff] %v5268_v23  ;;  %6640 = vst [vmem:[#allocation89_spill] sm:$0xff] %v5284_v9 }
 0x213   :  { %vm2258_vm14 = vcmp.eq.f32.partialorder %v4815_v34, %v2254_v38  ;;  %6633 = vst [vmem:[#allocation82_spill] sm:$0xff] %v5259_v14  ;;  %v2202_v34 = vshra.s32 %v5263_v40, 16  ;;  %v2917_v40 = vld [vmem:[#allocation7 + $0x170] sm:$0xff] }
 0x214   :  { %v5266_v18 = vsel %vm2258_vm14, %v4865_v49, 128  ;;  %v2358_v22 = vpop.xlane.xlu0 %2357 }
 0x215   :  { %6635 = vst [vmem:[#allocation84_spill] sm:$0xff] %v5266_v18  ;;  %v2306_v13 = vshra.s32 %v5266_v18, 16  ;;  %vm2362_vm15 = vcmp.eq.f32.partialorder %v4817_v53, %v2358_v22  ;;  %2101 = vmin.xlane.f32.xlu0 %v5259_v14  ;;  %v5290_v22 = vcvt.s32.f32 %v2202_v34  ;;  %v5295_v18 = vcvt.s32.f32 %v2292_v16 }
 0x216   :  { %2281 = vmin.xlane.f32.xlu1 %v5268_v23  ;;  %v5282_v30 = vsel %vm2362_vm15, %v4865_v49, 128 }
 0x217   :  { %v5278_v15 = vcvt.s32.f32 %v2306_v13  ;;  %6639 = vst [vmem:[#allocation88_spill] sm:$0xff] %v5282_v30  ;;  %v2410_v53 = vshra.s32 %v5282_v30, 16  ;;  %6642 = vst [vmem:[#allocation19_spill] sm:$0xff] %v5290_v22 }
 0x218   :  { %v2456_v38 = vpop.xlane.xlu0 %2455  ;;  %6644 = vst [vmem:[#allocation91_spill] sm:$0xff] %v5295_v18 }
 0x219   :  { %6638 = vst [vmem:[#allocation87_spill] sm:$0xff] %v5278_v15  ;;  %vm2463_vm0 = vcmp.eq.f32.partialorder %v6641_v7, %v2456_v38  ;;  %2309 = vmin.xlane.f32.xlu0 %v5278_v15  ;;  %v5301_v38 = vcvt.s32.f32 %v2410_v53  ;;  %v6651_v53 = vld [vmem:[#allocation22_spill] sm:$0xff] }
 0x21a   :  { %2087 = vmin.xlane.f32.xlu1 %v5284_v9  ;;  %v5293_v13 = vsel %vm2463_vm0, %v4865_v49, 128 }
 0x21b   :  { %6643 = vst [vmem:[#allocation90_spill] sm:$0xff] %v5293_v13  ;;  %v2472_v7 = vshra.s32 %v5293_v13, 16  ;;  %6646 = vst [vmem:[#allocation20_spill] sm:$0xff] %v5301_v38 }
 0x21d   :  { %v2664_v14 = vpop.xlane.xlu0 %2663  ;;  %2205 = vmin.xlane.f32.xlu0 %v5290_v22  ;;  %v5309_v9 = vcvt.s32.f32 %v2472_v7  ;;  %v6654_v7 = vld [vmem:[#allocation23_spill] sm:$0xff] }
 0x21e   :  { %vm2671_vm1 = vcmp.eq.f32.partialorder %v6645_v60, %v2664_v14  ;;  %2295 = vmin.xlane.f32.xlu1 %v5295_v18  ;;  %v2934_v22 = vld [vmem:[#allocation7 + $0x1f8] sm:$0xff] }
 0x21f   :  { %v5304_v15 = vsel %vm2671_vm1, %v4865_v49, 128  ;;  %6649 = vst [vmem:[#allocation21_spill] sm:$0xff] %v5309_v9  ;;  %4039 = vmatprep.subr.mxu1 %v2934_v22  ;;  %v2899_v22 = vld [vmem:[#allocation7 + $0xe0] sm:$0xff] }
 0x220   :  { %6647 = vst [vmem:[#allocation92_spill] sm:$0xff] %v5304_v15  ;;  %v2680_v16 = vshra.s32 %v5304_v15, 16  ;;  %4040 = vmatpush3.msra.mxu1 %v2918_v12  ;;  %v6684_v12 = vld [vmem:[#allocation29_spill] sm:$0xff] }
 0x221   :  { %v2560_v34 = vpop.xlane.xlu0 %2559  ;;  %2413 = vmin.xlane.f32.xlu0 %v5301_v38 }
 0x222   :  { %vm2567_vm2 = vcmp.eq.f32.partialorder %v6648_v63, %v2560_v34  ;;  %v5317_v18 = vcvt.s32.f32 %v2680_v16  ;;  %v6657_v16 = vld [vmem:[#allocation24_spill] sm:$0xff] }
 0x223   :  { %v5312_v14 = vsel %vm2567_vm2, %v4865_v49, 128 }
 0x224   :  { %6650 = vst [vmem:[#allocation93_spill] sm:$0xff] %v5312_v14  ;;  %v2576_v13 = vshra.s32 %v5312_v14, 16  ;;  %6652 = vst [vmem:[#allocation22_spill] sm:$0xff] %v5317_v18 }
 0x225   :  { %v2768_v60 = vpop.xlane.xlu0 %2767  ;;  %2475 = vmin.xlane.f32.xlu0 %v5309_v9 }
 0x226   :  { %vm2775_vm3 = vcmp.eq.f32.partialorder %v6651_v53, %v2768_v60  ;;  %v5325_v15 = vcvt.s32.f32 %v2576_v13  ;;  %v6658_v53 = vld [vmem:[#allocation26_spill] sm:$0xff]  ;;  %v6661_v13 = vld [vmem:[#allocation27_spill] sm:$0xff] }
 0x227   :  { %v5320_v23 = vsel %vm2775_vm3, %v4865_v49, 128  ;;  %v1223_v31 = vand.u32 65535, %v6658_v53  ;;  %v6666_v53 = vld [vmem:[#allocation28_spill] sm:$0xff] }
 0x228   :  { %6653 = vst [vmem:[#allocation94_spill] sm:$0xff] %v5320_v23  ;;  %v2784_v34 = vshra.s32 %v5320_v23, 16  ;;  %6655 = vst [vmem:[#allocation23_spill] sm:$0xff] %v5325_v15 }
 0x229   :  { %v2458_v63 = vpop.xlane.xlu0 %2457  ;;  %2683 = vmin.xlane.f32.xlu0 %v5317_v18  ;;  %v6662_v18 = vld [vmem:[#allocation25_spill] sm:$0xff] }
 0x22a   :  { %vm2464_vm4 = vcmp.eq.f32.partialorder %v6654_v7, %v2458_v63  ;;  %v5334_v14 = vcvt.s32.f32 %v2784_v34  ;;  %v1431_v23 = vand.u32 65535, %v6662_v18 }
 0x22b   :  { %v5328_v9 = vsel %vm2464_vm4, %v4865_v49, 128 }
 0x22c   :  { %6656 = vst [vmem:[#allocation95_spill] sm:$0xff] %v5328_v9  ;;  %v2486_v17 = vshra.s32 %v5328_v9, 16  ;;  %6659 = vst [vmem:[#allocation24_spill] sm:$0xff] %v5334_v14 }
 0x22d   :  { %v2666_v60 = vpop.xlane.xlu0 %2665  ;;  %2579 = vmin.xlane.f32.xlu0 %v5325_v15 }
 0x22e   :  { %vm2672_vm5 = vcmp.eq.f32.partialorder %v6657_v16, %v2666_v60  ;;  %v5343_v52 = vcvt.s32.f32 %v2486_v17  ;;  %v1225_v16 = vcvt.s32.f32 %v1223_v31  ;;  %v1433_v31 = vcvt.s32.f32 %v1431_v23 }
 0x22f   :  { %v5337_v63 = vsel %vm2672_vm5, %v4865_v49, 128 }
 0x230   :  { %6660 = vst [vmem:[#allocation26_spill] sm:$0xff] %v5337_v63  ;;  %v2694_v15 = vshra.s32 %v5337_v63, 16  ;;  %6663 = vst [vmem:[#allocation27_spill] sm:$0xff] %v5343_v52  ;;  %v6670_v63 = vld [vmem:[#allocation30_spill] sm:$0xff] }
 0x231   :  { %v2562_v7 = vpop.xlane.xlu0 %2561  ;;  %2787 = vmin.xlane.f32.xlu0 %v5334_v14 }
 0x232   :  { %vm2568_vm6 = vcmp.eq.f32.partialorder %v6661_v13, %v2562_v7  ;;  %v5355_v17 = vcvt.s32.f32 %v2694_v15 }
 0x233   :  { %v5345_v60 = vpop.xlane.xlu1 %1227  ;;  %v5348_v34 = vsel %vm2568_vm6, %v4865_v49, 128 }
 0x234   :  { %6664 = vst [vmem:[#allocation25_spill] sm:$0xff] %v5345_v60  ;;  %6665 = vst [vmem:[#allocation96_spill] sm:$0xff] %v5348_v34  ;;  %vm1229_vm7 = vcmp.eq.f32.partialorder %v6666_v53, %v5345_v60  ;;  %v2590_v18 = vshra.s32 %v5348_v34, 16  ;;  %v2885_v34 = vld [vmem:[#allocation7 + $0x70] sm:$0xff] }
 0x235   :  { %v2770_v9 = vpop.xlane.xlu0 %2769  ;;  %2489 = vmin.xlane.f32.xlu0 %v5343_v52  ;;  %v1230_v14 = vsel %vm1229_vm7, %v1225_v16, inf  ;;  %6667 = vst [vmem:[#allocation28_spill] sm:$0xff] %v5355_v17 }
 0x236   :  { %vm2776_vm8 = vcmp.eq.f32.partialorder %v4889_v55, %v2770_v9  ;;  %1231 = vmin.xlane.f32.xlu1 %v1230_v14  ;;  %v5368_v9 = vcvt.s32.f32 %v2590_v18 }
 0x237   :  { %v5357_v7 = vpop.xlane.xlu1 %1435  ;;  %v5360_v13 = vsel %vm2776_vm8, %v4865_v49, 128 }
 0x238   :  { %6668 = vst [vmem:[#allocation97_spill] sm:$0xff] %v5357_v7  ;;  %6669 = vst [vmem:[#allocation98_spill] sm:$0xff] %v5360_v13  ;;  %vm1437_vm9 = vcmp.eq.f32.partialorder %v6670_v63, %v5357_v7  ;;  %v2798_v55 = vshra.s32 %v5360_v13, 16  ;;  %v2886_v13 = vld [vmem:[#allocation7 + $0x78] sm:$0xff] }
 0x239   :  { %v5364_v53 = vpop.xlane.xlu0 %2459  ;;  %2697 = vmin.xlane.f32.xlu0 %v5355_v17  ;;  %v1438_v16 = vsel %vm1437_vm9, %v1433_v31, inf  ;;  %6671 = vst [vmem:[#allocation30_spill] sm:$0xff] %v5368_v9 }
 0x23a   :  { %1439 = vmin.xlane.f32.xlu1 %v1438_v16  ;;  %v5375_v23 = vcvt.s32.f32 %v2798_v55  ;;  %vm2465_vm14 = vcmp.eq.f32.partialorder %v6684_v12, %v5364_v53  ;;  %v2895_v53 = vld [vmem:[#allocation7 + $0xc0] sm:$0xff] }
 0x23b   :  { %v5370_v15 = vpop.xlane.xlu1 %1241 }
 0x23c   :  { %6672 = vst [vmem:[#allocation99_spill] sm:$0xff] %v5370_v15  ;;  %6673 = vst [vmem:[#allocation100_spill] sm:$0xff] %v5375_v23  ;;  %vm1243_vm13 = vcmp.eq.f32.partialorder %v4910_v35, %v5370_v15  ;;  %v6686_v35 = vld [vmem:[#allocation33_spill] sm:$0xff] }
 0x23d   :  { %v5372_v14 = vpop.xlane.xlu0 %2667  ;;  %2593 = vmin.xlane.f32.xlu0 %v5368_v9  ;;  %v2902_v9 = vld [vmem:[#allocation7 + $0xf8] sm:$0xff] }
 0x23e   :  { %3995 = vmatprep.subr.mxu0 %v2902_v9 }
 0x23f   :  { %v5377_v60 = vpop.xlane.xlu1 %1449  ;;  %3996 = vmatpush3.msra.mxu0 %v2886_v13 }
 0x241   :  { %v2564_v63 = vpop.xlane.xlu0 %2563  ;;  %2801 = vmin.xlane.f32.xlu0 %v5375_v23 }
 0x242   :  { %vm2569_vm10 = vcmp.eq.f32.partialorder %v4929_v62, %v2564_v63 }
 0x243   :  { %v5382_v31 = vsel %vm2569_vm10, %v4865_v49, 128  ;;  %v5384_v18 = vpop.xlane.xlu1 %1345 }
 0x244   :  { %6674 = vst [vmem:[#allocation101_spill] sm:$0xff] %v5382_v31  ;;  %v2604_v16 = vshra.s32 %v5382_v31, 16  ;;  %vm1347_vm2 = vcmp.eq.f32.partialorder %v4934_v2, %v5384_v18 }
 0x245   :  { %v5387_v7 = vpop.xlane.xlu0 %2771 }
 0x246   :  { %v5389_v17 = vcvt.s32.f32 %v2604_v16  ;;  %v2901_v16 = vld [vmem:[#allocation7 + $0xf0] sm:$0xff]  ;;  %vm2777_vm1 = vcmp.eq.f32.partialorder %v4941_v37, %v5387_v7  ;;  %v2878_v37 = vld [vmem:[#allocation7 + $0x38] sm:$0xff]  ;;  %v2912_v7 = vld [vmem:[#allocation7 + $0x148] sm:$0xff] }
 0x247   :  { %v5391_v55 = vpop.xlane.xlu1 %1553  ;;  %3997 = vmatprep.subr.mxu0 %v2901_v16  ;;  %v2933_v16 = vld [vmem:[#allocation7 + $0x1f0] sm:$0xff] }
 0x248   :  { %6675 = vst [vmem:[#allocation102_spill] sm:$0xff] %v5389_v17  ;;  %2607 = vmin.xlane.f32.xlu0 %v5389_v17  ;;  %v2900_v17 = vld [vmem:[#allocation7 + $0xe8] sm:$0xff]  ;;  %3998 = vmatpush3.msra.mxu0 %v2885_v34  ;;  %v2883_v34 = vld [vmem:[#allocation7 + $0x60] sm:$0xff]  ;;  %vm1555_vm5 = vcmp.eq.f32.partialorder %v4949_v42, %v5391_v55 }
 0x249   :  { %v2462_v52 = vpop.xlane.xlu0 %2461  ;;  %3999 = vmatprep.subr.mxu0 %v2900_v17  ;;  %4041 = vmatprep.subr.mxu1 %v2933_v16  ;;  %v2915_v16 = vld [vmem:[#allocation7 + $0x160] sm:$0xff] }
 0x24a   :  { %vm2466_vm11 = vcmp.eq.f32.partialorder %v4946_v25, %v2462_v52  ;;  %4042 = vmatpush3.msra.mxu1 %v2917_v40 }
 0x24b   :  { %v5396_v62 = vsel %vm2466_vm11, %v4865_v49, 128  ;;  %v5398_v63 = vpop.xlane.xlu1 %1255  ;;  %4043 = vmatprep.subr.mxu1 %v2932_v44 }
 0x24c   :  { %6676 = vst [vmem:[#allocation103_spill] sm:$0xff] %v5396_v62  ;;  %v2514_v31 = vshra.s32 %v5396_v62, 16  ;;  %v6680_v62 = vld [vmem:[#allocation31_spill] sm:$0xff]  ;;  %4044 = vmatpush3.msra.mxu1 %v2916_v8  ;;  %vm1257_vm7 = vcmp.eq.f32.partialorder %v4961_v59, %v5398_v63 }
 0x24d   :  { %v2670_v23 = vpop.xlane.xlu0 %2669  ;;  %v1237_v30 = vand.u32 65535, %v6680_v62  ;;  %v1327_v62 = vand.u32 65535, %v4984_v50  ;;  %v2897_v50 = vld [vmem:[#allocation7 + $0xd0] sm:$0xff]  ;;  %v2914_v8 = vld [vmem:[#allocation7 + $0x158] sm:$0xff] }
 0x24e   :  { %vm2674_vm12 = vcmp.eq.f32.partialorder %v4958_v26, %v2670_v23  ;;  %v5402_v38 = vcvt.s32.f32 %v2514_v31  ;;  %v2884_v31 = vld [vmem:[#allocation7 + $0x68] sm:$0xff] }
 0x24f   :  { %v5405_v25 = vsel %vm2674_vm12, %v4865_v49, 128  ;;  %v5407_v52 = vpop.xlane.xlu1 %1463  ;;  %4000 = vmatpush3.msra.mxu0 %v2884_v31  ;;  %v1329_v40 = vcvt.s32.f32 %v1327_v62  ;;  %v2929_v62 = vld [vmem:[#allocation7 + $0x1d0] sm:$0xff] }
 0x250   :  { %6677 = vst [vmem:[#allocation104_spill] sm:$0xff] %v5402_v38  ;;  %6678 = vst [vmem:[#allocation105_spill] sm:$0xff] %v5405_v25  ;;  %v2722_v9 = vshra.s32 %v5405_v25, 16  ;;  %2517 = vmin.xlane.f32.xlu1 %v5402_v38  ;;  %v6683_v38 = vld [vmem:[#allocation34_spill] sm:$0xff]  ;;  %4001 = vmatprep.subr.mxu0 %v2899_v22 }
 0x251   :  { %6679 = vst [vmem:[#allocation106_spill] sm:$0xff] %v5407_v52  ;;  %v5412_v26 = vpop.xlane.xlu0 %2565  ;;  %v1445_v25 = vand.u32 65535, %v6683_v38  ;;  %4002 = vmatpush3.msra.mxu0 %v2883_v34  ;;  %v2931_v38 = vld [vmem:[#allocation7 + $0x1e0] sm:$0xff]  ;;  %v2881_v22 = vld [vmem:[#allocation7 + $0x50] sm:$0xff]  ;;  %v1535_v34 = vand.u32 65535, %v5002_v32  ;;  %v5444_v32 = vsel %vm2465_vm14, %v4865_v49, 128 }
 0x252   :  { %v5414_v13 = vcvt.s32.f32 %v2722_v9  ;;  %v1239_v9 = vcvt.s32.f32 %v1237_v30  ;;  %4003 = vmatprep.subr.mxu0 %v2898_v46  ;;  %v6685_v30 = vld [vmem:[#allocation35_spill] sm:$0xff]  ;;  %4045 = vmatprep.subr.mxu1 %v2931_v38  ;;  %vm2570_vm6 = vcmp.eq.f32.partialorder %v4979_v39, %v5412_v26  ;;  %v2909_v39 = vld [vmem:[#allocation7 + $0x130] sm:$0xff] }
 0x253   :  { %v5416_v23 = vpop.xlane.xlu1 %1359  ;;  %vm1451_vm15 = vcmp.eq.f32.partialorder %v6685_v30, %v5377_v60  ;;  %v1447_v46 = vcvt.s32.f32 %v1445_v25  ;;  %4046 = vmatpush3.msra.mxu1 %v2915_v16  ;;  %v1537_v30 = vcvt.s32.f32 %v1535_v34  ;;  %v2879_v16 = vld [vmem:[#allocation7 + $0x40] sm:$0xff]  ;;  %v5503_v59 = vsel %vm2570_vm6, %v4865_v49, 128 }
 0x254   :  { %6681 = vst [vmem:[#allocation31_spill] sm:$0xff] %v5414_v13  ;;  %6682 = vst [vmem:[#allocation107_spill] sm:$0xff] %v5416_v23  ;;  %2725 = vmin.xlane.f32.xlu1 %v5414_v13  ;;  %v2882_v13 = vld [vmem:[#allocation7 + $0x58] sm:$0xff]  ;;  %v1244_v31 = vsel %vm1243_vm13, %v1239_v9, inf  ;;  %v1341_v9 = vand.u32 65535, %v6686_v35  ;;  %4047 = vmatprep.subr.mxu1 %v2930_v11 }
 0x255   :  { %v5423_v17 = vpop.xlane.xlu0 %2773  ;;  %4004 = vmatpush3.msra.mxu0 %v2882_v13  ;;  %v1452_v25 = vsel %vm1451_vm15, %v1447_v46, inf  ;;  %4048 = vmatpush3.msra.mxu1 %v2914_v8  ;;  %v5465_v46 = vsel %vm2777_vm1, %v4865_v49, 128  ;;  %6691 = vst [vmem:[#allocation34_spill] sm:$0xff] %v5503_v59  ;;  %v6693_v26 = vld [vmem:[#allocation39_spill] sm:$0xff] }
 0x256   :  { %4005 = vmatprep.subr.mxu0 %v2897_v50  ;;  %v6687_v50 = vld [vmem:[#allocation36_spill] sm:$0xff]  ;;  %v1343_v35 = vcvt.s32.f32 %v1341_v9  ;;  %4049 = vmatprep.subr.mxu1 %v2929_v62  ;;  %v2812_v8 = vshra.s32 %v5465_v46, 16  ;;  %v2893_v62 = vld [vmem:[#allocation7 + $0xb0] sm:$0xff]  ;;  %vm2778_vm8 = vcmp.eq.f32.partialorder %v4996_v41, %v5423_v17 }
 0x257   :  { %v5428_v29 = vpop.xlane.xlu1 %1567  ;;  %4006 = vmatpush3.msra.mxu0 %v2881_v22  ;;  %v1549_v38 = vand.u32 65535, %v6687_v50  ;;  %v2500_v22 = vshra.s32 %v5444_v32, 16  ;;  %v2928_v9 = vld [vmem:[#allocation7 + $0x1c8] sm:$0xff]  ;;  %v2927_v50 = vld [vmem:[#allocation7 + $0x1c0] sm:$0xff] }
 0x258   :  { %1245 = vmin.xlane.f32.xlu1 %v1244_v31  ;;  %v2896_v31 = vld [vmem:[#allocation7 + $0xc8] sm:$0xff]  ;;  %v1348_v11 = vsel %vm1347_vm2, %v1343_v35, inf }
 0x259   :  { %v5436_v15 = vpop.xlane.xlu0 %1331  ;;  %4007 = vmatprep.subr.mxu0 %v2896_v31  ;;  %v6688_v31 = vld [vmem:[#allocation32_spill] sm:$0xff]  ;;  %v1551_v2 = vcvt.s32.f32 %v1549_v38 }
 0x25a   :  { %vm1333_vm0 = vcmp.eq.f32.partialorder %v5012_v33, %v5436_v15  ;;  %v2880_v33 = vld [vmem:[#allocation7 + $0x48] sm:$0xff]  ;;  %vm2673_vm4 = vcmp.eq.f32.partialorder %v6688_v31, %v5372_v14  ;;  %v5497_v31 = vcvt.s32.f32 %v2812_v8 }
 0x25b   :  { %v1334_v44 = vsel %vm1333_vm0, %v1329_v40, inf  ;;  %v5449_v13 = vpop.xlane.xlu1 %1269  ;;  %4008 = vmatpush3.msra.mxu0 %v2880_v33  ;;  %v2913_v40 = vld [vmem:[#allocation7 + $0x150] sm:$0xff]  ;;  %v5484_v42 = vsel %vm2673_vm4, %v4865_v49, 128  ;;  %v2892_v14 = vld [vmem:[#allocation7 + $0xa8] sm:$0xff] }
 0x25c   :  { %1335 = vmin.xlane.f32.xlu0 %v1334_v44  ;;  %1453 = vmin.xlane.f32.xlu1 %v1452_v25  ;;  %v6689_v25 = vld [vmem:[#allocation37_spill] sm:$0xff]  ;;  %v6692_v8 = vld [vmem:[#allocation40_spill] sm:$0xff]  ;;  %vm1271_vm13 = vcmp.eq.f32.partialorder %v5017_v20, %v5449_v13 }
 0x25d   :  { %v5456_v12 = vpop.xlane.xlu0 %1539  ;;  %4009 = vmatprep.subr.mxu0 %v2895_v53  ;;  %v1251_v33 = vand.u32 65535, %v6689_v25  ;;  %4050 = vmatpush3.msra.mxu1 %v2913_v40  ;;  %v5478_v53 = vcvt.s32.f32 %v2500_v22  ;;  %v2911_v22 = vld [vmem:[#allocation7 + $0x140] sm:$0xff]  ;;  %v2926_v40 = vld [vmem:[#allocation7 + $0x1b8] sm:$0xff]  ;;  %vm1465_vm9 = vcmp.eq.f32.partialorder %v6692_v8, %v5407_v52 }
 0x25e   :  { %vm1541_vm3 = vcmp.eq.f32.partialorder %v5024_v54, %v5456_v12  ;;  %v2894_v54 = vld [vmem:[#allocation7 + $0xb8] sm:$0xff]  ;;  %4010 = vmatpush3.msra.mxu0 %v2879_v16  ;;  %4051 = vmatprep.subr.mxu1 %v2928_v9  ;;  %v2877_v16 = vld [vmem:[#allocation7 + $0x30] sm:$0xff]  ;;  %v2708_v9 = vshra.s32 %v5484_v42, 16  ;;  %v2919_v20 = vld [vmem:[#allocation7 + $0x180] sm:$0xff] }
 0x25f   :  { %v1542_v44 = vsel %vm1541_vm3, %v1537_v30, inf  ;;  %v5470_v34 = vpop.xlane.xlu1 %1477  ;;  %4011 = vmatprep.subr.mxu0 %v2894_v54  ;;  %v1556_v30 = vsel %vm1555_vm5, %v1551_v2, inf  ;;  %4052 = vmatpush3.msra.mxu1 %v2912_v7  ;;  %v1253_v54 = vcvt.s32.f32 %v1251_v33  ;;  %v2910_v7 = vld [vmem:[#allocation7 + $0x138] sm:$0xff]  ;;  %v2891_v33 = vld [vmem:[#allocation7 + $0xa0] sm:$0xff] }
 0x260   :  { %1543 = vmin.xlane.f32.xlu0 %v1542_v44  ;;  %1349 = vmin.xlane.f32.xlu1 %v1348_v11  ;;  %v6690_v44 = vld [vmem:[#allocation38_spill] sm:$0xff] }
 0x261   :  { %4012 = vmatpush3.msra.mxu0 %v2878_v37  ;;  %v1459_v11 = vand.u32 65535, %v6690_v44  ;;  %4053 = vmatprep.subr.mxu1 %v2927_v50  ;;  %v2876_v37 = vld [vmem:[#allocation7 + $0x28] sm:$0xff]  ;;  %v1258_v25 = vsel %vm1257_vm7, %v1253_v54, inf  ;;  %v2875_v50 = vld [vmem:[#allocation7 + $0x20] sm:$0xff]  ;;  %v2890_v44 = vld [vmem:[#allocation7 + $0x98] sm:$0xff] }
 0x262   :  { %4013 = vmatprep.subr.mxu0 %v2893_v62  ;;  %4054 = vmatpush3.msra.mxu1 %v2911_v22  ;;  %v2925_v62 = vld [vmem:[#allocation7 + $0x1b0] sm:$0xff]  ;;  %v2924_v54 = vld [vmem:[#allocation7 + $0x1a8] sm:$0xff] }
 0x263   :  { %v5486_v35 = vpop.xlane.xlu0 %1761  ;;  %v5488_v38 = vpop.xlane.xlu1 %1373  ;;  %4014 = vmatpush3.msra.mxu0 %v2877_v16  ;;  %4055 = vmatprep.subr.mxu1 %v2926_v40  ;;  %v1461_v16 = vcvt.s32.f32 %v1459_v11  ;;  %v5516_v40 = vcvt.s32.f32 %v2708_v9  ;;  %v6696_v9 = vld [vmem:[#allocation42_spill] sm:$0xff] }
 0x264   :  { %2503 = vmin.xlane.f32.xlu0 %v5478_v53  ;;  %1557 = vmin.xlane.f32.xlu1 %v1556_v30  ;;  %v1355_v30 = vand.u32 65535, %v6693_v26  ;;  %vm1361_vm10 = vcmp.eq.f32.partialorder %v6696_v9, %v5416_v23  ;;  %v6697_v26 = vld [vmem:[#allocation41_spill] sm:$0xff]  ;;  %vm1763_vm12 = vcmp.eq.f32.partialorder %v5041_v57, %v5486_v35 }
 0x265   :  { %4015 = vmatprep.subr.mxu0 %v2892_v14  ;;  %4056 = vmatpush3.msra.mxu1 %v2910_v7  ;;  %v2618_v14 = vshra.s32 %v5503_v59, 16  ;;  %6694 = vst [vmem:[#allocation29_spill] sm:$0xff] %v5516_v40  ;;  %v1466_v8 = vsel %vm1465_vm9, %v1461_v16, inf  ;;  %v2908_v7 = vld [vmem:[#allocation7 + $0x128] sm:$0xff]  ;;  %v1563_v52 = vand.u32 65535, %v6697_v26  ;;  %v2873_v16 = vld [vmem:[#allocation7 + $0x10] sm:$0xff] }
 0x266   :  { %4016 = vmatpush3.msra.mxu0 %v2876_v37  ;;  %4057 = vmatprep.subr.mxu1 %v2925_v62  ;;  %v2874_v37 = vld [vmem:[#allocation7 + $0x18] sm:$0xff]  ;;  %v2923_v62 = vld [vmem:[#allocation7 + $0x1a0] sm:$0xff]  ;;  %v1357_v41 = vcvt.s32.f32 %v1355_v30  ;;  %v2888_v9 = vld [vmem:[#allocation7 + $0x88] sm:$0xff] }
 0x267   :  { %v5505_v2 = vpop.xlane.xlu1 %1581  ;;  %4017 = vmatprep.subr.mxu0 %v2891_v33  ;;  %4058 = vmatpush3.msra.mxu1 %v2909_v39  ;;  %v2889_v33 = vld [vmem:[#allocation7 + $0x90] sm:$0xff]  ;;  %v5533_v39 = vcvt.s32.f32 %v2618_v14  ;;  %v2922_v26 = vld [vmem:[#allocation7 + $0x198] sm:$0xff]  ;;  %v6699_v30 = vld [vmem:[#allocation44_spill] sm:$0xff] }
 0x268   :  { %2815 = vmin.xlane.f32.xlu0 %v5497_v31  ;;  %1259 = vmin.xlane.f32.xlu1 %v1258_v25  ;;  %v5522_v25 = vsel %vm2778_vm8, %v4865_v49, 128  ;;  %vm1569_vm11 = vcmp.eq.f32.partialorder %v6699_v30, %v5428_v29  ;;  %v2906_v14 = vld [vmem:[#allocation7 + $0x118] sm:$0xff]  ;;  %v2871_v30 = vld [vmem:[#allocation7] sm:$0xff]  ;;  %vm1583_vm3 = vcmp.eq.f32.partialorder %v5057_v61, %v5505_v2 }
 0x269   :  { %v5513_v22 = vpop.xlane.xlu0 %1969  ;;  %6695 = vst [vmem:[#allocation35_spill] sm:$0xff] %v5522_v25  ;;  %4018 = vmatpush3.msra.mxu0 %v2875_v50  ;;  %4059 = vmatprep.subr.mxu1 %v2924_v54  ;;  %v2826_v50 = vshra.s32 %v5522_v25, 16  ;;  %6698 = vst [vmem:[#allocation33_spill] sm:$0xff] %v5533_v39  ;;  %v6700_v54 = vld [vmem:[#allocation43_spill] sm:$0xff]  ;;  %v1565_v25 = vcvt.s32.f32 %v1563_v52  ;;  %v6701_v52 = vld [vmem:[#allocation45_spill] sm:$0xff] }
 0x26a   :  { %4019 = vmatprep.subr.mxu0 %v2890_v44  ;;  %4060 = vmatpush3.msra.mxu1 %v2908_v7  ;;  %v2872_v44 = vld [vmem:[#allocation7 + $0x8] sm:$0xff]  ;;  %v1757_v7 = vand.u32 65535, %v5036_v1  ;;  %vm1971_vm14 = vcmp.eq.f32.partialorder %v5065_v0, %v5513_v22 }
 0x26b   :  { %v5524_v11 = vpop.xlane.xlu1 %1643  ;;  %4020 = vmatpush3.msra.mxu0 %v2874_v37  ;;  %4061 = vmatprep.subr.mxu1 %v2923_v62  ;;  %v1265_v37 = vand.u32 65535, %v6700_v54  ;;  %v2921_v62 = vld [vmem:[#allocation7 + $0x190] sm:$0xff]  ;;  %v2920_v1 = vld [vmem:[#allocation7 + $0x188] sm:$0xff] }
 0x26c   :  { %2711 = vmin.xlane.f32.xlu0 %v5516_v40  ;;  %1467 = vmin.xlane.f32.xlu1 %v1466_v8  ;;  %v2907_v8 = vld [vmem:[#allocation7 + $0x120] sm:$0xff]  ;;  %v1362_v40 = vsel %vm1361_vm10, %v1357_v41, inf  ;;  %v5542_v41 = vcvt.s32.f32 %v2826_v50  ;;  %v2905_v54 = vld [vmem:[#allocation7 + $0x110] sm:$0xff]  ;;  %v1965_v50 = vand.u32 65535, %v5054_v5 }
 0x26d   :  { %v5530_v17 = vpop.xlane.xlu0 %1775  ;;  %4021 = vmatprep.subr.mxu0 %v2889_v33  ;;  %4062 = vmatpush3.msra.mxu1 %v2907_v8  ;;  %v2887_v33 = vld [vmem:[#allocation7 + $0x80] sm:$0xff]  ;;  %v1267_v8 = vcvt.s32.f32 %v1265_v37  ;;  %v6703_v37 = vld [vmem:[#allocation46_spill] sm:$0xff]  ;;  %v6704_v0 = vld [vmem:[#allocation49_spill] sm:$0xff] }
 0x26e   :  { %4022 = vmatpush3.msra.mxu0 %v2873_v16  ;;  %4063 = vmatprep.subr.mxu1 %v2922_v26  ;;  %v1759_v16 = vcvt.s32.f32 %v1757_v7  ;;  %v6702_v5 = vld [vmem:[#allocation47_spill] sm:$0xff]  ;;  %v1369_v7 = vand.u32 65535, %v6703_v37  ;;  %vm1777_vm0 = vcmp.eq.f32.partialorder %v5080_v28, %v5530_v17  ;;  %vm1375_vm1 = vcmp.eq.f32.partialorder %v6704_v0, %v5488_v38  ;;  %v6706_v28 = vld [vmem:[#allocation50_spill] sm:$0xff]  ;;  %v6707_v61 = vld [vmem:[#allocation52_spill] sm:$0xff] }
 0x26f   :  { %v5535_v59 = vpop.xlane.xlu1 %1851  ;;  %4023 = vmatprep.subr.mxu0 %v2888_v9  ;;  %4064 = vmatpush3.msra.mxu1 %v2906_v14  ;;  %v2904_v9 = vld [vmem:[#allocation7 + $0x108] sm:$0xff]  ;;  %vm1479_vm15 = vcmp.eq.f32.partialorder %v6702_v5, %v5470_v34  ;;  %v2903_v14 = vld [vmem:[#allocation7 + $0x100] sm:$0xff]  ;;  %v1785_v5 = vand.u32 65535, %v5107_v27  ;;  %vm1645_vm5 = vcmp.eq.f32.partialorder %v6707_v61, %v5524_v11  ;;  %v1993_v27 = vand.u32 65535, %v5126_v21 }
 0x270   :  { %2621 = vmin.xlane.f32.xlu0 %v5533_v39  ;;  %1363 = vmin.xlane.f32.xlu1 %v1362_v40  ;;  %v1570_v39 = vsel %vm1569_vm11, %v1565_v25, inf  ;;  %v1473_v25 = vand.u32 65535, %v6701_v52  ;;  %v1764_v26 = vsel %vm1763_vm12, %v1759_v16, inf  ;;  %v6705_v16 = vld [vmem:[#allocation48_spill] sm:$0xff]  ;;  %vm1853_vm7 = vcmp.eq.f32.partialorder %v5085_v48, %v5535_v59  ;;  %v6712_v48 = vld [vmem:[#allocation54_spill] sm:$0xff] }
 0x271   :  { %4024 = vmatpush3.msra.mxu0 %v2872_v44  ;;  %4065 = vmatprep.subr.mxu1 %v2921_v62  ;;  %v1967_v62 = vcvt.s32.f32 %v1965_v50  ;;  %v1371_v50 = vcvt.s32.f32 %v1369_v7 }
 0x272   :  { %4025 = vmatprep.subr.mxu0 %v2887_v33  ;;  %4066 = vmatpush3.msra.mxu1 %v2905_v54  ;;  %v1771_v33 = vand.u32 65535, %v5069_v47  ;;  %v1979_v47 = vand.u32 65535, %v5092_v45 }
 0x273   :  { %v5544_v40 = vpop.xlane.xlu0 %1983  ;;  %v5546_v23 = vpop.xlane.xlu1 %1747  ;;  %4026 = vmatpush3.msra.mxu0 %v2871_v30  ;;  %4067 = vmatprep.subr.mxu1 %v2920_v1  ;;  %v1475_v30 = vcvt.s32.f32 %v1473_v25  ;;  %v1972_v54 = vsel %vm1971_vm14, %v1967_v62, inf }
 0x274   :  { %2829 = vmin.xlane.f32.xlu0 %v5542_v41  ;;  %1571 = vmin.xlane.f32.xlu1 %v1570_v39  ;;  %v1272_v39 = vsel %vm1271_vm13, %v1267_v8, inf  ;;  %v1577_v8 = vand.u32 65535, %v6705_v16  ;;  %v1773_v25 = vcvt.s32.f32 %v1771_v33  ;;  %vm1985_vm2 = vcmp.eq.f32.partialorder %v5098_v19, %v5544_v40  ;;  %v6708_v19 = vld [vmem:[#allocation51_spill] sm:$0xff] }
 0x275   :  { %4068 = vmatpush3.msra.mxu1 %v2904_v9  ;;  %v1480_v1 = vsel %vm1479_vm15, %v1475_v30, inf  ;;  %v2966_v30 = vld [vmem:[#allocation7 + $0x2f8] sm:$0xff] }
 0x276   :  { %4069 = vmatprep.subr.mxu1 %v2919_v20  ;;  %v1639_v20 = vand.u32 65535, %v6706_v28  ;;  %v1579_v45 = vcvt.s32.f32 %v1577_v8  ;;  %4083 = vmatprep.subr.mxu0 %v2966_v30 }
 0x277   :  { %v5555_v44 = vpop.xlane.xlu0 %1789  ;;  %v5557_v57 = vpop.xlane.xlu1 %1955  ;;  %4070 = vmatpush3.msra.mxu1 %v2903_v14  ;;  %v1981_v14 = vcvt.s32.f32 %v1979_v47 }
 0x278   :  { %1765 = vmin.xlane.f32.xlu0 %v1764_v26  ;;  %1273 = vmin.xlane.f32.xlu1 %v1272_v39  ;;  %v1778_v26 = vsel %vm1777_vm0, %v1773_v25, inf  ;;  %v1376_v39 = vsel %vm1375_vm1, %v1371_v50, inf  ;;  %v1584_v33 = vsel %vm1583_vm3, %v1579_v45, inf  ;;  %vm1791_vm4 = vcmp.eq.f32.partialorder %v5113_v3, %v5555_v44  ;;  %v2998_v50 = vld [vmem:[#allocation7 + $0x3f8] sm:$0xff]  ;;  %v6709_v3 = vld [vmem:[#allocation53_spill] sm:$0xff] }
 0x279   :  { %v1986_v7 = vsel %vm1985_vm2, %v1981_v14, inf  ;;  %v1641_v0 = vcvt.s32.f32 %v1639_v20  ;;  %v1743_v21 = vand.u32 65535, %v6709_v3  ;;  %4127 = vmatprep.subr.mxu1 %v2998_v50  ;;  %v1951_v45 = vand.u32 65535, %v6712_v48  ;;  %v6716_v3 = vld [vmem:[#allocation58_spill] sm:$0xff] }
 0x27a   :  { %vm1957_vm11 = vcmp.eq.f32.partialorder %v5115_v43, %v5557_v57  ;;  %v6717_v43 = vld [vmem:[#allocation57_spill] sm:$0xff] }
 0x27b   :  { %v5565_v52 = vpop.xlane.xlu1 %1657  ;;  %v1646_v8 = vsel %vm1645_vm5, %v1641_v0, inf  ;;  %v1953_v0 = vcvt.s32.f32 %v1951_v45  ;;  %v6721_v45 = vld [vmem:[#allocation71_spill] sm:$0xff] }
 0x27c   :  { %1973 = vmin.xlane.f32.xlu0 %v1972_v54  ;;  %1481 = vmin.xlane.f32.xlu1 %v1480_v1  ;;  %v1847_v54 = vand.u32 65535, %v6708_v19  ;;  %v1787_v1 = vcvt.s32.f32 %v1785_v5  ;;  %vm1659_vm13 = vcmp.eq.f32.partialorder %v6716_v3, %v5565_v52 }
 0x27d   :  { %v5573_v9 = vpop.xlane.xlu0 %1997 }
 0x27e   :  { %v1792_v16 = vsel %vm1791_vm4, %v1787_v1, inf  ;;  %vm1999_vm6 = vcmp.eq.f32.partialorder %v5136_v24, %v5573_v9  ;;  %v1849_v28 = vcvt.s32.f32 %v1847_v54  ;;  %v6711_v24 = vld [vmem:[#allocation55_spill] sm:$0xff]  ;;  %v6714_v54 = vld [vmem:[#allocation56_spill] sm:$0xff] }
 0x27f   :  { %v5581_v37 = vpop.xlane.xlu1 %1865  ;;  %vm1749_vm9 = vcmp.eq.f32.partialorder %v6711_v24, %v5546_v23  ;;  %v6720_v24 = vld [vmem:[#allocation59_spill] sm:$0xff] }
 0x280   :  { %1779 = vmin.xlane.f32.xlu0 %v1778_v26  ;;  %1377 = vmin.xlane.f32.xlu1 %v1376_v39  ;;  %v2159_v26 = vand.u32 65535, %v5148_v36  ;;  %v1995_v39 = vcvt.s32.f32 %v1993_v27  ;;  %v1854_v5 = vsel %vm1853_vm7, %v1849_v28, inf  ;;  %v1653_v27 = vand.u32 65535, %v6714_v54 }
 0x281   :  { %v1667_v48 = vand.u32 65535, %v6720_v24 }
 0x282   :  { %v2000_v20 = vsel %vm1999_vm6, %v1995_v39, inf  ;;  %v2161_v36 = vcvt.s32.f32 %v2159_v26  ;;  %v1655_v39 = vcvt.s32.f32 %v1653_v27  ;;  %v6723_v27 = vld [vmem:[#allocation74_spill] sm:$0xff] }
 0x283   :  { %v5583_v62 = vpop.xlane.xlu0 %2163  ;;  %v5593_v25 = vpop.xlane.xlu1 %1671 }
 0x284   :  { %1987 = vmin.xlane.f32.xlu0 %v1986_v7  ;;  %1585 = vmin.xlane.f32.xlu1 %v1584_v33  ;;  %vm2165_vm8 = vcmp.eq.f32.partialorder %v5154_v6, %v5583_v62  ;;  %v2367_v7 = vand.u32 65535, %v5163_v58  ;;  %v1745_v33 = vcvt.s32.f32 %v1743_v21  ;;  %v2173_v58 = vand.u32 65535, %v5179_v51 }
 0x285   :  { %v2166_v61 = vsel %vm2165_vm8, %v2161_v36, inf  ;;  %v1861_v21 = vand.u32 65535, %v6717_v43  ;;  %v2381_v51 = vand.u32 65535, %v5196_v4  ;;  %v1669_v43 = vcvt.s32.f32 %v1667_v48 }
 0x286   :  { %v1750_v19 = vsel %vm1749_vm9, %v1745_v33, inf  ;;  %v2369_v1 = vcvt.s32.f32 %v2367_v7  ;;  %v2175_v26 = vcvt.s32.f32 %v2173_v58  ;;  %v2187_v7 = vand.u32 65535, %v6721_v45  ;;  %v6724_v58 = vld [vmem:[#allocation62_spill] sm:$0xff] }
 0x287   :  { %v5591_v47 = vpop.xlane.xlu0 %2371  ;;  %v5609_v30 = vpop.xlane.xlu1 %1879  ;;  %v2383_v36 = vcvt.s32.f32 %v2381_v51  ;;  %v1863_v33 = vcvt.s32.f32 %v1861_v21  ;;  %vm1673_vm1 = vcmp.eq.f32.partialorder %v6724_v58, %v5593_v25 }
 0x288   :  { %1793 = vmin.xlane.f32.xlu0 %v1792_v16  ;;  %1647 = vmin.xlane.f32.xlu1 %v1646_v8  ;;  %vm2373_vm10 = vcmp.eq.f32.partialorder %v5170_v10, %v5591_v47  ;;  %v1958_v8 = vsel %vm1957_vm11, %v1953_v0, inf  ;;  %v2189_v3 = vcvt.s32.f32 %v2187_v7  ;;  %v6731_v7 = vld [vmem:[#allocation83_spill] sm:$0xff] }
 0x289   :  { %v2374_v16 = vsel %vm2373_vm10, %v2369_v1, inf  ;;  %v6725_v1 = vld [vmem:[#allocation61_spill] sm:$0xff]  ;;  %v2201_v48 = vand.u32 65535, %v6731_v7 }
 0x28a   :  { %v1875_v0 = vand.u32 65535, %v6725_v1 }
 0x28b   :  { %v5601_v14 = vpop.xlane.xlu0 %2177  ;;  %v5619_v50 = vpop.xlane.xlu1 %1685 }
 0x28c   :  { %6710 = vst [vmem:[#allocation36_spill] sm:$0xff] %v5601_v14  ;;  %2001 = vmin.xlane.f32.xlu0 %v2000_v20  ;;  %1855 = vmin.xlane.f32.xlu1 %v1854_v5  ;;  %vm2179_vm12 = vcmp.eq.f32.partialorder %v5185_v56, %v5601_v14  ;;  %v1660_v20 = vsel %vm1659_vm13, %v1655_v39, inf  ;;  %v6718_v5 = vld [vmem:[#allocation70_spill] sm:$0xff]  ;;  %v6719_v56 = vld [vmem:[#allocation60_spill] sm:$0xff]  ;;  %v1877_v45 = vcvt.s32.f32 %v1875_v0  ;;  %v2203_v0 = vcvt.s32.f32 %v2201_v48 }
 0x28d   :  { %v2180_v28 = vsel %vm2179_vm12, %v2175_v26, inf  ;;  %vm1867_vm15 = vcmp.eq.f32.partialorder %v6719_v56, %v5581_v37  ;;  %v1674_v26 = vsel %vm1673_vm1, %v1669_v43, inf }
 0x28e   :  { %v1868_v54 = vsel %vm1867_vm15, %v1863_v33, inf }
 0x290   :  { %2167 = vmin.xlane.f32.xlu0 %v2166_v61  ;;  %1751 = vmin.xlane.f32.xlu1 %v1750_v19  ;;  %v5613_v6 = vpop.xlane.xlu0 %2385  ;;  %v5635_v61 = vpop.xlane.xlu1 %1893 }
 0x291   :  { %6713 = vst [vmem:[#allocation32_spill] sm:$0xff] %v5613_v6  ;;  %vm2387_vm14 = vcmp.eq.f32.partialorder %v6718_v5, %v5613_v6  ;;  %v6730_v5 = vld [vmem:[#allocation63_spill] sm:$0xff]  ;;  %v1560_v6 = vcvt.f32.s32 %v5391_v55 }
 0x292   :  { %v2388_v19 = vsel %vm2387_vm14, %v2383_v36, inf  ;;  %v1681_v56 = vand.u32 65535, %v6730_v5  ;;  %v6740_v5 = vld [vmem:[#allocation67_spill] sm:$0xff] }
 0x294   :  { %2375 = vmin.xlane.f32.xlu0 %v2374_v16  ;;  %1959 = vmin.xlane.f32.xlu1 %v1958_v8  ;;  %v5623_v10 = vpop.xlane.xlu0 %2191  ;;  %v6726_v16 = vld [vmem:[#allocation75_spill] sm:$0xff]  ;;  %v5647_v39 = vpop.xlane.xlu1 %2059  ;;  %v1683_v1 = vcvt.s32.f32 %v1681_v56 }
 0x295   :  { %6715 = vst [vmem:[#allocation37_spill] sm:$0xff] %v5623_v10  ;;  %vm2193_vm0 = vcmp.eq.f32.partialorder %v6723_v27, %v5623_v10  ;;  %v2395_v8 = vand.u32 65535, %v6726_v16  ;;  %v6734_v27 = vld [vmem:[#allocation65_spill] sm:$0xff] }
 0x296   :  { %v2194_v51 = vsel %vm2193_vm0, %v2189_v3, inf  ;;  %v1889_v58 = vand.u32 65535, %v6734_v27  ;;  %v6736_v3 = vld [vmem:[#allocation88_spill] sm:$0xff]  ;;  %v6762_v10 = vld [vmem:[#allocation89_spill] sm:$0xff] }
 0x297   :  { %v2397_v24 = vcvt.s32.f32 %v2395_v8  ;;  %v2409_v43 = vand.u32 65535, %v6736_v3 }
 0x298   :  { %2181 = vmin.xlane.f32.xlu0 %v2180_v28  ;;  %1661 = vmin.xlane.f32.xlu1 %v1660_v20  ;;  %v6728_v28 = vld [vmem:[#allocation79_spill] sm:$0xff]  ;;  %v6729_v20 = vld [vmem:[#allocation64_spill] sm:$0xff]  ;;  %v5660_v16 = vpop.xlane.xlu1 %2267  ;;  %v1891_v56 = vcvt.s32.f32 %v1889_v58 }
 0x299   :  { %vm1881_vm3 = vcmp.eq.f32.partialorder %v6729_v20, %v5609_v30  ;;  %6735 = vst [vmem:[#allocation42_spill] sm:$0xff] %v5660_v16  ;;  %v2411_v7 = vcvt.s32.f32 %v2409_v43  ;;  %v6747_v43 = vld [vmem:[#allocation76_spill] sm:$0xff] }
 0x29a   :  { %v5637_v4 = vpop.xlane.xlu0 %2399  ;;  %vm2269_vm9 = vcmp.eq.f32.partialorder %v6747_v43, %v5660_v16 }
 0x29b   :  { %6722 = vst [vmem:[#allocation38_spill] sm:$0xff] %v5637_v4  ;;  %vm2401_vm2 = vcmp.eq.f32.partialorder %v6728_v28, %v5637_v4  ;;  %v6739_v28 = vld [vmem:[#allocation68_spill] sm:$0xff] }
 0x29c   :  { %2389 = vmin.xlane.f32.xlu0 %v2388_v19  ;;  %1869 = vmin.xlane.f32.xlu1 %v1868_v54  ;;  %v2402_v33 = vsel %vm2401_vm2, %v2397_v24, inf  ;;  %v1882_v19 = vsel %vm1881_vm3, %v1877_v45, inf  ;;  %v6733_v54 = vld [vmem:[#allocation66_spill] sm:$0xff]  ;;  %vm1895_vm6 = vcmp.eq.f32.partialorder %v6739_v28, %v5635_v61  ;;  %v2055_v24 = vand.u32 65535, %v6740_v5 }
 0x29d   :  { %vm1687_vm4 = vcmp.eq.f32.partialorder %v6733_v54, %v5619_v50  ;;  %v1896_v48 = vsel %vm1895_vm6, %v1891_v56, inf  ;;  %v6744_v54 = vld [vmem:[#allocation72_spill] sm:$0xff]  ;;  %v6750_v56 = vld [vmem:[#allocation93_spill] sm:$0xff] }
 0x29e   :  { %v5645_v21 = vpop.xlane.xlu0 %2101  ;;  %vm2061_vm8 = vcmp.eq.f32.partialorder %v6744_v54, %v5647_v39  ;;  %v6752_v54 = vld [vmem:[#allocation80_spill] sm:$0xff] }
 0x29f   :  { %6727 = vst [vmem:[#allocation40_spill] sm:$0xff] %v5645_v21 }
 0x2a0   :  { %2195 = vmin.xlane.f32.xlu0 %v2194_v51  ;;  %1675 = vmin.xlane.f32.xlu1 %v1674_v26  ;;  %v6738_v51 = vld [vmem:[#allocation19_spill] sm:$0xff]  ;;  %v1688_v26 = vsel %vm1687_vm4, %v1683_v1, inf  ;;  %v6745_v1 = vld [vmem:[#allocation69_spill] sm:$0xff] }
 0x2a1   :  { %v2263_v3 = vand.u32 65535, %v6745_v1 }
 0x2a2   :  { %v5655_v36 = vpop.xlane.xlu0 %2309 }
 0x2a3   :  { %6732 = vst [vmem:[#allocation39_spill] sm:$0xff] %v5655_v36  ;;  %v2265_v5 = vcvt.s32.f32 %v2263_v3  ;;  %v6757_v3 = vld [vmem:[#allocation23_spill] sm:$0xff] }
 0x2a4   :  { %2403 = vmin.xlane.f32.xlu0 %v2402_v33  ;;  %1883 = vmin.xlane.f32.xlu1 %v1882_v19  ;;  %v6742_v33 = vld [vmem:[#allocation20_spill] sm:$0xff]  ;;  %v5674_v19 = vpop.xlane.xlu1 %2073 }
 0x2a5   :  { %6743 = vst [vmem:[#allocation43_spill] sm:$0xff] %v5674_v19  ;;  %vm2075_vm10 = vcmp.eq.f32.partialorder %v6752_v54, %v5674_v19 }
 0x2a6   :  { %v5663_v8 = vpop.xlane.xlu0 %2205 }
 0x2a7   :  { %6737 = vst [vmem:[#allocation41_spill] sm:$0xff] %v5663_v8  ;;  %vm2207_vm5 = vcmp.eq.f32.partialorder %v6738_v51, %v5663_v8 }
 0x2a8   :  { %1689 = vmin.xlane.f32.xlu1 %v1688_v26  ;;  %v2208_v20 = vsel %vm2207_vm5, %v2203_v0, inf  ;;  %v2057_v0 = vcvt.s32.f32 %v2055_v24  ;;  %v6748_v26 = vld [vmem:[#allocation73_spill] sm:$0xff] }
 0x2a9   :  { %2209 = vmin.xlane.f32.xlu0 %v2208_v20  ;;  %v2069_v28 = vand.u32 65535, %v6748_v26  ;;  %v5684_v20 = vpop.xlane.xlu1 %2281  ;;  %v6753_v24 = vld [vmem:[#allocation77_spill] sm:$0xff] }
 0x2aa   :  { %v5670_v45 = vpop.xlane.xlu0 %2413  ;;  %v2062_v58 = vsel %vm2061_vm8, %v2057_v0, inf  ;;  %6749 = vst [vmem:[#allocation47_spill] sm:$0xff] %v5684_v20  ;;  %v6754_v0 = vld [vmem:[#allocation94_spill] sm:$0xff] }
 0x2ab   :  { %6741 = vst [vmem:[#allocation44_spill] sm:$0xff] %v5670_v45  ;;  %vm2415_vm7 = vcmp.eq.f32.partialorder %v6742_v33, %v5670_v45  ;;  %v2575_v33 = vand.u32 65535, %v6750_v56  ;;  %v2071_v1 = vcvt.s32.f32 %v2069_v28  ;;  %v2783_v43 = vand.u32 65535, %v6754_v0 }
 0x2ac   :  { %1897 = vmin.xlane.f32.xlu1 %v1896_v48  ;;  %v2416_v27 = vsel %vm2415_vm7, %v2411_v7, inf  ;;  %v2270_v7 = vsel %vm2269_vm9, %v2265_v5, inf  ;;  %v6758_v5 = vld [vmem:[#allocation85_spill] sm:$0xff] }
 0x2ad   :  { %2417 = vmin.xlane.f32.xlu0 %v2416_v27  ;;  %v2277_v27 = vand.u32 65535, %v6753_v24  ;;  %v2577_v26 = vcvt.s32.f32 %v2575_v33  ;;  %v5695_v45 = vpop.xlane.xlu1 %2087  ;;  %v2076_v56 = vsel %vm2075_vm10, %v2071_v1, inf  ;;  %vm2283_vm12 = vcmp.eq.f32.partialorder %v6758_v5, %v5684_v20  ;;  %v6761_v33 = vld [vmem:[#allocation24_spill] sm:$0xff] }
 0x2ae   :  { %v5679_v51 = vpop.xlane.xlu0 %2475  ;;  %6756 = vst [vmem:[#allocation48_spill] sm:$0xff] %v5695_v45  ;;  %v2785_v0 = vcvt.s32.f32 %v2783_v43  ;;  %vm2089_vm14 = vcmp.eq.f32.partialorder %v6762_v10, %v5695_v45  ;;  %v6766_v43 = vld [vmem:[#allocation91_spill] sm:$0xff] }
 0x2af   :  { %6746 = vst [vmem:[#allocation45_spill] sm:$0xff] %v5679_v51  ;;  %v2279_v28 = vcvt.s32.f32 %v2277_v27 }
 0x2b0   :  { %2063 = vmin.xlane.f32.xlu1 %v2062_v58 }
 0x2b1   :  { %v2284_v4 = vsel %vm2283_vm12, %v2279_v28, inf }
 0x2b2   :  { %v5687_v48 = vpop.xlane.xlu0 %2683 }
 0x2b3   :  { %6751 = vst [vmem:[#allocation46_spill] sm:$0xff] %v5687_v48 }
 0x2b4   :  { %2271 = vmin.xlane.f32.xlu1 %v2270_v7  ;;  %v6759_v7 = vld [vmem:[#allocation81_spill] sm:$0xff] }
 0x2b5   :  { %v2083_v8 = vand.u32 65535, %v6759_v7  ;;  %v6767_v7 = vld [vmem:[#allocation78_spill] sm:$0xff] }
 0x2b6   :  { %v5693_v58 = vpop.xlane.xlu0 %2579  ;;  %v2097_v28 = vand.u32 65535, %v6767_v7 }
 0x2b7   :  { %6755 = vst [vmem:[#allocation49_spill] sm:$0xff] %v5693_v58  ;;  %vm2581_vm11 = vcmp.eq.f32.partialorder %v6757_v3, %v5693_v58  ;;  %v6763_v3 = vld [vmem:[#allocation86_spill] sm:$0xff] }
 0x2b8   :  { %2077 = vmin.xlane.f32.xlu1 %v2076_v56  ;;  %v2582_v54 = vsel %vm2581_vm11, %v2577_v26, inf  ;;  %v2291_v5 = vand.u32 65535, %v6763_v3  ;;  %v5709_v56 = vpop.xlane.xlu1 %2295  ;;  %v2085_v26 = vcvt.s32.f32 %v2083_v8  ;;  %v6770_v3 = vld [vmem:[#allocation82_spill] sm:$0xff]  ;;  %v6771_v8 = vld [vmem:[#allocation84_spill] sm:$0xff]  ;;  %v2099_v58 = vcvt.s32.f32 %v2097_v28 }
 0x2b9   :  { %2583 = vmin.xlane.f32.xlu0 %v2582_v54  ;;  %6764 = vst [vmem:[#allocation52_spill] sm:$0xff] %v5709_v56  ;;  %vm2297_vm15 = vcmp.eq.f32.partialorder %v6766_v43, %v5709_v56  ;;  %vm2103_vm0 = vcmp.eq.f32.partialorder %v6770_v3, %v5645_v21  ;;  %v6774_v43 = vld [vmem:[#allocation30_spill] sm:$0xff]  ;;  %v6779_v21 = vld [vmem:[#allocation21_spill] sm:$0xff] }
 0x2ba   :  { %v5702_v24 = vpop.xlane.xlu0 %2787  ;;  %v2090_v27 = vsel %vm2089_vm14, %v2085_v26, inf  ;;  %v6772_v26 = vld [vmem:[#allocation98_spill] sm:$0xff]  ;;  %vm2477_vm4 = vcmp.eq.f32.partialorder %v6779_v21, %v5679_v51 }
 0x2bb   :  { %6760 = vst [vmem:[#allocation50_spill] sm:$0xff] %v5702_v24  ;;  %vm2789_vm13 = vcmp.eq.f32.partialorder %v6761_v33, %v5702_v24  ;;  %v2293_v33 = vcvt.s32.f32 %v2291_v5  ;;  %v6768_v24 = vld [vmem:[#allocation96_spill] sm:$0xff]  ;;  %v2797_v45 = vand.u32 65535, %v6772_v26  ;;  %v2104_v5 = vsel %vm2103_vm0, %v2099_v58, inf }
 0x2bc   :  { %2285 = vmin.xlane.f32.xlu1 %v2284_v4  ;;  %v2790_v1 = vsel %vm2789_vm13, %v2785_v0, inf  ;;  %v2589_v10 = vand.u32 65535, %v6768_v24  ;;  %v6775_v24 = vld [vmem:[#allocation87_spill] sm:$0xff]  ;;  %v6778_v26 = vld [vmem:[#allocation100_spill] sm:$0xff] }
 0x2bd   :  { %2791 = vmin.xlane.f32.xlu0 %v2790_v1  ;;  %v2298_v0 = vsel %vm2297_vm15, %v2293_v33, inf  ;;  %v2305_v1 = vand.u32 65535, %v6771_v8  ;;  %vm2311_vm2 = vcmp.eq.f32.partialorder %v6775_v24, %v5655_v36  ;;  %v6776_v33 = vld [vmem:[#allocation90_spill] sm:$0xff]  ;;  %v2799_v28 = vcvt.s32.f32 %v2797_v45  ;;  %v6783_v45 = vld [vmem:[#allocation95_spill] sm:$0xff] }
 0x2be   :  { %v5711_v54 = vpop.xlane.xlu0 %2489  ;;  %v2471_v3 = vand.u32 65535, %v6776_v33 }
 0x2bf   :  { %6765 = vst [vmem:[#allocation51_spill] sm:$0xff] %v5711_v54 }
 0x2c0   :  { %2091 = vmin.xlane.f32.xlu1 %v2090_v27  ;;  %v2591_v27 = vcvt.s32.f32 %v2589_v10  ;;  %v2473_v33 = vcvt.s32.f32 %v2471_v3  ;;  %v6786_v3 = vld [vmem:[#allocation27_spill] sm:$0xff] }
 0x2c1   :  { %vm2491_vm7 = vcmp.eq.f32.partialorder %v6786_v3, %v5711_v54  ;;  %v6790_v3 = vld [vmem:[#allocation97_spill] sm:$0xff] }
 0x2c2   :  { %v5717_v4 = vpop.xlane.xlu0 %2697 }
 0x2c3   :  { %6769 = vst [vmem:[#allocation53_spill] sm:$0xff] %v5717_v4 }
 0x2c4   :  { %2299 = vmin.xlane.f32.xlu1 %v2298_v0  ;;  %v2307_v0 = vcvt.s32.f32 %v2305_v1  ;;  %v2478_v1 = vsel %vm2477_vm4, %v2473_v33, inf }
 0x2c6   :  { %v5723_v20 = vpop.xlane.xlu0 %2593  ;;  %v2312_v10 = vsel %vm2311_vm2, %v2307_v0, inf }
 0x2c7   :  { %6773 = vst [vmem:[#allocation55_spill] sm:$0xff] %v5723_v20  ;;  %vm2595_vm1 = vcmp.eq.f32.partialorder %v6774_v43, %v5723_v20  ;;  %v6780_v43 = vld [vmem:[#allocation92_spill] sm:$0xff]  ;;  %v6782_v20 = vld [vmem:[#allocation22_spill] sm:$0xff] }
 0x2c8   :  { %2105 = vmin.xlane.f32.xlu1 %v2104_v5  ;;  %v2596_v7 = vsel %vm2595_vm1, %v2591_v27, inf  ;;  %v2679_v24 = vand.u32 65535, %v6780_v43  ;;  %v6781_v5 = vld [vmem:[#allocation101_spill] sm:$0xff]  ;;  %vm2685_vm5 = vcmp.eq.f32.partialorder %v6782_v20, %v5687_v48 }
 0x2c9   :  { %2597 = vmin.xlane.f32.xlu0 %v2596_v7  ;;  %v2603_v27 = vand.u32 65535, %v6781_v5  ;;  %v1232_v7 = vpop.xlane.xlu1 %1231 }
 0x2ca   :  { %v5730_v8 = vpop.xlane.xlu0 %2801  ;;  %v2681_v21 = vcvt.s32.f32 %v2679_v24 }
 0x2cb   :  { %6777 = vst [vmem:[#allocation54_spill] sm:$0xff] %v5730_v8  ;;  %vm2803_vm3 = vcmp.eq.f32.partialorder %v6778_v26, %v5730_v8  ;;  %v2485_v26 = vand.u32 65535, %v6783_v45  ;;  %v2605_v8 = vcvt.s32.f32 %v2603_v27  ;;  %v6788_v45 = vld [vmem:[#allocation28_spill] sm:$0xff] }
 0x2cc   :  { %2313 = vmin.xlane.f32.xlu1 %v2312_v10  ;;  %v2804_v58 = vsel %vm2803_vm3, %v2799_v28, inf  ;;  %v6785_v28 = vld [vmem:[#allocation102_spill] sm:$0xff]  ;;  %v2686_v43 = vsel %vm2685_vm5, %v2681_v21, inf  ;;  %vm2699_vm8 = vcmp.eq.f32.partialorder %v6788_v45, %v5717_v4  ;;  %v6789_v21 = vld [vmem:[#allocation25_spill] sm:$0xff] }
 0x2cd   :  { %2805 = vmin.xlane.f32.xlu0 %v2804_v58  ;;  %v1440_v5 = vpop.xlane.xlu1 %1439  ;;  %v6787_v58 = vld [vmem:[#allocation26_spill] sm:$0xff]  ;;  %v2487_v33 = vcvt.s32.f32 %v2485_v26  ;;  %v2499_v26 = vand.u32 65535, %v5444_v32 }
 0x2ce   :  { %v2693_v20 = vand.u32 65535, %v6787_v58  ;;  %v1456_v58 = vcvt.f32.s32 %v5377_v60  ;;  %v1441_v48 = vcvt.f32.s32 %v1440_v5 }
 0x2cf   :  { %v2501_v19 = vcvt.s32.f32 %v2499_v26 }
 0x2d0   :  { %2479 = vmin.xlane.f32.xlu1 %v2478_v1  ;;  %v2492_v1 = vsel %vm2491_vm7, %v2487_v33, inf  ;;  %v2695_v27 = vcvt.s32.f32 %v2693_v20  ;;  %v1352_v33 = vcvt.f32.s32 %v5384_v18  ;;  %v1338_v20 = vcvt.f32.s32 %v5436_v15 }
 0x2d1   :  { %v5741_v0 = vpop.xlane.xlu0 %2607  ;;  %v1457_v60 = vshll.u32 %v1456_v58, 16 }
 0x2d2   :  { %6784 = vst [vmem:[#allocation56_spill] sm:$0xff] %v5741_v0  ;;  %vm2609_vm6 = vcmp.eq.f32.partialorder %v6785_v28, %v5741_v0  ;;  %v2700_v28 = vsel %vm2699_vm8, %v2695_v27, inf  ;;  %v1234_v0 = vcvt.f32.s32 %v6789_v21  ;;  %v6792_v27 = vld [vmem:[#allocation18_spill] sm:$0xff]  ;;  %v1353_v36 = vshll.u32 %v1352_v33, 16 }
 0x2d3   :  { %v2610_v10 = vsel %vm2609_vm6, %v2605_v8, inf  ;;  %v1199_v21 = vadd.s32 8, %v6792_v27  ;;  %v1339_v15 = vshll.u32 %v1338_v20, 16 }
 0x2d4   :  { %2611 = vmin.xlane.f32.xlu0 %v2610_v10  ;;  %2687 = vmin.xlane.f32.xlu1 %v2686_v43  ;;  %v1442_v10 = vcvt.f32.s32 %v6790_v3  ;;  %v6791_v43 = vld [vmem:[#allocation99_spill] sm:$0xff]  ;;  %v1235_v4 = vshll.u32 %v1234_v0, 16 }
 0x2d5   :  { %v1248_v54 = vcvt.f32.s32 %v6791_v43  ;;  %v1546_v43 = vcvt.f32.s32 %v5456_v12 }
 0x2d6   :  { %v1443_v3 = vshll.u32 %v1442_v10, 16  ;;  %v5770_v10 = vmul.u32 16, %v1199_v21  ;;  %v1561_v21 = vshll.u32 %v1560_v6, 16 }
 0x2d7   :  { %v1249_v51 = vshll.u32 %v1248_v54, 16  ;;  %v1547_v12 = vshll.u32 %v1546_v43, 16 }
 0x2d8   :  { %2493 = vmin.xlane.f32.xlu1 %v2492_v1  ;;  %v1233_v1 = vcvt.f32.s32 %v1232_v7  ;;  %v1444_v54 = vadd.s32 %v1443_v3, %v1441_v48  ;;  %v1384_v55 = vadd.s32 1, %v5770_v10  ;;  %v2811_v48 = vand.u32 65535, %v5465_v46  ;;  %v2950_v3 = vld [vmem:[#allocation7 + $0x278] sm:$0xff] }
 0x2d9   :  { %v5750_v24 = vpop.xlane.xlu1 %2517  ;;  %v1592_v46 = vadd.s32 3, %v5770_v10  ;;  %vm1284_vm3 = vcmp.lt.s32.totalorder %v5770_v10, 512 }
 0x2da   :  { %v1236_v18 = vadd.s32 %v1235_v4, %v1233_v1  ;;  %vm1495_vm14 = vcmp.eq.s32.totalorder %v4865_v49, %v1444_v54  ;;  %vm1388_vm2 = vcmp.lt.s32.totalorder %v1384_v55, 512  ;;  %v2707_v54 = vand.u32 65535, %v5484_v42  ;;  %v2981_v55 = vld [vmem:[#allocation7 + $0x370] sm:$0xff] }
 0x2db   :  { %v1200_v42 = vadd.s32 16, %v6792_v27 }
 0x2dc   :  { %2701 = vmin.xlane.f32.xlu1 %v2700_v28  ;;  %v5762_v28 = vmul.u32 16, %v6792_v27  ;;  %vm1287_vm11 = vcmp.eq.s32.totalorder %v4865_v49, %v1236_v18  ;;  %v1488_v18 = vadd.s32 2, %v5770_v10 }
 0x2dd   :  { %v5752_v8 = vpop.xlane.xlu1 %2725 }
 0x2de   :  { %v1383_v32 = vadd.s32 1, %v5762_v28  ;;  %vm1283_vm9 = vcmp.lt.s32.totalorder %v5762_v28, 512  ;;  %v1487_v5 = vadd.s32 2, %v5762_v28  ;;  %v1591_v4 = vadd.s32 3, %v5762_v28 }
 0x2df   :  { %vm1299_vm0 = vmand %vm1287_vm11, %vm1283_vm9  ;;  %vm1596_vm11 = vcmp.lt.s32.totalorder %v1592_v46, 512 }
 0x2e0   :  { %vm1387_vm10 = vcmp.lt.s32.totalorder %v1383_v32, 512  ;;  %vm1491_vm13 = vcmp.lt.s32.totalorder %v1487_v5, 512  ;;  %vm1595_vm1 = vcmp.lt.s32.totalorder %v1591_v4, 512  ;;  %v2997_v5 = vld [vmem:[#allocation7 + $0x3f0] sm:$0xff]  ;;  %v2813_v4 = vcvt.s32.f32 %v2811_v48  ;;  %v2996_v48 = vld [vmem:[#allocation7 + $0x3e8] sm:$0xff] }
 0x2e1   :  { %v1246_v45 = vpop.xlane.xlu1 %1245  ;;  %vm5793_vm4 = vmand %vm1495_vm14, %vm1491_vm13  ;;  %vm1492_vm13 = vcmp.lt.s32.totalorder %v1488_v18, 512 }
 0x2e2   :  { %v1247_v16 = vcvt.f32.s32 %v1246_v45 }
 0x2e4   :  { %v1250_v1 = vadd.s32 %v1249_v51, %v1247_v16  ;;  %v6565_v51 = vmov 1.0  }
 0x2e5   :  { %v1336_v7 = vpop.xlane.xlu0 %1335  ;;  %v1454_v56 = vpop.xlane.xlu1 %1453 }
 0x2e6   :  { %v1337_v0 = vcvt.f32.s32 %v1336_v7  ;;  %v1455_v26 = vcvt.f32.s32 %v1454_v56  ;;  %vm1288_vm7 = vcmp.eq.s32.totalorder %v4865_v49, %v1250_v1  ;;  %v6795_v1 = vld [vmem:[#allocation103_spill] sm:$0xff] }
 0x2e8   :  { %v1340_v14 = vadd.s32 %v1339_v15, %v1337_v0  ;;  %v1458_v6 = vadd.s32 %v1457_v60, %v1455_v26  ;;  %v2982_v15 = vld [vmem:[#allocation7 + $0x378] sm:$0xff]  ;;  %v2964_v26 = vld [vmem:[#allocation7 + $0x2e8] sm:$0xff] }
 0x2e9   :  { %v1544_v58 = vpop.xlane.xlu0 %1543  ;;  %v1350_v33 = vpop.xlane.xlu1 %1349 }
 0x2ea   :  { %v1545_v45 = vcvt.f32.s32 %v1544_v58  ;;  %v1351_v20 = vcvt.f32.s32 %v1350_v33  ;;  %vm1391_vm12 = vcmp.eq.s32.totalorder %v4865_v49, %v1340_v14  ;;  %v2965_v14 = vld [vmem:[#allocation7 + $0x2f0] sm:$0xff]  ;;  %vm1496_vm14 = vcmp.eq.s32.totalorder %v4865_v49, %v1458_v6  ;;  %v2948_v33 = vld [vmem:[#allocation7 + $0x268] sm:$0xff] }
 0x2eb   :  { %vm1403_vm15 = vmand %vm1391_vm12, %vm1387_vm10  ;;  %v6800_v6 = vld [vmem:[#allocation29_spill] sm:$0xff] }
 0x2ec   :  { %v1548_v56 = vadd.s32 %v1547_v12, %v1545_v45  ;;  %v1354_v16 = vadd.s32 %v1353_v36, %v1351_v20  ;;  %3931 = vmatprep.mubr.msk.f32.mxu0 %vm1403_vm15, %v6565_v51  ;;  %vm1300_vm12 = vmand %vm1288_vm7, %vm1284_vm3  ;;  %v2513_v45 = vand.u32 65535, %v6795_v1  ;;  %v1262_v20 = vcvt.f32.s32 %v5398_v63  ;;  %v2947_v63 = vld [vmem:[#allocation7 + $0x260] sm:$0xff] }
 0x2ed   :  { %3932 = vmatmul.mubr.msk.f32.vlgmr.msra.gmra.mxu0 %vm1299_vm0, %v6565_v51  ;;  %v5786_v43 = vpop.xlane.xlu0 %2503  ;;  %v1558_v32 = vpop.xlane.xlu1 %1557  ;;  %v6799_v36 = vld [vmem:[#allocation107_spill] sm:$0xff] }
 0x2ee   :  { %vm2505_vm5 = vcmp.eq.f32.partialorder %v5478_v53, %v5786_v43  ;;  %v1559_v60 = vcvt.f32.s32 %v1558_v32  ;;  %vm1599_vm6 = vcmp.eq.s32.totalorder %v4865_v49, %v1548_v56  ;;  %4084 = vmatpush3.msra.mxu0 %v2950_v3  ;;  %vm1392_vm9 = vcmp.eq.s32.totalorder %v4865_v49, %v1354_v16  ;;  %v2949_v53 = vld [vmem:[#allocation7 + $0x270] sm:$0xff] }
 0x2ef   :  { %vm1611_vm8 = vmand %vm1599_vm6, %vm1595_vm1  ;;  %v2506_v7 = vsel %vm2505_vm5, %v2501_v19, inf  ;;  %4085 = vmatprep.subr.mxu0 %v2965_v14  ;;  %v6797_v56 = vld [vmem:[#allocation106_spill] sm:$0xff]  ;;  %v2709_v32 = vcvt.s32.f32 %v2707_v54  ;;  %v1263_v1 = vshll.u32 %v1262_v20, 16 }
 0x2f0   :  { %v1562_v0 = vadd.s32 %v1561_v21, %v1559_v60  ;;  %3939 = vmatprep.mubr.msk.f32.mxu1 %vm1611_vm8, %v6565_v51  ;;  %2507 = vmin.xlane.f32.xlu1 %v2506_v7  ;;  %vm1404_vm10 = vmand %vm1392_vm9, %vm1388_vm2  ;;  %v6796_v21 = vld [vmem:[#allocation34_spill] sm:$0xff]  ;;  %v1470_v16 = vcvt.f32.s32 %v6797_v56  ;;  %v1366_v60 = vcvt.f32.s32 %v6799_v36  ;;  %v5840_v7 = vmul.u32 16, %v1200_v42  ;;  %v6803_v56 = vld [vmem:[#allocation35_spill] sm:$0xff] }
 0x2f1   :  { %3940 = vmatmul.mubr.msk.f32.vlgmr.msra.gmra.mxu1 %vm5793_vm4, %v6565_v51  ;;  %v5809_v19 = vpop.xlane.xlu0 %2815  ;;  %3933 = vmatprep.mubr.msk.f32.mxu0 %vm1404_vm10, %v6565_v51  ;;  %v5812_v12 = vpop.xlane.xlu1 %1259  ;;  %vm1508_vm2 = vmand %vm1496_vm14, %vm1492_vm13  ;;  %v2617_v3 = vand.u32 65535, %v6796_v21  ;;  %v2515_v42 = vcvt.s32.f32 %v2513_v45  ;;  %v2979_v21 = vld [vmem:[#allocation7 + $0x360] sm:$0xff]  ;;  %v2825_v36 = vand.u32 65535, %v6803_v56 }
 0x2f2   :  { %vm2817_vm15 = vcmp.eq.f32.partialorder %v5497_v31, %v5809_v19  ;;  %3934 = vmatmul.mubr.msk.f32.gmra.mxu0 %vm1300_vm12, %v6565_v51  ;;  %vm1600_vm0 = vcmp.eq.s32.totalorder %v4865_v49, %v1562_v0  ;;  %4128 = vmatpush3.msra.mxu1 %v2982_v15  ;;  %v2963_v31 = vld [vmem:[#allocation7 + $0x2e0] sm:$0xff]  ;;  %v1261_v18 = vcvt.f32.s32 %v5812_v12  ;;  %v2962_v15 = vld [vmem:[#allocation7 + $0x2d8] sm:$0xff]  ;;  %v2980_v0 = vld [vmem:[#allocation7 + $0x368] sm:$0xff]  ;;  %v1367_v20 = vshll.u32 %v1366_v60, 16 }
 0x2f3   :  { %v2818_v58 = vsel %vm2817_vm15, %v2813_v4, inf  ;;  %vm1612_vm1 = vmand %vm1600_vm0, %vm1596_vm11  ;;  %4086 = vmatpush3.msra.mxu0 %v2949_v53  ;;  %4129 = vmatprep.subr.mxu1 %v2997_v5  ;;  %v6801_v53 = vld [vmem:[#allocation105_spill] sm:$0xff]  ;;  %v1574_v4 = vcvt.f32.s32 %v5428_v29  ;;  %v6802_v12 = vld [vmem:[#allocation104_spill] sm:$0xff]  ;;  %vm1285_vm8 = vcmp.lt.s32.totalorder %v5840_v7, 512 }
 0x2f4   :  { %2819 = vmin.xlane.f32.xlu0 %v2818_v58  ;;  %3941 = vmatprep.mubr.msk.f32.mxu1 %vm1612_vm1, %v6565_v51  ;;  %v2721_v5 = vand.u32 65535, %v6801_v53  ;;  %v2995_v58 = vld [vmem:[#allocation7 + $0x3e0] sm:$0xff]  ;;  %vm2519_vm4 = vcmp.eq.f32.partialorder %v6802_v12, %v5750_v24  ;;  %v1264_v53 = vadd.s32 %v1263_v1, %v1261_v18  ;;  %v2978_v60 = vld [vmem:[#allocation7 + $0x358] sm:$0xff] }
 0x2f5   :  { %v5833_v46 = vpop.xlane.xlu0 %2711  ;;  %v1468_v14 = vpop.xlane.xlu1 %1467  ;;  %3942 = vmatmul.mubr.msk.f32.gmra.mxu1 %vm1508_vm2, %v6565_v51  ;;  %4087 = vmatprep.subr.mxu0 %v2964_v26  ;;  %v2946_v26 = vld [vmem:[#allocation7 + $0x258] sm:$0xff] }
 0x2f6   :  { %6798 = vst [vmem:[#allocation58_spill] sm:$0xff] %v5833_v46  ;;  %vm2713_vm3 = vcmp.eq.f32.partialorder %v6800_v6, %v5833_v46  ;;  %4088 = vmatpush3.msra.mxu0 %v2948_v33  ;;  %4130 = vmatpush3.msra.mxu1 %v2981_v55  ;;  %v1385_v33 = vadd.s32 1, %v5840_v7  ;;  %v2961_v55 = vld [vmem:[#allocation7 + $0x2d0] sm:$0xff]  ;;  %v1471_v6 = vshll.u32 %v1470_v16, 16  ;;  %v1469_v29 = vcvt.f32.s32 %v1468_v14  ;;  %v2994_v51 = vld [vmem:[#allocation7 + $0x3d8] sm:$0xff] }
 0x2f7   :  { %v2714_v54 = vsel %vm2713_vm3, %v2709_v32, inf  ;;  %4089 = vmatprep.subr.mxu0 %v2963_v31  ;;  %4131 = vmatprep.subr.mxu1 %v2996_v48  ;;  %v2619_v48 = vcvt.s32.f32 %v2617_v3  ;;  %v1575_v46 = vshll.u32 %v1574_v4, 16  ;;  %v2520_v16 = vsel %vm2519_vm4, %v2515_v42, inf  ;;  %v2960_v3 = vld [vmem:[#allocation7 + $0x2c8] sm:$0xff]  ;;  %v6805_v18 = vld [vmem:[#allocation31_spill] sm:$0xff] }
 0x2f8   :  { %2715 = vmin.xlane.f32.xlu1 %v2714_v54  ;;  %4090 = vmatpush3.msra.mxu0 %v2947_v63  ;;  %v6804_v54 = vld [vmem:[#allocation33_spill] sm:$0xff]  ;;  %v2723_v56 = vcvt.s32.f32 %v2721_v5  ;;  %vm2727_vm6 = vcmp.eq.f32.partialorder %v6805_v18, %v5752_v8  ;;  %vm1389_vm7 = vcmp.lt.s32.totalorder %v1385_v33, 512  ;;  %v2827_v5 = vcvt.s32.f32 %v2825_v36 }
 0x2f9   :  { %v5848_v32 = vpop.xlane.xlu0 %2621  ;;  %v1364_v31 = vpop.xlane.xlu1 %1363  ;;  %4091 = vmatprep.subr.mxu0 %v2962_v15  ;;  %4132 = vmatpush3.msra.mxu1 %v2980_v0  ;;  %v2945_v63 = vld [vmem:[#allocation7 + $0x250] sm:$0xff]  ;;  %v1593_v0 = vadd.s32 3, %v5840_v7  ;;  %v2944_v4 = vld [vmem:[#allocation7 + $0x248] sm:$0xff]  ;;  %v1489_v42 = vadd.s32 2, %v5840_v7  ;;  %vm1289_vm11 = vcmp.eq.s32.totalorder %v4865_v49, %v1264_v53  ;;  %v1201_v33 = vadd.s32 24, %v6792_v27 }
 0x2fa   :  { %vm2623_vm5 = vcmp.eq.f32.partialorder %v6804_v54, %v5848_v32  ;;  %v1365_v45 = vcvt.f32.s32 %v1364_v31  ;;  %4092 = vmatpush3.msra.mxu0 %v2946_v26  ;;  %4133 = vmatprep.subr.mxu1 %v2995_v58  ;;  %v2993_v26 = vld [vmem:[#allocation7 + $0x3d0] sm:$0xff]  ;;  %v1472_v58 = vadd.s32 %v1471_v6, %v1469_v29  ;;  %v2728_v36 = vsel %vm2727_vm6, %v2723_v56, inf  ;;  %v2992_v31 = vld [vmem:[#allocation7 + $0x3c8] sm:$0xff]  ;;  %vm1301_vm14 = vmand %vm1289_vm11, %vm1285_vm8 }
 0x2fb   :  { %v2624_v14 = vsel %vm2623_vm5, %v2619_v48, inf  ;;  %4093 = vmatprep.subr.mxu0 %v2961_v55  ;;  %4134 = vmatpush3.msra.mxu1 %v2979_v21  ;;  %v2959_v21 = vld [vmem:[#allocation7 + $0x2c0] sm:$0xff]  ;;  %vm1597_vm13 = vcmp.lt.s32.totalorder %v1593_v0, 512  ;;  %vm1493_vm15 = vcmp.lt.s32.totalorder %v1489_v42, 512  ;;  %v2976_v53 = vld [vmem:[#allocation7 + $0x348] sm:$0xff]  ;;  %v2941_v56 = vld [vmem:[#allocation7 + $0x230] sm:$0xff] }
 0x2fc   :  { %v1368_v15 = vadd.s32 %v1367_v20, %v1365_v45  ;;  %2521 = vmin.xlane.f32.xlu1 %v2520_v16  ;;  %2625 = vmin.xlane.f32.xlu0 %v2624_v14  ;;  %v6806_v20 = vmov 1.0   ;;  %vm1497_vm0 = vcmp.eq.s32.totalorder %v4865_v49, %v1472_v58  ;;  %v2942_v45 = vld [vmem:[#allocation7 + $0x238] sm:$0xff]  ;;  %v2957_v16 = vld [vmem:[#allocation7 + $0x2b0] sm:$0xff]  ;;  %v2991_v14 = vld [vmem:[#allocation7 + $0x3c0] sm:$0xff]  ;;  %v5891_v0 = vmul.u32 16, %v1201_v33 }
 0x2fd   :  { %v5858_v1 = vpop.xlane.xlu0 %2829  ;;  %v1572_v12 = vpop.xlane.xlu1 %1571  ;;  %4094 = vmatpush3.msra.mxu0 %v2945_v63  ;;  %4135 = vmatprep.subr.mxu1 %v2994_v51  ;;  %v2977_v51 = vld [vmem:[#allocation7 + $0x350] sm:$0xff]  ;;  %v1276_v63 = vcvt.f32.s32 %v5449_v13  ;;  %vm1509_vm3 = vmand %vm1497_vm0, %vm1493_vm15  ;;  %v2975_v13 = vld [vmem:[#allocation7 + $0x340] sm:$0xff] }
 0x2fe   :  { %vm2831_vm9 = vcmp.eq.f32.partialorder %v5542_v41, %v5858_v1  ;;  %v1573_v55 = vcvt.f32.s32 %v1572_v12  ;;  %vm1393_vm10 = vcmp.eq.s32.totalorder %v4865_v49, %v1368_v15  ;;  %4095 = vmatprep.subr.mxu0 %v2960_v3  ;;  %4136 = vmatpush3.msra.mxu1 %v2978_v60  ;;  %v2943_v41 = vld [vmem:[#allocation7 + $0x240] sm:$0xff]  ;;  %v2956_v18 = vld [vmem:[#allocation7 + $0x2a8] sm:$0xff]  ;;  %v1380_v15 = vcvt.f32.s32 %v5488_v38  ;;  %v2938_v33 = vld [vmem:[#allocation7 + $0x218] sm:$0xff] }
 0x2ff   :  { %v2832_v6 = vsel %vm2831_vm9, %v2827_v5, inf  ;;  %vm1405_vm12 = vmand %vm1393_vm10, %vm1389_vm7  ;;  %4096 = vmatpush3.msra.mxu0 %v2944_v4  ;;  %4137 = vmatprep.subr.mxu1 %v2993_v26  ;;  %v2990_v4 = vld [vmem:[#allocation7 + $0x3b8] sm:$0xff]  ;;  %v2940_v26 = vld [vmem:[#allocation7 + $0x228] sm:$0xff]  ;;  %v1277_v58 = vshll.u32 %v1276_v63, 16  ;;  %v1484_v12 = vcvt.f32.s32 %v5470_v34  ;;  %v1588_v34 = vcvt.f32.s32 %v5505_v2 }
 0x300   :  { %v1576_v29 = vadd.s32 %v1575_v46, %v1573_v55  ;;  %2729 = vmin.xlane.f32.xlu1 %v2728_v36  ;;  %2833 = vmin.xlane.f32.xlu0 %v2832_v6  ;;  %v2958_v46 = vld [vmem:[#allocation7 + $0x2b8] sm:$0xff]  ;;  %v2955_v42 = vld [vmem:[#allocation7 + $0x2a0] sm:$0xff]  ;;  %v1386_v55 = vadd.s32 1, %v5891_v0  ;;  %v2937_v2 = vld [vmem:[#allocation7 + $0x210] sm:$0xff]  ;;  %vm1286_vm5 = vcmp.lt.s32.totalorder %v5891_v0, 512 }
 0x301   :  { %v5870_v48 = vpop.xlane.xlu0 %1765  ;;  %3935 = vmatprep.mubr.msk.f32.mxu0 %vm1405_vm12, %v6806_v20  ;;  %v1274_v54 = vpop.xlane.xlu1 %1273  ;;  %4097 = vmatprep.subr.mxu0 %v2959_v21  ;;  %v2974_v5 = vld [vmem:[#allocation7 + $0x338] sm:$0xff]  ;;  %v2989_v21 = vld [vmem:[#allocation7 + $0x3b0] sm:$0xff]  ;;  %v2939_v36 = vld [vmem:[#allocation7 + $0x220] sm:$0xff] }
 0x302   :  { %3936 = vmatmul.mubr.msk.f32.gmra.mxu0 %vm1301_vm14, %v6806_v20  ;;  %vm1601_vm1 = vcmp.eq.s32.totalorder %v4865_v49, %v1576_v29  ;;  %4138 = vmatpush3.msra.mxu1 %v2977_v51  ;;  %v1275_v3 = vcvt.f32.s32 %v1274_v54  ;;  %v2973_v29 = vld [vmem:[#allocation7 + $0x330] sm:$0xff]  ;;  %vm1390_vm4 = vcmp.lt.s32.totalorder %v1386_v55, 512 }
 0x303   :  { %vm1613_vm2 = vmand %vm1601_vm1, %vm1597_vm13  ;;  %4098 = vmatpush3.msra.mxu0 %v2943_v41  ;;  %4139 = vmatprep.subr.mxu1 %v2992_v31  ;;  %v2954_v41 = vld [vmem:[#allocation7 + $0x298] sm:$0xff]  ;;  %v1381_v31 = vshll.u32 %v1380_v15, 16  ;;  %v2971_v15 = vld [vmem:[#allocation7 + $0x320] sm:$0xff] }
 0x304   :  { %3943 = vmatprep.mubr.msk.f32.mxu1 %vm1613_vm2, %v6806_v20  ;;  %4099 = vmatprep.subr.mxu0 %v2958_v46  ;;  %v1278_v38 = vadd.s32 %v1277_v58, %v1275_v3  ;;  %v2988_v46 = vld [vmem:[#allocation7 + $0x3a8] sm:$0xff]  ;;  %v2987_v3 = vld [vmem:[#allocation7 + $0x3a0] sm:$0xff] }
 0x305   :  { %v5887_v27 = vpop.xlane.xlu0 %1973  ;;  %v1482_v60 = vpop.xlane.xlu1 %1481  ;;  %3944 = vmatmul.mubr.msk.f32.gmra.mxu1 %vm1509_vm3, %v6806_v20  ;;  %4100 = vmatpush3.msra.mxu0 %v2942_v45  ;;  %v1485_v45 = vshll.u32 %v1484_v12, 16  ;;  %v2952_v58 = vld [vmem:[#allocation7 + $0x288] sm:$0xff]  ;;  %v2986_v12 = vld [vmem:[#allocation7 + $0x398] sm:$0xff] }
 0x306   :  { %4140 = vmatpush3.msra.mxu1 %v2976_v53  ;;  %4101 = vmatprep.subr.mxu0 %v2957_v16  ;;  %v1483_v6 = vcvt.f32.s32 %v1482_v60  ;;  %v2972_v53 = vld [vmem:[#allocation7 + $0x328] sm:$0xff]  ;;  %v2953_v16 = vld [vmem:[#allocation7 + $0x290] sm:$0xff]  ;;  %vm1290_vm6 = vcmp.eq.s32.totalorder %v4865_v49, %v1278_v38  ;;  %v2935_v38 = vld [vmem:[#allocation7 + $0x200] sm:$0xff] }
 0x307   :  { %4141 = vmatprep.subr.mxu1 %v2991_v14  ;;  %4102 = vmatpush3.msra.mxu0 %v2941_v56  ;;  %v1594_v56 = vadd.s32 3, %v5891_v0  ;;  %vm1302_vm9 = vmand %vm1290_vm6, %vm1286_vm5 }
 0x308   :  { %4142 = vmatpush3.msra.mxu1 %v2975_v13  ;;  %4103 = vmatprep.subr.mxu0 %v2956_v18  ;;  %v1486_v60 = vadd.s32 %v1485_v45, %v1483_v6  ;;  %v1490_v18 = vadd.s32 2, %v5891_v0  ;;  %v2968_v45 = vld [vmem:[#allocation7 + $0x308] sm:$0xff] }
 0x309   :  { %v1378_v51 = vpop.xlane.xlu1 %1377  ;;  %4143 = vmatprep.subr.mxu1 %v2990_v4  ;;  %4104 = vmatpush3.msra.mxu0 %v2940_v26  ;;  %v5896_v63 = vpop.xlane.xlu0 %1779  ;;  %v1589_v4 = vshll.u32 %v1588_v34, 16  ;;  %vm1598_vm10 = vcmp.lt.s32.totalorder %v1594_v56, 512  ;;  %v1768_v34 = vcvt.f32.s32 %v5486_v35  ;;  %v1767_v35 = vcvt.f32.s32 %v5870_v48 }
 0x30a   :  { %v1379_v54 = vcvt.f32.s32 %v1378_v51  ;;  %4144 = vmatpush3.msra.mxu1 %v2974_v5  ;;  %4105 = vmatprep.subr.mxu0 %v2955_v42  ;;  %v2936_v5 = vld [vmem:[#allocation7 + $0x208] sm:$0xff]  ;;  %vm1494_vm11 = vcmp.lt.s32.totalorder %v1490_v18, 512  ;;  %vm1498_vm12 = vcmp.eq.s32.totalorder %v4865_v49, %v1486_v60  ;;  %v2985_v51 = vld [vmem:[#allocation7 + $0x390] sm:$0xff]  ;;  %v1858_v56 = vcvt.f32.s32 %v5535_v59  ;;  %v3062_v18 = vld [vmem:[#allocation7 + $0x5f8] sm:$0xff] }
 0x30b   :  { %4145 = vmatprep.subr.mxu1 %v2989_v21  ;;  %4106 = vmatpush3.msra.mxu0 %v2939_v36  ;;  %v2970_v21 = vld [vmem:[#allocation7 + $0x318] sm:$0xff]  ;;  %v2951_v36 = vld [vmem:[#allocation7 + $0x280] sm:$0xff]  ;;  %vm1510_vm15 = vmand %vm1498_vm12, %vm1494_vm11  ;;  %v1769_v60 = vshll.u32 %v1768_v34, 16  ;;  %v1695_v48 = vadd.s32 4, %v5762_v28 }
 0x30c   :  { %v1382_v14 = vadd.s32 %v1381_v31, %v1379_v54  ;;  %4146 = vmatpush3.msra.mxu1 %v2973_v29  ;;  %4107 = vmatprep.subr.mxu0 %v2954_v41  ;;  %v1650_v29 = vcvt.f32.s32 %v5524_v11  ;;  %v2969_v41 = vld [vmem:[#allocation7 + $0x310] sm:$0xff]  ;;  %v3030_v31 = vld [vmem:[#allocation7 + $0x4f8] sm:$0xff]  ;;  %v2984_v54 = vld [vmem:[#allocation7 + $0x388] sm:$0xff] }
 0x30d   :  { %v1586_v13 = vpop.xlane.xlu1 %1585  ;;  %4147 = vmatprep.subr.mxu1 %v2988_v46  ;;  %4108 = vmatpush3.msra.mxu0 %v2938_v33  ;;  %v5909_v6 = vpop.xlane.xlu0 %1987  ;;  %v1976_v46 = vcvt.f32.s32 %v5513_v22  ;;  %v2967_v22 = vld [vmem:[#allocation7 + $0x300] sm:$0xff]  ;;  %v1770_v59 = vadd.s32 %v1769_v60, %v1767_v35  ;;  %vm1699_vm1 = vcmp.lt.s32.totalorder %v1695_v48, 512  ;;  %v1990_v35 = vcvt.f32.s32 %v5544_v40  ;;  %v3028_v40 = vld [vmem:[#allocation7 + $0x4e8] sm:$0xff] }
 0x30e   :  { %v1587_v26 = vcvt.f32.s32 %v1586_v13  ;;  %vm1394_vm7 = vcmp.eq.s32.totalorder %v4865_v49, %v1382_v14  ;;  %4148 = vmatpush3.msra.mxu1 %v2972_v53  ;;  %4109 = vmatprep.subr.mxu0 %v2953_v16  ;;  %v1754_v53 = vcvt.f32.s32 %v5546_v23  ;;  %v2983_v16 = vld [vmem:[#allocation7 + $0x380] sm:$0xff]  ;;  %v1651_v14 = vshll.u32 %v1650_v29, 16 }
 0x30f   :  { %vm1406_vm8 = vmand %vm1394_vm7, %vm1390_vm4  ;;  %4149 = vmatprep.subr.mxu1 %v2987_v3  ;;  %4110 = vmatpush3.msra.mxu0 %v2937_v2  ;;  %v1962_v3 = vcvt.f32.s32 %v5557_v57  ;;  %v1799_v13 = vadd.s32 5, %v5762_v28  ;;  %v1977_v23 = vshll.u32 %v1976_v46, 16  ;;  %v1800_v57 = vadd.s32 5, %v5770_v10 }
 0x310   :  { %v1590_v42 = vadd.s32 %v1589_v4, %v1587_v26  ;;  %3937 = vmatprep.mubr.msk.f32.mxu0 %vm1406_vm8, %v6806_v20  ;;  %4150 = vmatpush3.msra.mxu1 %v2971_v15  ;;  %vm1808_vm5 = vcmp.eq.s32.totalorder %v4865_v49, %v1770_v59  ;;  %v2008_v46 = vadd.s32 7, %v5770_v10  ;;  %v3011_v59 = vld [vmem:[#allocation7 + $0x460] sm:$0xff] }
 0x311   :  { %v1648_v55 = vpop.xlane.xlu1 %1647  ;;  %3938 = vmatmul.mubr.msk.f32.gmra.mxu0 %vm1302_vm9, %v6806_v20  ;;  %4111 = vmatprep.subr.mxu0 %v2952_v58  ;;  %v5927_v2 = vpop.xlane.xlu0 %1793  ;;  %v1755_v58 = vshll.u32 %v1754_v53, 16  ;;  %vm1803_vm0 = vcmp.lt.s32.totalorder %v1799_v13, 512  ;;  %vm1804_vm4 = vcmp.lt.s32.totalorder %v1800_v57, 512  ;;  %v3012_v13 = vld [vmem:[#allocation7 + $0x468] sm:$0xff]  ;;  %v1678_v57 = vcvt.f32.s32 %v5593_v25 }
 0x312   :  { %vm1602_vm13 = vcmp.eq.s32.totalorder %v4865_v49, %v1590_v42  ;;  %4151 = vmatprep.subr.mxu1 %v2986_v12  ;;  %4112 = vmatpush3.msra.mxu0 %v2936_v5  ;;  %v1649_v33 = vcvt.f32.s32 %v1648_v55  ;;  %v1782_v5 = vcvt.f32.s32 %v5530_v17  ;;  %v1859_v42 = vshll.u32 %v1858_v56, 16  ;;  %vm1820_vm11 = vmand %vm1808_vm5, %vm1804_vm4 }
 0x313   :  { %vm1614_vm14 = vmand %vm1602_vm13, %vm1598_vm10  ;;  %4152 = vmatpush3.msra.mxu1 %v2970_v21  ;;  %4113 = vmatprep.subr.mxu0 %v2951_v36  ;;  %v1963_v21 = vshll.u32 %v1962_v3, 16  ;;  %v1975_v36 = vcvt.f32.s32 %v5887_v27  ;;  %v1664_v55 = vcvt.f32.s32 %v5565_v52  ;;  %v1781_v27 = vcvt.f32.s32 %v5896_v63 }
 0x314   :  { %3945 = vmatprep.mubr.msk.f32.mxu1 %vm1614_vm14, %v6806_v20  ;;  %4153 = vmatprep.subr.mxu1 %v2985_v51  ;;  %v1652_v15 = vadd.s32 %v1651_v14, %v1649_v33  ;;  %v1783_v53 = vshll.u32 %v1782_v5, 16  ;;  %v1872_v56 = vcvt.f32.s32 %v5581_v37  ;;  %vm2012_vm14 = vcmp.lt.s32.totalorder %v2008_v46, 512 }
 0x315   :  { %v1856_v11 = vpop.xlane.xlu1 %1855  ;;  %3946 = vmatmul.mubr.msk.f32.gmra.mxu1 %vm1510_vm15, %v6806_v20  ;;  %4114 = vmatpush3.msra.mxu0 %v2935_v38  ;;  %v2007_v38 = vadd.s32 7, %v5762_v28  ;;  %v5937_v29 = vpop.xlane.xlu0 %2001  ;;  %v1978_v52 = vadd.s32 %v1977_v23, %v1975_v36  ;;  %v1665_v14 = vshll.u32 %v1664_v55, 16  ;;  %v1801_v37 = vadd.s32 5, %v5840_v7  ;;  %v3026_v36 = vld [vmem:[#allocation7 + $0x4d8] sm:$0xff]  ;;  %v3060_v55 = vld [vmem:[#allocation7 + $0x5e8] sm:$0xff] }
 0x316   :  { %4154 = vmatpush3.msra.mxu1 %v2969_v41  ;;  %4171 = vmatprep.subr.mxu0 %v3030_v31  ;;  %v1857_v4 = vcvt.f32.s32 %v1856_v11  ;;  %vm1703_vm2 = vcmp.eq.s32.totalorder %v4865_v49, %v1652_v15  ;;  %v1903_v41 = vadd.s32 6, %v5762_v28  ;;  %v3029_v11 = vld [vmem:[#allocation7 + $0x4f0] sm:$0xff]  ;;  %v1989_v23 = vcvt.f32.s32 %v5909_v6  ;;  %v3027_v15 = vld [vmem:[#allocation7 + $0x4e0] sm:$0xff] }
 0x317   :  { %4155 = vmatprep.subr.mxu1 %v2984_v54  ;;  %v3014_v54 = vld [vmem:[#allocation7 + $0x478] sm:$0xff]  ;;  %vm1715_vm7 = vmand %vm1703_vm2, %vm1699_vm1  ;;  %vm2011_vm8 = vcmp.lt.s32.totalorder %v2007_v38, 512  ;;  %vm2016_vm15 = vcmp.eq.s32.totalorder %v4865_v49, %v1978_v52  ;;  %v1873_v6 = vshll.u32 %v1872_v56, 16  ;;  %vm1805_vm5 = vcmp.lt.s32.totalorder %v1801_v37, 512  ;;  %v3044_v52 = vld [vmem:[#allocation7 + $0x568] sm:$0xff] }
 0x318   :  { %4156 = vmatpush3.msra.mxu1 %v2968_v45  ;;  %v1860_v31 = vadd.s32 %v1859_v42, %v1857_v4  ;;  %v1696_v45 = vadd.s32 4, %v5770_v10  ;;  %vm1907_vm9 = vcmp.lt.s32.totalorder %v1903_v41, 512  ;;  %v1991_v4 = vshll.u32 %v1990_v35, 16  ;;  %vm2028_vm2 = vmand %vm2016_vm15, %vm2012_vm14  ;;  %v3045_v42 = vld [vmem:[#allocation7 + $0x570] sm:$0xff]  ;;  %v3010_v38 = vld [vmem:[#allocation7 + $0x458] sm:$0xff] }
 0x319   :  { %v1752_v26 = vpop.xlane.xlu1 %1751  ;;  %4157 = vmatprep.subr.mxu1 %v2983_v16  ;;  %v3013_v16 = vld [vmem:[#allocation7 + $0x470] sm:$0xff]  ;;  %v5956_v60 = vpop.xlane.xlu0 %2167  ;;  %v2009_v41 = vadd.s32 7, %v5840_v7  ;;  %v1679_v46 = vshll.u32 %v1678_v57, 16  ;;  %v2004_v35 = vcvt.f32.s32 %v5573_v9  ;;  %v1802_v9 = vadd.s32 5, %v5891_v0 }
 0x31a   :  { %v1753_v12 = vcvt.f32.s32 %v1752_v26  ;;  %4158 = vmatpush3.msra.mxu1 %v2967_v22  ;;  %vm1911_vm10 = vcmp.eq.s32.totalorder %v4865_v49, %v1860_v31  ;;  %v1784_v22 = vadd.s32 %v1783_v53, %v1781_v27  ;;  %vm1700_vm1 = vcmp.lt.s32.totalorder %v1696_v45, 512  ;;  %v3025_v27 = vld [vmem:[#allocation7 + $0x4d0] sm:$0xff]  ;;  %v3043_v45 = vld [vmem:[#allocation7 + $0x560] sm:$0xff]  ;;  %v3024_v53 = vld [vmem:[#allocation7 + $0x4c8] sm:$0xff] }
 0x31b   :  { %4215 = vmatprep.subr.mxu1 %v3062_v18  ;;  %v3046_v18 = vld [vmem:[#allocation7 + $0x578] sm:$0xff]  ;;  %v1992_v25 = vadd.s32 %v1991_v4, %v1989_v23  ;;  %v1886_v31 = vcvt.f32.s32 %v5609_v30  ;;  %v3059_v30 = vld [vmem:[#allocation7 + $0x5e0] sm:$0xff]  ;;  %v1905_v4 = vadd.s32 6, %v5840_v7  ;;  %v1900_v57 = vcvt.f32.s32 %v5635_v61  ;;  %v3040_v61 = vld [vmem:[#allocation7 + $0x548] sm:$0xff] }
 0x31c   :  { %v1756_v51 = vadd.s32 %v1755_v58, %v1753_v12  ;;  %v3061_v58 = vld [vmem:[#allocation7 + $0x5f0] sm:$0xff]  ;;  %v1904_v12 = vadd.s32 6, %v5770_v10  ;;  %v3042_v23 = vld [vmem:[#allocation7 + $0x558] sm:$0xff] }
 0x31d   :  { %v1960_v17 = vpop.xlane.xlu1 %1959  ;;  %v1887_v56 = vshll.u32 %v1886_v31, 16  ;;  %v1698_v31 = vadd.s32 4, %v5891_v0 }
 0x31e   :  { %v1961_v34 = vcvt.f32.s32 %v1960_v17  ;;  %vm1807_vm3 = vcmp.eq.s32.totalorder %v4865_v49, %v1756_v51  ;;  %v5980_v17 = vpop.xlane.xlu0 %2375 }
 0x31f   :  { %vm1819_vm6 = vmand %vm1807_vm3, %vm1803_vm0 }
 0x320   :  { %v1964_v33 = vadd.s32 %v1963_v21, %v1961_v34  ;;  %3947 = vmatprep.mubr.msk.f32.mxu0 %vm1819_vm6, %v6806_v20  ;;  %vm1923_vm0 = vmand %vm1911_vm10, %vm1907_vm9  ;;  %v1796_v21 = vcvt.f32.s32 %v5555_v44  ;;  %vm1809_vm6 = vcmp.eq.s32.totalorder %v4865_v49, %v1784_v22  ;;  %v1795_v44 = vcvt.f32.s32 %v5927_v2  ;;  %v3009_v2 = vld [vmem:[#allocation7 + $0x450] sm:$0xff]  ;;  %v3008_v22 = vld [vmem:[#allocation7 + $0x448] sm:$0xff] }
 0x321   :  { %v1662_v63 = vpop.xlane.xlu1 %1661  ;;  %3948 = vmatmul.mubr.msk.f32.vlgmr.msra.gmra.mxu0 %vm1715_vm7, %v6806_v20  ;;  %vm1908_vm7 = vcmp.lt.s32.totalorder %v1904_v12, 512 }
 0x322   :  { %v1663_v3 = vcvt.f32.s32 %v1662_v63  ;;  %4172 = vmatpush3.msra.mxu0 %v3014_v54  ;;  %3949 = vmatprep.mubr.msk.f32.mxu0 %vm1820_vm11, %v6806_v20  ;;  %vm2015_vm12 = vcmp.eq.s32.totalorder %v4865_v49, %v1964_v33  ;;  %v1697_v54 = vadd.s32 4, %v5840_v7  ;;  %vm2013_vm11 = vcmp.lt.s32.totalorder %v2009_v41, 512  ;;  %v3021_v41 = vld [vmem:[#allocation7 + $0x4b0] sm:$0xff] }
 0x323   :  { %4173 = vmatprep.subr.mxu0 %v3029_v11  ;;  %vm2027_vm13 = vmand %vm2015_vm12, %vm2011_vm8  ;;  %v1797_v11 = vshll.u32 %v1796_v21, 16  ;;  %vm2017_vm12 = vcmp.eq.s32.totalorder %v4865_v49, %v1992_v25 }
 0x324   :  { %v1666_v48 = vadd.s32 %v1665_v14, %v1663_v3  ;;  %4174 = vmatpush3.msra.mxu0 %v3013_v16  ;;  %3955 = vmatprep.mubr.msk.f32.mxu1 %vm2027_vm13, %v6806_v20  ;;  %vm1821_vm8 = vmand %vm1809_vm6, %vm1805_vm5  ;;  %v3058_v14 = vld [vmem:[#allocation7 + $0x5d8] sm:$0xff]  ;;  %vm1701_vm13 = vcmp.lt.s32.totalorder %v1697_v54, 512  ;;  %v1901_v54 = vshll.u32 %v1900_v57, 16  ;;  %v2377_v16 = vcvt.f32.s32 %v5980_v17 }
 0x325   :  { %4175 = vmatprep.subr.mxu0 %v3028_v40  ;;  %v1870_v26 = vpop.xlane.xlu1 %1869  ;;  %3956 = vmatmul.mubr.msk.f32.vlgmr.msra.gmra.mxu1 %vm1923_vm0, %v6806_v20  ;;  %v1798_v3 = vadd.s32 %v1797_v11, %v1795_v44  ;;  %vm2029_vm15 = vmand %vm2017_vm12, %vm2013_vm11  ;;  %v2066_v11 = vcvt.f32.s32 %v5647_v39  ;;  %v2215_v39 = vadd.s32 9, %v5762_v28  ;;  %v2111_v57 = vadd.s32 8, %v5762_v28 }
 0x326   :  { %v1871_v5 = vcvt.f32.s32 %v1870_v26  ;;  %4176 = vmatpush3.msra.mxu0 %v3012_v13  ;;  %4216 = vmatpush3.msra.mxu1 %v3046_v18  ;;  %vm1704_vm3 = vcmp.eq.s32.totalorder %v4865_v49, %v1666_v48  ;;  %v1692_v13 = vcvt.f32.s32 %v5619_v50  ;;  %v2003_v18 = vcvt.f32.s32 %v5937_v29  ;;  %v3023_v48 = vld [vmem:[#allocation7 + $0x4c0] sm:$0xff]  ;;  %v3057_v50 = vld [vmem:[#allocation7 + $0x5d0] sm:$0xff] }
 0x327   :  { %3957 = vmatprep.mubr.msk.f32.mxu1 %vm2028_vm2, %v6806_v20  ;;  %4177 = vmatprep.subr.mxu0 %v3027_v15  ;;  %vm1716_vm4 = vmand %vm1704_vm3, %vm1700_vm1  ;;  %v6000_v15 = vpop.xlane.xlu0 %2181  ;;  %v3007_v29 = vld [vmem:[#allocation7 + $0x440] sm:$0xff]  ;;  %v2005_v26 = vshll.u32 %v2004_v35, 16  ;;  %vm1806_vm1 = vcmp.lt.s32.totalorder %v1802_v9, 512  ;;  %vm1810_vm2 = vcmp.eq.s32.totalorder %v4865_v49, %v1798_v3  ;;  %vm1909_vm3 = vcmp.lt.s32.totalorder %v1905_v4, 512 }
 0x328   :  { %v1874_v51 = vadd.s32 %v1873_v6, %v1871_v5  ;;  %4217 = vmatprep.subr.mxu1 %v3061_v58  ;;  %4178 = vmatpush3.msra.mxu0 %v3011_v59  ;;  %v3041_v59 = vld [vmem:[#allocation7 + $0x550] sm:$0xff]  ;;  %v2170_v6 = vcvt.f32.s32 %v5583_v62  ;;  %v3022_v5 = vld [vmem:[#allocation7 + $0x4b8] sm:$0xff]  ;;  %v2169_v62 = vcvt.f32.s32 %v5956_v60  ;;  %vm1822_vm5 = vmand %vm1810_vm2, %vm1806_vm1 }
 0x329   :  { %4218 = vmatpush3.msra.mxu1 %v3045_v42  ;;  %3950 = vmatmul.mubr.msk.f32.gmra.mxu0 %vm1716_vm4, %v6806_v20  ;;  %v1676_v34 = vpop.xlane.xlu1 %1675  ;;  %v3056_v42 = vld [vmem:[#allocation7 + $0x5c8] sm:$0xff]  ;;  %v3055_v60 = vld [vmem:[#allocation7 + $0x5c0] sm:$0xff] }
 0x32a   :  { %4179 = vmatprep.subr.mxu0 %v3026_v36  ;;  %4219 = vmatprep.subr.mxu1 %v3060_v55  ;;  %v1677_v33 = vcvt.f32.s32 %v1676_v34  ;;  %vm1912_vm9 = vcmp.eq.s32.totalorder %v4865_v49, %v1874_v51  ;;  %v1693_v36 = vshll.u32 %v1692_v13, 16  ;;  %v2006_v55 = vadd.s32 %v2005_v26, %v2003_v18  ;;  %v3006_v51 = vld [vmem:[#allocation7 + $0x438] sm:$0xff]  ;;  %v3005_v34 = vld [vmem:[#allocation7 + $0x430] sm:$0xff] }
 0x32b   :  { %3951 = vmatprep.mubr.msk.f32.mxu0 %vm1821_vm8, %v6806_v20  ;;  %4180 = vmatpush3.msra.mxu0 %v3010_v38  ;;  %vm5991_vm10 = vmand %vm1912_vm9, %vm1908_vm7  ;;  %v2010_v38 = vadd.s32 7, %v5891_v0  ;;  %vm1702_vm9 = vcmp.lt.s32.totalorder %v1698_v31, 512  ;;  %v1906_v13 = vadd.s32 6, %v5891_v0  ;;  %v3037_v18 = vld [vmem:[#allocation7 + $0x530] sm:$0xff]  ;;  %v3018_v26 = vld [vmem:[#allocation7 + $0x498] sm:$0xff] }
 0x32c   :  { %v1680_v63 = vadd.s32 %v1679_v46, %v1677_v33  ;;  %4220 = vmatpush3.msra.mxu1 %v3044_v52  ;;  %4181 = vmatprep.subr.mxu0 %v3025_v27  ;;  %v2171_v52 = vshll.u32 %v2170_v6, 16  ;;  %v2378_v27 = vcvt.f32.s32 %v5591_v47  ;;  %v6029_v46 = vpop.xlane.xlu0 %2389  ;;  %v3039_v33 = vld [vmem:[#allocation7 + $0x540] sm:$0xff]  ;;  %v3054_v47 = vld [vmem:[#allocation7 + $0x5b8] sm:$0xff]  ;;  %vm2018_vm8 = vcmp.eq.s32.totalorder %v4865_v49, %v2006_v55  ;;  %v3036_v55 = vld [vmem:[#allocation7 + $0x528] sm:$0xff] }
 0x32d   :  { %4221 = vmatprep.subr.mxu1 %v3059_v30  ;;  %4182 = vmatpush3.msra.mxu0 %v3009_v2  ;;  %v1884_v40 = vpop.xlane.xlu1 %1883  ;;  %v3020_v30 = vld [vmem:[#allocation7 + $0x4a8] sm:$0xff]  ;;  %vm2014_vm7 = vcmp.lt.s32.totalorder %v2010_v38, 512  ;;  %v3051_v38 = vld [vmem:[#allocation7 + $0x5a0] sm:$0xff] }
 0x32e   :  { %4222 = vmatpush3.msra.mxu1 %v3043_v45  ;;  %4183 = vmatprep.subr.mxu0 %v3024_v53  ;;  %v1885_v37 = vcvt.f32.s32 %v1884_v40  ;;  %vm1705_vm14 = vcmp.eq.s32.totalorder %v4865_v49, %v1680_v63  ;;  %v2172_v35 = vadd.s32 %v2171_v52, %v2169_v62  ;;  %v3004_v63 = vld [vmem:[#allocation7 + $0x428] sm:$0xff]  ;;  %vm2030_vm11 = vmand %vm2018_vm8, %vm2014_vm7  ;;  %v3053_v40 = vld [vmem:[#allocation7 + $0x5b0] sm:$0xff]  ;;  %v2379_v17 = vshll.u32 %v2378_v27, 16 }
 0x32f   :  { %3958 = vmatmul.mubr.msk.f32.gmra.mxu1 %vm5991_vm10, %v6806_v20  ;;  %4223 = vmatprep.subr.mxu1 %v3058_v14  ;;  %vm6011_vm0 = vmand %vm1705_vm14, %vm1701_vm13  ;;  %v3038_v14 = vld [vmem:[#allocation7 + $0x538] sm:$0xff]  ;;  %vm2219_vm13 = vcmp.lt.s32.totalorder %v2215_v39, 512 }
 0x330   :  { %v1888_v58 = vadd.s32 %v1887_v56, %v1885_v37  ;;  %3959 = vmatprep.mubr.msk.f32.mxu1 %vm2029_vm15, %v6806_v20  ;;  %4184 = vmatpush3.msra.mxu0 %v3008_v22  ;;  %v3019_v56 = vld [vmem:[#allocation7 + $0x4a0] sm:$0xff]  ;;  %v6060_v4 = vpop.xlane.xlu0 %2195  ;;  %vm2223_vm14 = vcmp.eq.s32.totalorder %v4865_v49, %v2172_v35  ;;  %v2380_v6 = vadd.s32 %v2379_v17, %v2377_v16  ;;  %vm1910_vm15 = vcmp.lt.s32.totalorder %v1906_v13, 512  ;;  %v3034_v45 = vld [vmem:[#allocation7 + $0x518] sm:$0xff]  ;;  %v3033_v13 = vld [vmem:[#allocation7 + $0x510] sm:$0xff] }
 0x331   :  { %4224 = vmatpush3.msra.mxu1 %v3042_v23  ;;  %4185 = vmatprep.subr.mxu0 %v3023_v48  ;;  %v1690_v21 = vpop.xlane.xlu1 %1689  ;;  %v3003_v22 = vld [vmem:[#allocation7 + $0x420] sm:$0xff]  ;;  %vm2235_vm1 = vmand %vm2223_vm14, %vm2219_vm13  ;;  %v2391_v35 = vcvt.f32.s32 %v6029_v46  ;;  %v6821_v46 = vld [vmem:[#allocation37_spill] sm:$0xff] }
 0x332   :  { %4225 = vmatprep.subr.mxu1 %v3057_v50  ;;  %4186 = vmatpush3.msra.mxu0 %v3007_v29  ;;  %v1691_v25 = vcvt.f32.s32 %v1690_v21  ;;  %vm1913_vm4 = vcmp.eq.s32.totalorder %v4865_v49, %v1888_v58  ;;  %v6815_v48 = vld [vmem:[#allocation36_spill] sm:$0xff]  ;;  %v2067_v29 = vshll.u32 %v2066_v11, 16  ;;  %v2183_v21 = vcvt.f32.s32 %v6000_v15  ;;  %v3001_v15 = vld [vmem:[#allocation7 + $0x410] sm:$0xff]  ;;  %v6818_v52 = vld [vmem:[#allocation43_spill] sm:$0xff] }
 0x333   :  { %4226 = vmatpush3.msra.mxu1 %v3041_v59  ;;  %3952 = vmatmul.mubr.msk.f32.gmra.mxu0 %vm6011_vm0, %v6806_v20  ;;  %vm6036_vm6 = vmand %vm1913_vm4, %vm1909_vm3  ;;  %v2184_v50 = vcvt.f32.s32 %v6815_v48  ;;  %v3052_v58 = vld [vmem:[#allocation7 + $0x5a8] sm:$0xff]  ;;  %v6816_v59 = vld [vmem:[#allocation42_spill] sm:$0xff]  ;;  %v2080_v27 = vcvt.f32.s32 %v6818_v52  ;;  %vm2431_vm4 = vcmp.eq.s32.totalorder %v4865_v49, %v2380_v6 }
 0x334   :  { %4187 = vmatprep.subr.mxu0 %v3022_v5  ;;  %4227 = vmatprep.subr.mxu1 %v3056_v42  ;;  %v1694_v44 = vadd.s32 %v1693_v36, %v1691_v25  ;;  %v2274_v12 = vcvt.f32.s32 %v6816_v59  ;;  %v3002_v5 = vld [vmem:[#allocation7 + $0x418] sm:$0xff]  ;;  %v2423_v42 = vadd.s32 11, %v5762_v28  ;;  %v3017_v25 = vld [vmem:[#allocation7 + $0x490] sm:$0xff]  ;;  %v3000_v11 = vld [vmem:[#allocation7 + $0x408] sm:$0xff]  ;;  %v2424_v59 = vadd.s32 11, %v5770_v10 }
 0x335   :  { %3953 = vmatprep.mubr.msk.f32.mxu0 %vm1822_vm5, %v6806_v20  ;;  %4188 = vmatpush3.msra.mxu0 %v3006_v51  ;;  %v1898_v2 = vpop.xlane.xlu1 %1897  ;;  %vm2115_vm5 = vcmp.lt.s32.totalorder %v2111_v57, 512  ;;  %v3015_v16 = vld [vmem:[#allocation7 + $0x480] sm:$0xff]  ;;  %v2081_v17 = vshll.u32 %v2080_v27, 16  ;;  %v3048_v48 = vld [vmem:[#allocation7 + $0x588] sm:$0xff]  ;;  %v3078_v57 = vld [vmem:[#allocation7 + $0x678] sm:$0xff] }
 0x336   :  { %4228 = vmatpush3.msra.mxu1 %v3040_v61  ;;  %4189 = vmatprep.subr.mxu0 %v3021_v41  ;;  %v1899_v53 = vcvt.f32.s32 %v1898_v2  ;;  %vm1706_vm10 = vcmp.eq.s32.totalorder %v4865_v49, %v1694_v44  ;;  %v2185_v61 = vshll.u32 %v2184_v50, 16  ;;  %v6817_v41 = vld [vmem:[#allocation32_spill] sm:$0xff]  ;;  %vm2427_vm3 = vcmp.lt.s32.totalorder %v2423_v42, 512  ;;  %v6085_v2 = vpop.xlane.xlu0 %2403  ;;  %v3094_v50 = vld [vmem:[#allocation7 + $0x6f8] sm:$0xff] }
 0x337   :  { %4229 = vmatprep.subr.mxu1 %v3055_v60  ;;  %4190 = vmatpush3.msra.mxu0 %v3005_v34  ;;  %vm6055_vm12 = vmand %vm1706_vm10, %vm1702_vm9  ;;  %v2392_v31 = vcvt.f32.s32 %v6817_v41  ;;  %v3035_v44 = vld [vmem:[#allocation7 + $0x520] sm:$0xff]  ;;  %v3016_v60 = vld [vmem:[#allocation7 + $0x488] sm:$0xff]  ;;  %v2275_v34 = vshll.u32 %v2274_v12, 16  ;;  %v2197_v12 = vcvt.f32.s32 %v6060_v4  ;;  %v2112_v42 = vadd.s32 8, %v5770_v10 }
 0x338   :  { %4230 = vmatpush3.msra.mxu1 %v3039_v33  ;;  %4191 = vmatprep.subr.mxu0 %v3020_v30  ;;  %v1902_v3 = vadd.s32 %v1901_v54, %v1899_v53  ;;  %v3050_v33 = vld [vmem:[#allocation7 + $0x598] sm:$0xff]  ;;  %v2186_v30 = vadd.s32 %v2185_v61, %v2183_v21  ;;  %v2216_v53 = vadd.s32 9, %v5770_v10  ;;  %vm2443_vm7 = vmand %vm2431_vm4, %vm2427_vm3  ;;  %v3093_v21 = vld [vmem:[#allocation7 + $0x6f0] sm:$0xff]  ;;  %v2217_v54 = vadd.s32 9, %v5840_v7 }
 0x339   :  { %3960 = vmatmul.mubr.msk.f32.gmra.mxu1 %vm6036_vm6, %v6806_v20  ;;  %4231 = vmatprep.subr.mxu1 %v3054_v47  ;;  %v2064_v9 = vpop.xlane.xlu1 %2063  ;;  %v6825_v4 = vld [vmem:[#allocation38_spill] sm:$0xff]  ;;  %v6828_v41 = vld [vmem:[#allocation48_spill] sm:$0xff] }
 0x33a   :  { %3961 = vmatprep.mubr.msk.f32.mxu1 %vm2030_vm11, %v6806_v20  ;;  %4192 = vmatpush3.msra.mxu0 %v3004_v63  ;;  %v2065_v23 = vcvt.f32.s32 %v2064_v9  ;;  %vm1914_vm0 = vcmp.eq.s32.totalorder %v4865_v49, %v1902_v3  ;;  %v2319_v63 = vadd.s32 10, %v5762_v28  ;;  %vm2220_vm9 = vcmp.lt.s32.totalorder %v2216_v53, 512  ;;  %v3076_v27 = vld [vmem:[#allocation7 + $0x668] sm:$0xff]  ;;  %v3125_v53 = vld [vmem:[#allocation7 + $0x7f0] sm:$0xff] }
 0x33b   :  { %4232 = vmatpush3.msra.mxu1 %v3038_v14  ;;  %4193 = vmatprep.subr.mxu0 %v3019_v56  ;;  %vm6080_vm2 = vmand %vm1914_vm0, %vm1910_vm15  ;;  %v3049_v14 = vld [vmem:[#allocation7 + $0x590] sm:$0xff]  ;;  %v2999_v56 = vld [vmem:[#allocation7 + $0x400] sm:$0xff]  ;;  %vm2224_vm10 = vcmp.eq.s32.totalorder %v4865_v49, %v2186_v30  ;;  %vm2428_vm15 = vcmp.lt.s32.totalorder %v2424_v59, 512  ;;  %v2113_v59 = vadd.s32 8, %v5840_v7 }
 0x33c   :  { %4233 = vmatprep.subr.mxu1 %v3053_v40  ;;  %4194 = vmatpush3.msra.mxu0 %v3003_v22  ;;  %v2068_v36 = vadd.s32 %v2067_v29, %v2065_v23  ;;  %v2393_v40 = vshll.u32 %v2392_v31, 16  ;;  %v2198_v22 = vcvt.f32.s32 %v6821_v46  ;;  %v6106_v23 = vpop.xlane.xlu0 %2209  ;;  %vm2323_vm11 = vcmp.lt.s32.totalorder %v2319_v63, 512  ;;  %vm2236_vm13 = vmand %vm2224_vm10, %vm2220_vm9  ;;  %v3110_v30 = vld [vmem:[#allocation7 + $0x778] sm:$0xff]  ;;  %v3124_v9 = vld [vmem:[#allocation7 + $0x7e8] sm:$0xff] }
 0x33d   :  { %4234 = vmatpush3.msra.mxu1 %v3037_v18  ;;  %3954 = vmatmul.mubr.msk.f32.gmra.mxu0 %vm6055_vm12, %v6806_v20  ;;  %v2272_v51 = vpop.xlane.xlu1 %2271  ;;  %v6824_v18 = vld [vmem:[#allocation47_spill] sm:$0xff]  ;;  %v2094_v31 = vcvt.f32.s32 %v6828_v41  ;;  %v3072_v41 = vld [vmem:[#allocation7 + $0x648] sm:$0xff] }
 0x33e   :  { %4195 = vmatprep.subr.mxu0 %v3018_v26  ;;  %4235 = vmatprep.subr.mxu1 %v3052_v58  ;;  %v2273_v62 = vcvt.f32.s32 %v2272_v51  ;;  %vm2119_vm6 = vcmp.eq.s32.totalorder %v4865_v49, %v2068_v36  ;;  %v2288_v37 = vcvt.f32.s32 %v6824_v18  ;;  %v2394_v26 = vadd.s32 %v2393_v40, %v2391_v35  ;;  %v3032_v58 = vld [vmem:[#allocation7 + $0x508] sm:$0xff]  ;;  %v3031_v36 = vld [vmem:[#allocation7 + $0x500] sm:$0xff] }
 0x33f   :  { %4196 = vmatpush3.msra.mxu0 %v3002_v5  ;;  %3963 = vmatprep.mubr.msk.f32.mxu0 %vm2235_vm1, %v6806_v20  ;;  %vm6101_vm8 = vmand %vm2119_vm6, %vm2115_vm5  ;;  %v3047_v5 = vld [vmem:[#allocation7 + $0x580] sm:$0xff]  ;;  %vm2116_vm1 = vcmp.lt.s32.totalorder %v2112_v42, 512  ;;  %v2095_v40 = vshll.u32 %v2094_v31, 16  ;;  %vm2221_vm5 = vcmp.lt.s32.totalorder %v2217_v54, 512  ;;  %v2218_v31 = vadd.s32 9, %v5891_v0 }
 0x340   :  { %4236 = vmatpush3.msra.mxu1 %v3036_v55  ;;  %4197 = vmatprep.subr.mxu0 %v3017_v25  ;;  %v2276_v39 = vadd.s32 %v2275_v34, %v2273_v62  ;;  %v2199_v55 = vshll.u32 %v2198_v22, 16  ;;  %v2406_v25 = vcvt.f32.s32 %v6825_v4  ;;  %v2289_v61 = vshll.u32 %v2288_v37, 16  ;;  %v6131_v52 = vpop.xlane.xlu0 %2417  ;;  %v3075_v35 = vld [vmem:[#allocation7 + $0x660] sm:$0xff]  ;;  %v3090_v22 = vld [vmem:[#allocation7 + $0x6d8] sm:$0xff] }
 0x341   :  { %4237 = vmatprep.subr.mxu1 %v3051_v38  ;;  %4198 = vmatpush3.msra.mxu0 %v3001_v15  ;;  %v2078_v47 = vpop.xlane.xlu1 %2077  ;;  %v3077_v38 = vld [vmem:[#allocation7 + $0x670] sm:$0xff]  ;;  %vm2432_vm0 = vcmp.eq.s32.totalorder %v4865_v49, %v2394_v26  ;;  %v3074_v37 = vld [vmem:[#allocation7 + $0x658] sm:$0xff]  ;;  %v3108_v26 = vld [vmem:[#allocation7 + $0x768] sm:$0xff]  ;;  %v2321_v54 = vadd.s32 10, %v5840_v7 }
 0x342   :  { %4238 = vmatpush3.msra.mxu1 %v3035_v44  ;;  %4199 = vmatprep.subr.mxu0 %v3016_v60  ;;  %v2079_v3 = vcvt.f32.s32 %v2078_v47  ;;  %vm2327_vm12 = vcmp.eq.s32.totalorder %v4865_v49, %v2276_v39  ;;  %v3092_v44 = vld [vmem:[#allocation7 + $0x6e8] sm:$0xff]  ;;  %v3126_v60 = vld [vmem:[#allocation7 + $0x7f8] sm:$0xff]  ;;  %v2200_v34 = vadd.s32 %v2199_v55, %v2197_v12  ;;  %vm2444_vm3 = vmand %vm2432_vm0, %vm2428_vm15  ;;  %v2407_v39 = vshll.u32 %v2406_v25, 16 }
 0x343   :  { %3962 = vmatmul.mubr.msk.f32.gmra.mxu1 %vm6080_vm2, %v6806_v20  ;;  %4239 = vmatprep.subr.mxu1 %v3050_v33  ;;  %vm6124_vm14 = vmand %vm2327_vm12, %vm2323_vm11  ;;  %v2405_v33 = vcvt.f32.s32 %v6085_v2  ;;  %v6834_v4 = vld [vmem:[#allocation44_spill] sm:$0xff] }
 0x344   :  { %4200 = vmatpush3.msra.mxu0 %v3000_v11  ;;  %4240 = vmatpush3.msra.mxu1 %v3034_v45  ;;  %v2082_v6 = vadd.s32 %v2081_v17, %v2079_v3  ;;  %v3091_v11 = vld [vmem:[#allocation7 + $0x6e0] sm:$0xff]  ;;  %v2320_v45 = vadd.s32 10, %v5770_v10  ;;  %v6154_v46 = vpop.xlane.xlu0 %2583  ;;  %vm2225_vm6 = vcmp.eq.s32.totalorder %v4865_v49, %v2200_v34  ;;  %v2420_v25 = vcvt.f32.s32 %v6834_v4  ;;  %v3106_v34 = vld [vmem:[#allocation7 + $0x758] sm:$0xff] }
 0x345   :  { %3971 = vmatprep.mubr.msk.f32.mxu1 %vm2443_vm7, %v6806_v20  ;;  %4201 = vmatprep.subr.mxu0 %v3015_v16  ;;  %v2286_v29 = vpop.xlane.xlu1 %2285  ;;  %v3109_v16 = vld [vmem:[#allocation7 + $0x770] sm:$0xff]  ;;  %v2408_v18 = vadd.s32 %v2407_v39, %v2405_v33  ;;  %vm2237_vm9 = vmand %vm2225_vm6, %vm2221_vm5 }
 0x346   :  { %4241 = vmatprep.subr.mxu1 %v3049_v14  ;;  %4202 = vmatpush3.msra.mxu0 %v2999_v56  ;;  %v2287_v15 = vcvt.f32.s32 %v2286_v29  ;;  %vm2120_vm2 = vcmp.eq.s32.totalorder %v4865_v49, %v2082_v6  ;;  %v6831_v56 = vld [vmem:[#allocation41_spill] sm:$0xff]  ;;  %vm2324_vm7 = vcmp.lt.s32.totalorder %v2320_v45, 512  ;;  %v3086_v14 = vld [vmem:[#allocation7 + $0x6b8] sm:$0xff] }
 0x347   :  { %4242 = vmatpush3.msra.mxu1 %v3033_v13  ;;  %3964 = vmatmul.mubr.msk.f32.vlgmr.msra.gmra.mxu0 %vm6101_vm8, %v6806_v20  ;;  %vm6149_vm4 = vmand %vm2120_vm2, %vm2116_vm1  ;;  %v2212_v3 = vcvt.f32.s32 %v6831_v56  ;;  %v6832_v13 = vld [vmem:[#allocation52_spill] sm:$0xff]  ;;  %v3073_v6 = vld [vmem:[#allocation7 + $0x650] sm:$0xff]  ;;  %vm2433_vm12 = vcmp.eq.s32.totalorder %v4865_v49, %v2408_v18  ;;  %vm2222_vm1 = vcmp.lt.s32.totalorder %v2218_v31, 512 }
 0x348   :  { %4243 = vmatprep.subr.mxu1 %v3048_v48  ;;  %4259 = vmatprep.subr.mxu0 %v3094_v50  ;;  %v2290_v47 = vadd.s32 %v2289_v61, %v2287_v15  ;;  %v2302_v17 = vcvt.f32.s32 %v6832_v13  ;;  %v2425_v48 = vadd.s32 11, %v5840_v7  ;;  %v2211_v50 = vcvt.f32.s32 %v6106_v23  ;;  %v3123_v23 = vld [vmem:[#allocation7 + $0x7e0] sm:$0xff]  ;;  %v3122_v15 = vld [vmem:[#allocation7 + $0x7d8] sm:$0xff]  ;;  %v6182_v61 = vpop.xlane.xlu0 %2791  ;;  %v6840_v39 = vld [vmem:[#allocation49_spill] sm:$0xff] }
 0x349   :  { %3965 = vmatprep.mubr.msk.f32.mxu0 %vm2236_vm13, %v6806_v20  ;;  %4244 = vmatpush3.msra.mxu1 %v3032_v58  ;;  %v2092_v62 = vpop.xlane.xlu1 %2091  ;;  %v3089_v58 = vld [vmem:[#allocation7 + $0x6d0] sm:$0xff]  ;;  %v2213_v42 = vshll.u32 %v2212_v3, 16  ;;  %vm2117_vm13 = vcmp.lt.s32.totalorder %v2113_v59, 512  ;;  %v3120_v56 = vld [vmem:[#allocation7 + $0x7c8] sm:$0xff]  ;;  %v2426_v13 = vadd.s32 11, %v5891_v0  ;;  %v3103_v59 = vld [vmem:[#allocation7 + $0x740] sm:$0xff] }
 0x34a   :  { %4260 = vmatpush3.msra.mxu0 %v3078_v57  ;;  %4245 = vmatprep.subr.mxu1 %v3047_v5  ;;  %v2093_v63 = vcvt.f32.s32 %v2092_v62  ;;  %vm2328_vm8 = vcmp.eq.s32.totalorder %v4865_v49, %v2290_v47  ;;  %v6833_v57 = vld [vmem:[#allocation40_spill] sm:$0xff]  ;;  %v2303_v51 = vshll.u32 %v2302_v17, 16  ;;  %vm2429_vm11 = vcmp.lt.s32.totalorder %v2425_v48, 512  ;;  %v3085_v48 = vld [vmem:[#allocation7 + $0x6b0] sm:$0xff]  ;;  %v3102_v31 = vld [vmem:[#allocation7 + $0x738] sm:$0xff] }
 0x34b   :  { %4261 = vmatprep.subr.mxu0 %v3093_v21  ;;  %4246 = vmatpush3.msra.mxu1 %v3031_v36  ;;  %v2108_v5 = vcvt.f32.s32 %v6833_v57  ;;  %v3107_v21 = vld [vmem:[#allocation7 + $0x760] sm:$0xff]  ;;  %v3088_v36 = vld [vmem:[#allocation7 + $0x6c8] sm:$0xff]  ;;  %vm6177_vm10 = vmand %vm2328_vm8, %vm2324_vm7  ;;  %v2214_v62 = vadd.s32 %v2213_v42, %v2211_v50  ;;  %v2421_v47 = vshll.u32 %v2420_v25, 16  ;;  %v2585_v17 = vcvt.f32.s32 %v6154_v46 }
 0x34c   :  { %4262 = vmatpush3.msra.mxu0 %v3077_v38  ;;  %3972 = vmatmul.mubr.msk.f32.vlgmr.msra.gmra.mxu1 %vm6124_vm14, %v6806_v20  ;;  %v2096_v29 = vadd.s32 %v2095_v40, %v2093_v63  ;;  %vm2445_vm15 = vmand %vm2433_vm12, %vm2429_vm11  ;;  %v6839_v63 = vld [vmem:[#allocation39_spill] sm:$0xff]  ;;  %v2114_v50 = vadd.s32 8, %v5891_v0  ;;  %v3069_v46 = vld [vmem:[#allocation7 + $0x630] sm:$0xff]  ;;  %vm2430_vm7 = vcmp.lt.s32.totalorder %v2426_v13, 512  ;;  %v2631_v38 = vadd.s32 13, %v5762_v28 }
 0x34d   :  { %4263 = vmatprep.subr.mxu0 %v3092_v44  ;;  %4303 = vmatprep.subr.mxu1 %v3126_v60  ;;  %v6143_v2 = vpop.xlane.xlu1 %2299  ;;  %v2419_v60 = vcvt.f32.s32 %v6131_v52  ;;  %v2109_v45 = vshll.u32 %v2108_v5, 16  ;;  %vm2226_vm2 = vcmp.eq.s32.totalorder %v4865_v49, %v2214_v62  ;;  %v6841_v57 = vld [vmem:[#allocation45_spill] sm:$0xff]  ;;  %v6842_v42 = vld [vmem:[#allocation50_spill] sm:$0xff] }
 0x34e   :  { %3973 = vmatprep.mubr.msk.f32.mxu1 %vm2444_vm3, %v6806_v20  ;;  %4264 = vmatpush3.msra.mxu0 %v3076_v27  ;;  %v2301_v55 = vcvt.f32.s32 %v6143_v2  ;;  %vm2121_vm14 = vcmp.eq.s32.totalorder %v4865_v49, %v2096_v29  ;;  %v3087_v27 = vld [vmem:[#allocation7 + $0x6c0] sm:$0xff]  ;;  %v2316_v2 = vcvt.f32.s32 %v6839_v63  ;;  %vm2325_vm3 = vcmp.lt.s32.totalorder %v2321_v54, 512  ;;  %vm2238_vm5 = vmand %vm2226_vm2, %vm2222_vm1  ;;  %v3068_v25 = vld [vmem:[#allocation7 + $0x628] sm:$0xff] }
 0x34f   :  { %4304 = vmatpush3.msra.mxu1 %v3110_v30  ;;  %4265 = vmatprep.subr.mxu0 %v3091_v11  ;;  %v3121_v30 = vld [vmem:[#allocation7 + $0x7d0] sm:$0xff]  ;;  %v3071_v11 = vld [vmem:[#allocation7 + $0x640] sm:$0xff]  ;;  %vm6201_vm0 = vmand %vm2121_vm14, %vm2117_vm13  ;;  %v2482_v5 = vcvt.f32.s32 %v6841_v57  ;;  %vm2635_vm13 = vcmp.lt.s32.totalorder %v2631_v38, 512 }
 0x350   :  { %4305 = vmatprep.subr.mxu1 %v3125_v53  ;;  %4266 = vmatpush3.msra.mxu0 %v3075_v35  ;;  %v2304_v33 = vadd.s32 %v2303_v51, %v2301_v55  ;;  %v3105_v53 = vld [vmem:[#allocation7 + $0x750] sm:$0xff]  ;;  %v3119_v29 = vld [vmem:[#allocation7 + $0x7c0] sm:$0xff]  ;;  %v3118_v55 = vld [vmem:[#allocation7 + $0x7b8] sm:$0xff] }
 0x351   :  { %4306 = vmatpush3.msra.mxu1 %v3109_v16  ;;  %3966 = vmatmul.mubr.msk.f32.gmra.mxu0 %vm6149_vm4, %v6806_v20  ;;  %v6165_v12 = vpop.xlane.xlu1 %2105  ;;  %v2586_v16 = vcvt.f32.s32 %v6840_v39  ;;  %v2483_v63 = vshll.u32 %v2482_v5, 16  ;;  %v3116_v39 = vld [vmem:[#allocation7 + $0x7a8] sm:$0xff]  ;;  %v6852_v57 = vld [vmem:[#allocation54_spill] sm:$0xff] }
 0x352   :  { %4267 = vmatprep.subr.mxu0 %v3090_v22  ;;  %4307 = vmatprep.subr.mxu1 %v3124_v9  ;;  %v2107_v52 = vcvt.f32.s32 %v6165_v12  ;;  %v6208_v3 = vpop.xlane.xlu0 %2597  ;;  %v2422_v22 = vadd.s32 %v2421_v47, %v2419_v60  ;;  %v3070_v9 = vld [vmem:[#allocation7 + $0x638] sm:$0xff]  ;;  %vm2329_vm4 = vcmp.eq.s32.totalorder %v4865_v49, %v2304_v33  ;;  %v3084_v12 = vld [vmem:[#allocation7 + $0x6a8] sm:$0xff]  ;;  %v2808_v5 = vcvt.f32.s32 %v6852_v57 }
 0x353   :  { %3967 = vmatprep.mubr.msk.f32.mxu0 %vm2237_vm9, %v6806_v20  ;;  %4268 = vmatpush3.msra.mxu0 %v3074_v37  ;;  %v3104_v37 = vld [vmem:[#allocation7 + $0x748] sm:$0xff]  ;;  %vm6231_vm6 = vmand %vm2329_vm4, %vm2325_vm3  ;;  %vm2118_vm9 = vcmp.lt.s32.totalorder %v2114_v50, 512  ;;  %v3114_v38 = vld [vmem:[#allocation7 + $0x798] sm:$0xff] }
 0x354   :  { %4308 = vmatpush3.msra.mxu1 %v3108_v26  ;;  %4269 = vmatprep.subr.mxu0 %v3089_v58  ;;  %v2110_v18 = vadd.s32 %v2109_v45, %v2107_v52  ;;  %v2317_v26 = vshll.u32 %v2316_v2, 16  ;;  %v2587_v58 = vshll.u32 %v2586_v16, 16  ;;  %vm2434_vm8 = vcmp.eq.s32.totalorder %v4865_v49, %v2422_v22  ;;  %v6847_v45 = vld [vmem:[#allocation55_spill] sm:$0xff]  ;;  %v3112_v35 = vld [vmem:[#allocation7 + $0x788] sm:$0xff] }
 0x355   :  { %4309 = vmatprep.subr.mxu1 %v3123_v23  ;;  %4270 = vmatpush3.msra.mxu0 %v3073_v6  ;;  %v6186_v44 = vpop.xlane.xlu1 %2313  ;;  %vm2446_vm11 = vmand %vm2434_vm8, %vm2430_vm7  ;;  %v2600_v47 = vcvt.f32.s32 %v6847_v45  ;;  %v3082_v2 = vld [vmem:[#allocation7 + $0x698] sm:$0xff]  ;;  %v2839_v16 = vadd.s32 15, %v5762_v28  ;;  %v2527_v22 = vadd.s32 12, %v5762_v28  ;;  %v3097_v45 = vld [vmem:[#allocation7 + $0x710] sm:$0xff] }
 0x356   :  { %4310 = vmatpush3.msra.mxu1 %v3107_v21  ;;  %4271 = vmatprep.subr.mxu0 %v3088_v36  ;;  %v2315_v23 = vcvt.f32.s32 %v6186_v44  ;;  %v2794_v21 = vcvt.f32.s32 %v6842_v42  ;;  %v2588_v4 = vadd.s32 %v2587_v58, %v2585_v17  ;;  %v6236_v51 = vpop.xlane.xlu0 %2805  ;;  %v3083_v44 = vld [vmem:[#allocation7 + $0x6a0] sm:$0xff]  ;;  %v3100_v17 = vld [vmem:[#allocation7 + $0x728] sm:$0xff]  ;;  %v3065_v58 = vld [vmem:[#allocation7 + $0x610] sm:$0xff]  ;;  %v2632_v36 = vadd.s32 13, %v5770_v10 }
 0x357   :  { %3974 = vmatmul.mubr.msk.f32.gmra.mxu1 %vm6177_vm10, %v6806_v20  ;;  %4311 = vmatprep.subr.mxu1 %v3122_v15  ;;  %vm2122_vm10 = vcmp.eq.s32.totalorder %v4865_v49, %v2110_v18  ;;  %v6845_v15 = vld [vmem:[#allocation46_spill] sm:$0xff]  ;;  %v2601_v50 = vshll.u32 %v2600_v47, 16  ;;  %v3099_v42 = vld [vmem:[#allocation7 + $0x720] sm:$0xff]  ;;  %vm2843_vm2 = vcmp.lt.s32.totalorder %v2839_v16, 512  ;;  %vm2531_vm3 = vcmp.lt.s32.totalorder %v2527_v22, 512 }
 0x358   :  { %3975 = vmatprep.mubr.msk.f32.mxu1 %vm2445_vm15, %v6806_v20  ;;  %4272 = vmatpush3.msra.mxu0 %v3072_v41  ;;  %v2690_v62 = vcvt.f32.s32 %v6845_v15  ;;  %v2793_v41 = vcvt.f32.s32 %v6182_v61  ;;  %v2318_v60 = vadd.s32 %v2317_v26, %v2315_v23  ;;  %v2322_v61 = vadd.s32 10, %v5891_v0  ;;  %vm6258_vm12 = vmand %vm2122_vm10, %vm2118_vm9  ;;  %v3081_v18 = vld [vmem:[#allocation7 + $0x690] sm:$0xff]  ;;  %v3115_v26 = vld [vmem:[#allocation7 + $0x7a0] sm:$0xff] }
 0x359   :  { %4312 = vmatpush3.msra.mxu1 %v3106_v34  ;;  %4273 = vmatprep.subr.mxu0 %v3087_v27  ;;  %v6210_v40 = vpop.xlane.xlu1 %2479  ;;  %v3117_v34 = vld [vmem:[#allocation7 + $0x7b0] sm:$0xff]  ;;  %v3067_v27 = vld [vmem:[#allocation7 + $0x620] sm:$0xff]  ;;  %vm2639_vm14 = vcmp.eq.s32.totalorder %v4865_v49, %v2588_v4  ;;  %v2807_v15 = vcvt.f32.s32 %v6236_v51  ;;  %vm2636_vm9 = vcmp.lt.s32.totalorder %v2632_v36, 512  ;;  %v2633_v47 = vadd.s32 13, %v5840_v7 }
 0x35a   :  { %4313 = vmatprep.subr.mxu1 %v3121_v30  ;;  %4274 = vmatpush3.msra.mxu0 %v3071_v11  ;;  %v2481_v54 = vcvt.f32.s32 %v6210_v40  ;;  %v2795_v30 = vshll.u32 %v2794_v21, 16  ;;  %v6846_v11 = vld [vmem:[#allocation51_spill] sm:$0xff]  ;;  %v2599_v40 = vcvt.f32.s32 %v6208_v3  ;;  %vm2326_vm15 = vcmp.lt.s32.totalorder %v2322_v61, 512  ;;  %vm2651_vm1 = vmand %vm2639_vm14, %vm2635_vm13  ;;  %v3080_v21 = vld [vmem:[#allocation7 + $0x688] sm:$0xff] }
 0x35b   :  { %4314 = vmatpush3.msra.mxu1 %v3105_v53  ;;  %3968 = vmatmul.mubr.msk.f32.gmra.mxu0 %vm6201_vm0, %v6806_v20  ;;  %v2496_v52 = vcvt.f32.s32 %v6846_v11  ;;  %v3101_v53 = vld [vmem:[#allocation7 + $0x730] sm:$0xff]  ;;  %vm2330_vm0 = vcmp.eq.s32.totalorder %v4865_v49, %v2318_v60  ;;  %v2735_v60 = vadd.s32 14, %v5762_v28  ;;  %v3063_v11 = vld [vmem:[#allocation7 + $0x600] sm:$0xff]  ;;  %v2736_v16 = vadd.s32 14, %v5770_v10 }
 0x35c   :  { %4275 = vmatprep.subr.mxu0 %v3086_v14  ;;  %4315 = vmatprep.subr.mxu1 %v3120_v56  ;;  %v2691_v14 = vshll.u32 %v2690_v62, 16  ;;  %v2796_v56 = vadd.s32 %v2795_v30, %v2793_v41  ;;  %v2484_v13 = vadd.s32 %v2483_v63, %v2481_v54  ;;  %vm6283_vm4 = vmand %vm2330_vm0, %vm2326_vm15  ;;  %v3064_v62 = vld [vmem:[#allocation7 + $0x608] sm:$0xff]  ;;  %v3098_v41 = vld [vmem:[#allocation7 + $0x718] sm:$0xff]  ;;  %v2809_v30 = vshll.u32 %v2808_v5, 16 }
 0x35d   :  { %3969 = vmatprep.mubr.msk.f32.mxu0 %vm2238_vm5, %v6806_v20  ;;  %4276 = vmatpush3.msra.mxu0 %v3070_v9  ;;  %v6224_v6 = vpop.xlane.xlu1 %2687  ;;  %v3066_v9 = vld [vmem:[#allocation7 + $0x618] sm:$0xff]  ;;  %v2497_v3 = vshll.u32 %v2496_v52, 16  ;;  %v3079_v54 = vld [vmem:[#allocation7 + $0x680] sm:$0xff]  ;;  %v3113_v51 = vld [vmem:[#allocation7 + $0x790] sm:$0xff]  ;;  %v2840_v63 = vadd.s32 15, %v5770_v10  ;;  %vm2739_vm13 = vcmp.lt.s32.totalorder %v2735_v60, 512 }
 0x35e   :  { %4316 = vmatpush3.msra.mxu1 %v3104_v37  ;;  %4277 = vmatprep.subr.mxu0 %v3085_v48  ;;  %v2612_v37 = vpop.xlane.xlu0 %2611  ;;  %vm2847_vm5 = vcmp.eq.s32.totalorder %v4865_v49, %v2796_v56  ;;  %v3095_v56 = vld [vmem:[#allocation7 + $0x700] sm:$0xff]  ;;  %v2634_v5 = vadd.s32 13, %v5891_v0 }
 0x35f   :  { %4317 = vmatprep.subr.mxu1 %v3119_v29  ;;  %4278 = vmatpush3.msra.mxu0 %v3069_v46  ;;  %v6850_v29 = vld [vmem:[#allocation56_spill] sm:$0xff]  ;;  %v2613_v4 = vcvt.f32.s32 %v2612_v37  ;;  %vm2859_vm7 = vmand %vm2847_vm5, %vm2843_vm2  ;;  %v2841_v37 = vadd.s32 15, %v5840_v7 }
 0x360   :  { %4318 = vmatpush3.msra.mxu1 %v3103_v59  ;;  %4279 = vmatprep.subr.mxu0 %v3084_v12  ;;  %v2614_v46 = vcvt.f32.s32 %v6850_v29  ;;  %v2689_v59 = vcvt.f32.s32 %v6224_v6  ;;  %v6851_v12 = vld [vmem:[#allocation53_spill] sm:$0xff] }
 0x361   :  { %3976 = vmatmul.mubr.msk.f32.gmra.mxu1 %vm6231_vm6, %v6806_v20  ;;  %4319 = vmatprep.subr.mxu1 %v3118_v55  ;;  %v6250_v33 = vpop.xlane.xlu1 %2493  ;;  %v2704_v23 = vcvt.f32.s32 %v6851_v12  ;;  %vm2535_vm6 = vcmp.eq.s32.totalorder %v4865_v49, %v2484_v13  ;;  %v2822_v13 = vcvt.f32.s32 %v5809_v19  ;;  %v2524_v19 = vcvt.f32.s32 %v5750_v24 }
 0x362   :  { %3977 = vmatprep.mubr.msk.f32.mxu1 %vm2446_vm11, %v6806_v20  ;;  %4280 = vmatpush3.msra.mxu0 %v3068_v25  ;;  %v2495_v48 = vcvt.f32.s32 %v6250_v33  ;;  %v2602_v25 = vadd.s32 %v2601_v50, %v2599_v40  ;;  %vm6301_vm8 = vmand %vm2535_vm6, %vm2531_vm3  ;;  %vm2740_vm6 = vcmp.lt.s32.totalorder %v2736_v16, 512  ;;  %v2529_v40 = vadd.s32 12, %v5840_v7  ;;  %v6857_v50 = vld [vmem:[#allocation58_spill] sm:$0xff] }
 0x363   :  { %4320 = vmatpush3.msra.mxu1 %v3102_v31  ;;  %4281 = vmatprep.subr.mxu0 %v3083_v44  ;;  %v2528_v44 = vadd.s32 12, %v5770_v10  ;;  %v2705_v33 = vshll.u32 %v2704_v23, 16  ;;  %v2510_v10 = vcvt.f32.s32 %v5786_v43  ;;  %v2718_v29 = vcvt.f32.s32 %v6857_v50 }
 0x364   :  { %4321 = vmatprep.subr.mxu1 %v3117_v34  ;;  %4282 = vmatpush3.msra.mxu0 %v3067_v27  ;;  %v2498_v31 = vadd.s32 %v2497_v3, %v2495_v48  ;;  %v2615_v34 = vshll.u32 %v2614_v46, 16  ;;  %v2692_v27 = vadd.s32 %v2691_v14, %v2689_v59  ;;  %vm2640_vm10 = vcmp.eq.s32.totalorder %v4865_v49, %v2602_v25  ;;  %v3111_v14 = vld [vmem:[#allocation7 + $0x780] sm:$0xff] }
 0x365   :  { %4322 = vmatpush3.msra.mxu1 %v3101_v53  ;;  %3970 = vmatmul.mubr.msk.f32.gmra.mxu0 %vm6258_vm12, %v6806_v20  ;;  %v2702_v55 = vpop.xlane.xlu1 %2701  ;;  %v2810_v53 = vadd.s32 %v2809_v30, %v2807_v15  ;;  %vm2532_vm11 = vcmp.lt.s32.totalorder %v2528_v44, 512  ;;  %vm2652_vm15 = vmand %vm2640_vm10, %vm2636_vm9  ;;  %v2823_v3 = vshll.u32 %v2822_v13, 16  ;;  %v2719_v59 = vshll.u32 %v2718_v29, 16 }
 0x366   :  { %4283 = vmatprep.subr.mxu0 %v3082_v2  ;;  %4323 = vmatprep.subr.mxu1 %v3116_v39  ;;  %v2703_v61 = vcvt.f32.s32 %v2702_v55  ;;  %v2616_v52 = vadd.s32 %v2615_v34, %v2613_v4  ;;  %vm2536_vm12 = vcmp.eq.s32.totalorder %v4865_v49, %v2498_v31  ;;  %vm2743_vm14 = vcmp.eq.s32.totalorder %v4865_v49, %v2692_v27  ;;  %v3096_v2 = vld [vmem:[#allocation7 + $0x708] sm:$0xff] }
 0x367   :  { %4284 = vmatpush3.msra.mxu0 %v3066_v9  ;;  %3979 = vmatprep.mubr.msk.f32.mxu0 %vm2651_vm1, %v6806_v20  ;;  %vm2548_vm0 = vmand %vm2536_vm12, %vm2532_vm11  ;;  %vm2637_vm1 = vcmp.lt.s32.totalorder %v2633_v47, 512  ;;  %vm2848_vm5 = vcmp.eq.s32.totalorder %v4865_v49, %v2810_v53  ;;  %v2511_v9 = vshll.u32 %v2510_v10, 16  ;;  %vm2533_vm11 = vcmp.lt.s32.totalorder %v2529_v40, 512 }
 0x368   :  { %4324 = vmatpush3.msra.mxu1 %v3100_v17  ;;  %4285 = vmatprep.subr.mxu0 %v3081_v18  ;;  %v2706_v39 = vadd.s32 %v2705_v33, %v2703_v61  ;;  %vm2641_vm2 = vcmp.eq.s32.totalorder %v4865_v49, %v2616_v52  ;;  %vm2755_vm3 = vmand %vm2743_vm14, %vm2739_vm13  ;;  %vm2845_vm14 = vcmp.lt.s32.totalorder %v2841_v37, 512  ;;  %v2628_v12 = vcvt.f32.s32 %v5848_v32 }
 0x369   :  { %4325 = vmatprep.subr.mxu1 %v3115_v26  ;;  %4286 = vmatpush3.msra.mxu0 %v3065_v58  ;;  %v2737_v26 = vadd.s32 14, %v5840_v7  ;;  %v2836_v7 = vcvt.f32.s32 %v5858_v1  ;;  %v2530_v55 = vadd.s32 12, %v5891_v0  ;;  %v2842_v15 = vadd.s32 15, %v5891_v0 }
 0x36a   :  { %4326 = vmatpush3.msra.mxu1 %v3099_v42  ;;  %4287 = vmatprep.subr.mxu0 %v3080_v21  ;;  %v2525_v42 = vshll.u32 %v2524_v19, 16  ;;  %v2732_v21 = vcvt.f32.s32 %v5752_v8  ;;  %v2629_v32 = vshll.u32 %v2628_v12, 16  ;;  %v2738_v31 = vadd.s32 14, %v5891_v0 }
 0x36b   :  { %3978 = vmatmul.mubr.msk.f32.gmra.mxu1 %vm6283_vm4, %v6806_v20  ;;  %4327 = vmatprep.subr.mxu1 %v3114_v38  ;;  %vm2844_vm4 = vcmp.lt.s32.totalorder %v2840_v63, 512 }
 0x36c   :  { %4288 = vmatpush3.msra.mxu0 %v3064_v62  ;;  %4328 = vmatpush3.msra.mxu1 %v3098_v41  ;;  %vm2860_vm9 = vmand %vm2848_vm5, %vm2844_vm4  ;;  %vm2638_vm4 = vcmp.lt.s32.totalorder %v2634_v5, 512  ;;  %v2733_v8 = vshll.u32 %v2732_v21, 16  ;;  %v2837_v62 = vshll.u32 %v2836_v7, 16  ;;  %vm2534_vm5 = vcmp.lt.s32.totalorder %v2530_v55, 512 }
 0x36d   :  { %3987 = vmatprep.mubr.msk.f32.mxu1 %vm2859_vm7, %v6806_v20  ;;  %4289 = vmatprep.subr.mxu0 %v3079_v54  ;;  %vm2744_vm7 = vcmp.eq.s32.totalorder %v4865_v49, %v2706_v39 }
 0x36e   :  { %4329 = vmatprep.subr.mxu1 %v3113_v51  ;;  %4290 = vmatpush3.msra.mxu0 %v3063_v11  ;;  %vm2756_vm10 = vmand %vm2744_vm7, %vm2740_vm6 }
 0x36f   :  { %4330 = vmatpush3.msra.mxu1 %v3097_v45  ;;  %3980 = vmatmul.mubr.msk.f32.vlgmr.msra.gmra.mxu0 %vm6301_vm8, %v6806_v20  ;;  %vm2653_vm8 = vmand %vm2641_vm2, %vm2637_vm1  ;;  %vm2741_vm1 = vcmp.lt.s32.totalorder %v2737_v26, 512 }
 0x370   :  { %4331 = vmatprep.subr.mxu1 %v3112_v35  ;;  %3981 = vmatprep.mubr.msk.f32.mxu0 %vm2652_vm15, %v6806_v20 }
 0x371   :  { %4332 = vmatpush3.msra.mxu1 %v3096_v2 }
 0x372   :  { %4333 = vmatprep.subr.mxu1 %v3111_v14 }
 0x373   :  { %4334 = vmatpush3.msra.mxu1 %v3095_v56  ;;  %3982 = vmatmul.mubr.msk.f32.gmra.mxu0 %vm2548_vm0, %v6806_v20 }
 0x374   :  { %3988 = vmatmul.mubr.msk.f32.vlgmr.msra.gmra.mxu1 %vm2755_vm3, %v6806_v20  ;;  %3983 = vmatprep.mubr.msk.f32.mxu0 %vm2653_vm8, %v6806_v20 }
 0x375   :  { %3989 = vmatprep.mubr.msk.f32.mxu1 %vm2860_vm9, %v6806_v20 }
 0x378   :  { %3990 = vmatmul.mubr.msk.f32.gmra.mxu1 %vm2756_vm10, %v6806_v20  ;;  %vm2846_vm10 = vcmp.lt.s32.totalorder %v2842_v15, 512 }
 0x379   :  { %v2508_v22 = vpop.xlane.xlu1 %2507 }
 0x37a   :  { %v2509_v17 = vcvt.f32.s32 %v2508_v22 }
 0x37c   :  { %v2512_v18 = vadd.s32 %v2511_v9, %v2509_v17 }
 0x37d   :  { %v2820_v48 = vpop.xlane.xlu0 %2819 }
 0x37e   :  { %v2821_v46 = vcvt.f32.s32 %v2820_v48  ;;  %vm2537_vm12 = vcmp.eq.s32.totalorder %v4865_v49, %v2512_v18 }
 0x37f   :  { %vm2549_vm13 = vmand %vm2537_vm12, %vm2533_vm11  ;;  %vm2742_vm11 = vcmp.lt.s32.totalorder %v2738_v31, 512 }
 0x380   :  { %v2824_v43 = vadd.s32 %v2823_v3, %v2821_v46  ;;  %3984 = vmatmul.mubr.msk.f32.gmra.mxu0 %vm2549_vm13, %v6806_v20 }
 0x381   :  { %v2716_v58 = vpop.xlane.xlu1 %2715 }
 0x382   :  { %v2717_v23 = vcvt.f32.s32 %v2716_v58  ;;  %vm2849_vm15 = vcmp.eq.s32.totalorder %v4865_v49, %v2824_v43 }
 0x383   :  { %vm2861_vm0 = vmand %vm2849_vm15, %vm2845_vm14 }
 0x384   :  { %v2720_v57 = vadd.s32 %v2719_v59, %v2717_v23  ;;  %3991 = vmatprep.mubr.msk.f32.mxu1 %vm2861_vm0, %v6806_v20 }
 0x385   :  { %v2522_v24 = vpop.xlane.xlu1 %2521  ;;  %v2626_v36 = vpop.xlane.xlu0 %2625 }
 0x386   :  { %v2523_v25 = vcvt.f32.s32 %v2522_v24  ;;  %v2627_v4 = vcvt.f32.s32 %v2626_v36  ;;  %vm2745_vm2 = vcmp.eq.s32.totalorder %v4865_v49, %v2720_v57 }
 0x387   :  { %vm2757_vm3 = vmand %vm2745_vm2, %vm2741_vm1 }
 0x388   :  { %v2526_v6 = vadd.s32 %v2525_v42, %v2523_v25  ;;  %v2630_v38 = vadd.s32 %v2629_v32, %v2627_v4  ;;  %3992 = vmatmul.mubr.msk.f32.gmra.mxu1 %vm2757_vm3, %v6806_v20 }
 0x389   :  { %v2730_v1 = vpop.xlane.xlu1 %2729  ;;  %v2834_v41 = vpop.xlane.xlu0 %2833 }
 0x38a   :  { %v2731_v44 = vcvt.f32.s32 %v2730_v1  ;;  %v2835_v34 = vcvt.f32.s32 %v2834_v41  ;;  %vm2642_vm6 = vcmp.eq.s32.totalorder %v4865_v49, %v2630_v38  ;;  %vm2538_vm7 = vcmp.eq.s32.totalorder %v4865_v49, %v2526_v6 }
 0x38b   :  { %vm2654_vm8 = vmand %vm2642_vm6, %vm2638_vm4 }
 0x38c   :  { %v2734_v60 = vadd.s32 %v2733_v8, %v2731_v44  ;;  %v2838_v27 = vadd.s32 %v2837_v62, %v2835_v34  ;;  %3985 = vmatprep.mubr.msk.f32.mxu0 %vm2654_vm8, %v6806_v20  ;;  %vm2550_vm9 = vmand %vm2538_vm7, %vm2534_vm5 }
 0x38d   :  { %3986 = vmatmul.mubr.msk.f32.gmra.mxu0 %vm2550_vm9, %v6806_v20 }
 0x38e   :  { %vm2746_vm12 = vcmp.eq.s32.totalorder %v4865_v49, %v2734_v60  ;;  %vm2850_vm13 = vcmp.eq.s32.totalorder %v4865_v49, %v2838_v27 }
 0x38f   :  { %vm2862_vm14 = vmand %vm2850_vm13, %vm2846_vm10 }
 0x390   :  { %3993 = vmatprep.mubr.msk.f32.mxu1 %vm2862_vm14, %v6806_v20  ;;  %vm2758_vm15 = vmand %vm2746_vm12, %vm2742_vm11 }
 0x391   :  { %3994 = vmatmul.mubr.msk.f32.gmra.mxu1 %vm2758_vm15, %v6806_v20 }
 0x3ad   :  { %v4027_v0 = vpop.f32.mrf.mxu0 }
 0x3af   :  { %v4028_v54 = vpop.f32.mrf.mxu0 }
 0x3b0   :  { %v4029_v7 = vadd.f32 %v4028_v54, %v4027_v0 }
 0x3b1   :  { %v4071_v61 = vpop.f32.mrf.mxu1 }
 0x3b2   :  { %v4030_v33 = vpop.f32.mrf.mxu0 }
 0x3b3   :  { %v4072_v30 = vpop.f32.mrf.mxu1 }
 0x3b4   :  { %v4031_v51 = vpop.f32.mrf.mxu0  ;;  %v4073_v42 = vadd.f32 %v4072_v30, %v4071_v61 }
 0x3b5   :  { %v4074_v11 = vpop.f32.mrf.mxu1  ;;  %v4032_v38 = vadd.f32 %v4031_v51, %v4030_v33 }
 0x3b6   :  { %v3279_v55 = vadd.f32 %v4073_v42, %v4029_v7 }
 0x3b7   :  { %v4075_v52 = vpop.f32.mrf.mxu1 }
 0x3b8   :  { %v4076_v32 = vadd.f32 %v4075_v52, %v4074_v11 }
 0x3ba   :  { %v3284_v41 = vadd.f32 %v4076_v32, %v4032_v38 }
 0x3c2   :  { %v6361_v28 = vpop.f32.mrf.mxu0 }
 0x3c4   :  { %v6363_v45 = vpop.f32.mrf.mxu0 }
 0x3c5   :  { %v6365_v47 = vpop.f32.mrf.mxu1 }
 0x3c7   :  { %v6369_v53 = vpop.f32.mrf.mxu1 }
 0x3d1   :  { %v6367_v49 = vpop.f32.mrf.mxu0 }
 0x3d3   :  { %v6371_v35 = vpop.f32.mrf.mxu0 }
 0x3d5   :  { %v6373_v20 = vpop.f32.mrf.mxu1 }
 0x3d7   :  { %v6375_v2 = vpop.f32.mrf.mxu1 }
 0x3e1   :  { %v4115_v63 = vpop.f32.mrf.mxu0 }
 0x3e3   :  { %v4116_v39 = vpop.f32.mrf.mxu0 }
 0x3e4   :  { %v4117_v24 = vadd.f32 %v4116_v39, %v4115_v63 }
 0x3e5   :  { %v4159_v16 = vpop.f32.mrf.mxu1 }
 0x3e6   :  { %v3364_v15 = vadd.f32 %v4117_v24, %v3279_v55 }
 0x3e7   :  { %v4160_v56 = vpop.f32.mrf.mxu1 }
 0x3e8   :  { %v4161_v25 = vadd.f32 %v4160_v56, %v4159_v16 }
 0x3e9   :  { %v4118_v14 = vpop.f32.mrf.mxu0 }
 0x3ea   :  { %v3449_v31 = vadd.f32 %v4161_v25, %v3364_v15 }
 0x3eb   :  { %v4119_v10 = vpop.f32.mrf.mxu0 }
 0x3ec   :  { %v4120_v8 = vadd.f32 %v4119_v10, %v4118_v14 }
 0x3ee   :  { %v3369_v0 = vadd.f32 %v4120_v8, %v3284_v41 }
 0x3ef   :  { %v4162_v40 = vpop.f32.mrf.mxu1 }
 0x3f1   :  { %v4163_v9 = vpop.f32.mrf.mxu1 }
 0x3f2   :  { %v4164_v44 = vadd.f32 %v4163_v9, %v4162_v40 }
 0x3f3   :  { %v6377_v22 = vpop.f32.mrf.mxu0 }
 0x3f4   :  { %v3454_v63 = vadd.f32 %v4164_v44, %v3369_v0  ;;  %v4362_v0 = vld [vmem:[#allocation2 + $0x10] sm:$0xff] }
 0x3f5   :  { %v6379_v13 = vpop.f32.mrf.mxu0 }
 0x3f9   :  { %v6381_v17 = vpop.f32.mrf.mxu1 }
 0x3fb   :  { %v6385_v37 = vpop.f32.mrf.mxu1 }
 0x3fc   :  { %v4167_v55 = vadd.f32 %v6385_v37, %v6381_v17 }
 0x3fd   :  { %v6383_v18 = vpop.f32.mrf.mxu0 }
 0x3ff   :  { %v6387_v48 = vpop.f32.mrf.mxu0 }
 0x403   :  { %v6389_v3 = vpop.f32.mrf.mxu1 }
 0x405   :  { %v6391_v29 = vpop.f32.mrf.mxu1 }
 0x406   :  { %v4170_v17 = vadd.f32 %v6391_v29, %v6389_v3  ;;  %v4361_v3 = vld [vmem:[#allocation2] sm:$0xff] }
 0x407   :  { %v4203_v50 = vpop.f32.mrf.mxu0 }
 0x409   :  { %v4204_v46 = vpop.f32.mrf.mxu0 }
 0x40a   :  { %v4205_v62 = vadd.f32 %v4204_v46, %v4203_v50 }
 0x40c   :  { %v4247_v43 = vpop.f32.mrf.mxu1  ;;  %v3534_v54 = vadd.f32 %v4205_v62, %v3449_v31 }
 0x40e   :  { %v4248_v19 = vpop.f32.mrf.mxu1 }
 0x40f   :  { %v4249_v34 = vadd.f32 %v4248_v19, %v4247_v43 }
 0x411   :  { %v4206_v26 = vpop.f32.mrf.mxu0  ;;  %v3619_v39 = vadd.f32 %v4249_v34, %v3534_v54 }
 0x413   :  { %v4207_v58 = vpop.f32.mrf.mxu0 }
 0x414   :  { %v4208_v61 = vadd.f32 %v4207_v58, %v4206_v26  ;;  %v4079_v26 = vadd.f32 %v6369_v53, %v6365_v47  ;;  %v4082_v47 = vadd.f32 %v6375_v2, %v6373_v20 }
 0x416   :  { %v3539_v14 = vadd.f32 %v4208_v61, %v3454_v63 }
 0x417   :  { %v4250_v59 = vpop.f32.mrf.mxu1 }
 0x419   :  { %v4251_v23 = vpop.f32.mrf.mxu1 }
 0x41a   :  { %v4252_v16 = vadd.f32 %v4251_v23, %v4250_v59  ;;  %v4035_v59 = vadd.f32 %v6363_v45, %v6361_v28  ;;  %v4123_v23 = vadd.f32 %v6379_v13, %v6377_v22  ;;  %v4038_v28 = vadd.f32 %v6371_v35, %v6367_v49 }
 0x41b   :  { %v4209_v12 = vpop.f32.mrf.mxu0  ;;  %v4126_v45 = vadd.f32 %v6387_v48, %v6383_v18  ;;  %v4360_v48 = vld [vmem:[#allocation2 + $0x8] sm:$0xff] }
 0x41c   :  { %v3624_v40 = vadd.f32 %v4252_v16, %v3539_v14  ;;  %v3289_v24 = vadd.f32 %v4079_v26, %v4035_v59 }
 0x41d   :  { %v4210_v57 = vpop.f32.mrf.mxu0 }
 0x41e   :  { %v3374_v32 = vadd.f32 %v4123_v23, %v3289_v24  ;;  %v4211_v25 = vadd.f32 %v4210_v57, %v4209_v12 }
 0x420   :  { %v3459_v15 = vadd.f32 %v4167_v55, %v3374_v32 }
 0x421   :  { %v4253_v5 = vpop.f32.mrf.mxu1 }
 0x422   :  { %v3544_v53 = vadd.f32 %v4211_v25, %v3459_v15 }
 0x423   :  { %v4254_v36 = vpop.f32.mrf.mxu1 }
 0x424   :  { %v4255_v8 = vadd.f32 %v4254_v36, %v4253_v5 }
 0x425   :  { %v6393_v21 = vpop.f32.mrf.mxu0 }
 0x426   :  { %v3629_v13 = vadd.f32 %v4255_v8, %v3544_v53 }
 0x427   :  { %v4213_v4 = vpop.f32.mrf.mxu0 }
 0x428   :  { %v4214_v20 = vadd.f32 %v4213_v4, %v6393_v21 }
 0x42b   :  { %v6395_v6 = vpop.f32.mrf.mxu1 }
 0x42d   :  { %v4257_v27 = vpop.f32.mrf.mxu1 }
 0x42e   :  { %v4258_v49 = vadd.f32 %v4257_v27, %v6395_v6  ;;  %v4363_v27 = vld [vmem:[#allocation2 + $0x18] sm:$0xff] }
 0x42f   :  { %v4291_v1 = vpop.f32.mrf.mxu0 }
 0x431   :  { %v4292_v60 = vpop.f32.mrf.mxu0 }
 0x432   :  { %v4293_v30 = vadd.f32 %v4292_v60, %v4291_v1  ;;  %v3294_v1 = vadd.f32 %v4082_v47, %v4038_v28 }
 0x433   :  { %v4294_v11 = vpop.f32.mrf.mxu0 }
 0x434   :  { %v4335_v52 = vpop.f32.mrf.mxu1  ;;  %v3704_v56 = vadd.f32 %v4293_v30, %v3619_v39  ;;  %v3379_v5 = vadd.f32 %v4126_v45, %v3294_v1 }
 0x435   :  { %v4295_v33 = vpop.f32.mrf.mxu0 }
 0x436   :  { %v4336_v51 = vpop.f32.mrf.mxu1  ;;  %v4296_v50 = vadd.f32 %v4295_v33, %v4294_v11  ;;  %v3464_v41 = vadd.f32 %v4170_v17, %v3379_v5 }
 0x437   :  { %v4337_v10 = vadd.f32 %v4336_v51, %v4335_v52 }
 0x438   :  { %v4338_v46 = vpop.f32.mrf.mxu1  ;;  %v3709_v19 = vadd.f32 %v4296_v50, %v3624_v40  ;;  %v3549_v18 = vadd.f32 %v4214_v20, %v3464_v41 }
 0x439   :  { %v3789_v9 = vadd.f32 %v4337_v10, %v3704_v56 }
 0x43a   :  { %v4339_v43 = vpop.f32.mrf.mxu1  ;;  %v3634_v60 = vadd.f32 %v4258_v49, %v3549_v18 }
 0x43b   :  { %3807 = vst [vmem:[#allocation10] sm:$0xff] %v3789_v9  ;;  %v4340_v42 = vadd.f32 %v4339_v43, %v4338_v46  ;;  %v3811_v29 = vsub.f32 %v3789_v9, %v4361_v3 }
 0x43d   :  { %v3794_v58 = vadd.f32 %v4340_v42, %v3709_v19  ;;  %v3815_v11 = vmul.f32 %v3811_v29, %v3811_v29 }
 0x43f   :  { %3808 = vst [vmem:[#allocation10 + $0x8] sm:$0xff] %v3794_v58  ;;  %v3812_v31 = vsub.f32 %v3794_v58, %v4360_v48 }
 0x440   :  { %v4297_v7 = vpop.f32.mrf.mxu0 }
 0x441   :  { %v3816_v30 = vmul.f32 %v3812_v31, %v3812_v31 }
 0x442   :  { %v4298_v38 = vpop.f32.mrf.mxu0 }
 0x443   :  { %v4299_v62 = vadd.f32 %v4298_v38, %v4297_v7  ;;  %v3819_v6 = vadd.f32 %v3816_v30, %v3815_v11 }
 0x445   :  { %v3714_v12 = vadd.f32 %v4299_v62, %v3629_v13 }
 0x448   :  { %v4341_v22 = vpop.f32.mrf.mxu1 }
 0x44a   :  { %v4342_v37 = vpop.f32.mrf.mxu1 }
 0x44b   :  { %v4343_v57 = vadd.f32 %v4342_v37, %v4341_v22 }
 0x44d   :  { %v3799_v2 = vadd.f32 %v4343_v57, %v3714_v12  ;;  %v4300_v36 = vpop.f32.mrf.mxu0 }
 0x44f   :  { %3809 = vst [vmem:[#allocation10 + $0x10] sm:$0xff] %v3799_v2  ;;  %v4301_v35 = vpop.f32.mrf.mxu0  ;;  %v3813_v54 = vsub.f32 %v3799_v2, %v4362_v0 }
 0x450   :  { %v4302_v44 = vadd.f32 %v4301_v35, %v4300_v36 }
 0x451   :  { %v4344_v34 = vpop.f32.mrf.mxu1  ;;  %v3817_v52 = vmul.f32 %v3813_v54, %v3813_v54 }
 0x452   :  { %v3719_v21 = vadd.f32 %v4302_v44, %v3634_v60 }
 0x453   :  { %v4345_v61 = vpop.f32.mrf.mxu1  ;;  %v3820_v33 = vadd.f32 %v3819_v6, %v3817_v52 }
 0x454   :  { %v4346_v4 = vadd.f32 %v4345_v61, %v4344_v34 }
 0x456   :  { %v3804_v63 = vadd.f32 %v4346_v4, %v3719_v21 }
 0x458   :  { %3810 = vst [vmem:[#allocation10 + $0x18] sm:$0xff] %v3804_v63  ;;  %v3814_v39 = vsub.f32 %v3804_v63, %v4363_v27 }
 0x45a   :  { %v3818_v16 = vmul.f32 %v3814_v39, %v3814_v39 }
 0x45c   :  { %v3821_v51 = vadd.f32 %v3820_v33, %v3818_v16 }
 0x45e   :  { %3822 = vadd.xlane.f32.xlu0 %v3821_v51 }
 0x45f   :  { %4455 = shalt.err (!%p4452_p10)
}
 0x460   :  { %3845 = dma.vmem_to_hbm [thread:$0]  %s3840_s3, 512, %s6428_s4, [#allocation4], %s4496_s22, %s4496_s22, %s4498_s28   ;;  %vm3832_vm0 = vcmask 0  }
 0x461   :  { %s4504_s17 = smov [#allocation11]  }
 0x462   :  { %s3852_s18 = sshll.u32 %s4504_s17, 4  ;;  %s3853_s18 = int_to_ptr.vmem [resolvable:$true] %s3852_s18 }
 0x463   :  { %s4464_s20 = scalar_lea.vmem %s3853_s18, 16  ;;  %s4468_s21 = scalar_lea.vmem %s3853_s18, 32 }
 0x464   :  { %p4465_p11 = scmp.ne.s32.totalorder %s3853_s18, %s4464_s20  ;;  %p4469_p12 = scmp.lt.s32.totalorder %s3853_s18, %s3853_s18 }
 0x465   :  { %p4470_p13 = scmp.lt.s32.totalorder %s4468_s21, %s4464_s20 }
 0x467   :  { %p4471_p0 = por %p4470_p13, %p4469_p12 }
 0x469   :  { %p4472_p1 = pnand %p4471_p0, %p4465_p11 }
 0x4e7   :  { %v3823_v14 = vpop.xlane.xlu0 %3822 }
 0x4e8   :  { %v3824_v56 = vrot.slane %v3823_v14, 4 }
 0x4ea   :  { %v3825_v10 = vadd.f32 %v3824_v56, %v3823_v14 }
 0x4ec   :  { %v3826_v50 = vrot.slane %v3825_v10, 2 }
 0x4ee   :  { %v3827_v46 = vadd.f32 %v3826_v50, %v3825_v10 }
 0x4f0   :  { %v3828_v40 = vrot.slane %v3827_v46, 1 }
 0x4f2   :  { %v3829_v9 = vadd.f32 %v3828_v40, %v3827_v46 }
 0x4f4   :  { %4347 = vpush %v3829_v9 }
 0x525   :  { %s4348_s19 = spop %4347 }
 0x526   :  { %v3831_v43 = vstv %s4348_s19 }
 0x527   :  { %3833 = vst.msk [vmem:[#allocation11] sm:$0x1] %vm3832_vm0, %v3831_v43 }
 0x528   :  { %4475 = shalt.err (!%p4472_p1)
}
 0x529   :  { %3855 = dma.vmem_to_hbm [thread:$0]  %s3853_s18, 16, %s6429_s5, [#allocation12]  }
 0x52a   :  { %4490 = dma.done.wait [#allocation4], 512  }
 0x52b   :  { %4491 = vsyncadd [#allocation4], 4294966784 }
 0x52c   :  { %4492 = dma.done.wait [#allocation12], 16  }
 0x52d   :  { %4493 = vsyncadd [#allocation12], 4294967280 }
 0x52e   :  { %3862 = vsyncpa [#allocation3], 1 }
 0x52f   :  { %3863 = vsyncpa [#allocation6], 1 }
 0x530   :  { %3864 = vsyncpa [#allocation9], 1 }
 0x531   :  { %3865 = vsyncpa [#allocation4], 1 }
 0x532   :  { %3866 = vsyncpa [#allocation12], 1 }

</bundles_post_ra>
